<compile_context>
chip_gen: v7x
topology: tpu7x:2x2x1
jax: 0.10.0
libtpu: 0.0.40
codegen_flags: <defaults>
</compile_context>

<pallas_src>
import jax
import jax.numpy as jnp
import numpy as np
from jax import lax
from jax.experimental import pallas as pl
from jax.experimental.pallas import tpu as pltpu


# ----------------------------------------------------------------------------
# Generation-aware VMEM budget
# ----------------------------------------------------------------------------
def _vmem_capacity_bytes():
    try:
        cap = int(pltpu.get_tpu_info().vmem_capacity_bytes)
        if cap > 0:
            return cap
    except Exception:
        pass
    return 64 * 1024 * 1024  # conservative (v7x per-TC) default


_VMEM_CAP = _vmem_capacity_bytes()
# ~85% of physical VMEM: ~54 MiB on v7x (64 MiB), ~108 MiB on v5e/v6e (128 MiB).
_VMEM_LIMIT = min(int(_VMEM_CAP * 0.85), 112 * 1024 * 1024)


def _compiler_params(sem):
    return pltpu.CompilerParams(dimension_semantics=sem, vmem_limit_bytes=_VMEM_LIMIT)


def _group_matrices(C, G):
    """0/1 aggregation matrices mapping channels<->groups (for in-kernel GN stats)."""
    Cg = C // G
    grp = jnp.arange(C, dtype=jnp.int32) // Cg
    agg = (grp[None, :] == jnp.arange(G, dtype=jnp.int32)[:, None]).astype(jnp.float32)
    return agg, agg.T  # (G, C), (C, G)


# ----------------------------------------------------------------------------
# GroupNorm stats-only kernel: per-(batch, channel) scale/shift vectors
# ----------------------------------------------------------------------------
def gn_scale_shift(x_flat, gamma, beta, num_groups, eps=1e-5):
    """x_flat: (B, C, HW) bf16.  Returns (scale, shift) of shape (B, C, 1) f32 with
    GroupNorm(x)*gamma + beta == x*scale + shift.  Variance is centered (two VMEM passes).
    """
    B, C, HW = x_flat.shape
    G = num_groups
    inv_n = 1.0 / float((C // G) * HW)
    agg, bcast = _group_matrices(C, G)
    gam = gamma.reshape(C, 1).astype(jnp.float32)
    bet = beta.reshape(C, 1).astype(jnp.float32)

    def kernel(x_ref, agg_ref, bc_ref, g_ref, b_ref, scale_ref, shift_ref):
        xv = x_ref[0].astype(jnp.float32)                                # (C, HW)
        s1 = jnp.sum(xv, axis=1, keepdims=True)                          # (C, 1)
        gmean = jnp.dot(agg_ref[...], s1, preferred_element_type=jnp.float32) * inv_n
        mean_c = jnp.dot(bc_ref[...], gmean, preferred_element_type=jnp.float32)
        d = xv - mean_c
        s2 = jnp.sum(d * d, axis=1, keepdims=True)                       # centered
        gvar = jnp.dot(agg_ref[...], s2, preferred_element_type=jnp.float32) * inv_n
        rstd_c = jnp.dot(bc_ref[...], lax.rsqrt(gvar + eps),
                         preferred_element_type=jnp.float32)
        scale_c = rstd_c * g_ref[...]
        scale_ref[0] = scale_c
        shift_ref[0] = b_ref[...] - mean_c * scale_c

    return pl.pallas_call(
        kernel,
        out_shape=(jax.ShapeDtypeStruct((B, C, 1), jnp.float32),
                   jax.ShapeDtypeStruct((B, C, 1), jnp.float32)),
        grid=(B,),
        in_specs=[
            pl.BlockSpec((1, C, HW), lambda b: (b, 0, 0)),
            pl.BlockSpec((G, C), lambda b: (0, 0)),
            pl.BlockSpec((C, G), lambda b: (0, 0)),
            pl.BlockSpec((C, 1), lambda b: (0, 0)),
            pl.BlockSpec((C, 1), lambda b: (0, 0)),
        ],
        out_specs=(pl.BlockSpec((1, C, 1), lambda b: (b, 0, 0)),
                   pl.BlockSpec((1, C, 1), lambda b: (b, 0, 0))),
        compiler_params=_compiler_params(("parallel",)),
        cost_estimate=pl.CostEstimate(flops=6 * B * C * HW, transcendentals=B * G,
                                      bytes_accessed=2 * B * C * HW + 8 * B * C),
    )(x_flat, agg, bcast, gam, bet)


# ----------------------------------------------------------------------------
# Fused GroupNorm-apply -> ReLU -> 3x3 conv (+ bias, + residual / 1x1 shortcut)
# ----------------------------------------------------------------------------
def fold_conv3x3_weights(w):
    """(O, Cin, 3, 3) -> (9, O, Cin) bf16, tap-major (index = 3*kh + kw)."""
    O, Cin = w.shape[0], w.shape[1]
    return jnp.transpose(w, (2, 3, 0, 1)).reshape(9, O, Cin).astype(jnp.bfloat16)


def _pick_row_tile(H, per_row_bytes, max_row_tile):
    """Largest multiple-of-8 divisor of H that fits the VMEM budget; else full height."""
    budget = _VMEM_LIMIT // 2
    cap = max(8, min(max_row_tile, budget // max(per_row_bytes, 1)))
    best = 0
    rt = 8
    while rt <= min(H, cap):
        if H % rt == 0:
            best = rt
        rt += 8
    return best if best > 0 else H


def gn_relu_conv3x3(x, scale, shift, w_taps, bias, *, residual=None, shortcut=None,
                    out_dtype=jnp.bfloat16, max_row_tile=128):
    """y = conv3x3(relu(x*scale + shift)) + bias [+ residual | + w_sc @ x_sc].

      x:        (B, C, H, W) bf16 (PRE-normalization activation)
      scale/shift: (B, C, 1) f32 from gn_scale_shift
      w_taps:   (9, O, C) bf16
      bias:     (O, 1) f32 (shortcut bias may be pre-added by the caller)
      residual: (B, O, H, W) bf16 identity shortcut
      shortcut: (x_sc (B, Cs, H, W) bf16, w_sc (O, Cs) bf16) fused 1x1-conv shortcut
    Returns (B, O, H, W) in out_dtype.
    """
    B, C, H, W = x.shape
    _, O, _ = w_taps.shape
    HW = H * W
    Wp = W + 2
    has_res = residual is not None
    has_sc = shortcut is not None
    Cs = shortcut[0].shape[1] if has_sc else 0

    per_row_bytes = 10 * C * Wp + 10 * O * W + 4 * (Cs + (O if has_res else 0)) * W
    RT = _pick_row_tile(H, per_row_bytes, max_row_tile)

    if RT % 8 == 0:
        n_rt = H // RT
        main_rows = RT
        main_idx = lambda b, r: (b, 0, r, 0)
        halo_rows = 8
        blocks_per_rt = RT // 8
        halo_idx = lambda b, r: (b, 0, (r + 1) * blocks_per_rt, 0)
        hoff = 0
    else:
        # H has no multiple-of-8 divisor: single full-height tile (both views = full block)
        RT, n_rt = H, 1
        main_rows = H + 8
        main_idx = lambda b, r: (b, 0, 0, 0)
        halo_rows = H + 8
        halo_idx = lambda b, r: (b, 0, 0, 0)
        hoff = H

    flat_ok = ((RT * W) % 128 == 0) or (n_rt == 1)   # lane-dense output path

    # pad by 1 ring (values irrelevant -- masked in-kernel) + 6 extra bottom rows so the
    # 8-row halo view never goes out of bounds.
    xp = jnp.pad(x, ((0, 0), (0, 0), (1, 7), (1, 1)))                    # (B, C, H+8, W+2)

    def kernel(*refs):
        i = 0
        xm_ref = refs[i]; i += 1
        xh_ref = refs[i]; i += 1
        w_ref = refs[i]; i += 1
        b_ref = refs[i]; i += 1
        sc_ref = refs[i]; i += 1
        sh_ref = refs[i]; i += 1
        if has_sc:
            sx_ref = refs[i]; i += 1
            sw_ref = refs[i]; i += 1
        if has_res:
            r_ref = refs[i]; i += 1
        o_ref = refs[i]; i += 1
        win = refs[i]                                                    # (C, RT+2, Wp) f32

        # assemble the halo'd row window in VMEM (no HBM im2col)
        win[:, 0:RT, :] = xm_ref[0, :, 0:RT, :].astype(jnp.float32)
        win[:, RT:RT + 2, :] = xh_ref[0, :, hoff:hoff + 2, :].astype(jnp.float32)

        # fused GroupNorm apply + ReLU; zero-pad ring must stay 0 post-norm -> mask
        r = pl.program_id(1)
        row_g = lax.broadcasted_iota(jnp.int32, (RT + 2, Wp), 0) + r * RT
        col_g = lax.broadcasted_iota(jnp.int32, (RT + 2, Wp), 1)
        interior = (row_g >= 1) & (row_g <= H) & (col_g >= 1) & (col_g <= W)
        scl = sc_ref[0][:, :, None]                                      # (C, 1, 1)
        sft = sh_ref[0][:, :, None]
        xn = jnp.maximum(win[...] * scl + sft, 0.0)
        xn = jnp.where(interior[None, :, :], xn, 0.0).astype(jnp.bfloat16)

        # 9 shifted-tap MXU matmuls, f32 accumulation; bias as a VPU add (no ones-row)
        acc = jnp.zeros((O, RT * W), jnp.float32)
        for kh in range(3):
            for kw in range(3):
                tap = xn[:, kh:kh + RT, kw:kw + W].reshape(C, RT * W)
                acc = acc + jnp.dot(w_ref[3 * kh + kw], tap,
                                    preferred_element_type=jnp.float32)
        acc = acc + b_ref[...]
        if has_sc:
            sxv = sx_ref[0]
            sxv = sxv if flat_ok else sxv.reshape(Cs, RT * W)
            acc = acc + jnp.dot(sw_ref[...], sxv, preferred_element_type=jnp.float32)
        if has_res:
            rv = r_ref[0]
            rv = rv if flat_ok else rv.reshape(O, RT * W)
            acc = acc + rv.astype(jnp.float32)
        if flat_ok:
            o_ref[0] = acc.astype(o_ref.dtype)
        else:
            o_ref[0] = acc.reshape(O, RT, W).astype(o_ref.dtype)

    in_specs = [
        pl.BlockSpec((1, C, main_rows, Wp), main_idx),
        pl.BlockSpec((1, C, halo_rows, Wp), halo_idx),
        pl.BlockSpec((9, O, C), lambda b, r: (0, 0, 0)),
        pl.BlockSpec((O, 1), lambda b, r: (0, 0)),
        pl.BlockSpec((1, C, 1), lambda b, r: (b, 0, 0)),
        pl.BlockSpec((1, C, 1), lambda b, r: (b, 0, 0)),
    ]
    args = [xp, xp, w_taps, bias, scale, shift]
    flops = 2 * B * O * 9 * C * HW
    out_bytes = np.dtype(out_dtype).itemsize
    bytes_acc = 2 * B * C * (H + 8) * Wp + 2 * 9 * O * C + B * O * HW * out_bytes

    if has_sc:
        x_sc, w_sc = shortcut
        x_sc_arg = x_sc.reshape(B, Cs, HW) if flat_ok else x_sc
        sc_block = (1, Cs, RT * W) if flat_ok else (1, Cs, RT, W)
        sc_map = (lambda b, r: (b, 0, r)) if flat_ok else (lambda b, r: (b, 0, r, 0))
        in_specs += [pl.BlockSpec(sc_block, sc_map),
                     pl.BlockSpec((O, Cs), lambda b, r: (0, 0))]
        args += [x_sc_arg, w_sc]
        flops += 2 * B * O * Cs * HW
        bytes_acc += 2 * B * Cs * HW + 2 * O * Cs
    if has_res:
        res_arg = residual.reshape(B, O, HW) if flat_ok else residual
        rs_block = (1, O, RT * W) if flat_ok else (1, O, RT, W)
        rs_map = (lambda b, r: (b, 0, r)) if flat_ok else (lambda b, r: (b, 0, r, 0))
        in_specs.append(pl.BlockSpec(rs_block, rs_map))
        args.append(res_arg)
        bytes_acc += 2 * B * O * HW

    if flat_ok:
        out_shape = jax.ShapeDtypeStruct((B, O, HW), out_dtype)
        out_spec = pl.BlockSpec((1, O, RT * W), lambda b, r: (b, 0, r))
    else:
        out_shape = jax.ShapeDtypeStruct((B, O, H, W), out_dtype)
        out_spec = pl.BlockSpec((1, O, RT, W), lambda b, r: (b, 0, r, 0))

    y = pl.pallas_call(
        kernel,
        out_shape=out_shape,
        grid=(B, n_rt),
        in_specs=in_specs,
        out_specs=out_spec,
        scratch_shapes=[pltpu.VMEM((C, RT + 2, Wp), jnp.float32)],
        compiler_params=_compiler_params(("parallel", "parallel")),
        cost_estimate=pl.CostEstimate(flops=int(flops), transcendentals=0,
                                      bytes_accessed=int(bytes_acc)),
    )(*args)
    return y.reshape(B, O, H, W)


# ----------------------------------------------------------------------------
# AttentionBlock: fused GroupNorm -> qkv -> softmax(QK^T/sqrt(C)) V -> out proj -> +res
# ----------------------------------------------------------------------------
def attention_with_gn(h3, gamma, beta, num_groups, wqkv, bqkv, wout, bout, eps=1e-5):
    """h3: (B, C, HW) bf16 (both GN input and residual).  bf16 MXU operands, f32 softmax."""
    B, C, HW = h3.shape
    G = num_groups
    inv_n = 1.0 / float((C // G) * HW)
    agg, bcast = _group_matrices(C, G)
    gam = gamma.reshape(C, 1).astype(jnp.float32)
    bet = beta.reshape(C, 1).astype(jnp.float32)
    wqkv2 = wqkv.reshape(3 * C, C).astype(jnp.bfloat16)
    bqkv2 = bqkv.reshape(3 * C, 1).astype(jnp.float32)
    wout2 = wout.reshape(C, C).astype(jnp.bfloat16)
    bout2 = bout.reshape(C, 1).astype(jnp.float32)
    scale = float(C) ** (-0.5)

    def kernel(h_ref, agg_ref, bc_ref, g_ref, b_ref,
               wq_ref, bq_ref, wo_ref, bo_ref, o_ref):
        hv = h_ref[0].astype(jnp.float32)                                # (C, HW)
        # fused GroupNorm, centered variance
        s1 = jnp.sum(hv, axis=1, keepdims=True)
        gmean = jnp.dot(agg_ref[...], s1, preferred_element_type=jnp.float32) * inv_n
        mean_c = jnp.dot(bc_ref[...], gmean, preferred_element_type=jnp.float32)
        d = hv - mean_c
        s2 = jnp.sum(d * d, axis=1, keepdims=True)
        gvar = jnp.dot(agg_ref[...], s2, preferred_element_type=jnp.float32) * inv_n
        rstd_c = jnp.dot(bc_ref[...], lax.rsqrt(gvar + eps),
                         preferred_element_type=jnp.float32)
        hn = d * (rstd_c * g_ref[...]) + b_ref[...]                      # (C, HW)
        # qkv projection (bf16 MXU, f32 accumulate)
        qkv = jnp.dot(wq_ref[...], hn.astype(jnp.bfloat16),
                      preferred_element_type=jnp.float32) + bq_ref[...]  # (3C, HW)
        q = qkv[0:C]
        k = qkv[C:2 * C]
        v = qkv[2 * C:3 * C]
        # logits[s, t] = sum_c q[c, s] k[c, t]; (HW, HW) tensors only ever contracted
        # over their minor (lane) axis -> no large XLU transposes.
        logits = lax.dot_general(q.astype(jnp.bfloat16), k.astype(jnp.bfloat16),
                                 (((0,), (0,)), ((), ())),
                                 preferred_element_type=jnp.float32) * scale
        m = jnp.max(logits, axis=-1, keepdims=True)
        p = jnp.exp(logits - m)
        attn = p * pl.reciprocal(jnp.sum(p, axis=-1, keepdims=True), approx=True)
        out_t = lax.dot_general(attn.astype(jnp.bfloat16), v.astype(jnp.bfloat16),
                                (((1,), (1,)), ((), ())),
                                preferred_element_type=jnp.float32)      # (HW, C)
        y = lax.dot_general(wo_ref[...], out_t.astype(jnp.bfloat16),
                            (((1,), (1,)), ((), ())),
                            preferred_element_type=jnp.float32) + bo_ref[...]
        o_ref[0] = (y + hv).astype(o_ref.dtype)

    flops = 2 * B * HW * (3 * C * C + 2 * HW * C + C * C)
    cost = pl.CostEstimate(flops=int(flops), transcendentals=B * HW * HW,
                           bytes_accessed=6 * B * C * HW + 2 * int(wqkv2.size + wout2.size))

    return pl.pallas_call(
        kernel,
        out_shape=jax.ShapeDtypeStruct((B, C, HW), jnp.float32),
        grid=(B,),
        in_specs=[
            pl.BlockSpec((1, C, HW), lambda b: (b, 0, 0)),
            pl.BlockSpec((G, C), lambda b: (0, 0)),
            pl.BlockSpec((C, G), lambda b: (0, 0)),
            pl.BlockSpec((C, 1), lambda b: (0, 0)),
            pl.BlockSpec((C, 1), lambda b: (0, 0)),
            pl.BlockSpec((3 * C, C), lambda b: (0, 0)),
            pl.BlockSpec((3 * C, 1), lambda b: (0, 0)),
            pl.BlockSpec((C, C), lambda b: (0, 0)),
            pl.BlockSpec((C, 1), lambda b: (0, 0)),
        ],
        out_specs=pl.BlockSpec((1, C, HW), lambda b: (b, 0, 0)),
        compiler_params=_compiler_params(("parallel",)),
        cost_estimate=cost,
    )(h3, agg, bcast, gam, bet, wqkv2, bqkv2, wout2, bout2)


# ----------------------------------------------------------------------------
# Full ResidualBlock forward (eval mode)
# ----------------------------------------------------------------------------
def residual_block_forward(x, params, num_groups, *, max_row_tile=128):
    B, Cin, H, W = x.shape
    HW = H * W
    Cout = params["conv1_w"].shape[0]
    x_bf = x.astype(jnp.bfloat16)

    w1 = fold_conv3x3_weights(params["conv1_w"])
    w2 = fold_conv3x3_weights(params["conv2_w"])
    b1 = params["conv1_b"].reshape(Cout, 1).astype(jnp.float32)

    # norm_1 -> ReLU -> conv_1   (GN apply fused into the conv kernel)
    sc1, sh1 = gn_scale_shift(x_bf.reshape(B, Cin, HW),
                              params["norm1_gamma"], params["norm1_beta"], num_groups)
    h1 = gn_relu_conv3x3(x_bf, sc1, sh1, w1, b1,
                         out_dtype=jnp.bfloat16, max_row_tile=max_row_tile)

    # norm_2 -> ReLU -> (dropout == identity in eval) -> conv_2 + shortcut(x), one kernel
    sc2, sh2 = gn_scale_shift(h1.reshape(B, Cout, HW),
                              params["norm2_gamma"], params["norm2_beta"], num_groups)
    if Cin != Cout:
        w_sc = params["short_w"].reshape(Cout, Cin).astype(jnp.bfloat16)
        b2 = (params["conv2_b"] + params["short_b"]).reshape(Cout, 1).astype(jnp.float32)
        h3 = gn_relu_conv3x3(h1, sc2, sh2, w2, b2, shortcut=(x_bf, w_sc),
                             out_dtype=jnp.bfloat16, max_row_tile=max_row_tile)
    else:
        b2 = params["conv2_b"].reshape(Cout, 1).astype(jnp.float32)
        h3 = gn_relu_conv3x3(h1, sc2, sh2, w2, b2, residual=x_bf,
                             out_dtype=jnp.bfloat16, max_row_tile=max_row_tile)

    # attention block (its GroupNorm fused into the kernel)
    out = attention_with_gn(h3.reshape(B, Cout, HW),
                            params["attn_gamma"], params["attn_beta"], num_groups,
                            params["qkv_w"], params["qkv_b"],
                            params["out_w"], params["out_b"])
    return out.reshape(B, Cout, H, W)


# ----------------------------------------------------------------------------
# Pure-JAX reference (mirrors the PyTorch module, eval mode, f32)
# ----------------------------------------------------------------------------
def reference_forward(x, params, num_groups):
    def gn(x, gamma, beta):
        B, C, H, W = x.shape
        xg = x.reshape(B, num_groups, -1)
        m = xg.mean(axis=2, keepdims=True)
        v = ((xg - m) ** 2).mean(axis=2, keepdims=True)
        xn = ((xg - m) / jnp.sqrt(v + 1e-5)).reshape(B, C, H, W)
        return xn * gamma[None, :, None, None] + beta[None, :, None, None]

    def conv(x, w, b, pad):
        y = lax.conv_general_dilated(x, w, (1, 1), [(pad, pad), (pad, pad)],
                                     dimension_numbers=("NCHW", "OIHW", "NCHW"))
        return y + b[None, :, None, None]

    relu = jax.nn.relu
    h = conv(relu(gn(x, params["norm1_gamma"], params["norm1_beta"])),
             params["conv1_w"], params["conv1_b"], 1)
    h2 = relu(gn(h, params["norm2_gamma"], params["norm2_beta"]))
    sc = conv(x, params["short_w"], params["short_b"], 0)
    h3 = conv(h2, params["conv2_w"], params["conv2_b"], 1) + sc

    B, C, H, W = h3.shape
    hn = gn(h3, params["attn_gamma"], params["attn_beta"])
    qkv = conv(hn, params["qkv_w"], params["qkv_b"], 0)
    q, k, v = jnp.split(qkv, 3, axis=1)
    q = q.transpose(0, 2, 3, 1).reshape(B, H * W, C)
    k = k.reshape(B, C, H * W)
    v = v.transpose(0, 2, 3, 1).reshape(B, H * W, C)
    attn = jax.nn.softmax(jnp.einsum("bqc,bck->bqk", q, k) * C ** (-0.5), axis=-1)
    out = jnp.einsum("bqk,bkc->bqc", attn, v).reshape(B, H, W, C).transpose(0, 3, 1, 2)
    return conv(out, params["out_w"], params["out_b"], 0) + h3


# ----------------------------------------------------------------------------
if __name__ == "__main__":
    B, Cin, Cout, H, W = 2, 8, 16, 16, 16
    num_groups = 4  # divides both Cin and Cout

    key = jax.random.PRNGKey(0)
    keys = jax.random.split(key, 17)

    def nrm(k, shape, s=0.1):
        return s * jax.random.normal(k, shape, dtype=jnp.float32)

    params = dict(
        norm1_gamma=1.0 + nrm(keys[0], (Cin,)),
        norm1_beta=nrm(keys[1], (Cin,)),
        conv1_w=nrm(keys[2], (Cout, Cin, 3, 3)),
        conv1_b=nrm(keys[3], (Cout,)),
        norm2_gamma=1.0 + nrm(keys[4], (Cout,)),
        norm2_beta=nrm(keys[5], (Cout,)),
        conv2_w=nrm(keys[6], (Cout, Cout, 3, 3)),
        conv2_b=nrm(keys[7], (Cout,)),
        short_w=nrm(keys[8], (Cout, Cin, 1, 1)),
        short_b=nrm(keys[9], (Cout,)),
        attn_gamma=1.0 + nrm(keys[10], (Cout,)),
        attn_beta=nrm(keys[11], (Cout,)),
        qkv_w=nrm(keys[12], (3 * Cout, Cout, 1, 1)),
        qkv_b=nrm(keys[13], (3 * Cout,)),
        out_w=nrm(keys[14], (Cout, Cout, 1, 1)),
        out_b=nrm(keys[15], (Cout,)),
    )

    x = jax.random.normal(keys[16], (B, Cin, H, W), dtype=jnp.float32)

    # max_row_tile=8 so H=16 is split into 2 row tiles -> exercises the halo path.
    fwd = jax.jit(lambda xx, pp: residual_block_forward(xx, pp, num_groups, max_row_tile=8))
    y = jax.block_until_ready(fwd(x, params))

    y_ref = jax.block_until_ready(reference_forward(x, params, num_groups))
    # Tolerance accounts for bf16 activation storage + bf16 MXU operands (f32 accumulate)
    # + approx softmax reciprocal.
    np.testing.assert_allclose(np.asarray(y), np.asarray(y_ref), rtol=5e-2, atol=5e-2)

    print("KERNEL_OK")
</pallas_src>

<mosaic_0001>
module attributes {stable_mosaic.version = 11 : i64} {
  func.func @kernel(%arg0: i32, %arg1: i32, %arg2: memref<1x8x8x18xbf16, #tpu.memory_space<vmem>>, %arg3: memref<1x8x8x18xbf16, #tpu.memory_space<vmem>>, %arg4: memref<9x16x8xbf16, #tpu.memory_space<vmem>>, %arg5: memref<16x1xf32, #tpu.memory_space<vmem>>, %arg6: memref<1x8x1xf32, #tpu.memory_space<vmem>>, %arg7: memref<1x8x1xf32, #tpu.memory_space<vmem>>, %arg8: memref<1x16x128xbf16, #tpu.memory_space<vmem>>, %arg9: memref<8x10x18xf32, #tpu.memory_space<vmem>>) attributes {dimension_semantics = [#tpu.dimension_semantics<parallel>, #tpu.dimension_semantics<parallel>], iteration_bounds = array<i64: 2, 2>, scalar_prefetch = 0 : i64, scratch_operands = 1 : i64, tpu.core_type = #tpu.core_type<tc>, window_params = [{transform_indices = @transform_0, window_bounds = array<i64: 1, 8, 8, 18>}, {transform_indices = @transform_1, window_bounds = array<i64: 1, 8, 8, 18>}, {pipeline_mode = #tpu.pipeline_mode<synchronous>, transform_indices = @transform_2, window_bounds = array<i64: 9, 16, 8>}, {pipeline_mode = #tpu.pipeline_mode<synchronous>, transform_indices = @transform_3, window_bounds = array<i64: 16, 1>}, {transform_indices = @transform_4, window_bounds = array<i64: 1, 8, 1>}, {transform_indices = @transform_5, window_bounds = array<i64: 1, 8, 1>}, {transform_indices = @transform_6, window_bounds = array<i64: 1, 16, 128>}]} {
    %c0 = arith.constant 0 : index
    %c0_0 = arith.constant 0 : index
    %c0_1 = arith.constant 0 : index
    %c0_2 = arith.constant 0 : index
    %0 = vector.load %arg2[%c0, %c0_0, %c0_1, %c0_2] : memref<1x8x8x18xbf16, #tpu.memory_space<vmem>>, vector<1x8x8x18xbf16>
    %1 = vector.shape_cast %0 : vector<1x8x8x18xbf16> to vector<8x8x18xbf16>
    %2 = arith.extf %1 : vector<8x8x18xbf16> to vector<8x8x18xf32>
    %c0_3 = arith.constant 0 : index
    %c0_4 = arith.constant 0 : index
    %c0_5 = arith.constant 0 : index
    %3 = vector.load %arg9[%c0_3, %c0_4, %c0_5] : memref<8x10x18xf32, #tpu.memory_space<vmem>>, vector<8x8x18xf32>
    tpu.vector_store %arg9[%c0_3, %c0_4, %c0_5], %2 {strides = array<i32>} : memref<8x10x18xf32, #tpu.memory_space<vmem>>, vector<8x8x18xf32>,
    %c0_6 = arith.constant 0 : index
    %c0_7 = arith.constant 0 : index
    %c0_8 = arith.constant 0 : index
    %c0_9 = arith.constant 0 : index
    %4 = vector.load %arg3[%c0_6, %c0_7, %c0_8, %c0_9] : memref<1x8x8x18xbf16, #tpu.memory_space<vmem>>, vector<1x8x2x18xbf16>
    %5 = vector.shape_cast %4 : vector<1x8x2x18xbf16> to vector<8x2x18xbf16>
    %6 = arith.extf %5 : vector<8x2x18xbf16> to vector<8x2x18xf32>
    %c0_10 = arith.constant 0 : index
    %c8 = arith.constant 8 : index
    %c0_11 = arith.constant 0 : index
    %7 = vector.load %arg9[%c0_10, %c8, %c0_11] : memref<8x10x18xf32, #tpu.memory_space<vmem>>, vector<8x2x18xf32>
    tpu.vector_store %arg9[%c0_10, %c8, %c0_11], %6 {strides = array<i32>} : memref<8x10x18xf32, #tpu.memory_space<vmem>>, vector<8x2x18xf32>,
    %8 = tpu.iota {dimensions = array<i32: 0>} : vector<10x18xi32>
    %c8_i32 = arith.constant 8 : i32
    %9 = arith.muli %arg1, %c8_i32 : i32
    %10 = vector.broadcast %9 : i32 to vector<10x18xi32>
    %11 = arith.addi %8, %10 : vector<10x18xi32>
    %12 = tpu.iota {dimensions = array<i32: 1>} : vector<10x18xi32>
    %c1_i32 = arith.constant 1 : i32
    %13 = vector.broadcast %c1_i32 : i32 to vector<10x18xi32>
    %14 = arith.cmpi sge, %11, %13 : vector<10x18xi32>
    %c16_i32 = arith.constant 16 : i32
    %15 = vector.broadcast %c16_i32 : i32 to vector<10x18xi32>
    %16 = arith.cmpi sle, %11, %15 : vector<10x18xi32>
    %17 = arith.andi %14, %16 : vector<10x18xi1>
    %c1_i32_12 = arith.constant 1 : i32
    %18 = vector.broadcast %c1_i32_12 : i32 to vector<10x18xi32>
    %19 = arith.cmpi sge, %12, %18 : vector<10x18xi32>
    %20 = arith.andi %17, %19 : vector<10x18xi1>
    %c16_i32_13 = arith.constant 16 : i32
    %21 = vector.broadcast %c16_i32_13 : i32 to vector<10x18xi32>
    %22 = arith.cmpi sle, %12, %21 : vector<10x18xi32>
    %23 = arith.andi %20, %22 : vector<10x18xi1>
    %c0_14 = arith.constant 0 : index
    %c0_15 = arith.constant 0 : index
    %c0_16 = arith.constant 0 : index
    %24 = vector.load %arg6[%c0_14, %c0_15, %c0_16] : memref<1x8x1xf32, #tpu.memory_space<vmem>>, vector<1x8x1xf32>
    %25 = vector.shape_cast %24 : vector<1x8x1xf32> to vector<8x1xf32>
    %26 = vector.shape_cast %25 : vector<8x1xf32> to vector<8x1x1xf32>
    %c0_17 = arith.constant 0 : index
    %c0_18 = arith.constant 0 : index
    %c0_19 = arith.constant 0 : index
    %27 = vector.load %arg7[%c0_17, %c0_18, %c0_19] : memref<1x8x1xf32, #tpu.memory_space<vmem>>, vector<1x8x1xf32>
    %28 = vector.shape_cast %27 : vector<1x8x1xf32> to vector<8x1xf32>
    %29 = vector.shape_cast %28 : vector<8x1xf32> to vector<8x1x1xf32>
    %c0_20 = arith.constant 0 : index
    %c0_21 = arith.constant 0 : index
    %c0_22 = arith.constant 0 : index
    %30 = vector.load %arg9[%c0_20, %c0_21, %c0_22] : memref<8x10x18xf32, #tpu.memory_space<vmem>>, vector<8x10x18xf32>
    %31 = vector.broadcast %26 : vector<8x1x1xf32> to vector<8x10x18xf32>
    %32 = arith.mulf %30, %31 : vector<8x10x18xf32>
    %33 = vector.broadcast %29 : vector<8x1x1xf32> to vector<8x10x18xf32>
    %34 = arith.addf %32, %33 : vector<8x10x18xf32>
    %cst = arith.constant 0.000000e+00 : f32
    %35 = vector.broadcast %cst : f32 to vector<8x10x18xf32>
    %36 = arith.maximumf %34, %35 : vector<8x10x18xf32>
    %37 = vector.shape_cast %23 : vector<10x18xi1> to vector<1x10x18xi1>
    %cst_23 = arith.constant 0.000000e+00 : f32
    %38 = vector.shape_cast %37 : vector<1x10x18xi1> to vector<1x10x18xi1>
    %39 = vector.broadcast %38 : vector<1x10x18xi1> to vector<8x10x18xi1>
    %40 = vector.broadcast %cst_23 : f32 to vector<8x10x18xf32>
    %41 = arith.select %39, %36, %40 : vector<8x10x18xi1>, vector<8x10x18xf32>
    %42 = arith.truncf %41 : vector<8x10x18xf32> to vector<8x10x18xbf16>
    %cst_24 = arith.constant 0.000000e+00 : f32
    %43 = vector.broadcast %cst_24 : f32 to vector<16x128xf32>
    %44 = vector.extract_strided_slice %42 {offsets = [0, 0, 0], sizes = [8, 8, 16], strides = [1, 1, 1]} : vector<8x10x18xbf16> to vector<8x8x16xbf16>
    %45 = vector.shape_cast %44 : vector<8x8x16xbf16> to vector<8x128xbf16>
    %c0_25 = arith.constant 0 : index
    %c0_26 = arith.constant 0 : index
    %c0_27 = arith.constant 0 : index
    %46 = vector.load %arg4[%c0_25, %c0_26, %c0_27] : memref<9x16x8xbf16, #tpu.memory_space<vmem>>, vector<1x16x8xbf16>
    %47 = vector.shape_cast %46 : vector<1x16x8xbf16> to vector<16x8xbf16>
    %cst_28 = arith.constant dense<0.000000e+00> : vector<16x128xf32>
    %48 = tpu.matmul %47, %45, %cst_28 {dimension_numbers = #tpu.dot_dimension_numbers<[1], [0], [0], [1], [0, 0, 1, 1], [], []>} : vector<16x8xbf16>, vector<8x128xbf16>, vector<16x128xf32> -> vector<16x128xf32>
    %49 = arith.addf %43, %48 : vector<16x128xf32>
    %50 = vector.extract_strided_slice %42 {offsets = [0, 0, 1], sizes = [8, 8, 16], strides = [1, 1, 1]} : vector<8x10x18xbf16> to vector<8x8x16xbf16>
    %51 = vector.shape_cast %50 : vector<8x8x16xbf16> to vector<8x128xbf16>
    %c1 = arith.constant 1 : index
    %c0_29 = arith.constant 0 : index
    %c0_30 = arith.constant 0 : index
    %52 = vector.load %arg4[%c1, %c0_29, %c0_30] : memref<9x16x8xbf16, #tpu.memory_space<vmem>>, vector<1x16x8xbf16>
    %53 = vector.shape_cast %52 : vector<1x16x8xbf16> to vector<16x8xbf16>
    %cst_31 = arith.constant dense<0.000000e+00> : vector<16x128xf32>
    %54 = tpu.matmul %53, %51, %cst_31 {dimension_numbers = #tpu.dot_dimension_numbers<[1], [0], [0], [1], [0, 0, 1, 1], [], []>} : vector<16x8xbf16>, vector<8x128xbf16>, vector<16x128xf32> -> vector<16x128xf32>
    %55 = arith.addf %49, %54 : vector<16x128xf32>
    %56 = vector.extract_strided_slice %42 {offsets = [0, 0, 2], sizes = [8, 8, 16], strides = [1, 1, 1]} : vector<8x10x18xbf16> to vector<8x8x16xbf16>
    %57 = vector.shape_cast %56 : vector<8x8x16xbf16> to vector<8x128xbf16>
    %c2 = arith.constant 2 : index
    %c0_32 = arith.constant 0 : index
    %c0_33 = arith.constant 0 : index
    %58 = vector.load %arg4[%c2, %c0_32, %c0_33] : memref<9x16x8xbf16, #tpu.memory_space<vmem>>, vector<1x16x8xbf16>
    %59 = vector.shape_cast %58 : vector<1x16x8xbf16> to vector<16x8xbf16>
    %cst_34 = arith.constant dense<0.000000e+00> : vector<16x128xf32>
    %60 = tpu.matmul %59, %57, %cst_34 {dimension_numbers = #tpu.dot_dimension_numbers<[1], [0], [0], [1], [0, 0, 1, 1], [], []>} : vector<16x8xbf16>, vector<8x128xbf16>, vector<16x128xf32> -> vector<16x128xf32>
    %61 = arith.addf %55, %60 : vector<16x128xf32>
    %62 = vector.extract_strided_slice %42 {offsets = [0, 1, 0], sizes = [8, 8, 16], strides = [1, 1, 1]} : vector<8x10x18xbf16> to vector<8x8x16xbf16>
    %63 = vector.shape_cast %62 : vector<8x8x16xbf16> to vector<8x128xbf16>
    %c3 = arith.constant 3 : index
    %c0_35 = arith.constant 0 : index
    %c0_36 = arith.constant 0 : index
    %64 = vector.load %arg4[%c3, %c0_35, %c0_36] : memref<9x16x8xbf16, #tpu.memory_space<vmem>>, vector<1x16x8xbf16>
    %65 = vector.shape_cast %64 : vector<1x16x8xbf16> to vector<16x8xbf16>
    %cst_37 = arith.constant dense<0.000000e+00> : vector<16x128xf32>
    %66 = tpu.matmul %65, %63, %cst_37 {dimension_numbers = #tpu.dot_dimension_numbers<[1], [0], [0], [1], [0, 0, 1, 1], [], []>} : vector<16x8xbf16>, vector<8x128xbf16>, vector<16x128xf32> -> vector<16x128xf32>
    %67 = arith.addf %61, %66 : vector<16x128xf32>
    %68 = vector.extract_strided_slice %42 {offsets = [0, 1, 1], sizes = [8, 8, 16], strides = [1, 1, 1]} : vector<8x10x18xbf16> to vector<8x8x16xbf16>
    %69 = vector.shape_cast %68 : vector<8x8x16xbf16> to vector<8x128xbf16>
    %c4 = arith.constant 4 : index
    %c0_38 = arith.constant 0 : index
    %c0_39 = arith.constant 0 : index
    %70 = vector.load %arg4[%c4, %c0_38, %c0_39] : memref<9x16x8xbf16, #tpu.memory_space<vmem>>, vector<1x16x8xbf16>
    %71 = vector.shape_cast %70 : vector<1x16x8xbf16> to vector<16x8xbf16>
    %cst_40 = arith.constant dense<0.000000e+00> : vector<16x128xf32>
    %72 = tpu.matmul %71, %69, %cst_40 {dimension_numbers = #tpu.dot_dimension_numbers<[1], [0], [0], [1], [0, 0, 1, 1], [], []>} : vector<16x8xbf16>, vector<8x128xbf16>, vector<16x128xf32> -> vector<16x128xf32>
    %73 = arith.addf %67, %72 : vector<16x128xf32>
    %74 = vector.extract_strided_slice %42 {offsets = [0, 1, 2], sizes = [8, 8, 16], strides = [1, 1, 1]} : vector<8x10x18xbf16> to vector<8x8x16xbf16>
    %75 = vector.shape_cast %74 : vector<8x8x16xbf16> to vector<8x128xbf16>
    %c5 = arith.constant 5 : index
    %c0_41 = arith.constant 0 : index
    %c0_42 = arith.constant 0 : index
    %76 = vector.load %arg4[%c5, %c0_41, %c0_42] : memref<9x16x8xbf16, #tpu.memory_space<vmem>>, vector<1x16x8xbf16>
    %77 = vector.shape_cast %76 : vector<1x16x8xbf16> to vector<16x8xbf16>
    %cst_43 = arith.constant dense<0.000000e+00> : vector<16x128xf32>
    %78 = tpu.matmul %77, %75, %cst_43 {dimension_numbers = #tpu.dot_dimension_numbers<[1], [0], [0], [1], [0, 0, 1, 1], [], []>} : vector<16x8xbf16>, vector<8x128xbf16>, vector<16x128xf32> -> vector<16x128xf32>
    %79 = arith.addf %73, %78 : vector<16x128xf32>
    %80 = vector.extract_strided_slice %42 {offsets = [0, 2, 0], sizes = [8, 8, 16], strides = [1, 1, 1]} : vector<8x10x18xbf16> to vector<8x8x16xbf16>
    %81 = vector.shape_cast %80 : vector<8x8x16xbf16> to vector<8x128xbf16>
    %c6 = arith.constant 6 : index
    %c0_44 = arith.constant 0 : index
    %c0_45 = arith.constant 0 : index
    %82 = vector.load %arg4[%c6, %c0_44, %c0_45] : memref<9x16x8xbf16, #tpu.memory_space<vmem>>, vector<1x16x8xbf16>
    %83 = vector.shape_cast %82 : vector<1x16x8xbf16> to vector<16x8xbf16>
    %cst_46 = arith.constant dense<0.000000e+00> : vector<16x128xf32>
    %84 = tpu.matmul %83, %81, %cst_46 {dimension_numbers = #tpu.dot_dimension_numbers<[1], [0], [0], [1], [0, 0, 1, 1], [], []>} : vector<16x8xbf16>, vector<8x128xbf16>, vector<16x128xf32> -> vector<16x128xf32>
    %85 = arith.addf %79, %84 : vector<16x128xf32>
    %86 = vector.extract_strided_slice %42 {offsets = [0, 2, 1], sizes = [8, 8, 16], strides = [1, 1, 1]} : vector<8x10x18xbf16> to vector<8x8x16xbf16>
    %87 = vector.shape_cast %86 : vector<8x8x16xbf16> to vector<8x128xbf16>
    %c7 = arith.constant 7 : index
    %c0_47 = arith.constant 0 : index
    %c0_48 = arith.constant 0 : index
    %88 = vector.load %arg4[%c7, %c0_47, %c0_48] : memref<9x16x8xbf16, #tpu.memory_space<vmem>>, vector<1x16x8xbf16>
    %89 = vector.shape_cast %88 : vector<1x16x8xbf16> to vector<16x8xbf16>
    %cst_49 = arith.constant dense<0.000000e+00> : vector<16x128xf32>
    %90 = tpu.matmul %89, %87, %cst_49 {dimension_numbers = #tpu.dot_dimension_numbers<[1], [0], [0], [1], [0, 0, 1, 1], [], []>} : vector<16x8xbf16>, vector<8x128xbf16>, vector<16x128xf32> -> vector<16x128xf32>
    %91 = arith.addf %85, %90 : vector<16x128xf32>
    %92 = vector.extract_strided_slice %42 {offsets = [0, 2, 2], sizes = [8, 8, 16], strides = [1, 1, 1]} : vector<8x10x18xbf16> to vector<8x8x16xbf16>
    %93 = vector.shape_cast %92 : vector<8x8x16xbf16> to vector<8x128xbf16>
    %c8_50 = arith.constant 8 : index
    %c0_51 = arith.constant 0 : index
    %c0_52 = arith.constant 0 : index
    %94 = vector.load %arg4[%c8_50, %c0_51, %c0_52] : memref<9x16x8xbf16, #tpu.memory_space<vmem>>, vector<1x16x8xbf16>
    %95 = vector.shape_cast %94 : vector<1x16x8xbf16> to vector<16x8xbf16>
    %cst_53 = arith.constant dense<0.000000e+00> : vector<16x128xf32>
    %96 = tpu.matmul %95, %93, %cst_53 {dimension_numbers = #tpu.dot_dimension_numbers<[1], [0], [0], [1], [0, 0, 1, 1], [], []>} : vector<16x8xbf16>, vector<8x128xbf16>, vector<16x128xf32> -> vector<16x128xf32>
    %97 = arith.addf %91, %96 : vector<16x128xf32>
    %c0_54 = arith.constant 0 : index
    %c0_55 = arith.constant 0 : index
    %98 = vector.load %arg5[%c0_54, %c0_55] : memref<16x1xf32, #tpu.memory_space<vmem>>, vector<16x1xf32>
    %99 = vector.broadcast %98 : vector<16x1xf32> to vector<16x128xf32>
    %100 = arith.addf %97, %99 : vector<16x128xf32>
    %101 = arith.truncf %100 : vector<16x128xf32> to vector<16x128xbf16>
    %c0_56 = arith.constant 0 : index
    %c0_57 = arith.constant 0 : index
    %c0_58 = arith.constant 0 : index
    %102 = vector.load %arg8[%c0_56, %c0_57, %c0_58] : memref<1x16x128xbf16, #tpu.memory_space<vmem>>, vector<1x16x128xbf16>
    %103 = vector.shape_cast %102 : vector<1x16x128xbf16> to vector<16x128xbf16>
    %104 = vector.shape_cast %101 : vector<16x128xbf16> to vector<1x16x128xbf16>
    tpu.vector_store %arg8[%c0_56, %c0_57, %c0_58], %104 {strides = array<i32>} : memref<1x16x128xbf16, #tpu.memory_space<vmem>>, vector<1x16x128xbf16>,
    return
  }
  func.func @transform_0(%arg0: i32, %arg1: i32) -> (i32, i32, i32, i32) {
    %c0_i32 = arith.constant 0 : i32
    %c0_i32_0 = arith.constant 0 : i32
    %c0_i32_1 = arith.constant 0 : i32
    return %arg0, %c0_i32, %arg1, %c0_i32_0 : i32, i32, i32, i32
  }
  func.func @transform_1(%arg0: i32, %arg1: i32) -> (i32, i32, i32, i32) {
    %c1_i32 = arith.constant 1 : i32
    %0 = arith.addi %arg1, %c1_i32 : i32
    %c1_i32_0 = arith.constant 1 : i32
    %1 = arith.muli %0, %c1_i32_0 : i32
    %c0_i32 = arith.constant 0 : i32
    %c0_i32_1 = arith.constant 0 : i32
    %c0_i32_2 = arith.constant 0 : i32
    return %arg0, %c0_i32, %1, %c0_i32_1 : i32, i32, i32, i32
  }
  func.func @transform_2(%arg0: i32, %arg1: i32) -> (i32, i32, i32) {
    %c0_i32 = arith.constant 0 : i32
    %c0_i32_0 = arith.constant 0 : i32
    %c0_i32_1 = arith.constant 0 : i32
    %c0_i32_2 = arith.constant 0 : i32
    return %c0_i32, %c0_i32_0, %c0_i32_1 : i32, i32, i32
  }
  func.func @transform_3(%arg0: i32, %arg1: i32) -> (i32, i32) {
    %c0_i32 = arith.constant 0 : i32
    %c0_i32_0 = arith.constant 0 : i32
    %c0_i32_1 = arith.constant 0 : i32
    return %c0_i32, %c0_i32_0 : i32, i32
  }
  func.func @transform_4(%arg0: i32, %arg1: i32) -> (i32, i32, i32) {
    %c0_i32 = arith.constant 0 : i32
    %c0_i32_0 = arith.constant 0 : i32
    %c0_i32_1 = arith.constant 0 : i32
    return %arg0, %c0_i32, %c0_i32_0 : i32, i32, i32
  }
  func.func @transform_5(%arg0: i32, %arg1: i32) -> (i32, i32, i32) {
    %c0_i32 = arith.constant 0 : i32
    %c0_i32_0 = arith.constant 0 : i32
    %c0_i32_1 = arith.constant 0 : i32
    return %arg0, %c0_i32, %c0_i32_0 : i32, i32, i32
  }
  func.func @transform_6(%arg0: i32, %arg1: i32) -> (i32, i32, i32) {
    %c0_i32 = arith.constant 0 : i32
    %c0_i32_0 = arith.constant 0 : i32
    return %arg0, %c0_i32, %arg1 : i32, i32, i32
  }
}

module attributes {stable_mosaic.version = 11 : i64} {
  func.func @kernel(%arg0: i32, %arg1: memref<1x8x256xbf16, #tpu.memory_space<vmem>>, %arg2: memref<4x8xf32, #tpu.memory_space<vmem>>, %arg3: memref<8x4xf32, #tpu.memory_space<vmem>>, %arg4: memref<8x1xf32, #tpu.memory_space<vmem>>, %arg5: memref<8x1xf32, #tpu.memory_space<vmem>>, %arg6: memref<1x8x1xf32, #tpu.memory_space<vmem>>, %arg7: memref<1x8x1xf32, #tpu.memory_space<vmem>>) attributes {dimension_semantics = [#tpu.dimension_semantics<parallel>], iteration_bounds = array<i64: 2>, scalar_prefetch = 0 : i64, scratch_operands = 0 : i64, tpu.core_type = #tpu.core_type<tc>, window_params = [{transform_indices = @transform_0, window_bounds = array<i64: 1, 8, 256>}, {pipeline_mode = #tpu.pipeline_mode<synchronous>, transform_indices = @transform_1, window_bounds = array<i64: 4, 8>}, {pipeline_mode = #tpu.pipeline_mode<synchronous>, transform_indices = @transform_2, window_bounds = array<i64: 8, 4>}, {pipeline_mode = #tpu.pipeline_mode<synchronous>, transform_indices = @transform_3, window_bounds = array<i64: 8, 1>}, {pipeline_mode = #tpu.pipeline_mode<synchronous>, transform_indices = @transform_4, window_bounds = array<i64: 8, 1>}, {transform_indices = @transform_5, window_bounds = array<i64: 1, 8, 1>}, {transform_indices = @transform_6, window_bounds = array<i64: 1, 8, 1>}]} {
    %c0 = arith.constant 0 : index
    %c0_0 = arith.constant 0 : index
    %c0_1 = arith.constant 0 : index
    %0 = vector.load %arg1[%c0, %c0_0, %c0_1] : memref<1x8x256xbf16, #tpu.memory_space<vmem>>, vector<1x8x256xbf16>
    %1 = vector.shape_cast %0 : vector<1x8x256xbf16> to vector<8x256xbf16>
    %2 = arith.extf %1 : vector<8x256xbf16> to vector<8x256xf32>
    %cst = arith.constant dense<0.000000e+00> : vector<8xf32>
    %3 = vector.multi_reduction <add>, %2, %cst [1] : vector<8x256xf32> to vector<8xf32>
    %4 = vector.shape_cast %3 : vector<8xf32> to vector<8x1xf32>
    %c0_2 = arith.constant 0 : index
    %c0_3 = arith.constant 0 : index
    %5 = vector.load %arg2[%c0_2, %c0_3] : memref<4x8xf32, #tpu.memory_space<vmem>>, vector<4x8xf32>
    %cst_4 = arith.constant dense<0.000000e+00> : vector<4x1xf32>
    %6 = tpu.matmul %5, %4, %cst_4 {dimension_numbers = #tpu.dot_dimension_numbers<[1], [0], [0], [1], [0, 0, 1, 1], [], []>} : vector<4x8xf32>, vector<8x1xf32>, vector<4x1xf32> -> vector<4x1xf32>
    %cst_5 = arith.constant 0.001953125 : f32
    %7 = vector.broadcast %cst_5 : f32 to vector<4x1xf32>
    %8 = arith.mulf %6, %7 : vector<4x1xf32>
    %c0_6 = arith.constant 0 : index
    %c0_7 = arith.constant 0 : index
    %9 = vector.load %arg3[%c0_6, %c0_7] : memref<8x4xf32, #tpu.memory_space<vmem>>, vector<8x4xf32>
    %cst_8 = arith.constant dense<0.000000e+00> : vector<8x1xf32>
    %10 = tpu.matmul %9, %8, %cst_8 {dimension_numbers = #tpu.dot_dimension_numbers<[1], [0], [0], [1], [0, 0, 1, 1], [], []>} : vector<8x4xf32>, vector<4x1xf32>, vector<8x1xf32> -> vector<8x1xf32>
    %11 = vector.broadcast %10 : vector<8x1xf32> to vector<8x256xf32>
    %12 = arith.subf %2, %11 : vector<8x256xf32>
    %13 = arith.mulf %12, %12 : vector<8x256xf32>
    %cst_9 = arith.constant dense<0.000000e+00> : vector<8xf32>
    %14 = vector.multi_reduction <add>, %13, %cst_9 [1] : vector<8x256xf32> to vector<8xf32>
    %15 = vector.shape_cast %14 : vector<8xf32> to vector<8x1xf32>
    %c0_10 = arith.constant 0 : index
    %c0_11 = arith.constant 0 : index
    %16 = vector.load %arg2[%c0_10, %c0_11] : memref<4x8xf32, #tpu.memory_space<vmem>>, vector<4x8xf32>
    %cst_12 = arith.constant dense<0.000000e+00> : vector<4x1xf32>
    %17 = tpu.matmul %16, %15, %cst_12 {dimension_numbers = #tpu.dot_dimension_numbers<[1], [0], [0], [1], [0, 0, 1, 1], [], []>} : vector<4x8xf32>, vector<8x1xf32>, vector<4x1xf32> -> vector<4x1xf32>
    %cst_13 = arith.constant 0.001953125 : f32
    %18 = vector.broadcast %cst_13 : f32 to vector<4x1xf32>
    %19 = arith.mulf %17, %18 : vector<4x1xf32>
    %c0_14 = arith.constant 0 : index
    %c0_15 = arith.constant 0 : index
    %20 = vector.load %arg3[%c0_14, %c0_15] : memref<8x4xf32, #tpu.memory_space<vmem>>, vector<8x4xf32>
    %cst_16 = arith.constant 9.99999974E-6 : f32
    %21 = vector.broadcast %cst_16 : f32 to vector<4x1xf32>
    %22 = arith.addf %19, %21 : vector<4x1xf32>
    %23 = math.rsqrt %22 : vector<4x1xf32>
    %cst_17 = arith.constant dense<0.000000e+00> : vector<8x1xf32>
    %24 = tpu.matmul %20, %23, %cst_17 {dimension_numbers = #tpu.dot_dimension_numbers<[1], [0], [0], [1], [0, 0, 1, 1], [], []>} : vector<8x4xf32>, vector<4x1xf32>, vector<8x1xf32> -> vector<8x1xf32>
    %c0_18 = arith.constant 0 : index
    %c0_19 = arith.constant 0 : index
    %25 = vector.load %arg4[%c0_18, %c0_19] : memref<8x1xf32, #tpu.memory_space<vmem>>, vector<8x1xf32>
    %26 = arith.mulf %24, %25 : vector<8x1xf32>
    %c0_20 = arith.constant 0 : index
    %c0_21 = arith.constant 0 : index
    %c0_22 = arith.constant 0 : index
    %27 = vector.load %arg6[%c0_20, %c0_21, %c0_22] : memref<1x8x1xf32, #tpu.memory_space<vmem>>, vector<1x8x1xf32>
    %28 = vector.shape_cast %27 : vector<1x8x1xf32> to vector<8x1xf32>
    %29 = vector.shape_cast %26 : vector<8x1xf32> to vector<1x8x1xf32>
    tpu.vector_store %arg6[%c0_20, %c0_21, %c0_22], %29 {strides = array<i32>} : memref<1x8x1xf32, #tpu.memory_space<vmem>>, vector<1x8x1xf32>,
    %c0_23 = arith.constant 0 : index
    %c0_24 = arith.constant 0 : index
    %30 = vector.load %arg5[%c0_23, %c0_24] : memref<8x1xf32, #tpu.memory_space<vmem>>, vector<8x1xf32>
    %31 = arith.mulf %10, %26 : vector<8x1xf32>
    %32 = arith.subf %30, %31 : vector<8x1xf32>
    %c0_25 = arith.constant 0 : index
    %c0_26 = arith.constant 0 : index
    %c0_27 = arith.constant 0 : index
    %33 = vector.load %arg7[%c0_25, %c0_26, %c0_27] : memref<1x8x1xf32, #tpu.memory_space<vmem>>, vector<1x8x1xf32>
    %34 = vector.shape_cast %33 : vector<1x8x1xf32> to vector<8x1xf32>
    %35 = vector.shape_cast %32 : vector<8x1xf32> to vector<1x8x1xf32>
    tpu.vector_store %arg7[%c0_25, %c0_26, %c0_27], %35 {strides = array<i32>} : memref<1x8x1xf32, #tpu.memory_space<vmem>>, vector<1x8x1xf32>,
    return
  }
  func.func @transform_0(%arg0: i32) -> (i32, i32, i32) {
    %c0_i32 = arith.constant 0 : i32
    %c0_i32_0 = arith.constant 0 : i32
    %c0_i32_1 = arith.constant 0 : i32
    return %arg0, %c0_i32, %c0_i32_0 : i32, i32, i32
  }
  func.func @transform_1(%arg0: i32) -> (i32, i32) {
    %c0_i32 = arith.constant 0 : i32
    %c0_i32_0 = arith.constant 0 : i32
    %c0_i32_1 = arith.constant 0 : i32
    return %c0_i32, %c0_i32_0 : i32, i32
  }
  func.func @transform_2(%arg0: i32) -> (i32, i32) {
    %c0_i32 = arith.constant 0 : i32
    %c0_i32_0 = arith.constant 0 : i32
    %c0_i32_1 = arith.constant 0 : i32
    return %c0_i32, %c0_i32_0 : i32, i32
  }
  func.func @transform_3(%arg0: i32) -> (i32, i32) {
    %c0_i32 = arith.constant 0 : i32
    %c0_i32_0 = arith.constant 0 : i32
    %c0_i32_1 = arith.constant 0 : i32
    return %c0_i32, %c0_i32_0 : i32, i32
  }
  func.func @transform_4(%arg0: i32) -> (i32, i32) {
    %c0_i32 = arith.constant 0 : i32
    %c0_i32_0 = arith.constant 0 : i32
    %c0_i32_1 = arith.constant 0 : i32
    return %c0_i32, %c0_i32_0 : i32, i32
  }
  func.func @transform_5(%arg0: i32) -> (i32, i32, i32) {
    %c0_i32 = arith.constant 0 : i32
    %c0_i32_0 = arith.constant 0 : i32
    %c0_i32_1 = arith.constant 0 : i32
    return %arg0, %c0_i32, %c0_i32_0 : i32, i32, i32
  }
  func.func @transform_6(%arg0: i32) -> (i32, i32, i32) {
    %c0_i32 = arith.constant 0 : i32
    %c0_i32_0 = arith.constant 0 : i32
    %c0_i32_1 = arith.constant 0 : i32
    return %arg0, %c0_i32, %c0_i32_0 : i32, i32, i32
  }
}

module attributes {stable_mosaic.version = 11 : i64} {
  func.func @kernel(%arg0: i32, %arg1: memref<1x16x256xbf16, #tpu.memory_space<vmem>>, %arg2: memref<4x16xf32, #tpu.memory_space<vmem>>, %arg3: memref<16x4xf32, #tpu.memory_space<vmem>>, %arg4: memref<16x1xf32, #tpu.memory_space<vmem>>, %arg5: memref<16x1xf32, #tpu.memory_space<vmem>>, %arg6: memref<1x16x1xf32, #tpu.memory_space<vmem>>, %arg7: memref<1x16x1xf32, #tpu.memory_space<vmem>>) attributes {dimension_semantics = [#tpu.dimension_semantics<parallel>], iteration_bounds = array<i64: 2>, scalar_prefetch = 0 : i64, scratch_operands = 0 : i64, tpu.core_type = #tpu.core_type<tc>, window_params = [{transform_indices = @transform_0, window_bounds = array<i64: 1, 16, 256>}, {pipeline_mode = #tpu.pipeline_mode<synchronous>, transform_indices = @transform_1, window_bounds = array<i64: 4, 16>}, {pipeline_mode = #tpu.pipeline_mode<synchronous>, transform_indices = @transform_2, window_bounds = array<i64: 16, 4>}, {pipeline_mode = #tpu.pipeline_mode<synchronous>, transform_indices = @transform_3, window_bounds = array<i64: 16, 1>}, {pipeline_mode = #tpu.pipeline_mode<synchronous>, transform_indices = @transform_4, window_bounds = array<i64: 16, 1>}, {transform_indices = @transform_5, window_bounds = array<i64: 1, 16, 1>}, {transform_indices = @transform_6, window_bounds = array<i64: 1, 16, 1>}]} {
    %c0 = arith.constant 0 : index
    %c0_0 = arith.constant 0 : index
    %c0_1 = arith.constant 0 : index
    %0 = vector.load %arg1[%c0, %c0_0, %c0_1] : memref<1x16x256xbf16, #tpu.memory_space<vmem>>, vector<1x16x256xbf16>
    %1 = vector.shape_cast %0 : vector<1x16x256xbf16> to vector<16x256xbf16>
    %2 = arith.extf %1 : vector<16x256xbf16> to vector<16x256xf32>
    %cst = arith.constant dense<0.000000e+00> : vector<16xf32>
    %3 = vector.multi_reduction <add>, %2, %cst [1] : vector<16x256xf32> to vector<16xf32>
    %4 = vector.shape_cast %3 : vector<16xf32> to vector<16x1xf32>
    %c0_2 = arith.constant 0 : index
    %c0_3 = arith.constant 0 : index
    %5 = vector.load %arg2[%c0_2, %c0_3] : memref<4x16xf32, #tpu.memory_space<vmem>>, vector<4x16xf32>
    %cst_4 = arith.constant dense<0.000000e+00> : vector<4x1xf32>
    %6 = tpu.matmul %5, %4, %cst_4 {dimension_numbers = #tpu.dot_dimension_numbers<[1], [0], [0], [1], [0, 0, 1, 1], [], []>} : vector<4x16xf32>, vector<16x1xf32>, vector<4x1xf32> -> vector<4x1xf32>
    %cst_5 = arith.constant 9.765625E-4 : f32
    %7 = vector.broadcast %cst_5 : f32 to vector<4x1xf32>
    %8 = arith.mulf %6, %7 : vector<4x1xf32>
    %c0_6 = arith.constant 0 : index
    %c0_7 = arith.constant 0 : index
    %9 = vector.load %arg3[%c0_6, %c0_7] : memref<16x4xf32, #tpu.memory_space<vmem>>, vector<16x4xf32>
    %cst_8 = arith.constant dense<0.000000e+00> : vector<16x1xf32>
    %10 = tpu.matmul %9, %8, %cst_8 {dimension_numbers = #tpu.dot_dimension_numbers<[1], [0], [0], [1], [0, 0, 1, 1], [], []>} : vector<16x4xf32>, vector<4x1xf32>, vector<16x1xf32> -> vector<16x1xf32>
    %11 = vector.broadcast %10 : vector<16x1xf32> to vector<16x256xf32>
    %12 = arith.subf %2, %11 : vector<16x256xf32>
    %13 = arith.mulf %12, %12 : vector<16x256xf32>
    %cst_9 = arith.constant dense<0.000000e+00> : vector<16xf32>
    %14 = vector.multi_reduction <add>, %13, %cst_9 [1] : vector<16x256xf32> to vector<16xf32>
    %15 = vector.shape_cast %14 : vector<16xf32> to vector<16x1xf32>
    %c0_10 = arith.constant 0 : index
    %c0_11 = arith.constant 0 : index
    %16 = vector.load %arg2[%c0_10, %c0_11] : memref<4x16xf32, #tpu.memory_space<vmem>>, vector<4x16xf32>
    %cst_12 = arith.constant dense<0.000000e+00> : vector<4x1xf32>
    %17 = tpu.matmul %16, %15, %cst_12 {dimension_numbers = #tpu.dot_dimension_numbers<[1], [0], [0], [1], [0, 0, 1, 1], [], []>} : vector<4x16xf32>, vector<16x1xf32>, vector<4x1xf32> -> vector<4x1xf32>
    %cst_13 = arith.constant 9.765625E-4 : f32
    %18 = vector.broadcast %cst_13 : f32 to vector<4x1xf32>
    %19 = arith.mulf %17, %18 : vector<4x1xf32>
    %c0_14 = arith.constant 0 : index
    %c0_15 = arith.constant 0 : index
    %20 = vector.load %arg3[%c0_14, %c0_15] : memref<16x4xf32, #tpu.memory_space<vmem>>, vector<16x4xf32>
    %cst_16 = arith.constant 9.99999974E-6 : f32
    %21 = vector.broadcast %cst_16 : f32 to vector<4x1xf32>
    %22 = arith.addf %19, %21 : vector<4x1xf32>
    %23 = math.rsqrt %22 : vector<4x1xf32>
    %cst_17 = arith.constant dense<0.000000e+00> : vector<16x1xf32>
    %24 = tpu.matmul %20, %23, %cst_17 {dimension_numbers = #tpu.dot_dimension_numbers<[1], [0], [0], [1], [0, 0, 1, 1], [], []>} : vector<16x4xf32>, vector<4x1xf32>, vector<16x1xf32> -> vector<16x1xf32>
    %c0_18 = arith.constant 0 : index
    %c0_19 = arith.constant 0 : index
    %25 = vector.load %arg4[%c0_18, %c0_19] : memref<16x1xf32, #tpu.memory_space<vmem>>, vector<16x1xf32>
    %26 = arith.mulf %24, %25 : vector<16x1xf32>
    %c0_20 = arith.constant 0 : index
    %c0_21 = arith.constant 0 : index
    %c0_22 = arith.constant 0 : index
    %27 = vector.load %arg6[%c0_20, %c0_21, %c0_22] : memref<1x16x1xf32, #tpu.memory_space<vmem>>, vector<1x16x1xf32>
    %28 = vector.shape_cast %27 : vector<1x16x1xf32> to vector<16x1xf32>
    %29 = vector.shape_cast %26 : vector<16x1xf32> to vector<1x16x1xf32>
    tpu.vector_store %arg6[%c0_20, %c0_21, %c0_22], %29 {strides = array<i32>} : memref<1x16x1xf32, #tpu.memory_space<vmem>>, vector<1x16x1xf32>,
    %c0_23 = arith.constant 0 : index
    %c0_24 = arith.constant 0 : index
    %30 = vector.load %arg5[%c0_23, %c0_24] : memref<16x1xf32, #tpu.memory_space<vmem>>, vector<16x1xf32>
    %31 = arith.mulf %10, %26 : vector<16x1xf32>
    %32 = arith.subf %30, %31 : vector<16x1xf32>
    %c0_25 = arith.constant 0 : index
    %c0_26 = arith.constant 0 : index
    %c0_27 = arith.constant 0 : index
    %33 = vector.load %arg7[%c0_25, %c0_26, %c0_27] : memref<1x16x1xf32, #tpu.memory_space<vmem>>, vector<1x16x1xf32>
    %34 = vector.shape_cast %33 : vector<1x16x1xf32> to vector<16x1xf32>
    %35 = vector.shape_cast %32 : vector<16x1xf32> to vector<1x16x1xf32>
    tpu.vector_store %arg7[%c0_25, %c0_26, %c0_27], %35 {strides = array<i32>} : memref<1x16x1xf32, #tpu.memory_space<vmem>>, vector<1x16x1xf32>,
    return
  }
  func.func @transform_0(%arg0: i32) -> (i32, i32, i32) {
    %c0_i32 = arith.constant 0 : i32
    %c0_i32_0 = arith.constant 0 : i32
    %c0_i32_1 = arith.constant 0 : i32
    return %arg0, %c0_i32, %c0_i32_0 : i32, i32, i32
  }
  func.func @transform_1(%arg0: i32) -> (i32, i32) {
    %c0_i32 = arith.constant 0 : i32
    %c0_i32_0 = arith.constant 0 : i32
    %c0_i32_1 = arith.constant 0 : i32
    return %c0_i32, %c0_i32_0 : i32, i32
  }
  func.func @transform_2(%arg0: i32) -> (i32, i32) {
    %c0_i32 = arith.constant 0 : i32
    %c0_i32_0 = arith.constant 0 : i32
    %c0_i32_1 = arith.constant 0 : i32
    return %c0_i32, %c0_i32_0 : i32, i32
  }
  func.func @transform_3(%arg0: i32) -> (i32, i32) {
    %c0_i32 = arith.constant 0 : i32
    %c0_i32_0 = arith.constant 0 : i32
    %c0_i32_1 = arith.constant 0 : i32
    return %c0_i32, %c0_i32_0 : i32, i32
  }
  func.func @transform_4(%arg0: i32) -> (i32, i32) {
    %c0_i32 = arith.constant 0 : i32
    %c0_i32_0 = arith.constant 0 : i32
    %c0_i32_1 = arith.constant 0 : i32
    return %c0_i32, %c0_i32_0 : i32, i32
  }
  func.func @transform_5(%arg0: i32) -> (i32, i32, i32) {
    %c0_i32 = arith.constant 0 : i32
    %c0_i32_0 = arith.constant 0 : i32
    %c0_i32_1 = arith.constant 0 : i32
    return %arg0, %c0_i32, %c0_i32_0 : i32, i32, i32
  }
  func.func @transform_6(%arg0: i32) -> (i32, i32, i32) {
    %c0_i32 = arith.constant 0 : i32
    %c0_i32_0 = arith.constant 0 : i32
    %c0_i32_1 = arith.constant 0 : i32
    return %arg0, %c0_i32, %c0_i32_0 : i32, i32, i32
  }
}

module attributes {stable_mosaic.version = 11 : i64} {
  func.func @kernel(%arg0: i32, %arg1: i32, %arg2: memref<1x16x8x18xbf16, #tpu.memory_space<vmem>>, %arg3: memref<1x16x8x18xbf16, #tpu.memory_space<vmem>>, %arg4: memref<9x16x16xbf16, #tpu.memory_space<vmem>>, %arg5: memref<16x1xf32, #tpu.memory_space<vmem>>, %arg6: memref<1x16x1xf32, #tpu.memory_space<vmem>>, %arg7: memref<1x16x1xf32, #tpu.memory_space<vmem>>, %arg8: memref<1x8x128xbf16, #tpu.memory_space<vmem>>, %arg9: memref<16x8xbf16, #tpu.memory_space<vmem>>, %arg10: memref<1x16x128xbf16, #tpu.memory_space<vmem>>, %arg11: memref<16x10x18xf32, #tpu.memory_space<vmem>>) attributes {dimension_semantics = [#tpu.dimension_semantics<parallel>, #tpu.dimension_semantics<parallel>], iteration_bounds = array<i64: 2, 2>, scalar_prefetch = 0 : i64, scratch_operands = 1 : i64, tpu.core_type = #tpu.core_type<tc>, window_params = [{transform_indices = @transform_0, window_bounds = array<i64: 1, 16, 8, 18>}, {transform_indices = @transform_1, window_bounds = array<i64: 1, 16, 8, 18>}, {pipeline_mode = #tpu.pipeline_mode<synchronous>, transform_indices = @transform_2, window_bounds = array<i64: 9, 16, 16>}, {pipeline_mode = #tpu.pipeline_mode<synchronous>, transform_indices = @transform_3, window_bounds = array<i64: 16, 1>}, {transform_indices = @transform_4, window_bounds = array<i64: 1, 16, 1>}, {transform_indices = @transform_5, window_bounds = array<i64: 1, 16, 1>}, {transform_indices = @transform_6, window_bounds = array<i64: 1, 8, 128>}, {pipeline_mode = #tpu.pipeline_mode<synchronous>, transform_indices = @transform_7, window_bounds = array<i64: 16, 8>}, {transform_indices = @transform_8, window_bounds = array<i64: 1, 16, 128>}]} {
    %c0 = arith.constant 0 : index
    %c0_0 = arith.constant 0 : index
    %c0_1 = arith.constant 0 : index
    %c0_2 = arith.constant 0 : index
    %0 = vector.load %arg2[%c0, %c0_0, %c0_1, %c0_2] : memref<1x16x8x18xbf16, #tpu.memory_space<vmem>>, vector<1x16x8x18xbf16>
    %1 = vector.shape_cast %0 : vector<1x16x8x18xbf16> to vector<16x8x18xbf16>
    %2 = arith.extf %1 : vector<16x8x18xbf16> to vector<16x8x18xf32>
    %c0_3 = arith.constant 0 : index
    %c0_4 = arith.constant 0 : index
    %c0_5 = arith.constant 0 : index
    %3 = vector.load %arg11[%c0_3, %c0_4, %c0_5] : memref<16x10x18xf32, #tpu.memory_space<vmem>>, vector<16x8x18xf32>
    tpu.vector_store %arg11[%c0_3, %c0_4, %c0_5], %2 {strides = array<i32>} : memref<16x10x18xf32, #tpu.memory_space<vmem>>, vector<16x8x18xf32>,
    %c0_6 = arith.constant 0 : index
    %c0_7 = arith.constant 0 : index
    %c0_8 = arith.constant 0 : index
    %c0_9 = arith.constant 0 : index
    %4 = vector.load %arg3[%c0_6, %c0_7, %c0_8, %c0_9] : memref<1x16x8x18xbf16, #tpu.memory_space<vmem>>, vector<1x16x2x18xbf16>
    %5 = vector.shape_cast %4 : vector<1x16x2x18xbf16> to vector<16x2x18xbf16>
    %6 = arith.extf %5 : vector<16x2x18xbf16> to vector<16x2x18xf32>
    %c0_10 = arith.constant 0 : index
    %c8 = arith.constant 8 : index
    %c0_11 = arith.constant 0 : index
    %7 = vector.load %arg11[%c0_10, %c8, %c0_11] : memref<16x10x18xf32, #tpu.memory_space<vmem>>, vector<16x2x18xf32>
    tpu.vector_store %arg11[%c0_10, %c8, %c0_11], %6 {strides = array<i32>} : memref<16x10x18xf32, #tpu.memory_space<vmem>>, vector<16x2x18xf32>,
    %8 = tpu.iota {dimensions = array<i32: 0>} : vector<10x18xi32>
    %c8_i32 = arith.constant 8 : i32
    %9 = arith.muli %arg1, %c8_i32 : i32
    %10 = vector.broadcast %9 : i32 to vector<10x18xi32>
    %11 = arith.addi %8, %10 : vector<10x18xi32>
    %12 = tpu.iota {dimensions = array<i32: 1>} : vector<10x18xi32>
    %c1_i32 = arith.constant 1 : i32
    %13 = vector.broadcast %c1_i32 : i32 to vector<10x18xi32>
    %14 = arith.cmpi sge, %11, %13 : vector<10x18xi32>
    %c16_i32 = arith.constant 16 : i32
    %15 = vector.broadcast %c16_i32 : i32 to vector<10x18xi32>
    %16 = arith.cmpi sle, %11, %15 : vector<10x18xi32>
    %17 = arith.andi %14, %16 : vector<10x18xi1>
    %c1_i32_12 = arith.constant 1 : i32
    %18 = vector.broadcast %c1_i32_12 : i32 to vector<10x18xi32>
    %19 = arith.cmpi sge, %12, %18 : vector<10x18xi32>
    %20 = arith.andi %17, %19 : vector<10x18xi1>
    %c16_i32_13 = arith.constant 16 : i32
    %21 = vector.broadcast %c16_i32_13 : i32 to vector<10x18xi32>
    %22 = arith.cmpi sle, %12, %21 : vector<10x18xi32>
    %23 = arith.andi %20, %22 : vector<10x18xi1>
    %c0_14 = arith.constant 0 : index
    %c0_15 = arith.constant 0 : index
    %c0_16 = arith.constant 0 : index
    %24 = vector.load %arg6[%c0_14, %c0_15, %c0_16] : memref<1x16x1xf32, #tpu.memory_space<vmem>>, vector<1x16x1xf32>
    %25 = vector.shape_cast %24 : vector<1x16x1xf32> to vector<16x1xf32>
    %26 = vector.shape_cast %25 : vector<16x1xf32> to vector<16x1x1xf32>
    %c0_17 = arith.constant 0 : index
    %c0_18 = arith.constant 0 : index
    %c0_19 = arith.constant 0 : index
    %27 = vector.load %arg7[%c0_17, %c0_18, %c0_19] : memref<1x16x1xf32, #tpu.memory_space<vmem>>, vector<1x16x1xf32>
    %28 = vector.shape_cast %27 : vector<1x16x1xf32> to vector<16x1xf32>
    %29 = vector.shape_cast %28 : vector<16x1xf32> to vector<16x1x1xf32>
    %c0_20 = arith.constant 0 : index
    %c0_21 = arith.constant 0 : index
    %c0_22 = arith.constant 0 : index
    %30 = vector.load %arg11[%c0_20, %c0_21, %c0_22] : memref<16x10x18xf32, #tpu.memory_space<vmem>>, vector<16x10x18xf32>
    %31 = vector.broadcast %26 : vector<16x1x1xf32> to vector<16x10x18xf32>
    %32 = arith.mulf %30, %31 : vector<16x10x18xf32>
    %33 = vector.broadcast %29 : vector<16x1x1xf32> to vector<16x10x18xf32>
    %34 = arith.addf %32, %33 : vector<16x10x18xf32>
    %cst = arith.constant 0.000000e+00 : f32
    %35 = vector.broadcast %cst : f32 to vector<16x10x18xf32>
    %36 = arith.maximumf %34, %35 : vector<16x10x18xf32>
    %37 = vector.shape_cast %23 : vector<10x18xi1> to vector<1x10x18xi1>
    %cst_23 = arith.constant 0.000000e+00 : f32
    %38 = vector.shape_cast %37 : vector<1x10x18xi1> to vector<1x10x18xi1>
    %39 = vector.broadcast %38 : vector<1x10x18xi1> to vector<16x10x18xi1>
    %40 = vector.broadcast %cst_23 : f32 to vector<16x10x18xf32>
    %41 = arith.select %39, %36, %40 : vector<16x10x18xi1>, vector<16x10x18xf32>
    %42 = arith.truncf %41 : vector<16x10x18xf32> to vector<16x10x18xbf16>
    %cst_24 = arith.constant 0.000000e+00 : f32
    %43 = vector.broadcast %cst_24 : f32 to vector<16x128xf32>
    %44 = vector.extract_strided_slice %42 {offsets = [0, 0, 0], sizes = [16, 8, 16], strides = [1, 1, 1]} : vector<16x10x18xbf16> to vector<16x8x16xbf16>
    %45 = vector.shape_cast %44 : vector<16x8x16xbf16> to vector<16x128xbf16>
    %c0_25 = arith.constant 0 : index
    %c0_26 = arith.constant 0 : index
    %c0_27 = arith.constant 0 : index
    %46 = vector.load %arg4[%c0_25, %c0_26, %c0_27] : memref<9x16x16xbf16, #tpu.memory_space<vmem>>, vector<1x16x16xbf16>
    %47 = vector.shape_cast %46 : vector<1x16x16xbf16> to vector<16x16xbf16>
    %cst_28 = arith.constant dense<0.000000e+00> : vector<16x128xf32>
    %48 = tpu.matmul %47, %45, %cst_28 {dimension_numbers = #tpu.dot_dimension_numbers<[1], [0], [0], [1], [0, 0, 1, 1], [], []>} : vector<16x16xbf16>, vector<16x128xbf16>, vector<16x128xf32> -> vector<16x128xf32>
    %49 = arith.addf %43, %48 : vector<16x128xf32>
    %50 = vector.extract_strided_slice %42 {offsets = [0, 0, 1], sizes = [16, 8, 16], strides = [1, 1, 1]} : vector<16x10x18xbf16> to vector<16x8x16xbf16>
    %51 = vector.shape_cast %50 : vector<16x8x16xbf16> to vector<16x128xbf16>
    %c1 = arith.constant 1 : index
    %c0_29 = arith.constant 0 : index
    %c0_30 = arith.constant 0 : index
    %52 = vector.load %arg4[%c1, %c0_29, %c0_30] : memref<9x16x16xbf16, #tpu.memory_space<vmem>>, vector<1x16x16xbf16>
    %53 = vector.shape_cast %52 : vector<1x16x16xbf16> to vector<16x16xbf16>
    %cst_31 = arith.constant dense<0.000000e+00> : vector<16x128xf32>
    %54 = tpu.matmul %53, %51, %cst_31 {dimension_numbers = #tpu.dot_dimension_numbers<[1], [0], [0], [1], [0, 0, 1, 1], [], []>} : vector<16x16xbf16>, vector<16x128xbf16>, vector<16x128xf32> -> vector<16x128xf32>
    %55 = arith.addf %49, %54 : vector<16x128xf32>
    %56 = vector.extract_strided_slice %42 {offsets = [0, 0, 2], sizes = [16, 8, 16], strides = [1, 1, 1]} : vector<16x10x18xbf16> to vector<16x8x16xbf16>
    %57 = vector.shape_cast %56 : vector<16x8x16xbf16> to vector<16x128xbf16>
    %c2 = arith.constant 2 : index
    %c0_32 = arith.constant 0 : index
    %c0_33 = arith.constant 0 : index
    %58 = vector.load %arg4[%c2, %c0_32, %c0_33] : memref<9x16x16xbf16, #tpu.memory_space<vmem>>, vector<1x16x16xbf16>
    %59 = vector.shape_cast %58 : vector<1x16x16xbf16> to vector<16x16xbf16>
    %cst_34 = arith.constant dense<0.000000e+00> : vector<16x128xf32>
    %60 = tpu.matmul %59, %57, %cst_34 {dimension_numbers = #tpu.dot_dimension_numbers<[1], [0], [0], [1], [0, 0, 1, 1], [], []>} : vector<16x16xbf16>, vector<16x128xbf16>, vector<16x128xf32> -> vector<16x128xf32>
    %61 = arith.addf %55, %60 : vector<16x128xf32>
    %62 = vector.extract_strided_slice %42 {offsets = [0, 1, 0], sizes = [16, 8, 16], strides = [1, 1, 1]} : vector<16x10x18xbf16> to vector<16x8x16xbf16>
    %63 = vector.shape_cast %62 : vector<16x8x16xbf16> to vector<16x128xbf16>
    %c3 = arith.constant 3 : index
    %c0_35 = arith.constant 0 : index
    %c0_36 = arith.constant 0 : index
    %64 = vector.load %arg4[%c3, %c0_35, %c0_36] : memref<9x16x16xbf16, #tpu.memory_space<vmem>>, vector<1x16x16xbf16>
    %65 = vector.shape_cast %64 : vector<1x16x16xbf16> to vector<16x16xbf16>
    %cst_37 = arith.constant dense<0.000000e+00> : vector<16x128xf32>
    %66 = tpu.matmul %65, %63, %cst_37 {dimension_numbers = #tpu.dot_dimension_numbers<[1], [0], [0], [1], [0, 0, 1, 1], [], []>} : vector<16x16xbf16>, vector<16x128xbf16>, vector<16x128xf32> -> vector<16x128xf32>
    %67 = arith.addf %61, %66 : vector<16x128xf32>
    %68 = vector.extract_strided_slice %42 {offsets = [0, 1, 1], sizes = [16, 8, 16], strides = [1, 1, 1]} : vector<16x10x18xbf16> to vector<16x8x16xbf16>
    %69 = vector.shape_cast %68 : vector<16x8x16xbf16> to vector<16x128xbf16>
    %c4 = arith.constant 4 : index
    %c0_38 = arith.constant 0 : index
    %c0_39 = arith.constant 0 : index
    %70 = vector.load %arg4[%c4, %c0_38, %c0_39] : memref<9x16x16xbf16, #tpu.memory_space<vmem>>, vector<1x16x16xbf16>
    %71 = vector.shape_cast %70 : vector<1x16x16xbf16> to vector<16x16xbf16>
    %cst_40 = arith.constant dense<0.000000e+00> : vector<16x128xf32>
    %72 = tpu.matmul %71, %69, %cst_40 {dimension_numbers = #tpu.dot_dimension_numbers<[1], [0], [0], [1], [0, 0, 1, 1], [], []>} : vector<16x16xbf16>, vector<16x128xbf16>, vector<16x128xf32> -> vector<16x128xf32>
    %73 = arith.addf %67, %72 : vector<16x128xf32>
    %74 = vector.extract_strided_slice %42 {offsets = [0, 1, 2], sizes = [16, 8, 16], strides = [1, 1, 1]} : vector<16x10x18xbf16> to vector<16x8x16xbf16>
    %75 = vector.shape_cast %74 : vector<16x8x16xbf16> to vector<16x128xbf16>
    %c5 = arith.constant 5 : index
    %c0_41 = arith.constant 0 : index
    %c0_42 = arith.constant 0 : index
    %76 = vector.load %arg4[%c5, %c0_41, %c0_42] : memref<9x16x16xbf16, #tpu.memory_space<vmem>>, vector<1x16x16xbf16>
    %77 = vector.shape_cast %76 : vector<1x16x16xbf16> to vector<16x16xbf16>
    %cst_43 = arith.constant dense<0.000000e+00> : vector<16x128xf32>
    %78 = tpu.matmul %77, %75, %cst_43 {dimension_numbers = #tpu.dot_dimension_numbers<[1], [0], [0], [1], [0, 0, 1, 1], [], []>} : vector<16x16xbf16>, vector<16x128xbf16>, vector<16x128xf32> -> vector<16x128xf32>
    %79 = arith.addf %73, %78 : vector<16x128xf32>
    %80 = vector.extract_strided_slice %42 {offsets = [0, 2, 0], sizes = [16, 8, 16], strides = [1, 1, 1]} : vector<16x10x18xbf16> to vector<16x8x16xbf16>
    %81 = vector.shape_cast %80 : vector<16x8x16xbf16> to vector<16x128xbf16>
    %c6 = arith.constant 6 : index
    %c0_44 = arith.constant 0 : index
    %c0_45 = arith.constant 0 : index
    %82 = vector.load %arg4[%c6, %c0_44, %c0_45] : memref<9x16x16xbf16, #tpu.memory_space<vmem>>, vector<1x16x16xbf16>
    %83 = vector.shape_cast %82 : vector<1x16x16xbf16> to vector<16x16xbf16>
    %cst_46 = arith.constant dense<0.000000e+00> : vector<16x128xf32>
    %84 = tpu.matmul %83, %81, %cst_46 {dimension_numbers = #tpu.dot_dimension_numbers<[1], [0], [0], [1], [0, 0, 1, 1], [], []>} : vector<16x16xbf16>, vector<16x128xbf16>, vector<16x128xf32> -> vector<16x128xf32>
    %85 = arith.addf %79, %84 : vector<16x128xf32>
    %86 = vector.extract_strided_slice %42 {offsets = [0, 2, 1], sizes = [16, 8, 16], strides = [1, 1, 1]} : vector<16x10x18xbf16> to vector<16x8x16xbf16>
    %87 = vector.shape_cast %86 : vector<16x8x16xbf16> to vector<16x128xbf16>
    %c7 = arith.constant 7 : index
    %c0_47 = arith.constant 0 : index
    %c0_48 = arith.constant 0 : index
    %88 = vector.load %arg4[%c7, %c0_47, %c0_48] : memref<9x16x16xbf16, #tpu.memory_space<vmem>>, vector<1x16x16xbf16>
    %89 = vector.shape_cast %88 : vector<1x16x16xbf16> to vector<16x16xbf16>
    %cst_49 = arith.constant dense<0.000000e+00> : vector<16x128xf32>
    %90 = tpu.matmul %89, %87, %cst_49 {dimension_numbers = #tpu.dot_dimension_numbers<[1], [0], [0], [1], [0, 0, 1, 1], [], []>} : vector<16x16xbf16>, vector<16x128xbf16>, vector<16x128xf32> -> vector<16x128xf32>
    %91 = arith.addf %85, %90 : vector<16x128xf32>
    %92 = vector.extract_strided_slice %42 {offsets = [0, 2, 2], sizes = [16, 8, 16], strides = [1, 1, 1]} : vector<16x10x18xbf16> to vector<16x8x16xbf16>
    %93 = vector.shape_cast %92 : vector<16x8x16xbf16> to vector<16x128xbf16>
    %c8_50 = arith.constant 8 : index
    %c0_51 = arith.constant 0 : index
    %c0_52 = arith.constant 0 : index
    %94 = vector.load %arg4[%c8_50, %c0_51, %c0_52] : memref<9x16x16xbf16, #tpu.memory_space<vmem>>, vector<1x16x16xbf16>
    %95 = vector.shape_cast %94 : vector<1x16x16xbf16> to vector<16x16xbf16>
    %cst_53 = arith.constant dense<0.000000e+00> : vector<16x128xf32>
    %96 = tpu.matmul %95, %93, %cst_53 {dimension_numbers = #tpu.dot_dimension_numbers<[1], [0], [0], [1], [0, 0, 1, 1], [], []>} : vector<16x16xbf16>, vector<16x128xbf16>, vector<16x128xf32> -> vector<16x128xf32>
    %97 = arith.addf %91, %96 : vector<16x128xf32>
    %c0_54 = arith.constant 0 : index
    %c0_55 = arith.constant 0 : index
    %98 = vector.load %arg5[%c0_54, %c0_55] : memref<16x1xf32, #tpu.memory_space<vmem>>, vector<16x1xf32>
    %99 = vector.broadcast %98 : vector<16x1xf32> to vector<16x128xf32>
    %100 = arith.addf %97, %99 : vector<16x128xf32>
    %c0_56 = arith.constant 0 : index
    %c0_57 = arith.constant 0 : index
    %c0_58 = arith.constant 0 : index
    %101 = vector.load %arg8[%c0_56, %c0_57, %c0_58] : memref<1x8x128xbf16, #tpu.memory_space<vmem>>, vector<1x8x128xbf16>
    %102 = vector.shape_cast %101 : vector<1x8x128xbf16> to vector<8x128xbf16>
    %c0_59 = arith.constant 0 : index
    %c0_60 = arith.constant 0 : index
    %103 = vector.load %arg9[%c0_59, %c0_60] : memref<16x8xbf16, #tpu.memory_space<vmem>>, vector<16x8xbf16>
    %cst_61 = arith.constant dense<0.000000e+00> : vector<16x128xf32>
    %104 = tpu.matmul %103, %102, %cst_61 {dimension_numbers = #tpu.dot_dimension_numbers<[1], [0], [0], [1], [0, 0, 1, 1], [], []>} : vector<16x8xbf16>, vector<8x128xbf16>, vector<16x128xf32> -> vector<16x128xf32>
    %105 = arith.addf %100, %104 : vector<16x128xf32>
    %106 = arith.truncf %105 : vector<16x128xf32> to vector<16x128xbf16>
    %c0_62 = arith.constant 0 : index
    %c0_63 = arith.constant 0 : index
    %c0_64 = arith.constant 0 : index
    %107 = vector.load %arg10[%c0_62, %c0_63, %c0_64] : memref<1x16x128xbf16, #tpu.memory_space<vmem>>, vector<1x16x128xbf16>
    %108 = vector.shape_cast %107 : vector<1x16x128xbf16> to vector<16x128xbf16>
    %109 = vector.shape_cast %106 : vector<16x128xbf16> to vector<1x16x128xbf16>
    tpu.vector_store %arg10[%c0_62, %c0_63, %c0_64], %109 {strides = array<i32>} : memref<1x16x128xbf16, #tpu.memory_space<vmem>>, vector<1x16x128xbf16>,
    return
  }
  func.func @transform_0(%arg0: i32, %arg1: i32) -> (i32, i32, i32, i32) {
    %c0_i32 = arith.constant 0 : i32
    %c0_i32_0 = arith.constant 0 : i32
    %c0_i32_1 = arith.constant 0 : i32
    return %arg0, %c0_i32, %arg1, %c0_i32_0 : i32, i32, i32, i32
  }
  func.func @transform_1(%arg0: i32, %arg1: i32) -> (i32, i32, i32, i32) {
    %c1_i32 = arith.constant 1 : i32
    %0 = arith.addi %arg1, %c1_i32 : i32
    %c1_i32_0 = arith.constant 1 : i32
    %1 = arith.muli %0, %c1_i32_0 : i32
    %c0_i32 = arith.constant 0 : i32
    %c0_i32_1 = arith.constant 0 : i32
    %c0_i32_2 = arith.constant 0 : i32
    return %arg0, %c0_i32, %1, %c0_i32_1 : i32, i32, i32, i32
  }
  func.func @transform_2(%arg0: i32, %arg1: i32) -> (i32, i32, i32) {
    %c0_i32 = arith.constant 0 : i32
    %c0_i32_0 = arith.constant 0 : i32
    %c0_i32_1 = arith.constant 0 : i32
    %c0_i32_2 = arith.constant 0 : i32
    return %c0_i32, %c0_i32_0, %c0_i32_1 : i32, i32, i32
  }
  func.func @transform_3(%arg0: i32, %arg1: i32) -> (i32, i32) {
    %c0_i32 = arith.constant 0 : i32
    %c0_i32_0 = arith.constant 0 : i32
    %c0_i32_1 = arith.constant 0 : i32
    return %c0_i32, %c0_i32_0 : i32, i32
  }
  func.func @transform_4(%arg0: i32, %arg1: i32) -> (i32, i32, i32) {
    %c0_i32 = arith.constant 0 : i32
    %c0_i32_0 = arith.constant 0 : i32
    %c0_i32_1 = arith.constant 0 : i32
    return %arg0, %c0_i32, %c0_i32_0 : i32, i32, i32
  }
  func.func @transform_5(%arg0: i32, %arg1: i32) -> (i32, i32, i32) {
    %c0_i32 = arith.constant 0 : i32
    %c0_i32_0 = arith.constant 0 : i32
    %c0_i32_1 = arith.constant 0 : i32
    return %arg0, %c0_i32, %c0_i32_0 : i32, i32, i32
  }
  func.func @transform_6(%arg0: i32, %arg1: i32) -> (i32, i32, i32) {
    %c0_i32 = arith.constant 0 : i32
    %c0_i32_0 = arith.constant 0 : i32
    return %arg0, %c0_i32, %arg1 : i32, i32, i32
  }
  func.func @transform_7(%arg0: i32, %arg1: i32) -> (i32, i32) {
    %c0_i32 = arith.constant 0 : i32
    %c0_i32_0 = arith.constant 0 : i32
    %c0_i32_1 = arith.constant 0 : i32
    return %c0_i32, %c0_i32_0 : i32, i32
  }
  func.func @transform_8(%arg0: i32, %arg1: i32) -> (i32, i32, i32) {
    %c0_i32 = arith.constant 0 : i32
    %c0_i32_0 = arith.constant 0 : i32
    return %arg0, %c0_i32, %arg1 : i32, i32, i32
  }
}

module attributes {stable_mosaic.version = 11 : i64} {
  func.func @kernel(%arg0: i32, %arg1: memref<1x16x256xbf16, #tpu.memory_space<vmem>>, %arg2: memref<4x16xf32, #tpu.memory_space<vmem>>, %arg3: memref<16x4xf32, #tpu.memory_space<vmem>>, %arg4: memref<16x1xf32, #tpu.memory_space<vmem>>, %arg5: memref<16x1xf32, #tpu.memory_space<vmem>>, %arg6: memref<48x16xbf16, #tpu.memory_space<vmem>>, %arg7: memref<48x1xf32, #tpu.memory_space<vmem>>, %arg8: memref<16x16xbf16, #tpu.memory_space<vmem>>, %arg9: memref<16x1xf32, #tpu.memory_space<vmem>>, %arg10: memref<1x16x256xf32, #tpu.memory_space<vmem>>) attributes {dimension_semantics = [#tpu.dimension_semantics<parallel>], iteration_bounds = array<i64: 2>, scalar_prefetch = 0 : i64, scratch_operands = 0 : i64, tpu.core_type = #tpu.core_type<tc>, window_params = [{transform_indices = @transform_0, window_bounds = array<i64: 1, 16, 256>}, {pipeline_mode = #tpu.pipeline_mode<synchronous>, transform_indices = @transform_1, window_bounds = array<i64: 4, 16>}, {pipeline_mode = #tpu.pipeline_mode<synchronous>, transform_indices = @transform_2, window_bounds = array<i64: 16, 4>}, {pipeline_mode = #tpu.pipeline_mode<synchronous>, transform_indices = @transform_3, window_bounds = array<i64: 16, 1>}, {pipeline_mode = #tpu.pipeline_mode<synchronous>, transform_indices = @transform_4, window_bounds = array<i64: 16, 1>}, {pipeline_mode = #tpu.pipeline_mode<synchronous>, transform_indices = @transform_5, window_bounds = array<i64: 48, 16>}, {pipeline_mode = #tpu.pipeline_mode<synchronous>, transform_indices = @transform_6, window_bounds = array<i64: 48, 1>}, {pipeline_mode = #tpu.pipeline_mode<synchronous>, transform_indices = @transform_7, window_bounds = array<i64: 16, 16>}, {pipeline_mode = #tpu.pipeline_mode<synchronous>, transform_indices = @transform_8, window_bounds = array<i64: 16, 1>}, {transform_indices = @transform_9, window_bounds = array<i64: 1, 16, 256>}]} {
    %c0 = arith.constant 0 : index
    %c0_0 = arith.constant 0 : index
    %c0_1 = arith.constant 0 : index
    %0 = vector.load %arg1[%c0, %c0_0, %c0_1] : memref<1x16x256xbf16, #tpu.memory_space<vmem>>, vector<1x16x256xbf16>
    %1 = vector.shape_cast %0 : vector<1x16x256xbf16> to vector<16x256xbf16>
    %2 = arith.extf %1 : vector<16x256xbf16> to vector<16x256xf32>
    %cst = arith.constant dense<0.000000e+00> : vector<16xf32>
    %3 = vector.multi_reduction <add>, %2, %cst [1] : vector<16x256xf32> to vector<16xf32>
    %4 = vector.shape_cast %3 : vector<16xf32> to vector<16x1xf32>
    %c0_2 = arith.constant 0 : index
    %c0_3 = arith.constant 0 : index
    %5 = vector.load %arg2[%c0_2, %c0_3] : memref<4x16xf32, #tpu.memory_space<vmem>>, vector<4x16xf32>
    %cst_4 = arith.constant dense<0.000000e+00> : vector<4x1xf32>
    %6 = tpu.matmul %5, %4, %cst_4 {dimension_numbers = #tpu.dot_dimension_numbers<[1], [0], [0], [1], [0, 0, 1, 1], [], []>} : vector<4x16xf32>, vector<16x1xf32>, vector<4x1xf32> -> vector<4x1xf32>
    %cst_5 = arith.constant 9.765625E-4 : f32
    %7 = vector.broadcast %cst_5 : f32 to vector<4x1xf32>
    %8 = arith.mulf %6, %7 : vector<4x1xf32>
    %c0_6 = arith.constant 0 : index
    %c0_7 = arith.constant 0 : index
    %9 = vector.load %arg3[%c0_6, %c0_7] : memref<16x4xf32, #tpu.memory_space<vmem>>, vector<16x4xf32>
    %cst_8 = arith.constant dense<0.000000e+00> : vector<16x1xf32>
    %10 = tpu.matmul %9, %8, %cst_8 {dimension_numbers = #tpu.dot_dimension_numbers<[1], [0], [0], [1], [0, 0, 1, 1], [], []>} : vector<16x4xf32>, vector<4x1xf32>, vector<16x1xf32> -> vector<16x1xf32>
    %11 = vector.broadcast %10 : vector<16x1xf32> to vector<16x256xf32>
    %12 = arith.subf %2, %11 : vector<16x256xf32>
    %13 = arith.mulf %12, %12 : vector<16x256xf32>
    %cst_9 = arith.constant dense<0.000000e+00> : vector<16xf32>
    %14 = vector.multi_reduction <add>, %13, %cst_9 [1] : vector<16x256xf32> to vector<16xf32>
    %15 = vector.shape_cast %14 : vector<16xf32> to vector<16x1xf32>
    %c0_10 = arith.constant 0 : index
    %c0_11 = arith.constant 0 : index
    %16 = vector.load %arg2[%c0_10, %c0_11] : memref<4x16xf32, #tpu.memory_space<vmem>>, vector<4x16xf32>
    %cst_12 = arith.constant dense<0.000000e+00> : vector<4x1xf32>
    %17 = tpu.matmul %16, %15, %cst_12 {dimension_numbers = #tpu.dot_dimension_numbers<[1], [0], [0], [1], [0, 0, 1, 1], [], []>} : vector<4x16xf32>, vector<16x1xf32>, vector<4x1xf32> -> vector<4x1xf32>
    %cst_13 = arith.constant 9.765625E-4 : f32
    %18 = vector.broadcast %cst_13 : f32 to vector<4x1xf32>
    %19 = arith.mulf %17, %18 : vector<4x1xf32>
    %c0_14 = arith.constant 0 : index
    %c0_15 = arith.constant 0 : index
    %20 = vector.load %arg3[%c0_14, %c0_15] : memref<16x4xf32, #tpu.memory_space<vmem>>, vector<16x4xf32>
    %cst_16 = arith.constant 9.99999974E-6 : f32
    %21 = vector.broadcast %cst_16 : f32 to vector<4x1xf32>
    %22 = arith.addf %19, %21 : vector<4x1xf32>
    %23 = math.rsqrt %22 : vector<4x1xf32>
    %cst_17 = arith.constant dense<0.000000e+00> : vector<16x1xf32>
    %24 = tpu.matmul %20, %23, %cst_17 {dimension_numbers = #tpu.dot_dimension_numbers<[1], [0], [0], [1], [0, 0, 1, 1], [], []>} : vector<16x4xf32>, vector<4x1xf32>, vector<16x1xf32> -> vector<16x1xf32>
    %c0_18 = arith.constant 0 : index
    %c0_19 = arith.constant 0 : index
    %25 = vector.load %arg4[%c0_18, %c0_19] : memref<16x1xf32, #tpu.memory_space<vmem>>, vector<16x1xf32>
    %26 = arith.mulf %24, %25 : vector<16x1xf32>
    %27 = vector.broadcast %26 : vector<16x1xf32> to vector<16x256xf32>
    %28 = arith.mulf %12, %27 : vector<16x256xf32>
    %c0_20 = arith.constant 0 : index
    %c0_21 = arith.constant 0 : index
    %29 = vector.load %arg5[%c0_20, %c0_21] : memref<16x1xf32, #tpu.memory_space<vmem>>, vector<16x1xf32>
    %30 = vector.broadcast %29 : vector<16x1xf32> to vector<16x256xf32>
    %31 = arith.addf %28, %30 : vector<16x256xf32>
    %c0_22 = arith.constant 0 : index
    %c0_23 = arith.constant 0 : index
    %32 = vector.load %arg6[%c0_22, %c0_23] : memref<48x16xbf16, #tpu.memory_space<vmem>>, vector<48x16xbf16>
    %33 = arith.truncf %31 : vector<16x256xf32> to vector<16x256xbf16>
    %cst_24 = arith.constant dense<0.000000e+00> : vector<48x256xf32>
    %34 = tpu.matmul %32, %33, %cst_24 {dimension_numbers = #tpu.dot_dimension_numbers<[1], [0], [0], [1], [0, 0, 1, 1], [], []>} : vector<48x16xbf16>, vector<16x256xbf16>, vector<48x256xf32> -> vector<48x256xf32>
    %c0_25 = arith.constant 0 : index
    %c0_26 = arith.constant 0 : index
    %35 = vector.load %arg7[%c0_25, %c0_26] : memref<48x1xf32, #tpu.memory_space<vmem>>, vector<48x1xf32>
    %36 = vector.broadcast %35 : vector<48x1xf32> to vector<48x256xf32>
    %37 = arith.addf %34, %36 : vector<48x256xf32>
    %38 = vector.extract_strided_slice %37 {offsets = [0, 0], sizes = [16, 256], strides = [1, 1]} : vector<48x256xf32> to vector<16x256xf32>
    %39 = vector.extract_strided_slice %37 {offsets = [16, 0], sizes = [16, 256], strides = [1, 1]} : vector<48x256xf32> to vector<16x256xf32>
    %40 = vector.extract_strided_slice %37 {offsets = [32, 0], sizes = [16, 256], strides = [1, 1]} : vector<48x256xf32> to vector<16x256xf32>
    %41 = arith.truncf %38 : vector<16x256xf32> to vector<16x256xbf16>
    %42 = arith.truncf %39 : vector<16x256xf32> to vector<16x256xbf16>
    %cst_27 = arith.constant dense<0.000000e+00> : vector<256x256xf32>
    %43 = tpu.matmul %41, %42, %cst_27 {dimension_numbers = #tpu.dot_dimension_numbers<[0], [0], [1], [1], [0, 1, 1, 1], [], []>} : vector<16x256xbf16>, vector<16x256xbf16>, vector<256x256xf32> -> vector<256x256xf32>
    %cst_28 = arith.constant 2.500000e-01 : f32
    %44 = vector.broadcast %cst_28 : f32 to vector<256x256xf32>
    %45 = arith.mulf %43, %44 : vector<256x256xf32>
    %cst_29 = arith.constant dense<0xFF800000> : vector<256xf32>
    %46 = vector.multi_reduction <maximumf>, %45, %cst_29 [1] : vector<256x256xf32> to vector<256xf32>
    %47 = vector.shape_cast %46 : vector<256xf32> to vector<256x1xf32>
    %48 = vector.broadcast %47 : vector<256x1xf32> to vector<256x256xf32>
    %49 = arith.subf %45, %48 : vector<256x256xf32>
    %50 = math.exp %49 : vector<256x256xf32>
    %cst_30 = arith.constant dense<0.000000e+00> : vector<256xf32>
    %51 = vector.multi_reduction <add>, %50, %cst_30 [1] : vector<256x256xf32> to vector<256xf32>
    %52 = vector.shape_cast %51 : vector<256xf32> to vector<256x1xf32>
    %53 = tpu.reciprocal %52 {approx = true} : vector<256x1xf32> -> vector<256x1xf32>
    %54 = vector.broadcast %53 : vector<256x1xf32> to vector<256x256xf32>
    %55 = arith.mulf %50, %54 : vector<256x256xf32>
    %56 = arith.truncf %55 : vector<256x256xf32> to vector<256x256xbf16>
    %57 = arith.truncf %40 : vector<16x256xf32> to vector<16x256xbf16>
    %cst_31 = arith.constant dense<0.000000e+00> : vector<256x16xf32>
    %58 = tpu.matmul %56, %57, %cst_31 {dimension_numbers = #tpu.dot_dimension_numbers<[1], [1], [0], [0], [0, 0, 1, 0], [], []>} : vector<256x256xbf16>, vector<16x256xbf16>, vector<256x16xf32> -> vector<256x16xf32>
    %c0_32 = arith.constant 0 : index
    %c0_33 = arith.constant 0 : index
    %59 = vector.load %arg8[%c0_32, %c0_33] : memref<16x16xbf16, #tpu.memory_space<vmem>>, vector<16x16xbf16>
    %60 = arith.truncf %58 : vector<256x16xf32> to vector<256x16xbf16>
    %cst_34 = arith.constant dense<0.000000e+00> : vector<16x256xf32>
    %61 = tpu.matmul %59, %60, %cst_34 {dimension_numbers = #tpu.dot_dimension_numbers<[1], [1], [0], [0], [0, 0, 1, 0], [], []>} : vector<16x16xbf16>, vector<256x16xbf16>, vector<16x256xf32> -> vector<16x256xf32>
    %c0_35 = arith.constant 0 : index
    %c0_36 = arith.constant 0 : index
    %62 = vector.load %arg9[%c0_35, %c0_36] : memref<16x1xf32, #tpu.memory_space<vmem>>, vector<16x1xf32>
    %63 = vector.broadcast %62 : vector<16x1xf32> to vector<16x256xf32>
    %64 = arith.addf %61, %63 : vector<16x256xf32>
    %65 = arith.addf %64, %2 : vector<16x256xf32>
    %c0_37 = arith.constant 0 : index
    %c0_38 = arith.constant 0 : index
    %c0_39 = arith.constant 0 : index
    %66 = vector.load %arg10[%c0_37, %c0_38, %c0_39] : memref<1x16x256xf32, #tpu.memory_space<vmem>>, vector<1x16x256xf32>
    %67 = vector.shape_cast %66 : vector<1x16x256xf32> to vector<16x256xf32>
    %68 = vector.shape_cast %65 : vector<16x256xf32> to vector<1x16x256xf32>
    tpu.vector_store %arg10[%c0_37, %c0_38, %c0_39], %68 {strides = array<i32>} : memref<1x16x256xf32, #tpu.memory_space<vmem>>, vector<1x16x256xf32>,
    return
  }
  func.func @transform_0(%arg0: i32) -> (i32, i32, i32) {
    %c0_i32 = arith.constant 0 : i32
    %c0_i32_0 = arith.constant 0 : i32
    %c0_i32_1 = arith.constant 0 : i32
    return %arg0, %c0_i32, %c0_i32_0 : i32, i32, i32
  }
  func.func @transform_1(%arg0: i32) -> (i32, i32) {
    %c0_i32 = arith.constant 0 : i32
    %c0_i32_0 = arith.constant 0 : i32
    %c0_i32_1 = arith.constant 0 : i32
    return %c0_i32, %c0_i32_0 : i32, i32
  }
  func.func @transform_2(%arg0: i32) -> (i32, i32) {
    %c0_i32 = arith.constant 0 : i32
    %c0_i32_0 = arith.constant 0 : i32
    %c0_i32_1 = arith.constant 0 : i32
    return %c0_i32, %c0_i32_0 : i32, i32
  }
  func.func @transform_3(%arg0: i32) -> (i32, i32) {
    %c0_i32 = arith.constant 0 : i32
    %c0_i32_0 = arith.constant 0 : i32
    %c0_i32_1 = arith.constant 0 : i32
    return %c0_i32, %c0_i32_0 : i32, i32
  }
  func.func @transform_4(%arg0: i32) -> (i32, i32) {
    %c0_i32 = arith.constant 0 : i32
    %c0_i32_0 = arith.constant 0 : i32
    %c0_i32_1 = arith.constant 0 : i32
    return %c0_i32, %c0_i32_0 : i32, i32
  }
  func.func @transform_5(%arg0: i32) -> (i32, i32) {
    %c0_i32 = arith.constant 0 : i32
    %c0_i32_0 = arith.constant 0 : i32
    %c0_i32_1 = arith.constant 0 : i32
    return %c0_i32, %c0_i32_0 : i32, i32
  }
  func.func @transform_6(%arg0: i32) -> (i32, i32) {
    %c0_i32 = arith.constant 0 : i32
    %c0_i32_0 = arith.constant 0 : i32
    %c0_i32_1 = arith.constant 0 : i32
    return %c0_i32, %c0_i32_0 : i32, i32
  }
  func.func @transform_7(%arg0: i32) -> (i32, i32) {
    %c0_i32 = arith.constant 0 : i32
    %c0_i32_0 = arith.constant 0 : i32
    %c0_i32_1 = arith.constant 0 : i32
    return %c0_i32, %c0_i32_0 : i32, i32
  }
  func.func @transform_8(%arg0: i32) -> (i32, i32) {
    %c0_i32 = arith.constant 0 : i32
    %c0_i32_0 = arith.constant 0 : i32
    %c0_i32_1 = arith.constant 0 : i32
    return %c0_i32, %c0_i32_0 : i32, i32
  }
  func.func @transform_9(%arg0: i32) -> (i32, i32, i32) {
    %c0_i32 = arith.constant 0 : i32
    %c0_i32_0 = arith.constant 0 : i32
    %c0_i32_1 = arith.constant 0 : i32
    return %arg0, %c0_i32, %c0_i32_0 : i32, i32, i32
  }
}

</mosaic_0001>

<bundles_post_ra>
// kernel: _lambda_.5
= control target key start
LH: loop header
LB: loop body
LE: loop exit
PB: predicated region body
PF: predicated region fallthrough
CT: control target
= control target key end

     0   :  { %s778_s21 = smov 0   ;;  %s825_s0 = inlined_call_operand.vmem [shape: bf16[2,8,256], index: 0, kind: input, shape index: {}]   ;;  %s826_s1 = inlined_call_operand.vmem [shape: f32[4,8], index: 1, kind: input, shape index: {}]   ;;  %s827_s2 = inlined_call_operand.vmem [shape: f32[8,4], index: 2, kind: input, shape index: {}]   ;;  %s828_s3 = inlined_call_operand.vmem [shape: f32[8,1], index: 3, kind: input, shape index: {}]   ;;  %s829_s4 = inlined_call_operand.vmem [shape: f32[8,1], index: 4, kind: input, shape index: {}]   ;;  %s830_s5 = inlined_call_operand.vmem [shape: f32[2,8,1], index: 5, kind: output, shape index: {0}]   ;;  %s831_s6 = inlined_call_operand.vmem [shape: f32[2,8,1], index: 6, kind: output, shape index: {1}]  }
   0x1 LB: > { %s672_s22 = sadd.s32 4294967295, %s738_s21   ;;  %p676_p0 = scmp.ge.s32.totalorder %s738_s21, 1  ;;  %s738_s21 = sphi %s778_s21, %s17_s21  }
   0x2   : > { %p215_p1 = scmp.lt.s32.totalorder %s738_s21, 3 }
   0x4   : > { %p216_p2 = pnand %p676_p0, %p215_p1 }
   0x5   : > { %p248_p3 = scmp.lt.s32.totalorder (!%p216_p2), %s672_s22, 1  ;;  %v740_v0 = vmov (!%p216_p2), 0.0   ;;  %vm741_vm0 = vmmov (!%p216_p2), 0   ;;  %v267_v5 = vld [vmem:[%s826_s1] sm:$0xf] (!%p216_p2)  ;;  %vm268_vm1 = vcmask (!%p216_p2), 64512  }
   0x6   : > { %219 = sbr.rel (%p216_p2) target bundleno = 1315 (0x523), region = 40  ;;  %698 = vmatprep.subr.mxu0 (!%p216_p2), %v740_v0  ;;  %703 = vmatprep.subr.mxu1 (!%p216_p2), %v740_v0  ;;  %v742_v7 = vmov (!%p216_p2), 0   ;;  %vm348_vm2 = vcmask (!%p216_p2), 1043456   ;;  %v343_v11 = vld [vmem:[%s827_s2] sm:$0xff] (!%p216_p2)  ;;  %vm344_vm3 = vcmask (!%p216_p2), 31744   ;;  %vm582_vm4 = vcmask (!%p216_p2), 7168  }
   0x7   : > { %700 = vmatprep.mubr.msk.f32.mxu0 (!%p216_p2), %vm741_vm0, %v740_v0  ;;  %705 = vmatprep.mubr.msk.f32.mxu1 (!%p216_p2), %vm741_vm0, %v740_v0  ;;  %v580_v26 = vld [vmem:[%s828_s3] sm:$0xff] (!%p216_p2) }
   0x8   : > { %729 = vset.pattern.permute.xlu0 (!%p216_p2), %v742_v7  ;;  %v584_v30 = vld [vmem:[%s829_s4] sm:$0xff] (!%p216_p2) }
   0xd   : > { %s833_s22 = smov (!%p248_p3, %s672_s22), 1 }
   0xe   : > { %s786_s23 = sshll.u32 %s833_s22, 3 }
   0xf   : > { %s252_s26 = scalar_lea.vmem %s825_s0, %s786_s23  ;;  %s256_s11 = scalar_lea.vmem %s830_s5, %s786_s23 }
  0x10   : > { %v261_v1 = vld [vmem:[%s252_s26] sm:$0xff]  ;;  %s260_s16 = scalar_lea.vmem %s831_s6, %s786_s23 }
  0x11   : > { %v262_v2 = vunpack.c.l.bf16 %v261_v1  ;;  %v263_v3 = vunpack.c.h.bf16 %v261_v1 }
  0x13   : > { %v264_v4 = vadd.f32 %v263_v3, %v262_v2 }
  0x15   : > { %265 = vadd.xlane.f32.xlu0 %v264_v4 }
  0xa2   : > { %v266_v6 = vpop.xlane.xlu0 %265 }
  0xa3   : > { %699 = vmatpush3.msra.mxu0 %v266_v6 }
  0xa4   : > { %701 = vmatmul.mubr.msk.f32.vlgmr.msra.gmra.mrb[0].mxu0 %vm268_vm1, %v267_v5  ;;  %708 = vmatprep.subr.mxu0 %v740_v0 }
  0xa5   : > { %710 = vmatprep.mubr.msk.f32.mxu0 %vm741_vm0, %v740_v0 }
 0x177   : > { %v338_v8 = vpop.f32.mrb[0].mxu0 }
 0x178   : > { %v342_v9 = vmul.f32 0.001953125, %v338_v8  ;;  %v702_v10 = vpop.f32.mrb[1].mxu0 }
 0x17a   : > { %704 = vmatpush3.msk.msra.mxu1 %vm348_vm2, %v342_v9 }
 0x17b   : > { %706 = vmatmul.mubr.msk.f32.vlgmr.msra.gmra.mrb[0].mxu1 %vm344_vm3, %v343_v11  ;;  %713 = vmatprep.subr.mxu1 %v740_v0 }
 0x17c   : > { %715 = vmatprep.mubr.msk.f32.mxu1 %vm741_vm0, %v740_v0 }
 0x24e   : > { %v418_v12 = vpop.f32.mrb[0].mxu1 }
 0x24f   : > { %424 = vperm.xlu0 %729, %v418_v12   ;;  %v707_v13 = vpop.f32.mrb[1].mxu1 }
 0x2ce   : > { %v425_v14 = vpop.permute.xlu0 %424 }
 0x2cf   : > { %v427_v15 = vsub.f32 %v262_v2, %v425_v14  ;;  %v428_v16 = vsub.f32 %v263_v3, %v425_v14 }
 0x2d1   : > { %v429_v17 = vmul.f32 %v427_v15, %v427_v15  ;;  %v430_v18 = vmul.f32 %v428_v16, %v428_v16 }
 0x2d3   : > { %v431_v19 = vadd.f32 %v430_v18, %v429_v17 }
 0x2d5   : > { %432 = vadd.xlane.f32.xlu1 %v431_v19 }
 0x362   : > { %v433_v20 = vpop.xlane.xlu1 %432 }
 0x363   : > { %709 = vmatpush3.msra.mxu0 %v433_v20 }
 0x364   : > { %711 = vmatmul.mubr.msk.f32.vlgmr.msra.gmra.mrb[2].mxu0 %vm268_vm1, %v267_v5 }
 0x437   : > { %v500_v21 = vpop.f32.mrb[2].mxu0 }
 0x438   : > { %v504_v22 = vmul.f32 0.001953125, %v500_v21  ;;  %v712_v23 = vpop.f32.mrb[3].mxu0 }
 0x43a   : > { %v505_v24 = vadd.f32 1e-05, %v504_v22 }
 0x43c   : > { %730 = vrsqrt.f32 %v505_v24 }
 0x446   : > { %v731_v25 = vpop.eup %730 }
 0x447   : > { %714 = vmatpush3.msk.msra.mxu1 %vm348_vm2, %v731_v25 }
 0x448   : > { %716 = vmatmul.mubr.msk.f32.vlgmr.msra.gmra.mrb[2].mxu1 %vm344_vm3, %v343_v11 }
 0x51b   : > { %v576_v27 = vpop.f32.mrb[2].mxu1 }
 0x51c   : > { %v581_v28 = vmul.f32 %v580_v26, %v576_v27  ;;  %v717_v29 = vpop.f32.mrb[3].mxu1 }
 0x51e   : > { %583 = vst.msk [vmem:[%s256_s11] sm:$0xff] %vm582_vm4, %v581_v28  ;;  %v585_v31 = vmul.f32 %v581_v28, %v418_v12 }
 0x520   : > { %v586_v32 = vsub.f32 %v584_v30, %v585_v31 }
 0x522   : > { %587 = vst.msk [vmem:[%s260_s16] sm:$0xff] %vm582_vm4, %v586_v32 }
 0x523 PF: > { %s17_s21 = sadd.s32 1, %s738_s21  }
 0x524   : > { %p14_p4 = scmp.ge.s32.totalorder %s17_s21, 4  }
 0x526   :  { %16 = sbr.rel (!%p14_p4) target bundleno = 1 (0x1), region = 82 }

// kernel: _lambda_.7
= control target key start
LH: loop header
LB: loop body
LE: loop exit
PB: predicated region body
PF: predicated region fallthrough
CT: control target
= control target key end

     0   :  { %s848_s21 = smov 0   ;;  %s906_s0 = inlined_call_operand.vmem [shape: bf16[2,16,256], index: 0, kind: input, shape index: {}]   ;;  %s907_s1 = inlined_call_operand.vmem [shape: f32[4,16], index: 1, kind: input, shape index: {}]   ;;  %s908_s2 = inlined_call_operand.vmem [shape: f32[16,4], index: 2, kind: input, shape index: {}]   ;;  %s909_s3 = inlined_call_operand.vmem [shape: f32[16,1], index: 3, kind: input, shape index: {}]   ;;  %s910_s4 = inlined_call_operand.vmem [shape: f32[16,1], index: 4, kind: input, shape index: {}]   ;;  %s911_s5 = inlined_call_operand.vmem [shape: f32[2,16,1], index: 5, kind: output, shape index: {0}]   ;;  %s912_s6 = inlined_call_operand.vmem [shape: f32[2,16,1], index: 6, kind: output, shape index: {1}]  }
   0x1 LB: > { %s719_s22 = sadd.s32 4294967295, %s807_s21   ;;  %p723_p0 = scmp.ge.s32.totalorder %s807_s21, 1  ;;  %s807_s21 = sphi %s848_s21, %s17_s21  }
   0x2   : > { %p215_p1 = scmp.lt.s32.totalorder %s807_s21, 3 }
   0x4   : > { %p216_p2 = pnand %p723_p0, %p215_p1 }
   0x5   : > { %p250_p3 = scmp.lt.s32.totalorder (!%p216_p2), %s719_s22, 1  ;;  %v809_v8 = vmov (!%p216_p2), 0.0|0.0   ;;  %vm810_vm0 = vmmov (!%p216_p2), 0   ;;  %v811_v9 = vmov (!%p216_p2), 0.0   ;;  %v277_v13 = vld [vmem:[%s907_s1] sm:$0xf] (!%p216_p2) }
   0x6   : > { %219 = sbr.rel (%p216_p2) target bundleno = 1335 (0x537), region = 40  ;;  %779 = vmatprep.subr.bf16.mxu0 (!%p216_p2), %v809_v8  ;;  %759 = vmatprep.mubr.msk.f32.mxu0 (!%p216_p2), %vm810_vm0, %v811_v9  ;;  %vm278_vm1 = vcmask (!%p216_p2), 130048   ;;  %v353_v14 = vld [vmem:[%s908_s2] sm:$0xff] (!%p216_p2)  ;;  %vm355_vm2 = vcmask (!%p216_p2), 31744   ;;  %vm362_vm3 = vcmask (!%p216_p2), 1043456   ;;  %v354_v18 = vld [vmem:[%s908_s2 + $0x8] sm:$0xff] (!%p216_p2) }
   0x7   : > { %764 = vmatprep.mubr.msk.f32.mxu1 (!%p216_p2), %vm355_vm2, %v353_v14  ;;  %v812_v19 = vmov (!%p216_p2), 0   ;;  %v617_v42 = vld [vmem:[%s909_s3 + $0x8] sm:$0xff] (!%p216_p2)  ;;  %v616_v43 = vld [vmem:[%s909_s3] sm:$0xff] (!%p216_p2)  ;;  %vm620_vm4 = vcmask (!%p216_p2), 7168  }
   0x8   : > { %797 = vset.pattern.permute.xlu1 (!%p216_p2), %v812_v19  ;;  %798 = vset.pattern.permute.xlu0 (!%p216_p2), %v812_v19  ;;  %v624_v47 = vld [vmem:[%s910_s4 + $0x8] sm:$0xff] (!%p216_p2)  ;;  %v623_v50 = vld [vmem:[%s910_s4] sm:$0xff] (!%p216_p2) }
   0xd   : > { %s914_s22 = smov (!%p250_p3, %s719_s22), 1 }
   0xe   : > { %s856_s23 = sshll.u32 %s914_s22, 4 }
   0xf   : > { %s254_s26 = scalar_lea.vmem %s906_s0, %s856_s23  ;;  %s259_s15 = scalar_lea.vmem %s911_s5, %s856_s23 }
  0x10   : > { %v265_v0 = vld [vmem:[%s254_s26] sm:$0xff]  ;;  %v266_v1 = vld [vmem:[%s254_s26 + $0x8] sm:$0xff]  ;;  %s264_s24 = scalar_lea.vmem %s912_s6, %s856_s23 }
  0x11   : > { %v267_v2 = vunpack.c.l.bf16 %v265_v0  ;;  %v268_v3 = vunpack.c.h.bf16 %v265_v0  ;;  %v269_v4 = vunpack.c.l.bf16 %v266_v1  ;;  %v270_v5 = vunpack.c.h.bf16 %v266_v1 }
  0x13   : > { %v271_v6 = vadd.f32 %v268_v3, %v267_v2  ;;  %v274_v7 = vadd.f32 %v270_v5, %v269_v4 }
  0x15   : > { %272 = vadd.xlane.f32.xlu0 %v271_v6 }
  0x19   : > { %275 = vadd.xlane.f32.xlu0 %v274_v7 }
  0xa2   : > { %v273_v10 = vpop.xlane.xlu0 %272 }
  0xa6   : > { %v276_v11 = vpop.xlane.xlu0 %275 }
  0xa7   : > { %v780_v12 = vpack.c.bf16 %v276_v11, %v273_v10 }
  0xa9   : > { %781 = vmatpush3.bf16.msra.mxu0 %v780_v12 }
  0xac   : > { %760 = vmatmul.mubr.msk.f32.vlgmr.msra.gmra.mrb[0].mxu0 %vm278_vm1, %v277_v13 }
  0xad   : > { %776 = vmatprep.mubr.msk.f32.mxu0 %vm355_vm2, %v353_v14 }
 0x17f   : > { %v348_v15 = vpop.f32.mrb[0].mxu0 }
 0x180   : > { %v352_v16 = vmul.f32 0.0009765625, %v348_v15  ;;  %v761_v17 = vpop.f32.mrb[1].mxu0 }
 0x182   : > { %762 = vmatprep.subr.msk.mxu1 %vm362_vm3, %v352_v16 }
 0x183   : > { %763 = vmatpush3.msk.msra.mxu1 %vm362_vm3, %v352_v16 }
 0x184   : > { %765 = vmatmul.mubr.msk.f32.vlgmr.msra.gmra.mrb[0].mxu1 %vm355_vm2, %v354_v18  ;;  %782 = vmatprep.subr.bf16.mxu1 %v809_v8 }
 0x185   : > { %771 = vmatprep.mubr.msk.f32.mxu1 %vm810_vm0, %v811_v9 }
 0x257   : > { %v766_v20 = vpop.f32.mrb[0].mxu1 }
 0x258   : > { %v432_v21 = vpop.f32.mrb[1].mxu1 }
 0x259   : > { %443 = vperm.xlu1 %797, %v432_v21  }
 0x25d   : > { %448 = vperm.xlu1 %797, %v766_v20  }
 0x2d8   : > { %v444_v22 = vpop.permute.xlu1 %443 }
 0x2d9   : > { %v451_v23 = vsub.f32 %v267_v2, %v444_v22  ;;  %v452_v24 = vsub.f32 %v268_v3, %v444_v22 }
 0x2db   : > { %v455_v25 = vmul.f32 %v451_v23, %v451_v23  ;;  %v456_v26 = vmul.f32 %v452_v24, %v452_v24 }
 0x2dc   : > { %v449_v27 = vpop.permute.xlu1 %448 }
 0x2dd   : > { %v453_v28 = vsub.f32 %v269_v4, %v449_v27  ;;  %v454_v29 = vsub.f32 %v270_v5, %v449_v27  ;;  %v459_v30 = vadd.f32 %v456_v26, %v455_v25 }
 0x2df   : > { %v457_v31 = vmul.f32 %v453_v28, %v453_v28  ;;  %v458_v32 = vmul.f32 %v454_v29, %v454_v29  ;;  %460 = vadd.xlane.f32.xlu0 %v459_v30 }
 0x2e1   : > { %v462_v33 = vadd.f32 %v458_v32, %v457_v31 }
 0x2e3   : > { %463 = vadd.xlane.f32.xlu1 %v462_v33 }
 0x36c   : > { %v461_v34 = vpop.xlane.xlu0 %460 }
 0x370   : > { %v464_v35 = vpop.xlane.xlu1 %463 }
 0x371   : > { %v783_v36 = vpack.c.bf16 %v464_v35, %v461_v34 }
 0x373   : > { %784 = vmatpush3.bf16.msra.mxu1 %v783_v36 }
 0x376   : > { %772 = vmatmul.mubr.msk.f32.vlgmr.msra.gmra.mrb[2].mxu1 %vm278_vm1, %v277_v13 }
 0x449   : > { %v531_v37 = vpop.f32.mrb[2].mxu1 }
 0x44a   : > { %v535_v38 = vmul.f32 0.0009765625, %v531_v37  ;;  %v773_v39 = vpop.f32.mrb[3].mxu1 }
 0x44c   : > { %v536_v40 = vadd.f32 1e-05, %v535_v38 }
 0x44e   : > { %799 = vrsqrt.f32 %v536_v40 }
 0x458   : > { %v800_v41 = vpop.eup %799 }
 0x459   : > { %774 = vmatprep.subr.msk.mxu0 %vm362_vm3, %v800_v41 }
 0x45a   : > { %775 = vmatpush3.msk.msra.mxu0 %vm362_vm3, %v800_v41 }
 0x45b   : > { %777 = vmatmul.mubr.msk.f32.vlgmr.msra.gmra.mrb[2].mxu0 %vm355_vm2, %v354_v18 }
 0x52e   : > { %v778_v44 = vpop.f32.mrb[2].mxu0 }
 0x52f   : > { %v619_v45 = vmul.f32 %v778_v44, %v617_v42  ;;  %v607_v46 = vpop.f32.mrb[3].mxu0 }
 0x530   : > { %v618_v48 = vmul.f32 %v616_v43, %v607_v46 }
 0x531   : > { %622 = vst.msk [vmem:[%s259_s15 + $0x8] sm:$0xff] %vm620_vm4, %v619_v45  ;;  %v626_v49 = vmul.f32 %v766_v20, %v619_v45 }
 0x532   : > { %621 = vst.msk [vmem:[%s259_s15] sm:$0xff] %vm620_vm4, %v618_v48  ;;  %v625_v51 = vmul.f32 %v618_v48, %v432_v21 }
 0x533   : > { %v628_v52 = vsub.f32 %v624_v47, %v626_v49 }
 0x534   : > { %v627_v53 = vsub.f32 %v623_v50, %v625_v51 }
 0x535   : > { %630 = vst.msk [vmem:[%s264_s24 + $0x8] sm:$0xff] %vm620_vm4, %v628_v52 }
 0x536   : > { %629 = vst.msk [vmem:[%s264_s24] sm:$0xff] %vm620_vm4, %v627_v53 }
 0x537 PF: > { %s17_s21 = sadd.s32 1, %s807_s21  }
 0x538   : > { %p14_p4 = scmp.ge.s32.totalorder %s17_s21, 4  }
 0x53a   :  { %16 = sbr.rel (!%p14_p4) target bundleno = 1 (0x1), region = 82 }

// kernel: _lambda_.6
= control target key start
LH: loop header
LB: loop body
LE: loop exit
PB: predicated region body
PF: predicated region fallthrough
CT: control target
= control target key end

     0   :  { %s4496_s0 = inlined_call_operand.vmem [shape: bf16[2,8,24,18], index: 0, kind: input, shape index: {}, may-alias: {0,1}]   ;;  %s4497_s1 = inlined_call_operand.vmem [shape: bf16[2,8,24,18], index: 1, kind: input, shape index: {}, may-alias: {0,1}]   ;;  %s4498_s2 = inlined_call_operand.vmem [shape: bf16[9,16,8], index: 2, kind: input, shape index: {}]   ;;  %s4499_s3 = inlined_call_operand.vmem [shape: f32[16,1], index: 3, kind: input, shape index: {}]   ;;  %s4500_s4 = inlined_call_operand.vmem [shape: f32[2,8,1], index: 4, kind: input, shape index: {}]   ;;  %s4501_s5 = inlined_call_operand.vmem [shape: f32[2,8,1], index: 5, kind: input, shape index: {}]   ;;  %s4502_s6 = inlined_call_operand.vmem [shape: bf16[2,16,256], index: 6, kind: output, shape index: {}]  }
   0x1   :  { %4506 = sst [smem:[#allocation7_spill]] %s4496_s0 }
   0x2   :  { %s3271_s21 = smov 0   ;;  %s3273_s22 = smov 0  }
   0x3   :  { %s3275_s23 = smov 0   ;;  %s3277_s24 = smov 0  }
   0x4   :  { %s3279_s25 = smov 0   ;;  %s3281_s26 = smov 0  }
   0x5   :  { %s3283_s27 = smov 0   ;;  %s3285_s28 = smov 0  }
   0x6   :  { %s3287_s29 = smov 0  }
   0x7 LB: > { %s2882_s30 = sadd.s32 4294967295, %s3219_s29   ;;  %s25_s7 = sadd.s32 1, %s3211_s27  ;;  %s3219_s29 = sphi %s3287_s29, %s16_s29   ;;  %s3215_s28 = sphi %s3285_s28, %s4534_s28   ;;  %s3211_s27 = sphi %s3283_s27, %s4533_s27   ;;  %s3207_s26 = sphi %s3281_s26, %s4532_s26   ;;  %s3203_s25 = sphi %s3279_s25, %s4531_s25   ;;  %s3199_s24 = sphi %s3277_s24, %s4530_s24   ;;  %s3195_s23 = sphi %s3275_s23, %s4529_s23   ;;  %s3191_s22 = sphi %s3273_s22, %s4528_s22   ;;  %s3187_s21 = sphi %s3271_s21, %s4527_s21  }
   0x8   : > { %p26_p0 = scmp.ge.s32.totalorder %s25_s7, 2  ;;  %s28_s8 = sadd.s32 1, %s3215_s28 }
   0x9   : > { %s37_s9 = sadd.s32 1, %s3199_s24  ;;  %p44_p1 = scmp.ne.s32.totalorder %s3199_s24, %s3195_s23 }
   0xa   : > { %s3322_s10 = scalar_select %p26_p0, 0, %s25_s7  }
   0xb   : > { %s4536_s8 = smov (!%p26_p0, %s28_s8), %s3215_s28  ;;  %p45_p2 = scmp.eq.s32.totalorder %s3219_s29, 0 }
   0xc   : > { %s33_s11 = ssub.s32 %s3211_s27, %s3322_s10  ;;  %p30_p3 = scmp.ge.s32.totalorder %s4536_s8, 2 }
   0xd   : > { %s61_s12 = sadd.s32 1, %s3322_s10  ;;  %p3334_p4 = por %p45_p2, %p44_p1 }
   0xe   : > { %s63_s14 = ssub.s32 %s25_s7, %s61_s12  ;;  %s4538_s8 = smov (%p30_p3, %s4536_s8), 0 }
   0xf   : > { %4508 = sst [smem:[#allocation6_spill]] %s4538_s8  ;;  %s67_s15 = sadd.s32 1, %s3191_s22 }
  0x10   : > { %p74_p5 = scmp.ne.s32.totalorder %s3191_s22, %s3187_s21  ;;  %s32_s16 = ssub.s32 %s3215_s28, %s4538_s8 }
  0x11   : > { %p200_p6 = scmp.eq.s32.totalorder %s2882_s30, 3  ;;  %s34_s17 = sor.u32 %s33_s11, %s32_s16 }
  0x12   : > { %s64_s18 = sor.u32 %s63_s14, %s32_s16  ;;  %p35_p7 = scmp.eq.s32.totalorder %s34_s17, 0 }
  0x13   : > { %p65_p8 = scmp.eq.s32.totalorder %s64_s18, 0  ;;  %p3347_p9 = por %p74_p5, %p45_p2 }
  0x14   : > { %p3354_p10 = por %p200_p6, %p44_p1  ;;  %p2885_p11 = scmp.ge.s32.totalorder %s3219_s29, 4 }
  0x15   : > { %s3359_s7 = scalar_select %p35_p7, %s3199_s24, %s37_s9  }
  0x16   : > { %s3362_s12 = scalar_select %p65_p8, %s3191_s22, %s67_s15  }
  0x17   : > { %228 = sbr.rel (%p2885_p11) target bundleno = 57 (0x39), region = 24 }
  0x1e   : > { %231 = sbr.rel (!%p3334_p4) target bundleno = 45 (0x2d), region = 28  ;;  %s233_s30 = sand.u32 (%p3334_p4), 1, %s3199_s24  }
  0x1f   : > { %s3048_s11 = smul.u32 (%p3334_p4), 24, %s3215_s28  ;;  %s2886_s14 = sshll.u32 (%p3334_p4), %s233_s30, 5 }
  0x20   : > { %s4511_s0 = sld [smem:[#allocation7_spill]] (%p3334_p4)  ;;  %s235_s15 = scalar_lea.vmem (%p3334_p4), [#allocation3], %s2886_s14 }
  0x21   : > { %s237_s16 = sadd.s32 (%p3334_p4), %s3211_s27, %s3048_s11 }
  0x22   : > { %s2887_s17 = sshll.u32 (%p3334_p4), %s237_s16, 2 }
  0x26   : > { %s239_s9 = scalar_lea.vmem %s4511_s0, %s2887_s17 }
  0x27   : > { %v255_v0 = vld [vmem:[%s239_s9] sm:$0xf]  ;;  %v257_v1 = vld [vmem:[%s239_s9 + $0xc] sm:$0xf]  ;;  %v259_v2 = vld [vmem:[%s239_s9 + $0x18] sm:$0xf] }
  0x28   : > { %256 = vst [vmem:[%s235_s15] sm:$0xf] %v255_v0  ;;  %258 = vst [vmem:[%s235_s15 + $0x4] sm:$0xf] %v257_v1  ;;  %v261_v3 = vld [vmem:[%s239_s9 + $0x24] sm:$0xf] }
  0x29   : > { %260 = vst [vmem:[%s235_s15 + $0x8] sm:$0xf] %v259_v2  ;;  %v263_v4 = vld [vmem:[%s239_s9 + $0x30] sm:$0xf]  ;;  %v265_v5 = vld [vmem:[%s239_s9 + $0x3c] sm:$0xf] }
  0x2a   : > { %262 = vst [vmem:[%s235_s15 + $0xc] sm:$0xf] %v261_v3  ;;  %264 = vst [vmem:[%s235_s15 + $0x10] sm:$0xf] %v263_v4  ;;  %v267_v6 = vld [vmem:[%s239_s9 + $0x48] sm:$0xf] }
  0x2b   : > { %266 = vst [vmem:[%s235_s15 + $0x14] sm:$0xf] %v265_v5  ;;  %v269_v7 = vld [vmem:[%s239_s9 + $0x54] sm:$0xf]  ;;  %268 = vst [vmem:[%s235_s15 + $0x18] sm:$0xf] %v267_v6 }
  0x2c   : > { %270 = vst [vmem:[%s235_s15 + $0x1c] sm:$0xf] %v269_v7 }
  0x2d PF: > { %309 = sbr.rel (!%p3347_p9) target bundleno = 57 (0x39), region = 69  ;;  %s311_s8 = sand.u32 (%p3347_p9), 1, %s3191_s22  }
  0x2e   : > { %s2785_s13 = smul.u32 (%p3347_p9), 24, %s3215_s28  ;;  %s2888_s30 = sshll.u32 (%p3347_p9), %s311_s8, 5 }
  0x2f   : > { %s313_s9 = scalar_lea.vmem (%p3347_p9), [#allocation4], %s2888_s30 }
  0x30   : > { %s2786_s11 = sadd.s32 (%p3347_p9), %s3211_s27, %s2785_s13 }
  0x31   : > { %s2889_s14 = sshll.u32 (%p3347_p9), %s2786_s11, 2 }
  0x32   : > { %s2788_s18 = scalar_lea.vmem (%p3347_p9), %s4497_s1, %s2889_s14 }
  0x33   : > { %v2890_v8 = vld [vmem:[%s2788_s18 + $0x4] sm:$0xf] (%p3347_p9)  ;;  %v2891_v9 = vld [vmem:[%s2788_s18 + $0x10] sm:$0xf] (%p3347_p9)  ;;  %v2892_v10 = vld [vmem:[%s2788_s18 + $0x1c] sm:$0xf] (%p3347_p9) }
  0x34   : > { %335 = vst [vmem:[%s313_s9] sm:$0xf] %v2890_v8  ;;  %337 = vst [vmem:[%s313_s9 + $0x4] sm:$0xf] %v2891_v9  ;;  %v2893_v11 = vld [vmem:[%s2788_s18 + $0x28] sm:$0xf] }
  0x35   : > { %339 = vst [vmem:[%s313_s9 + $0x8] sm:$0xf] %v2892_v10  ;;  %v2894_v12 = vld [vmem:[%s2788_s18 + $0x34] sm:$0xf]  ;;  %v2895_v13 = vld [vmem:[%s2788_s18 + $0x40] sm:$0xf] }
  0x36   : > { %341 = vst [vmem:[%s313_s9 + $0xc] sm:$0xf] %v2893_v11  ;;  %343 = vst [vmem:[%s313_s9 + $0x10] sm:$0xf] %v2894_v12  ;;  %v2896_v14 = vld [vmem:[%s2788_s18 + $0x4c] sm:$0xf] }
  0x37   : > { %345 = vst [vmem:[%s313_s9 + $0x14] sm:$0xf] %v2895_v13  ;;  %v2897_v15 = vld [vmem:[%s2788_s18 + $0x58] sm:$0xf]  ;;  %347 = vst [vmem:[%s313_s9 + $0x18] sm:$0xf] %v2896_v14 }
  0x38   : > { %349 = vst [vmem:[%s313_s9 + $0x1c] sm:$0xf] %v2897_v15 }
  0x39 PF: > { %p2898_p12 = scmp.ge.s32.totalorder %s3219_s29, 1  ;;  %p401_p13 = scmp.lt.s32.totalorder %s3219_s29, 5 }
  0x3b   : > { %p402_p0 = pnand %p2898_p12, %p401_p13 }
  0x3c   : > { %p456_p1 = scmp.lt.s32.totalorder (!%p402_p0), %s3207_s26, 1  ;;  %v515_v16 = vlaneseq (!%p402_p0)  ;;  %v4504_v17 = vmov (!%p402_p0), 0   ;;  %v3222_v18 = vmov (!%p402_p0), 1966171168   ;;  %s408_s19 = sand.u32 (!%p402_p0), 1, %s3195_s23   ;;  %vm481_vm0 = vcmask (!%p402_p0), 146432  }
  0x3d   : > { %405 = sbr.rel (%p402_p0) target bundleno = 835 (0x343), region = 118  ;;  %3136 = vset.pattern.permute.xlu0 (!%p402_p0), %v4504_v17  ;;  %v540_v19 = vunpack.c.l.s4 (!%p402_p0), %v3222_v18  ;;  %3137 = vset.pattern.permute.xlu1 (!%p402_p0), %v4504_v17  ;;  %s415_s15 = sand.u32 (!%p402_p0), 1, %s3187_s21   ;;  %vm506_vm1 = vcmask (!%p402_p0), 140288   ;;  %vm3235_vm14 = vmmov (!%p402_p0), 0   ;;  %vm964_vm15 = vcmask (!%p402_p0), 130048  }
  0x3e   : > { %v3390_v20 = vshrl.u32 (!%p402_p0), %v515_v16, 7  ;;  %s2899_s13 = sshll.u32 (!%p402_p0), %s408_s19, 5  ;;  %s2900_s30 = sshll.u32 (!%p402_p0), %s415_s15, 5  ;;  %v523_v61 = vand.u32 (!%p402_p0), 127, %v515_v16 }
  0x3f   : > { %v541_v21 = vunpack.c.0.s8 (!%p402_p0), %v540_v19  ;;  %s3403_s21 = scalar_lea.vmem (!%p402_p0), [#allocation3], %s2899_s13  ;;  %s3418_s15 = scalar_lea.vmem (!%p402_p0), [#allocation4], %s2900_s30 }
  0x40   : > { %v3406_v23 = vld [vmem:[%s3403_s21] sm:$0xff] (!%p402_p0)   ;;  %v3409_v24 = vld [vmem:[%s3403_s21 + $0x8] sm:$0xff] (!%p402_p0)   ;;  %v3412_v26 = vsub.s32 (!%p402_p0), 0, %v3390_v20  ;;  %v517_v56 = vadd.s32 (!%p402_p0), 8, %v3390_v20  ;;  %v2974_v3 = vld [vmem:[%s3403_s21 + $0x10] sm:$0xff] (!%p402_p0)   ;;  %vm530_vm7 = vcmp.ge.s32.totalorder (!%p402_p0), %v523_v61, 1 }
  0x41   : > { %v3401_v22 = vsub.s32 (!%p402_p0), %v541_v21, %v3390_v20  ;;  %v2954_v28 = vunpack.c.l.bf16 (!%p402_p0), %v3406_v23  ;;  %v2958_v29 = vunpack.c.l.bf16 (!%p402_p0), %v3409_v24  ;;  %v490_v33 = vld [vmem:[%s3418_s15] sm:$0x1] (!%p402_p0)  ;;  %v492_v34 = vld [vmem:[%s3418_s15 + $0x8] sm:$0x1] (!%p402_p0)  ;;  %v491_v54 = vld [vmem:[%s3418_s15 + $0x4] sm:$0x1] (!%p402_p0)  ;;  %v2955_v1 = vunpack.c.h.bf16 (!%p402_p0), %v3406_v23 }
  0x42   : > { %v498_v35 = vunpack.c.l.bf16 (!%p402_p0), %v490_v33  ;;  %v500_v36 = vunpack.c.l.bf16 (!%p402_p0), %v492_v34  ;;  %v493_v62 = vld [vmem:[%s3418_s15 + $0xc] sm:$0x1] (!%p402_p0)  ;;  %v499_v2 = vunpack.c.l.bf16 (!%p402_p0), %v491_v54  ;;  %v494_v4 = vld [vmem:[%s3418_s15 + $0x10] sm:$0x1] (!%p402_p0)  ;;  %v495_v5 = vld [vmem:[%s3418_s15 + $0x14] sm:$0x1] (!%p402_p0)  ;;  %v2959_v12 = vunpack.c.h.bf16 (!%p402_p0), %v3409_v24 }
  0x43   : > { %482 = vst.msk [vmem:[#allocation2] sm:$0xff] (!%p402_p0), %vm481_vm0, %v2954_v28  ;;  %484 = vst.msk [vmem:[#allocation2 + $0x20] sm:$0xff] (!%p402_p0), %vm481_vm0, %v2958_v29  ;;  %v2975_v8 = vld [vmem:[%s3403_s21 + $0x18] sm:$0xff] (!%p402_p0)   ;;  %vm533_vm9 = vcmp.le.s32.totalorder (!%p402_p0), %v523_v61, 16  ;;  %v501_v13 = vunpack.c.l.bf16 (!%p402_p0), %v493_v62  ;;  %v2962_v14 = vunpack.c.l.bf16 (!%p402_p0), %v2974_v3  ;;  %v502_v16 = vunpack.c.l.bf16 (!%p402_p0), %v494_v4  ;;  %s3226_s13 = smov (!%p402_p0), 126   ;;  %s3227_s30 = smov (!%p402_p0), 16  }
  0x44   : > { %s457_s8 = scalar_select %p456_p1, %s3207_s26, 1  ;;  %507 = vst.msk [vmem:[#allocation2 + $0x8] sm:$0x3] %vm506_vm1, %v498_v35  ;;  %509 = vst.msk [vmem:[#allocation2 + $0x28] sm:$0x3] %vm506_vm1, %v500_v36  ;;  %v2963_v18 = vunpack.c.h.bf16 %v2974_v3  ;;  %v503_v19 = vunpack.c.l.bf16 %v495_v5  ;;  %v2966_v21 = vunpack.c.l.bf16 %v2975_v8 }
  0x45   : > { %v496_v9 = vld [vmem:[%s3418_s15 + $0x18] sm:$0x1]  ;;  %483 = vst.msk [vmem:[#allocation2 + $0x10] sm:$0xff] %vm481_vm0, %v2955_v1  ;;  %v497_v11 = vld [vmem:[%s3418_s15 + $0x1c] sm:$0x1]  ;;  %485 = vst.msk [vmem:[#allocation2 + $0x30] sm:$0xff] %vm481_vm0, %v2959_v12 }
  0x46   : > { %s2902_s11 = sshll.u32 %s457_s8, 3  ;;  %508 = vst.msk [vmem:[#allocation2 + $0x18] sm:$0x3] %vm506_vm1, %v499_v2  ;;  %510 = vst.msk [vmem:[#allocation2 + $0x38] sm:$0x3] %vm506_vm1, %v501_v13  ;;  %v504_v24 = vunpack.c.l.bf16 %v496_v9  ;;  %s3225_s8 = smov 127  }
  0x47   : > { %s459_s17 = scalar_lea.vmem %s4500_s4, %s2902_s11  ;;  %s463_s0 = scalar_lea.vmem %s4501_s5, %s2902_s11  ;;  %486 = vst.msk [vmem:[#allocation2 + $0x40] sm:$0xff] %vm481_vm0, %v2962_v14  ;;  %487 = vst.msk [vmem:[#allocation2 + $0x50] sm:$0xff] %vm481_vm0, %v2963_v18  ;;  %v3223_v62 = vmov 1983009808  }
  0x48   : > { %v536_v25 = vld [vmem:[%s459_s17] sm:$0xff]  ;;  %511 = vst.msk [vmem:[#allocation2 + $0x48] sm:$0x3] %vm506_vm1, %v502_v16  ;;  %512 = vst.msk [vmem:[#allocation2 + $0x58] sm:$0x3] %vm506_vm1, %v503_v19  ;;  %s3228_s11 = smov 64  }
  0x49   : > { %v587_v27 = vld [vmem:[%s463_s0] sm:$0xff]  ;;  %v545_v30 = vrot.slane %v536_v25, %v3401_v22  ;;  %v538_v31 = vcombine.high %v536_v25, %v536_v25  ;;  %s2904_s0 = sshll.u32 %s3203_s25, 3  ;;  %v2967_v25 = vunpack.c.h.bf16 %v2975_v8  ;;  %488 = vst.msk [vmem:[#allocation2 + $0x60] sm:$0xff] %vm481_vm0, %v2966_v21  ;;  %s3229_s14 = smov 32  }
  0x4a   : > { %v596_v32 = vrot.slane %v587_v27, %v3401_v22  ;;  %v589_v50 = vcombine.high %v587_v27, %v587_v27  ;;  %v519_v57 = vstv %s2904_s0  ;;  %v505_v27 = vunpack.c.l.bf16 %v497_v11  ;;  %513 = vst.msk [vmem:[#allocation2 + $0x68] sm:$0x3] %vm506_vm1, %v504_v24  ;;  %v642_v13 = vld [vmem:[#allocation2 + $0x20] sm:$0xff]  ;;  %s3231_s16 = smov 80   ;;  %s3232_s17 = smov 96  }
  0x4b   : > { %v561_v37 = vrot.slane %v545_v30, %v3401_v22  ;;  %v553_v38 = vcombine.high %v545_v30, %v545_v30  ;;  %v552_v41 = vrot.slane %v538_v31, %v3401_v22  ;;  %v520_v60 = vadd.s32 %v519_v57, %v3390_v20  ;;  %489 = vst.msk [vmem:[#allocation2 + $0x70] sm:$0xff] %vm481_vm0, %v2967_v25  ;;  %v643_v16 = vld [vmem:[#allocation2 + $0x28] sm:$0x3]  ;;  %s3233_s18 = smov 48   ;;  %s3234_s9 = smov 112  }
  0x4c   : > { %v3426_v39 = vrot.slane %v596_v32, %v3401_v22  ;;  %v604_v40 = vcombine.high %v596_v32, %v596_v32  ;;  %v3451_v59 = vrot.slane %v589_v50, %v3401_v22  ;;  %v521_v0 = vadd.s32 %v519_v57, %v517_v56  ;;  %514 = vst.msk [vmem:[#allocation2 + $0x78] sm:$0x3] %vm506_vm1, %v505_v27  ;;  %v640_v54 = vld [vmem:[#allocation2 + $0x10] sm:$0xff]  ;;  %s2946_s21 = sshll.u32 (%p3354_p10), %s3207_s26, 2 }
  0x4d   : > { %v657_v42 = vrot.slane %v561_v37, %v3412_v26  ;;  %v583_v43 = vcombine.high %v561_v37, %v561_v37  ;;  %v575_v45 = vrot.slane %v553_v38, %v3401_v22  ;;  %v554_v46 = vcombine.high %v552_v41, %v552_v41  ;;  %v644_v19 = vld [vmem:[#allocation2 + $0x30] sm:$0xff]  ;;  %v645_v21 = vld [vmem:[#allocation2 + $0x38] sm:$0x3]  ;;  %s2719_s15 = sadd.s32 (%p3354_p10), %s3203_s25, %s2946_s21 }
  0x4e   : > { %v3433_v44 = vrot.slane %v604_v40, %v3401_v22  ;;  %v737_v48 = vrot.slane %v3426_v39, %v3412_v26  ;;  %v568_v49 = vrot.slane %v552_v41, %v3401_v22  ;;  %vm524_vm2 = vcmp.ge.s32.totalorder %v520_v60, 1  ;;  %v646_v24 = vld [vmem:[#allocation2 + $0x40] sm:$0xff]  ;;  %s2947_s23 = sshll.u32 (%p3354_p10), %s2719_s15, 2 }
  0x4f   : > { %687 = vperm.xlu0 %3136, %v657_v42   ;;  %v665_v47 = vrot.slane %v583_v43, %v3412_v26  ;;  %v585_v52 = vcombine.high %v575_v45, %v575_v45  ;;  %v3444_v53 = vrot.slane %v554_v46, %v3401_v22  ;;  %v661_v55 = vrot.slane %v575_v45, %v3412_v26  ;;  %v638_v45 = vld [vmem:[#allocation2] sm:$0xff]  ;;  %v639_v46 = vld [vmem:[#allocation2 + $0x8] sm:$0x3] }
  0x50   : > { %v741_v51 = vrot.slane %v3433_v44, %v3412_v26  ;;  %v673_v58 = vrot.slane %v568_v49, %v3412_v26  ;;  %v584_v7 = vcombine.high %v568_v49, %v568_v49  ;;  %vm526_vm3 = vcmp.le.s32.totalorder %v520_v60, 16  ;;  %v647_v25 = vld [vmem:[#allocation2 + $0x48] sm:$0x3] }
  0x51   : > { %695 = vperm.xlu1 %3137, %v665_v47   ;;  %v669_v63 = vrot.slane %v585_v52, %v3412_v26  ;;  %v677_v6 = vrot.slane %v3444_v53, %v3412_v26  ;;  %v586_v10 = vcombine.high %v3444_v53, %v3444_v53  ;;  %vm525_vm4 = vcmp.ge.s32.totalorder %v521_v0, 1  ;;  %vm528_vm6 = vmand %vm524_vm2, %vm526_vm3 }
  0x52   : > { %vm527_vm5 = vcmp.le.s32.totalorder %v521_v0, 16  ;;  %vm3472_vm10 = vmand %vm528_vm6, %vm530_vm7  ;;  %v681_v28 = vrot.slane %v584_v7, %v3412_v26  ;;  %v634_v29 = vcombine.high %v3426_v39, %v3426_v39  ;;  %v636_v33 = vcombine.high %v3433_v44, %v3433_v44 }
  0x53   : > { %767 = vperm.xlu0 %3136, %v737_v48   ;;  %vm529_vm8 = vmand %vm525_vm4, %vm527_vm5  ;;  %v685_v32 = vrot.slane %v586_v10, %v3412_v26  ;;  %v605_v34 = vcombine.high %v3451_v59, %v3451_v59  ;;  %v619_v36 = vrot.slane %v3451_v59, %v3401_v22  ;;  %v3224_v0 = vmov 1934713408  }
  0x54   : > { %vm3477_vm11 = vmand %vm529_vm8, %vm530_vm7  ;;  %v745_v35 = vrot.slane %v634_v29, %v3412_v26  ;;  %v749_v37 = vrot.slane %v636_v33, %v3412_v26  ;;  %v877_v1 = vunpack.c.l.s4 %v3224_v0  ;;  %v648_v29 = vld [vmem:[#allocation2 + $0x50] sm:$0xff]  ;;  %vm968_vm0 = vcmask 261120  }
  0x55   : > { %771 = vperm.xlu1 %3137, %v741_v51   ;;  %vm3490_vm12 = vmand %vm3472_vm10, %vm533_vm9  ;;  %v633_v38 = vrot.slane %v605_v34, %v3401_v22  ;;  %v753_v39 = vrot.slane %v619_v36, %v3412_v26  ;;  %v635_v40 = vcombine.high %v619_v36, %v619_v36  ;;  %vm971_vm1 = vcmask 392192  }
  0x56   : > { %vm3501_vm13 = vmand %vm3477_vm11, %vm533_vm9  ;;  %v878_v10 = vunpack.c.0.s8 %v877_v1  ;;  %vm974_vm2 = vcmask 523264   ;;  %vm977_vm3 = vcmask 654336   ;;  %vm980_vm4 = vcmask 785408  }
  0x57   : > { %691 = vperm.xlu0 %3136, %v661_v55   ;;  %v757_v41 = vrot.slane %v633_v38, %v3412_v26  ;;  %v637_v42 = vcombine.high %v633_v38, %v633_v38  ;;  %v761_v43 = vrot.slane %v635_v40, %v3412_v26  ;;  %v641_v55 = vld [vmem:[#allocation2 + $0x18] sm:$0x3]  ;;  %v650_v40 = vld [vmem:[#allocation2 + $0x60] sm:$0xff]  ;;  %vm983_vm5 = vcmask 916480  }
  0x58   : > { %vm1153_vm6 = vcmask 1043456   ;;  %vm1149_vm7 = vcmask 64512  }
  0x59   : > { %699 = vperm.xlu1 %3137, %v669_v63   ;;  %v765_v44 = vrot.slane %v637_v42, %v3412_v26  ;;  %v860_v63 = vunpack.c.l.s4 %v3223_v62 }
  0x5b   : > { %703 = vperm.xlu0 %3136, %v673_v58   ;;  %v861_v9 = vunpack.c.0.s8 %v860_v63 }
  0x5d   : > { %707 = vperm.xlu1 %3137, %v677_v6   ;;  %v3539_v27 = vsub.s32 %v861_v9, %v3390_v20 }
  0x5f   : > { %711 = vperm.xlu0 %3136, %v681_v28   ;;  %v3542_v28 = vsub.s32 %v878_v10, %v3390_v20 }
  0x61   : > { %715 = vperm.xlu1 %3137, %v685_v32   ;;  %v649_v32 = vld [vmem:[#allocation2 + $0x58] sm:$0x3] }
  0x63   : > { %775 = vperm.xlu0 %3136, %v745_v35  }
  0x65   : > { %779 = vperm.xlu1 %3137, %v749_v37  }
  0x67   : > { %783 = vperm.xlu0 %3136, %v753_v39  }
  0x69   : > { %787 = vperm.xlu1 %3137, %v757_v41   ;;  %v651_v41 = vld [vmem:[#allocation2 + $0x68] sm:$0x3] }
  0x6b   : > { %791 = vperm.xlu0 %3136, %v761_v43  }
  0x6d   : > { %795 = vperm.xlu1 %3137, %v765_v44  }
  0xce   : > { %v688_v47 = vpop.permute.xlu0 %687 }
  0xcf   : > { %v718_v22 = vmul.f32 %v688_v47, %v638_v45  ;;  %v719_v48 = vmul.f32 %v688_v47, %v639_v46 }
  0xd0   : > { %v696_v49 = vpop.permute.xlu1 %695 }
  0xd1   : > { %v722_v36 = vmul.f32 %v696_v49, %v642_v13  ;;  %v723_v37 = vmul.f32 %v696_v49, %v643_v16 }
  0xd2   : > { %v768_v50 = vpop.permute.xlu0 %767 }
  0xd3   : > { %v798_v51 = vadd.f32 %v768_v50, %v718_v22  ;;  %v799_v52 = vadd.f32 %v768_v50, %v719_v48  ;;  %v652_v22 = vld [vmem:[#allocation2 + $0x70] sm:$0xff]  ;;  %v653_v48 = vld [vmem:[#allocation2 + $0x78] sm:$0x3] }
  0xd4   : > { %v772_v53 = vpop.permute.xlu1 %771 }
  0xd5   : > { %v814_v56 = vmax.f32 %v798_v51, 0.0  ;;  %v815_v57 = vmax.f32 %v799_v52, 0.0 }
  0xd6   : > { %v692_v58 = vpop.permute.xlu0 %691 }
  0xd7   : > { %v3524_v26 = vsel %vm3490_vm12, %v814_v56, 0.0  ;;  %v835_v59 = vsel %vm3501_vm13, %v815_v57, 0.0  ;;  %v720_v60 = vmul.f32 %v692_v58, %v640_v54  ;;  %v721_v61 = vmul.f32 %v692_v58, %v641_v55 }
  0xd8   : > { %v850_v2 = vpack.c.bf16 %v835_v59, %v3524_v26  ;;  %v700_v3 = vpop.permute.xlu1 %699 }
  0xd9   : > { %v800_v4 = vadd.f32 %v772_v53, %v720_v60  ;;  %v801_v5 = vadd.f32 %v772_v53, %v721_v61  ;;  %v724_v38 = vmul.f32 %v700_v3, %v644_v19  ;;  %v725_v39 = vmul.f32 %v700_v3, %v645_v21 }
  0xda   : > { %v704_v6 = vpop.permute.xlu0 %703  ;;  %996 = vrot.lane.b32.xlu0 %v850_v2, %s3225_s8  ;;  %v1452_v12 = vshll.u32 %v850_v2, 16  ;;  %v3545_v45 = vrot.slane %v850_v2, 1  ;;  %v1450_v20 = vshrl.u32 %v850_v2, 16 }
  0xdb   : > { %v816_v7 = vmax.f32 %v800_v4, 0.0  ;;  %v817_v8 = vmax.f32 %v801_v5, 0.0  ;;  %v726_v42 = vmul.f32 %v704_v6, %v646_v24  ;;  %v727_v43 = vmul.f32 %v704_v6, %v647_v25 }
  0xdc   : > { %v708_v11 = vpop.permute.xlu1 %707  ;;  %v1454_v34 = vrot.slane %v1452_v12, 1 }
  0xdd   : > { %v3532_v14 = vsel %vm3490_vm12, %v816_v7, 0.0  ;;  %v837_v15 = vsel %vm3501_vm13, %v817_v8, 0.0  ;;  %v728_v46 = vmul.f32 %v708_v11, %v648_v29  ;;  %v729_v47 = vmul.f32 %v708_v11, %v649_v32 }
  0xde   : > { %v851_v18 = vpack.c.bf16 %v837_v15, %v3532_v14  ;;  %v712_v23 = vpop.permute.xlu0 %711  ;;  %1248 = vrot.lane.b32.xlu0 %v850_v2, %s3226_s13  ;;  %v3548_v49 = vor.u32 %v1454_v34, %v1450_v20 }
  0xdf   : > { %v730_v52 = vmul.f32 %v712_v23, %v650_v40  ;;  %v731_v53 = vmul.f32 %v712_v23, %v651_v41 }
  0xe0   : > { %v716_v33 = vpop.permute.xlu1 %715  ;;  %998 = vrot.lane.b32.xlu1 %v851_v18, %s3225_s8  ;;  %v1459_v35 = vshll.u32 %v851_v18, 16  ;;  %v3550_v63 = vrot.slane %v851_v18, 1  ;;  %v1457_v0 = vshrl.u32 %v851_v18, 16 }
  0xe1   : > { %v732_v60 = vmul.f32 %v716_v33, %v652_v22  ;;  %v733_v61 = vmul.f32 %v716_v33, %v653_v48 }
  0xe2   : > { %v776_v44 = vpop.permute.xlu0 %775  ;;  %v1461_v55 = vrot.slane %v1459_v35, 1 }
  0xe3   : > { %v802_v50 = vadd.f32 %v776_v44, %v722_v36  ;;  %v803_v51 = vadd.f32 %v776_v44, %v723_v37 }
  0xe4   : > { %v780_v54 = vpop.permute.xlu1 %779  ;;  %1250 = vrot.lane.b32.xlu1 %v851_v18, %s3226_s13  ;;  %v3558_v9 = vor.u32 %v1461_v55, %v1457_v0 }
  0xe5   : > { %v818_v56 = vmax.f32 %v802_v50, 0.0  ;;  %v819_v57 = vmax.f32 %v803_v51, 0.0  ;;  %v804_v58 = vadd.f32 %v780_v54, %v724_v38  ;;  %v805_v59 = vadd.f32 %v780_v54, %v725_v39 }
  0xe6   : > { %v784_v62 = vpop.permute.xlu0 %783 }
  0xe7   : > { %v838_v1 = vsel %vm3490_vm12, %v818_v56, 0.0  ;;  %v839_v2 = vsel %vm3501_vm13, %v819_v57, 0.0  ;;  %v820_v3 = vmax.f32 %v804_v58, 0.0  ;;  %v821_v4 = vmax.f32 %v805_v59, 0.0 }
  0xe8   : > { %v3556_v5 = vpack.c.bf16 %v839_v2, %v838_v1  ;;  %v806_v6 = vadd.f32 %v784_v62, %v726_v42  ;;  %v807_v7 = vadd.f32 %v784_v62, %v727_v43  ;;  %v788_v8 = vpop.permute.xlu1 %787 }
  0xe9   : > { %v840_v10 = vsel %vm3490_vm12, %v820_v3, 0.0  ;;  %v841_v11 = vsel %vm3501_vm13, %v821_v4, 0.0  ;;  %v808_v12 = vadd.f32 %v788_v8, %v728_v46  ;;  %v809_v13 = vadd.f32 %v788_v8, %v729_v47 }
  0xea   : > { %v3564_v15 = vpack.c.bf16 %v841_v11, %v840_v10  ;;  %v822_v16 = vmax.f32 %v806_v6, 0.0  ;;  %v823_v18 = vmax.f32 %v807_v7, 0.0  ;;  %v792_v19 = vpop.permute.xlu0 %791  ;;  %1000 = vrot.lane.b32.xlu0 %v3556_v5, %s3225_s8  ;;  %v3569_v21 = vrot.slane %v3556_v5, 1 }
  0xeb   : > { %v824_v23 = vmax.f32 %v808_v12, 0.0  ;;  %v825_v24 = vmax.f32 %v809_v13, 0.0  ;;  %v810_v25 = vadd.f32 %v792_v19, %v730_v52  ;;  %v811_v29 = vadd.f32 %v792_v19, %v731_v53 }
  0xec   : > { %v842_v32 = vsel %vm3490_vm12, %v822_v16, 0.0  ;;  %v843_v33 = vsel %vm3501_vm13, %v823_v18, 0.0  ;;  %v796_v34 = vpop.permute.xlu1 %795  ;;  %1002 = vrot.lane.b32.xlu1 %v3564_v15, %s3225_s8  ;;  %v3578_v35 = vrot.slane %v3564_v15, 1  ;;  %v1464_v36 = vshrl.u32 %v3556_v5, 16 }
  0xed   : > { %v854_v37 = vpack.c.bf16 %v843_v33, %v842_v32  ;;  %v2905_v38 = vpack.c.bf16 %v842_v32, %v3524_v26  ;;  %v844_v39 = vsel %vm3490_vm12, %v824_v23, 0.0  ;;  %v845_v40 = vsel %vm3501_vm13, %v825_v24, 0.0 }
  0xee   : > { %v3586_v41 = vpack.c.bf16 %v845_v40, %v844_v39  ;;  %v2907_v42 = vpack.c.bf16 %v844_v39, %v3532_v14  ;;  %v826_v43 = vmax.f32 %v810_v25, 0.0  ;;  %v827_v44 = vmax.f32 %v811_v29, 0.0 }
  0xef   : > { %v3590_v20 = vrot.slane %v2905_v38, %v3539_v27  ;;  %v812_v46 = vadd.f32 %v796_v34, %v732_v60  ;;  %v813_v47 = vadd.f32 %v796_v34, %v733_v61  ;;  %1004 = vrot.lane.b32.xlu0 %v854_v37, %s3225_s8  ;;  %v3593_v26 = vrot.slane %v854_v37, 1 }
  0xf0   : > { %v3596_v22 = vrot.slane %v2907_v42, %v3539_v27  ;;  %v846_v48 = vsel %vm3490_vm12, %v826_v43, 0.0  ;;  %v847_v14 = vsel %vm3501_vm13, %v827_v44, 0.0  ;;  %1006 = vrot.lane.b32.xlu1 %v3586_v41, %s3225_s8  ;;  %v3605_v50 = vrot.slane %v3586_v41, 1 }
  0xf1   : > { %v3607_v51 = vpack.c.bf16 %v847_v14, %v846_v48  ;;  %v2906_v52 = vpack.c.bf16 %v846_v48, %v838_v1  ;;  %v828_v53 = vmax.f32 %v812_v46, 0.0  ;;  %v829_v54 = vmax.f32 %v813_v47, 0.0 }
  0xf2   : > { %v2108_v55 = vcombine.low %v3545_v45, %v3593_v26  ;;  %v2142_v56 = vcombine.low %v3550_v63, %v3605_v50  ;;  %v1466_v57 = vshll.u32 %v3556_v5, 16  ;;  %v1471_v58 = vshrl.u32 %v3564_v15, 16 }
  0xf3   : > { %v873_v59 = vrot.slane %v2906_v52, %v3539_v27  ;;  %v848_v60 = vsel %vm3490_vm12, %v828_v53, 0.0  ;;  %v849_v61 = vsel %vm3501_vm13, %v829_v54, 0.0  ;;  %1252 = vrot.lane.b32.xlu0 %v3556_v5, %s3226_s13  ;;  %v3623_v62 = vrot.slane %v3607_v51, 1 }
  0xf4   : > { %v3625_v0 = vpack.c.bf16 %v849_v61, %v848_v60  ;;  %v2908_v1 = vpack.c.bf16 %v848_v60, %v840_v10  ;;  %1254 = vrot.lane.b32.xlu1 %v3564_v15, %s3226_s13  ;;  %v3630_v2 = vrot.slane %v2108_v55, %v3539_v27  ;;  %v3633_v30 = vrot.slane %v2142_v56, %v3539_v27 }
  0xf5   : > { %v874_v31 = vcombine.low %v3590_v20, %v873_v59  ;;  %v2116_v3 = vcombine.low %v3569_v21, %v3623_v62  ;;  %v1468_v4 = vrot.slane %v1466_v57, 1  ;;  %v1473_v5 = vshll.u32 %v3564_v15, 16 }
  0xf6   : > { %v907_v6 = vrot.slane %v2908_v1, %v3539_v27  ;;  %v3641_v7 = vrot.slane %v3625_v0, 1  ;;  %v1478_v8 = vshrl.u32 %v854_v37, 16  ;;  %v1480_v10 = vshll.u32 %v854_v37, 16 }
  0xf7   : > { %1256 = vrot.lane.b32.xlu0 %v854_v37, %s3226_s13  ;;  %v3645_v11 = vrot.slane %v2116_v3, %v3539_v27  ;;  %v3647_v12 = vor.u32 %v1468_v4, %v1464_v36  ;;  %v1475_v13 = vrot.slane %v1473_v5, 1  ;;  %v1485_v16 = vshrl.u32 %v3586_v41, 16 }
  0xf8   : > { %v908_v18 = vcombine.low %v3596_v22, %v907_v6  ;;  %1258 = vrot.lane.b32.xlu1 %v3586_v41, %s3226_s13  ;;  %v2150_v15 = vcombine.low %v3578_v35, %v3641_v7  ;;  %v1482_v19 = vrot.slane %v1480_v10, 1  ;;  %v1487_v23 = vshll.u32 %v3586_v41, 16 }
  0xf9   : > { %v3656_v24 = vor.u32 %v1475_v13, %v1471_v58  ;;  %v1492_v25 = vshrl.u32 %v3607_v51, 16  ;;  %v1494_v29 = vshll.u32 %v3607_v51, 16  ;;  %v1499_v32 = vshrl.u32 %v3625_v0, 16 }
  0xfa   : > { %v2157_v33 = vrot.slane %v2150_v15, %v3539_v27  ;;  %v3662_v34 = vor.u32 %v1482_v19, %v1478_v8  ;;  %v1489_v36 = vrot.slane %v1487_v23, 1  ;;  %v1501_v37 = vshll.u32 %v3625_v0, 16 }
  0xfb   : > { %2285 = vrot.lane.b32.xlu0 %v3545_v45, %s3225_s8  ;;  %v1496_v38 = vrot.slane %v1494_v29, 1  ;;  %v3668_v39 = vrot.slane %v874_v31, %v3542_v28  ;;  %v3671_v40 = vrot.slane %v908_v18, %v3542_v28  ;;  %v875_v41 = vcombine.high %v3590_v20, %v873_v59 }
  0xfc   : > { %2287 = vrot.lane.b32.xlu1 %v3550_v63, %s3225_s8  ;;  %v1513_v42 = vcombine.low %v3548_v49, %v3662_v34  ;;  %v3678_v43 = vor.u32 %v1489_v36, %v1485_v16  ;;  %v1503_v44 = vrot.slane %v1501_v37, 1  ;;  %v909_v46 = vcombine.high %v3596_v22, %v907_v6 }
  0xfd   : > { %v3681_v47 = vor.u32 %v1496_v38, %v1492_v25  ;;  %v929_v48 = vshrl.u32 %v3668_v39, 16  ;;  %v930_v14 = vshrl.u32 %v3671_v40, 16  ;;  %v3686_v52 = vrot.slane %v875_v41, %v3542_v28 }
  0xfe   : > { %v3689_v20 = vrot.slane %v1513_v42, %v3539_v27  ;;  %v1547_v53 = vcombine.low %v3558_v9, %v3678_v43  ;;  %v3693_v54 = vor.u32 %v1503_v44, %v1499_v32  ;;  %v3696_v55 = vrot.slane %v909_v46, %v3542_v28 }
  0xff   : > { %2486 = vrot.lane.b32.xlu0 %v3545_v45, %s3226_s13  ;;  %v1521_v22 = vcombine.low %v3647_v12, %v3681_v47  ;;  %v3702_v56 = vpack.i.b16 %v930_v14, %v929_v48  ;;  %v3706_v57 = vcombine.high %v3668_v39, %v4504_v17  ;;  %v3710_v58 = vcombine.high %v3671_v40, %v4504_v17 }
 0x100   : > { %2488 = vrot.lane.b32.xlu1 %v3550_v63, %s3226_s13  ;;  %v1554_v59 = vrot.slane %v1547_v53, %v3539_v27  ;;  %v1555_v45 = vcombine.low %v3656_v24, %v3693_v54  ;;  %v940_v60 = vpack.i.b16 %v3696_v55, %v3686_v52  ;;  %v941_v61 = vshrl.u32 %v3686_v52, 16 }
 0x101   : > { %v1528_v1 = vrot.slane %v1521_v22, %v3539_v27  ;;  %v934_v31 = vpack.i.b16 %v3710_v58, %v3706_v57  ;;  %v942_v3 = vshrl.u32 %v3696_v55, 16  ;;  %v2125_v63 = vcombine.high %v3630_v2, %v3645_v11 }
 0x102   : > { %v1562_v4 = vrot.slane %v1555_v45, %v3539_v27  ;;  %v2159_v5 = vcombine.high %v3633_v30, %v2157_v33  ;;  %v3730_v6 = vcombine.high %v3686_v52, %v4504_v17  ;;  %v3734_v8 = vcombine.high %v3696_v55, %v4504_v17 }
 0x103   : > { %1008 = vrot.lane.b32.xlu0 %v3607_v51, %s3225_s8  ;;  %v3738_v10 = vpack.i.b16 %v942_v3, %v941_v61  ;;  %v3741_v13 = vrot.slane %v2125_v63, %v3542_v28  ;;  %v2124_v16 = vcombine.low %v3630_v2, %v3645_v11  ;;  %v2158_v18 = vcombine.low %v3633_v30, %v2157_v33 }
 0x104   : > { %1010 = vrot.lane.b32.xlu1 %v3625_v0, %s3225_s8  ;;  %v3749_v15 = vrot.slane %v2159_v5, %v3542_v28  ;;  %v946_v19 = vpack.i.b16 %v3734_v8, %v3730_v6  ;;  %v935_v23 = vshrl.u32 %v3706_v57, 16  ;;  %v936_v25 = vshrl.u32 %v3710_v58, 16 }
 0x105   : > { %v3756_v29 = vrot.slane %v2124_v16, %v3542_v28  ;;  %v3759_v2 = vrot.slane %v2158_v18, %v3542_v28  ;;  %v947_v30 = vshrl.u32 %v3730_v6, 16  ;;  %v948_v11 = vshrl.u32 %v3734_v8, 16 }
 0x106   : > { %v2190_v32 = vpack.i.b16 %v3749_v15, %v3741_v13  ;;  %v3765_v33 = vpack.i.b16 %v936_v25, %v935_v23  ;;  %v2191_v36 = vshrl.u32 %v3741_v13, 16  ;;  %v2192_v37 = vshrl.u32 %v3749_v15, 16 }
 0x107   : > { %1260 = vrot.lane.b32.xlu0 %v3607_v51, %s3226_s13  ;;  %v2179_v38 = vshrl.u32 %v3756_v29, 16  ;;  %v2180_v41 = vshrl.u32 %v3759_v2, 16  ;;  %v3775_v42 = vcombine.high %v3756_v29, %v4504_v17  ;;  %v3779_v44 = vcombine.high %v3759_v2, %v4504_v17 }
 0x108   : > { %1262 = vrot.lane.b32.xlu1 %v3625_v0, %s3226_s13  ;;  %v3783_v46 = vpack.i.b16 %v948_v11, %v947_v30  ;;  %v3785_v48 = vpack.i.b16 %v2192_v37, %v2191_v36  ;;  %v3789_v51 = vcombine.high %v3741_v13, %v4504_v17  ;;  %v3793_v14 = vcombine.high %v3749_v15, %v4504_v17 }
 0x109   : > { %v3795_v53 = vpack.i.b16 %v2180_v41, %v2179_v38  ;;  %v2184_v22 = vpack.i.b16 %v3779_v44, %v3775_v42  ;;  %v2185_v45 = vshrl.u32 %v3775_v42, 16  ;;  %v2186_v0 = vshrl.u32 %v3779_v44, 16 }
 0x10a   : > { %v1530_v3 = vcombine.high %v3689_v20, %v1528_v1  ;;  %v1564_v63 = vcombine.high %v1554_v59, %v1562_v4  ;;  %v2197_v5 = vshrl.u32 %v3789_v51, 16  ;;  %v2198_v18 = vshrl.u32 %v3793_v14, 16 }
 0x10b   : > { %2289 = vrot.lane.b32.xlu0 %v3569_v21, %s3225_s8  ;;  %v3807_v16 = vpack.i.b16 %v2186_v0, %v2185_v45  ;;  %v1529_v23 = vcombine.low %v3689_v20, %v1528_v1  ;;  %v1563_v25 = vcombine.low %v1554_v59, %v1562_v4 }
 0x10c   : > { %2291 = vrot.lane.b32.xlu1 %v3578_v35, %s3225_s8  ;;  %v3814_v30 = vrot.slane %v1530_v3, %v3542_v28  ;;  %v3817_v11 = vrot.slane %v1564_v63, %v3542_v28  ;;  %v3823_v38 = vpack.i.b16 %v2198_v18, %v2197_v5 }
 0x10d   : > { %v3826_v20 = vrot.slane %v1529_v23, %v3542_v28  ;;  %v3829_v59 = vrot.slane %v1563_v25, %v3542_v28 }
 0x10e   : > { %v1596_v4 = vshrl.u32 %v3814_v30, 16  ;;  %v1597_v41 = vshrl.u32 %v3817_v11, 16  ;;  %v3837_v45 = vcombine.high %v3814_v30, %v4504_v17  ;;  %v3857_v23 = vcombine.high %v3817_v11, %v4504_v17 }
 0x10f   : > { %2293 = vrot.lane.b32.xlu0 %v3593_v26, %s3225_s8  ;;  %v1584_v0 = vshrl.u32 %v3826_v20, 16  ;;  %v1585_v3 = vshrl.u32 %v3829_v59, 16  ;;  %v3845_v63 = vcombine.high %v3826_v20, %v4504_v17  ;;  %v3849_v5 = vcombine.high %v3829_v59, %v4504_v17 }
 0x110   : > { %2295 = vrot.lane.b32.xlu1 %v3605_v50, %s3225_s8  ;;  %v3853_v18 = vpack.i.b16 %v1597_v41, %v1596_v4  ;;  %v1601_v4 = vpack.i.b16 %v3857_v23, %v3837_v45  ;;  %v1602_v41 = vshrl.u32 %v3837_v45, 16  ;;  %v1603_v17 = vshrl.u32 %v3857_v23, 16 }
 0x111   : > { %v3861_v37 = vpack.i.b16 %v1585_v3, %v1584_v0  ;;  %v1589_v36 = vpack.i.b16 %v3849_v5, %v3845_v63  ;;  %v1590_v1 = vshrl.u32 %v3845_v63, 16  ;;  %v1591_v61 = vshrl.u32 %v3849_v5, 16 }
 0x112   : > { %v3877_v0 = vpack.i.b16 %v1603_v17, %v1602_v41  ;;  %v3230_v17 = vmov 0.0  }
 0x113   : > { %2490 = vrot.lane.b32.xlu0 %v3569_v21, %s3226_s13  ;;  %v3873_v25 = vpack.i.b16 %v1591_v61, %v1590_v1  ;;  %3000 = vmatprep.subr.bf16.mxu1 %v3230_v17 }
 0x114   : > { %2492 = vrot.lane.b32.xlu1 %v3578_v35, %s3226_s13  ;;  %2994 = vmatprep.subr.bf16.mxu0 %v3230_v17  ;;  %v4520_v35 = vpack.i.b16 %v3793_v14, %v3789_v51 }
 0x115   : > { %3002 = vmatprep.mubr.msk.bf16.mxu1 %vm3235_vm14, %v3230_v17  ;;  %2996 = vmatprep.mubr.msk.bf16.mxu0 %vm3235_vm14, %v3230_v17 }
 0x117   : > { %2494 = vrot.lane.b32.xlu0 %v3593_v26, %s3226_s13 }
 0x118   : > { %2496 = vrot.lane.b32.xlu1 %v3605_v50, %s3226_s13 }
 0x11b   : > { %1690 = vrot.lane.b32.xlu0 %v3548_v49, %s3225_s8 }
 0x11c   : > { %1692 = vrot.lane.b32.xlu1 %v3558_v9, %s3225_s8 }
 0x11f   : > { %1891 = vrot.lane.b32.xlu0 %v3548_v49, %s3226_s13 }
 0x120   : > { %1893 = vrot.lane.b32.xlu1 %v3558_v9, %s3226_s13 }
 0x123   : > { %2297 = vrot.lane.b32.xlu0 %v3623_v62, %s3225_s8 }
 0x124   : > { %2299 = vrot.lane.b32.xlu1 %v3641_v7, %s3225_s8 }
 0x127   : > { %2498 = vrot.lane.b32.xlu0 %v3623_v62, %s3226_s13  ;;  %v4521_v62 = vpack.i.b16 %v3817_v11, %v3814_v30 }
 0x128   : > { %2500 = vrot.lane.b32.xlu1 %v3641_v7, %s3226_s13 }
 0x12b   : > { %1694 = vrot.lane.b32.xlu0 %v3647_v12, %s3225_s8 }
 0x12c   : > { %1696 = vrot.lane.b32.xlu1 %v3656_v24, %s3225_s8 }
 0x12f   : > { %1698 = vrot.lane.b32.xlu0 %v3662_v34, %s3225_s8 }
 0x130   : > { %1700 = vrot.lane.b32.xlu1 %v3678_v43, %s3225_s8 }
 0x133   : > { %1895 = vrot.lane.b32.xlu0 %v3647_v12, %s3226_s13 }
 0x134   : > { %1897 = vrot.lane.b32.xlu1 %v3656_v24, %s3226_s13 }
 0x137   : > { %1899 = vrot.lane.b32.xlu0 %v3662_v34, %s3226_s13 }
 0x138   : > { %1901 = vrot.lane.b32.xlu1 %v3678_v43, %s3226_s13 }
 0x13b   : > { %1702 = vrot.lane.b32.xlu0 %v3681_v47, %s3225_s8 }
 0x13c   : > { %1704 = vrot.lane.b32.xlu1 %v3693_v54, %s3225_s8  ;;  %s2721_s8 = scalar_lea.vmem (%p3354_p10), %s4502_s6, %s2947_s23 }
 0x13f   : > { %1903 = vrot.lane.b32.xlu0 %v3681_v47, %s3226_s13 }
 0x140   : > { %1905 = vrot.lane.b32.xlu1 %v3693_v54, %s3226_s13 }
 0x143   : > { %950 = vrot.lane.b32.xlu0 %v3702_v56, %s3227_s30 }
 0x144   : > { %956 = vrot.lane.b32.xlu1 %v940_v60, %s3228_s11 }
 0x147   : > { %952 = vrot.lane.b32.xlu0 %v934_v31, %s3229_s14 }
 0x148   : > { %958 = vrot.lane.b32.xlu1 %v3738_v10, %s3231_s16 }
 0x14b   : > { %2206 = vrot.lane.b32.xlu0 %v2190_v32, %s3228_s11 }
 0x14c   : > { %960 = vrot.lane.b32.xlu1 %v946_v19, %s3232_s17  ;;  %v997_v49 = vpop.permute.xlu0 %996 }
 0x14f   : > { %2200 = vrot.lane.b32.xlu0 %v3795_v53, %s3227_s30 }
 0x150   : > { %954 = vrot.lane.b32.xlu1 %v3765_v33, %s3233_s18  ;;  %v1249_v21 = vpop.permute.xlu0 %1248 }
 0x152   : > { %v999_v9 = vpop.permute.xlu1 %998 }
 0x153   : > { %2202 = vrot.lane.b32.xlu0 %v2184_v22, %s3229_s14 }
 0x154   : > { %962 = vrot.lane.b32.xlu1 %v3783_v46, %s3234_s9 }
 0x156   : > { %v1251_v26 = vpop.permute.xlu1 %1250 }
 0x157   : > { %2208 = vrot.lane.b32.xlu0 %v3785_v48, %s3231_s16 }
 0x158   : > { %2210 = vrot.lane.b32.xlu1 %v4520_v35, %s3232_s17 }
 0x15b   : > { %2204 = vrot.lane.b32.xlu0 %v3807_v16, %s3233_s18 }
 0x15c   : > { %v1001_v50 = vpop.permute.xlu0 %1000  ;;  %1611 = vrot.lane.b32.xlu1 %v4521_v62, %s3228_s11 }
 0x15e   : > { %v1003_v7 = vpop.permute.xlu1 %1002 }
 0x15f   : > { %2212 = vrot.lane.b32.xlu0 %v3823_v38, %s3234_s9 }
 0x160   : > { %1605 = vrot.lane.b32.xlu1 %v3861_v37, %s3227_s30 }
 0x161   : > { %v1005_v12 = vpop.permute.xlu0 %1004 }
 0x162   : > { %v1007_v24 = vpop.permute.xlu1 %1006  ;;  %v1020_v58 = vcombine.low %v997_v49, %v1005_v12 }
 0x163   : > { %1607 = vrot.lane.b32.xlu0 %v1589_v36, %s3229_s14  ;;  %v1054_v60 = vcombine.low %v999_v9, %v1007_v24 }
 0x164   : > { %1613 = vrot.lane.b32.xlu1 %v3853_v18, %s3231_s16  ;;  %v1027_v13 = vrot.slane %v1020_v58, %v3539_v27 }
 0x165   : > { %v1253_v34 = vpop.permute.xlu0 %1252  ;;  %v1061_v33 = vrot.slane %v1054_v60, %v3539_v27 }
 0x166   : > { %v1255_v43 = vpop.permute.xlu1 %1254 }
 0x168   : > { %1615 = vrot.lane.b32.xlu1 %v1601_v4, %s3232_s17 }
 0x169   : > { %v1257_v47 = vpop.permute.xlu0 %1256 }
 0x16a   : > { %v1259_v52 = vpop.permute.xlu1 %1258  ;;  %v1272_v15 = vcombine.low %v1249_v21, %v1257_v47 }
 0x16b   : > { %v1306_v19 = vcombine.low %v1251_v26, %v1259_v52 }
 0x16c   : > { %1609 = vrot.lane.b32.xlu1 %v3873_v25, %s3233_s18  ;;  %v1279_v16 = vrot.slane %v1272_v15, %v3539_v27  ;;  %v4522_v25 = vmov 0  }
 0x16d   : > { %v3987_v54 = vpop.permute.xlu0 %2285  ;;  %v1313_v30 = vrot.slane %v1306_v19, %v3539_v27 }
 0x16e   : > { %v3989_v55 = vpop.permute.xlu1 %2287 }
 0x170   : > { %1617 = vrot.lane.b32.xlu1 %v3877_v0, %s3234_s9 }
 0x171   : > { %v3993_v56 = vpop.permute.xlu0 %2486 }
 0x172   : > { %v3995_v57 = vpop.permute.xlu1 %2488 }
 0x175   : > { %v1009_v31 = vpop.permute.xlu0 %1008 }
 0x176   : > { %v1028_v6 = vcombine.low %v1001_v50, %v1009_v31  ;;  %v1011_v8 = vpop.permute.xlu1 %1010 }
 0x177   : > { %v1062_v10 = vcombine.low %v1003_v7, %v1011_v8 }
 0x178   : > { %v1035_v32 = vrot.slane %v1028_v6, %v3539_v27 }
 0x179   : > { %v1069_v42 = vrot.slane %v1062_v10, %v3539_v27  ;;  %v1261_v44 = vpop.permute.xlu0 %1260 }
 0x17a   : > { %v1036_v46 = vcombine.low %v1027_v13, %v1035_v32  ;;  %v1037_v48 = vcombine.high %v1027_v13, %v1035_v32  ;;  %v1280_v51 = vcombine.low %v1253_v34, %v1261_v44  ;;  %v1263_v14 = vpop.permute.xlu1 %1262 }
 0x17b   : > { %v1070_v53 = vcombine.low %v1061_v33, %v1069_v42  ;;  %v1071_v22 = vcombine.high %v1061_v33, %v1069_v42  ;;  %v1314_v61 = vcombine.low %v1255_v43, %v1263_v14 }
 0x17c   : > { %v4004_v11 = vrot.slane %v1036_v46, %v3542_v28  ;;  %v1287_v36 = vrot.slane %v1280_v51, %v3539_v27  ;;  %v1051_v37 = vrot.slane %v1037_v48, %v3542_v28 }
 0x17d   : > { %v4009_v38 = vrot.slane %v1070_v53, %v3542_v28  ;;  %v1085_v1 = vrot.slane %v1071_v22, %v3542_v28  ;;  %v1321_v45 = vrot.slane %v1314_v61, %v3539_v27  ;;  %v4013_v3 = vpop.permute.xlu0 %2289 }
 0x17e   : > { %v1289_v63 = vcombine.high %v1279_v16, %v1287_v36  ;;  %v4015_v5 = vpop.permute.xlu1 %2291  ;;  %v4026_v9 = vcombine.high %v4004_v11, %v4522_v25  ;;  %v1288_v12 = vcombine.low %v1279_v16, %v1287_v36  ;;  %v4039_v34 = vcombine.high %v1051_v37, %v4522_v25 }
 0x17f   : > { %v1323_v18 = vcombine.high %v1313_v30, %v1321_v45  ;;  %v1102_v23 = vpack.i.b16 %v1085_v1, %v1051_v37  ;;  %v4019_v4 = vcombine.high %v4009_v38, %v4522_v25  ;;  %v1322_v21 = vcombine.low %v1313_v30, %v1321_v45 }
 0x180   : > { %v1303_v41 = vrot.slane %v1289_v63, %v3542_v28  ;;  %v4031_v62 = vcombine.high %v1085_v1, %v4522_v25  ;;  %v1092_v7 = vshrl.u32 %v4009_v38, 16  ;;  %v1091_v43 = vshrl.u32 %v4004_v11, 16 }
 0x181   : > { %v1337_v0 = vrot.slane %v1323_v18, %v3542_v28  ;;  %v2294_v49 = vpop.permute.xlu0 %2293  ;;  %1118 = vrot.lane.b32.xlu1 %v1102_v23, %s3228_s11  ;;  %v1096_v26 = vpack.i.b16 %v4019_v4, %v4026_v9  ;;  %v4043_v47 = vrot.slane %v1322_v21, %v3542_v28  ;;  %v1104_v6 = vshrl.u32 %v1085_v1, 16 }
 0x182   : > { %v2296_v35 = vpop.permute.xlu1 %2295  ;;  %v1108_v58 = vpack.i.b16 %v4031_v62, %v4039_v34  ;;  %v1093_v60 = vpack.i.b16 %v1092_v7, %v1091_v43  ;;  %v4053_v8 = vrot.slane %v1288_v12, %v3542_v28  ;;  %v4060_v13 = vcombine.high %v1303_v41, %v4522_v25 }
 0x183   : > { %v1354_v50 = vpack.i.b16 %v1337_v0, %v1303_v41  ;;  %v4050_v31 = vcombine.high %v1337_v0, %v4522_v25  ;;  %v1103_v15 = vshrl.u32 %v1051_v37, 16  ;;  %v1090_v32 = vpack.i.b16 %v4009_v38, %v4004_v11 }
 0x184   : > { %v1342_v33 = vpack.i.b16 %v4043_v47, %v4053_v8  ;;  %v1344_v46 = vshrl.u32 %v4043_v47, 16  ;;  %v1343_v51 = vshrl.u32 %v4053_v8, 16  ;;  %v1338_v22 = vcombine.high %v4043_v47, %v4522_v25 }
 0x185   : > { %v4034_v24 = vpop.permute.xlu0 %2490  ;;  %1114 = vrot.lane.b32.xlu1 %v1096_v26, %s3229_s14  ;;  %1370 = vrot.lane.b32.xlu0 %v1354_v50, %s3228_s11  ;;  %v1360_v42 = vpack.i.b16 %v4050_v31, %v4060_v13  ;;  %v1105_v44 = vpack.i.b16 %v1104_v6, %v1103_v15  ;;  %v1304_v16 = vcombine.high %v4053_v8, %v4522_v25  ;;  %v1356_v37 = vshrl.u32 %v1337_v0, 16 }
 0x186   : > { %v4045_v52 = vpop.permute.xlu1 %2492  ;;  %v1345_v53 = vpack.i.b16 %v1344_v46, %v1343_v51  ;;  %v2309_v1 = vcombine.low %v3987_v54, %v2294_v49  ;;  %v2343_v45 = vcombine.low %v3989_v55, %v2296_v35  ;;  %v1355_v18 = vshrl.u32 %v1303_v41, 16 }
 0x187   : > { %v1348_v36 = vpack.i.b16 %v1338_v22, %v1304_v16  ;;  %v1098_v7 = vshrl.u32 %v4019_v4, 16  ;;  %v1362_v51 = vshrl.u32 %v4050_v31, 16 }
 0x188   : > { %v1357_v50 = vpack.i.b16 %v1356_v37, %v1355_v18  ;;  %v2316_v12 = vrot.slane %v2309_v1, %v3539_v27  ;;  %v2350_v55 = vrot.slane %v2343_v45, %v3539_v27  ;;  %v1109_v45 = vshrl.u32 %v4039_v34, 16 }
 0x189   : > { %v4055_v10 = vpop.permute.xlu0 %2494  ;;  %1122 = vrot.lane.b32.xlu1 %v1108_v58, %s3232_s17  ;;  %1112 = vrot.lane.b32.xlu0 %v1093_v60, %s3227_s30  ;;  %v1350_v58 = vshrl.u32 %v1338_v22, 16 }
 0x18a   : > { %v2497_v19 = vpop.permute.xlu1 %2496 }
 0x18b   : > { %v2544_v0 = vcombine.low %v3995_v57, %v2497_v19 }
 0x18d   : > { %v4069_v48 = vpop.permute.xlu0 %1690  ;;  %1374 = vrot.lane.b32.xlu1 %v1360_v42, %s3232_s17  ;;  %1120 = vrot.lane.b32.xlu0 %v1105_v44, %s3231_s16  ;;  %v4103_v19 = vrot.slane %v2544_v0, %v3539_v27  ;;  %v1349_v44 = vshrl.u32 %v1304_v16, 16 }
 0x18e   : > { %v4074_v14 = vpop.permute.xlu1 %1692 }
 0x18f   : > { %v1351_v22 = vpack.i.b16 %v1350_v58, %v1349_v44 }
 0x191   : > { %v4078_v61 = vpop.permute.xlu0 %1891  ;;  %1364 = vrot.lane.b32.xlu0 %v1345_v53, %s3227_s30 }
 0x192   : > { %v4083_v30 = vpop.permute.xlu1 %1893 }
 0x195   : > { %v2298_v63 = vpop.permute.xlu0 %2297  ;;  %1366 = vrot.lane.b32.xlu0 %v1348_v36, %s3229_s14 }
 0x196   : > { %v2317_v23 = vcombine.low %v4013_v3, %v2298_v63  ;;  %v2300_v21 = vpop.permute.xlu1 %2299  ;;  %v1097_v3 = vshrl.u32 %v4026_v9, 16 }
 0x197   : > { %v2351_v26 = vcombine.low %v4015_v5, %v2300_v21  ;;  %v2510_v5 = vcombine.low %v3993_v56, %v4055_v10 }
 0x198   : > { %v2324_v54 = vrot.slane %v2317_v23, %v3539_v27  ;;  %v1099_v15 = vpack.i.b16 %v1098_v7, %v1097_v3 }
 0x199   : > { %v2358_v49 = vrot.slane %v2351_v26, %v3539_v27  ;;  %v2499_v35 = vpop.permute.xlu0 %2498  ;;  %1372 = vrot.lane.b32.xlu0 %v1357_v50, %s3231_s16  ;;  %v4121_v16 = vrot.slane %v2510_v5, %v3539_v27 }
 0x19a   : > { %v2326_v41 = vcombine.high %v2316_v12, %v2324_v54  ;;  %v2518_v4 = vcombine.low %v4034_v24, %v2499_v35  ;;  %v2501_v43 = vpop.permute.xlu1 %2500  ;;  %v2325_v42 = vcombine.low %v2316_v12, %v2324_v54 }
 0x19b   : > { %v2359_v57 = vcombine.low %v2350_v55, %v2358_v49  ;;  %v2360_v60 = vcombine.high %v2350_v55, %v2358_v49  ;;  %v2552_v6 = vcombine.low %v4045_v52, %v2501_v43  ;;  %v1110_v52 = vshrl.u32 %v4031_v62, 16 }
 0x19c   : > { %v4106_v9 = vrot.slane %v2326_v41, %v3542_v28  ;;  %v4112_v24 = vrot.slane %v2518_v4, %v3539_v27  ;;  %v1361_v62 = vshrl.u32 %v4060_v13, 16  ;;  %v4133_v31 = vrot.slane %v2325_v42, %v3542_v28 }
 0x19d   : > { %v4109_v56 = vrot.slane %v2360_v60, %v3542_v28  ;;  %v4115_v10 = vrot.slane %v2552_v6, %v3539_v27  ;;  %v1695_v46 = vpop.permute.xlu0 %1694  ;;  %1116 = vrot.lane.b32.xlu0 %v1099_v15, %s3233_s18  ;;  %v4124_v36 = vrot.slane %v2359_v57, %v3542_v28  ;;  %v1111_v21 = vpack.i.b16 %v1110_v52, %v1109_v45 }
 0x19e   : > { %v1697_v53 = vpop.permute.xlu1 %1696  ;;  %v2526_v63 = vcombine.low %v4121_v16, %v4112_v24  ;;  %v1363_v50 = vpack.i.b16 %v1362_v51, %v1361_v62  ;;  %v2380_v0 = vshrl.u32 %v4133_v31, 16  ;;  %v4155_v54 = vcombine.high %v4133_v31, %v4522_v25 }
 0x19f   : > { %v2560_v37 = vcombine.low %v4103_v19, %v4115_v10  ;;  %v2391_v1 = vpack.i.b16 %v4109_v56, %v4106_v9  ;;  %v2381_v34 = vshrl.u32 %v4124_v36, 16  ;;  %v4145_v13 = vcombine.high %v4124_v36, %v4522_v25 }
 0x1a0   : > { %v4148_v7 = vrot.slane %v2526_v63, %v3542_v28  ;;  %v2393_v3 = vshrl.u32 %v4109_v56, 16  ;;  %v2392_v4 = vshrl.u32 %v4106_v9, 16  ;;  %v2379_v57 = vpack.i.b16 %v4124_v36, %v4133_v31 }
 0x1a1   : > { %v1699_v18 = vpop.permute.xlu0 %1698  ;;  %2407 = vrot.lane.b32.xlu1 %v2391_v1, %s3228_s11  ;;  %1368 = vrot.lane.b32.xlu0 %v1351_v22, %s3233_s18  ;;  %v4140_v26 = vrot.slane %v2560_v37, %v3542_v28  ;;  %v2382_v49 = vpack.i.b16 %v2381_v34, %v2380_v0  ;;  %v2385_v35 = vpack.i.b16 %v4145_v13, %v4155_v54 }
 0x1a2   : > { %v1701_v23 = vpop.permute.xlu1 %1700  ;;  %v2581_v43 = vshrl.u32 %v4148_v7, 16  ;;  %v2394_v6 = vpack.i.b16 %v2393_v3, %v2392_v4  ;;  %v1714_v44 = vcombine.low %v4069_v48, %v1699_v18  ;;  %v4179_v22 = vcombine.high %v4148_v7, %v4522_v25 }
 0x1a3   : > { %v2582_v5 = vshrl.u32 %v4140_v26, 16  ;;  %v2580_v60 = vpack.i.b16 %v4140_v26, %v4148_v7  ;;  %v4171_v42 = vcombine.high %v4140_v26, %v4522_v25  ;;  %v1748_v52 = vcombine.low %v4074_v14, %v1701_v23  ;;  %v3147_v26 = vld [vmem:[%s4498_s2 + $0x38] sm:$0xff]  }
 0x1a4   : > { %v1721_v63 = vrot.slane %v1714_v44, %v3539_v27 }
 0x1a5   : > { %v1896_v12 = vpop.permute.xlu0 %1895  ;;  %1124 = vrot.lane.b32.xlu1 %v1111_v21, %s3234_s9  ;;  %1376 = vrot.lane.b32.xlu0 %v1363_v50, %s3234_s9  ;;  %v2583_v15 = vpack.i.b16 %v2582_v5, %v2581_v43  ;;  %v2586_v62 = vpack.i.b16 %v4171_v42, %v4179_v22  ;;  %v1755_v23 = vrot.slane %v1748_v52, %v3539_v27 }
 0x1a6   : > { %v1898_v55 = vpop.permute.xlu1 %1897 }
 0x1a9   : > { %v1900_v41 = vpop.permute.xlu0 %1899  ;;  %2401 = vrot.lane.b32.xlu1 %v2382_v49, %s3227_s30  ;;  %2403 = vrot.lane.b32.xlu0 %v2385_v35, %s3229_s14 }
 0x1aa   : > { %v1902_v58 = vpop.permute.xlu1 %1901  ;;  %v1915_v48 = vcombine.low %v4078_v61, %v1900_v41 }
 0x1ab   : > { %v1949_v14 = vcombine.low %v4083_v30, %v1902_v58 }
 0x1ac   : > { %v1922_v61 = vrot.slane %v1915_v48, %v3539_v27  ;;  %v2387_v48 = vshrl.u32 %v4145_v13, 16 }
 0x1ad   : > { %v1703_v51 = vpop.permute.xlu0 %1702  ;;  %2409 = vrot.lane.b32.xlu1 %v2394_v6, %s3231_s16  ;;  %2602 = vrot.lane.b32.xlu0 %v2583_v15, %s3227_s30  ;;  %v1956_v30 = vrot.slane %v1949_v14, %v3539_v27 }
 0x1ae   : > { %v1722_v37 = vcombine.low %v1695_v46, %v1703_v51  ;;  %v1705_v1 = vpop.permute.xlu1 %1704 }
 0x1af   : > { %v1756_v45 = vcombine.low %v1697_v53, %v1705_v1 }
 0x1b0   : > { %v1729_v18 = vrot.slane %v1722_v37, %v3539_v27 }
 0x1b1   : > { %v1763_v21 = vrot.slane %v1756_v45, %v3539_v27  ;;  %v1904_v50 = vpop.permute.xlu0 %1903  ;;  %2604 = vrot.lane.b32.xlu0 %v2586_v62, %s3229_s14 }
 0x1b2   : > { %v1730_v46 = vcombine.low %v1721_v63, %v1729_v18  ;;  %v1731_v53 = vcombine.high %v1721_v63, %v1729_v18  ;;  %v1923_v34 = vcombine.low %v1896_v12, %v1904_v50  ;;  %v1906_v0 = vpop.permute.xlu1 %1905  ;;  %v2386_v50 = vshrl.u32 %v4155_v54, 16 }
 0x1b3   : > { %v1764_v49 = vcombine.low %v1755_v23, %v1763_v21  ;;  %v1765_v35 = vcombine.high %v1755_v23, %v1763_v21  ;;  %v1957_v3 = vcombine.low %v1898_v55, %v1906_v0 }
 0x1b4   : > { %v4193_v5 = vrot.slane %v1730_v46, %v3542_v28  ;;  %v1930_v41 = vrot.slane %v1923_v34, %v3539_v27  ;;  %v1745_v4 = vrot.slane %v1731_v53, %v3542_v28  ;;  %v2388_v0 = vpack.i.b16 %v2387_v48, %v2386_v50 }
 0x1b5   : > { %v4198_v43 = vrot.slane %v1764_v49, %v3542_v28  ;;  %v1779_v12 = vrot.slane %v1765_v35, %v3542_v28  ;;  %v1964_v58 = vrot.slane %v1957_v3, %v3539_v27  ;;  %v951_v6 = vpop.permute.xlu0 %950 }
 0x1b6   : > { %v1932_v55 = vcombine.high %v1922_v61, %v1930_v41  ;;  %v957_v15 = vpop.permute.xlu1 %956  ;;  %v1785_v63 = vshrl.u32 %v4193_v5, 16  ;;  %v1931_v14 = vcombine.low %v1922_v61, %v1930_v41  ;;  %v1746_v13 = vcombine.high %v4193_v5, %v4522_v25 }
 0x1b7   : > { %v1966_v44 = vcombine.high %v1956_v30, %v1964_v58  ;;  %v1796_v52 = vpack.i.b16 %v1779_v12, %v1745_v4  ;;  %v1786_v51 = vshrl.u32 %v4198_v43, 16  ;;  %v1965_v1 = vcombine.low %v1956_v30, %v1964_v58 }
 0x1b8   : > { %v4204_v37 = vrot.slane %v1932_v55, %v3542_v28  ;;  %v4216_v21 = vcombine.high %v4198_v43, %v4522_v25  ;;  %v4229_v49 = vrot.slane %v1931_v14, %v3542_v28  ;;  %v4233_v35 = vcombine.high %v1779_v12, %v4522_v25 }
 0x1b9   : > { %v4207_v45 = vrot.slane %v1966_v44, %v3542_v28  ;;  %v953_v62 = vpop.permute.xlu0 %952  ;;  %1812 = vrot.lane.b32.xlu0 %v1796_v52, %s3228_s11  ;;  %v1787_v23 = vpack.i.b16 %v1786_v51, %v1785_v63  ;;  %v4220_v46 = vrot.slane %v1965_v1, %v3542_v28  ;;  %v1798_v3 = vshrl.u32 %v1779_v12, 16 }
 0x1ba   : > { %v959_v27 = vpop.permute.xlu1 %958  ;;  %v1790_v54 = vpack.i.b16 %v4216_v21, %v1746_v13  ;;  %v4523_v61 = vpack.i.b16 %v3671_v40, %v3668_v39  ;;  %v1747_v58 = vcombine.high %v1745_v4, %v4522_v25  ;;  %v1797_v55 = vshrl.u32 %v1745_v4, 16 }
 0x1bb   : > { %v1997_v18 = vpack.i.b16 %v4207_v45, %v4204_v37  ;;  %v1784_v44 = vpack.i.b16 %v4198_v43, %v4193_v5  ;;  %v1985_v12 = vpack.i.b16 %v4220_v46, %v4229_v49  ;;  %v4524_v40 = vpack.i.b16 %v3759_v2, %v3756_v29 }
 0x1bc   : > { %v967_v30 = vsel %vm964_vm15, %v4523_v61, %v951_v6  ;;  %v1802_v4 = vpack.i.b16 %v4233_v35, %v1747_v58  ;;  %v1799_v1 = vpack.i.b16 %v1798_v3, %v1797_v55  ;;  %v1987_v63 = vshrl.u32 %v4220_v46, 16 }
 0x1bd   : > { %v4222_v53 = vpop.permute.xlu0 %2206  ;;  %2013 = vrot.lane.b32.xlu1 %v1997_v18, %s3228_s11  ;;  %1806 = vrot.lane.b32.xlu0 %v1787_v23, %s3227_s30  ;;  %v970_v39 = vsel %vm968_vm0, %v967_v30, %v953_v62  ;;  %v1981_v62 = vcombine.high %v4220_v46, %v4522_v25  ;;  %v1986_v2 = vshrl.u32 %v4229_v49, 16  ;;  %v1999_v3 = vshrl.u32 %v4207_v45, 16 }
 0x1be   : > { %v961_v34 = vpop.permute.xlu1 %960 }
 0x1c1   : > { %v2201_v41 = vpop.permute.xlu0 %2200  ;;  %2405 = vrot.lane.b32.xlu1 %v2388_v0, %s3233_s18  ;;  %1808 = vrot.lane.b32.xlu0 %v1790_v54, %s3229_s14  ;;  %v1988_v54 = vpack.i.b16 %v1987_v63, %v1986_v2 }
 0x1c2   : > { %v2216_v6 = vsel %vm964_vm15, %v4524_v40, %v2201_v41  ;;  %v955_v52 = vpop.permute.xlu1 %954  ;;  %v3140_v41 = vld [vmem:[%s4498_s2] sm:$0xff]   ;;  %v1791_v40 = vshrl.u32 %v1746_v13, 16 }
 0x1c3   : > { %v973_v51 = vsel %vm971_vm1, %v970_v39, %v955_v52 }
 0x1c4   : > { %v976_v48 = vsel %vm974_vm2, %v973_v51, %v957_v15  ;;  %v1947_v15 = vcombine.high %v4229_v49, %v4522_v25  ;;  %v1804_v51 = vshrl.u32 %v4233_v35, 16 }
 0x1c5   : > { %v2203_v14 = vpop.permute.xlu0 %2202  ;;  %1816 = vrot.lane.b32.xlu1 %v1802_v4, %s3232_s17  ;;  %1814 = vrot.lane.b32.xlu0 %v1799_v1, %s3231_s16  ;;  %v979_v29 = vsel %vm977_vm3, %v976_v48, %v959_v27  ;;  %v1792_v27 = vshrl.u32 %v4216_v21, 16  ;;  %v1982_v21 = vcombine.high %v4207_v45, %v4522_v25  ;;  %v1948_v1 = vcombine.high %v4204_v37, %v4522_v25 }
 0x1c6   : > { %v2218_v18 = vsel %vm968_vm0, %v2216_v6, %v2203_v14  ;;  %v963_v23 = vpop.permute.xlu1 %962  ;;  %v982_v50 = vsel %vm980_vm4, %v979_v29, %v961_v34  ;;  %v1991_v30 = vpack.i.b16 %v1981_v62, %v1947_v15  ;;  %v1998_v34 = vshrl.u32 %v4204_v37, 16 }
 0x1c7   : > { %v985_v0 = vsel %vm983_vm5, %v982_v50, %v963_v23  ;;  %v1793_v52 = vpack.i.b16 %v1792_v27, %v1791_v40  ;;  %v1803_v45 = vshrl.u32 %v1747_v58, 16  ;;  %v2003_v48 = vpack.i.b16 %v1982_v21, %v1948_v1 }
 0x1c8   : > { %v1205_v61 = vsel %vm1153_vm6, %v985_v0, 0  ;;  %v2000_v6 = vpack.i.b16 %v1999_v3, %v1998_v34  ;;  %v1993_v14 = vshrl.u32 %v1981_v62, 16  ;;  %v2561_v29 = vcombine.high %v4103_v19, %v4115_v10 }
 0x1c9   : > { %v2209_v55 = vpop.permute.xlu0 %2208  ;;  %3001 = vmatpush3.bf16.msra.mxu1 %v1205_v61  ;;  %2007 = vrot.lane.b32.xlu1 %v1988_v54, %s3227_s30  ;;  %v1805_v37 = vpack.i.b16 %v1804_v51, %v1803_v45  ;;  %v2588_v23 = vshrl.u32 %v4171_v42, 16  ;;  %v1992_v0 = vshrl.u32 %v1947_v15, 16  ;;  %v2527_v58 = vcombine.high %v4121_v16, %v4112_v24 }
 0x1ca   : > { %2009 = vrot.lane.b32.xlu0 %v1991_v30, %s3229_s14  ;;  %v2211_v39 = vpop.permute.xlu1 %2210  ;;  %3012 = vmatprep.subr.bf16.mxu1 %v3230_v17  ;;  %v2587_v10 = vshrl.u32 %v4179_v22, 16  ;;  %v2005_v54 = vshrl.u32 %v1982_v21, 16  ;;  %v2575_v42 = vrot.slane %v2561_v29, %v3542_v28  ;;  %v2004_v61 = vshrl.u32 %v1948_v1, 16 }
 0x1cb   : > { %v1994_v62 = vpack.i.b16 %v1993_v14, %v1992_v0  ;;  %v2541_v15 = vrot.slane %v2527_v58, %v3542_v28  ;;  %v2376_v30 = vcombine.high %v4109_v56, %v4522_v25  ;;  %v4525_v40 = vpack.i.b16 %v3829_v59, %v3826_v20 }
 0x1cc   : > { %3003 = vmatmul.mubr.msk.bf16.vlgmr.msra.gmra.mrb[0].mxu1 %vm1149_vm7, %v3140_v41  ;;  %v2589_v3 = vpack.i.b16 %v2588_v23, %v2587_v10  ;;  %v2006_v16 = vpack.i.b16 %v2005_v54, %v2004_v61  ;;  %v2577_v27 = vcombine.high %v2575_v42, %v4522_v25  ;;  %v2594_v41 = vshrl.u32 %v2575_v42, 16  ;;  %v2688_v23 = vld [vmem:[%s4499_s3 + $0x8] sm:$0xff] }
 0x1cd   : > { %v2205_v4 = vpop.permute.xlu0 %2204  ;;  %2015 = vrot.lane.b32.xlu1 %v2000_v6, %s3231_s16  ;;  %3014 = vmatprep.mubr.msk.bf16.mxu1 %vm3235_vm14, %v3230_v17  ;;  %v2592_v22 = vpack.i.b16 %v2575_v42, %v2541_v15  ;;  %v2543_v34 = vcombine.high %v2541_v15, %v4522_v25 }
 0x1ce   : > { %v2220_v13 = vsel %vm971_vm1, %v2218_v18, %v2205_v4  ;;  %1810 = vrot.lane.b32.xlu0 %v1793_v52, %s3233_s18  ;;  %v1612_v63 = vpop.permute.xlu1 %1611  ;;  %v2399_v52 = vshrl.u32 %v2376_v30, 16  ;;  %v2600_v4 = vshrl.u32 %v2577_v27, 16 }
 0x1cf   : > { %v2222_v35 = vsel %vm974_vm2, %v2220_v13, %v4222_v53  ;;  %v2599_v13 = vshrl.u32 %v2543_v34, 16 }
 0x1d0   : > { %v2224_v2 = vsel %vm977_vm3, %v2222_v35, %v2209_v55  ;;  %v2342_v55 = vcombine.high %v4106_v9, %v4522_v25 }
 0x1d1   : > { %v2226_v50 = vsel %vm980_vm4, %v2224_v2, %v2211_v39  ;;  %v2213_v18 = vpop.permute.xlu0 %2212  ;;  %2017 = vrot.lane.b32.xlu1 %v2003_v48, %s3232_s17  ;;  %v2593_v39 = vshrl.u32 %v2541_v15, 16  ;;  %v2601_v59 = vpack.i.b16 %v2600_v4, %v2599_v13 }
 0x1d2   : > { %v4298_v53 = vsel %vm983_vm5, %v2226_v50, %v2213_v18  ;;  %1818 = vrot.lane.b32.xlu0 %v1805_v37, %s3234_s9  ;;  %v1606_v19 = vpop.permute.xlu1 %1605  ;;  %v2397_v21 = vpack.i.b16 %v2376_v30, %v2342_v55  ;;  %v2398_v1 = vshrl.u32 %v2342_v55, 16  ;;  %v2598_v37 = vpack.i.b16 %v2577_v27, %v2543_v34  ;;  %v2687_v18 = vld [vmem:[%s4499_s3] sm:$0xff] }
 0x1d3   : > { %v1621_v56 = vsel %vm964_vm15, %v4525_v40, %v1606_v19  ;;  %v2595_v51 = vpack.i.b16 %v2594_v41, %v2593_v39 }
 0x1d4   : > { %v2400_v35 = vpack.i.b16 %v2399_v52, %v2398_v1 }
 0x1d5   : > { %2011 = vrot.lane.b32.xlu1 %v1994_v62, %s3233_s18  ;;  %v1608_v6 = vpop.permute.xlu0 %1607 }
 0x1d6   : > { %2606 = vrot.lane.b32.xlu0 %v2589_v3, %s3233_s18  ;;  %v1614_v24 = vpop.permute.xlu1 %1613  ;;  %v1623_v9 = vsel %vm968_vm0, %v1621_v56, %v1608_v6  ;;  %s2901_s18 = sshll.u32 %s408_s19, 3 }
 0x1d9   : > { %2019 = vrot.lane.b32.xlu1 %v2006_v16, %s3234_s9 }
 0x1da   : > { %2608 = vrot.lane.b32.xlu0 %v2592_v22, %s3228_s11  ;;  %v1616_v28 = vpop.permute.xlu1 %1615 }
 0x1dd   : > { %2411 = vrot.lane.b32.xlu1 %v2397_v21, %s3232_s17  ;;  %v3141_v21 = vld [vmem:[%s4498_s2 + $0x8] sm:$0xff]  }
 0x1de   : > { %2610 = vrot.lane.b32.xlu0 %v2595_v51, %s3231_s16  ;;  %v1610_v25 = vpop.permute.xlu1 %1609 }
 0x1df   : > { %v1625_v45 = vsel %vm971_vm1, %v1623_v9, %v1610_v25  ;;  %v3142_v9 = vld [vmem:[%s4498_s2 + $0x10] sm:$0xff]  }
 0x1e0   : > { %v1627_v20 = vsel %vm974_vm2, %v1625_v45, %v1612_v63  ;;  %v3143_v63 = vld [vmem:[%s4498_s2 + $0x18] sm:$0xff]  }
 0x1e1   : > { %2413 = vrot.lane.b32.xlu1 %v2400_v35, %s3234_s9  ;;  %v1629_v48 = vsel %vm977_vm3, %v1627_v20, %v1614_v24 }
 0x1e2   : > { %2614 = vrot.lane.b32.xlu0 %v2601_v59, %s3234_s9  ;;  %v1618_v14 = vpop.permute.xlu1 %1617  ;;  %v1631_v29 = vsel %vm980_vm4, %v1629_v48, %v1616_v28  ;;  %s454_s9 = scalar_lea.vmem [#allocation5], %s2901_s18 }
 0x1e3   : > { %v1633_v2 = vsel %vm983_vm5, %v1631_v29, %v1618_v14 }
 0x1e4   : > { %v1645_v50 = vsel %vm1153_vm6, %v1633_v2, 0 }
 0x1e5   : > { %2612 = vrot.lane.b32.xlu1 %v2598_v37, %s3232_s17  ;;  %3013 = vmatpush3.bf16.msra.mxu1 %v1645_v50 }
 0x1e6   : > { %2696 = vperm.xlu0 %3136, %v2688_v23   ;;  %3024 = vmatprep.subr.bf16.mxu1 %v3230_v17 }
 0x1e8   : > { %3015 = vmatmul.mubr.msk.bf16.vlgmr.msra.gmra.mrb[4].mxu1 %vm1149_vm7, %v3143_v63 }
 0x1e9   : > { %2691 = vperm.xlu1 %3137, %v2687_v18   ;;  %3026 = vmatprep.mubr.msk.bf16.mxu1 %vm3235_vm14, %v3230_v17 }
 0x1f3   : > { %v1119_v19 = vpop.permute.xlu1 %1118 }
 0x1f7   : > { %v1371_v0 = vpop.permute.xlu0 %1370  ;;  %v1115_v62 = vpop.permute.xlu1 %1114 }
 0x1fb   : > { %v1113_v58 = vpop.permute.xlu0 %1112  ;;  %v1123_v3 = vpop.permute.xlu1 %1122 }
 0x1fc   : > { %v1128_v15 = vsel %vm964_vm15, %v1090_v32, %v1113_v58 }
 0x1fd   : > { %v1130_v16 = vsel %vm968_vm0, %v1128_v15, %v1115_v62 }
 0x1ff   : > { %v1121_v10 = vpop.permute.xlu0 %1120  ;;  %v1375_v24 = vpop.permute.xlu1 %1374 }
 0x203   : > { %v1365_v54 = vpop.permute.xlu0 %1364 }
 0x204   : > { %v1380_v41 = vsel %vm964_vm15, %v1342_v33, %v1365_v54 }
 0x207   : > { %v1367_v42 = vpop.permute.xlu0 %1366 }
 0x208   : > { %v1382_v55 = vsel %vm968_vm0, %v1380_v41, %v1367_v42 }
 0x20b   : > { %v1373_v61 = vpop.permute.xlu0 %1372 }
 0x20f   : > { %v1117_v30 = vpop.permute.xlu0 %1116 }
 0x210   : > { %v1132_v27 = vsel %vm971_vm1, %v1130_v16, %v1117_v30  ;;  %v2240_v16 = vsel %vm1153_vm6, %v4298_v53, 0 }
 0x211   : > { %v1134_v22 = vsel %vm974_vm2, %v1132_v27, %v1119_v19 }
 0x212   : > { %v1136_v32 = vsel %vm977_vm3, %v1134_v22, %v1121_v10 }
 0x213   : > { %v4355_v34 = vpop.permute.xlu1 %2407  ;;  %v1369_v11 = vpop.permute.xlu0 %1368  ;;  %v1138_v47 = vsel %vm980_vm4, %v1136_v32, %v1123_v3  ;;  %v3144_v3 = vld [vmem:[%s4498_s2 + $0x20] sm:$0xff]  }
 0x214   : > { %v1384_v38 = vsel %vm971_vm1, %v1382_v55, %v1369_v11  ;;  %v3145_v55 = vld [vmem:[%s4498_s2 + $0x28] sm:$0xff]   ;;  %v3146_v11 = vld [vmem:[%s4498_s2 + $0x30] sm:$0xff]  }
 0x215   : > { %v1386_v28 = vsel %vm974_vm2, %v1384_v38, %v1371_v0 }
 0x216   : > { %v1388_v39 = vsel %vm977_vm3, %v1386_v28, %v1373_v61 }
 0x217   : > { %v1125_v40 = vpop.permute.xlu1 %1124  ;;  %v1390_v56 = vsel %vm980_vm4, %v1388_v39, %v1375_v24  ;;  %v1377_v6 = vpop.permute.xlu0 %1376 }
 0x218   : > { %v1140_v8 = vsel %vm983_vm5, %v1138_v47, %v1125_v40  ;;  %v1392_v52 = vsel %vm983_vm5, %v1390_v56, %v1377_v6 }
 0x219   : > { %v1154_v33 = vsel %vm1153_vm6, %v1140_v8, 0  ;;  %v1404_v4 = vsel %vm1153_vm6, %v1392_v52, 0 }
 0x21a   : > { %2995 = vmatpush3.bf16.msra.mxu0 %v1154_v33 }
 0x21b   : > { %v2404_v51 = vpop.permute.xlu0 %2403  ;;  %3006 = vmatprep.subr.bf16.mxu0 %v3230_v17  ;;  %v2402_v25 = vpop.permute.xlu1 %2401 }
 0x21c   : > { %v2417_v46 = vsel %vm964_vm15, %v2379_v57, %v2402_v25 }
 0x21d   : > { %2997 = vmatmul.mubr.msk.bf16.vlgmr.msra.gmra.mrb[0].mxu0 %vm1149_vm7, %v3141_v21  ;;  %v2419_v27 = vsel %vm968_vm0, %v2417_v46, %v2404_v51 }
 0x21e   : > { %3007 = vmatpush3.bf16.msra.mxu0 %v1404_v4  ;;  %3008 = vmatprep.mubr.msk.bf16.mxu0 %vm3235_vm14, %v3230_v17 }
 0x21f   : > { %3018 = vmatprep.subr.bf16.mxu0 %v3230_v17  ;;  %v4375_v1 = vpop.permute.xlu0 %2602  ;;  %v2410_v45 = vpop.permute.xlu1 %2409 }
 0x220   : > { %v2618_v40 = vsel %vm964_vm15, %v2580_v60, %v4375_v1  ;;  %v3148_v1 = vld [vmem:[%s4498_s2 + $0x40] sm:$0xff]  }
 0x223   : > { %v2605_v13 = vpop.permute.xlu0 %2604 }
 0x224   : > { %v2620_v6 = vsel %vm968_vm0, %v2618_v40, %v2605_v13 }
 0x225   : > { %3009 = vmatmul.mubr.msk.bf16.vlgmr.msra.gmra.mrb[4].mxu0 %vm1149_vm7, %v3142_v9 }
 0x226   : > { %3020 = vmatprep.mubr.msk.bf16.mxu0 %vm3235_vm14, %v3230_v17 }
 0x22b   : > { %v1813_v35 = vpop.permute.xlu0 %1812 }
 0x22f   : > { %v2014_v20 = vpop.permute.xlu1 %2013  ;;  %v1807_v59 = vpop.permute.xlu0 %1806 }
 0x230   : > { %v1822_v50 = vsel %vm964_vm15, %v1784_v44, %v1807_v59 }
 0x233   : > { %v2406_v48 = vpop.permute.xlu1 %2405  ;;  %v1809_v14 = vpop.permute.xlu0 %1808 }
 0x234   : > { %v1824_v18 = vsel %vm968_vm0, %v1822_v50, %v1809_v14  ;;  %v2421_v57 = vsel %vm971_vm1, %v2419_v27, %v2406_v48 }
 0x235   : > { %v2423_v38 = vsel %vm974_vm2, %v2421_v57, %v4355_v34 }
 0x236   : > { %v2425_v28 = vsel %vm977_vm3, %v2423_v38, %v2410_v45 }
 0x237   : > { %v1817_v29 = vpop.permute.xlu1 %1816  ;;  %v1815_v2 = vpop.permute.xlu0 %1814 }
 0x23b   : > { %v2008_v37 = vpop.permute.xlu1 %2007 }
 0x23c   : > { %v2010_v23 = vpop.permute.xlu0 %2009  ;;  %v2023_v54 = vsel %vm964_vm15, %v1985_v12, %v2008_v37 }
 0x23d   : > { %v2025_v61 = vsel %vm968_vm0, %v2023_v54, %v2010_v23 }
 0x23f   : > { %v2016_v63 = vpop.permute.xlu1 %2015 }
 0x240   : > { %v1811_v0 = vpop.permute.xlu0 %1810 }
 0x241   : > { %v1826_v58 = vsel %vm971_vm1, %v1824_v18, %v1811_v0 }
 0x242   : > { %v1828_v19 = vsel %vm974_vm2, %v1826_v58, %v1813_v35 }
 0x243   : > { %v2018_v10 = vpop.permute.xlu1 %2017  ;;  %v1830_v62 = vsel %vm977_vm3, %v1828_v19, %v1815_v2 }
 0x244   : > { %v1832_v5 = vsel %vm980_vm4, %v1830_v62, %v1817_v29  ;;  %v1819_v43 = vpop.permute.xlu0 %1818 }
 0x245   : > { %v1834_v44 = vsel %vm983_vm5, %v1832_v5, %v1819_v43 }
 0x246   : > { %v1846_v42 = vsel %vm1153_vm6, %v1834_v44, 0 }
 0x247   : > { %3019 = vmatpush3.bf16.msra.mxu0 %v1846_v42  ;;  %v2012_v15 = vpop.permute.xlu1 %2011 }
 0x248   : > { %v2027_v49 = vsel %vm971_vm1, %v2025_v61, %v2012_v15  ;;  %v2607_v12 = vpop.permute.xlu0 %2606  ;;  %3030 = vmatprep.subr.bf16.mxu0 %v3230_v17 }
 0x249   : > { %v2029_v24 = vsel %vm974_vm2, %v2027_v49, %v2014_v20  ;;  %v2622_v8 = vsel %vm971_vm1, %v2620_v6, %v2607_v12 }
 0x24a   : > { %3021 = vmatmul.mubr.msk.bf16.vlgmr.msra.gmra.mrb[8].mxu0 %vm1149_vm7, %v3144_v3  ;;  %v2031_v30 = vsel %vm977_vm3, %v2029_v24, %v2016_v63 }
 0x24b   : > { %3031 = vmatpush3.bf16.msra.mxu0 %v2240_v16  ;;  %v2020_v36 = vpop.permute.xlu1 %2019  ;;  %v2033_v31 = vsel %vm980_vm4, %v2031_v30, %v2018_v10  ;;  %3032 = vmatprep.mubr.msk.bf16.mxu0 %vm3235_vm14, %v3230_v17 }
 0x24c   : > { %v2035_v22 = vsel %vm983_vm5, %v2033_v31, %v2020_v36  ;;  %v2609_v41 = vpop.permute.xlu0 %2608  ;;  %3042 = vmatprep.subr.bf16.mxu0 %v3230_v17 }
 0x24d   : > { %v2047_v53 = vsel %vm1153_vm6, %v2035_v22, 0  ;;  %v2624_v7 = vsel %vm974_vm2, %v2622_v8, %v2609_v41 }
 0x24e   : > { %3025 = vmatpush3.bf16.msra.mxu1 %v2047_v53 }
 0x24f   : > { %v2412_v32 = vpop.permute.xlu1 %2411  ;;  %3036 = vmatprep.subr.bf16.mxu1 %v3230_v17 }
 0x250   : > { %v2611_v39 = vpop.permute.xlu0 %2610  ;;  %v2427_v34 = vsel %vm980_vm4, %v2425_v28, %v2412_v32 }
 0x251   : > { %3027 = vmatmul.mubr.msk.bf16.vlgmr.msra.gmra.mrb[8].mxu1 %vm1149_vm7, %v3145_v55  ;;  %v2626_v60 = vsel %vm977_vm3, %v2624_v7, %v2611_v39 }
 0x252   : > { %3033 = vmatmul.mubr.msk.bf16.vlgmr.msra.gmra.mrb[12].mxu0 %vm1149_vm7, %v3146_v11  ;;  %3038 = vmatprep.mubr.msk.bf16.mxu1 %vm3235_vm14, %v3230_v17 }
 0x253   : > { %v2414_v56 = vpop.permute.xlu1 %2413  ;;  %3044 = vmatprep.mubr.msk.bf16.mxu0 %vm3235_vm14, %v3230_v17 }
 0x254   : > { %v2429_v47 = vsel %vm983_vm5, %v2427_v34, %v2414_v56  ;;  %v2615_v52 = vpop.permute.xlu0 %2614 }
 0x255   : > { %v2441_v33 = vsel %vm1153_vm6, %v2429_v47, 0 }
 0x256   : > { %3037 = vmatpush3.bf16.msra.mxu1 %v2441_v33 }
 0x257   : > { %v2613_v21 = vpop.permute.xlu1 %2612 }
 0x258   : > { %v2628_v17 = vsel %vm980_vm4, %v2626_v60, %v2613_v21 }
 0x259   : > { %v2630_v51 = vsel %vm983_vm5, %v2628_v17, %v2615_v52  ;;  %3039 = vmatmul.mubr.msk.bf16.vlgmr.msra.gmra.mrb[12].mxu1 %vm1149_vm7, %v3147_v26 }
 0x25a   : > { %v2642_v4 = vsel %vm1153_vm6, %v2630_v51, 0 }
 0x25b   : > { %3043 = vmatpush3.bf16.msra.mxu0 %v2642_v4 }
 0x25e   : > { %3045 = vmatmul.mubr.msk.bf16.vlgmr.msra.gmra.mrb[16].mxu0 %vm1149_vm7, %v3148_v1 }
 0x265   : > { %v2697_v47 = vpop.permute.xlu0 %2696 }
 0x268   : > { %v2692_v8 = vpop.permute.xlu1 %2691 }
 0x29f   : > { %v1241_v9 = vpop.f32.mrb[0].mxu1 }
 0x2a0   : > { %v3004_v25 = vpop.f32.mrb[1].mxu1 }
 0x2a1   : > { %v1244_v13 = vpop.f32.mrb[2].mxu1 }
 0x2a2   : > { %v3005_v45 = vpop.f32.mrb[3].mxu1 }
 0x2bb   : > { %v1681_v35 = vpop.f32.mrb[4].mxu1 }
 0x2bc   : > { %v3016_v20 = vpop.f32.mrb[5].mxu1 }
 0x2bd   : > { %v1684_v59 = vpop.f32.mrb[6].mxu1 }
 0x2be   : > { %v3017_v48 = vpop.f32.mrb[7].mxu1 }
 0x2f0   : > { %v1190_v14 = vpop.f32.mrb[0].mxu0 }
 0x2f1   : > { %v2998_v29 = vpop.f32.mrb[1].mxu0  ;;  %v1242_v2 = vadd.f32 %v1241_v9, %v1190_v14 }
 0x2f2   : > { %v1193_v37 = vpop.f32.mrb[2].mxu0 }
 0x2f3   : > { %v2999_v23 = vpop.f32.mrb[3].mxu0  ;;  %v1245_v50 = vadd.f32 %v1244_v13, %v1193_v37 }
 0x2f8   : > { %v1440_v63 = vpop.f32.mrb[4].mxu0 }
 0x2f9   : > { %v1447_v18 = vadd.f32 %v1440_v63, %v1242_v2  ;;  %v3010_v0 = vpop.f32.mrb[5].mxu0 }
 0x2fa   : > { %v1443_v58 = vpop.f32.mrb[6].mxu0 }
 0x2fb   : > { %v1448_v19 = vadd.f32 %v1443_v58, %v1245_v50  ;;  %v1688_v10 = vadd.f32 %v1681_v35, %v1447_v18  ;;  %v3011_v62 = vpop.f32.mrb[7].mxu0 }
 0x2fd   : > { %v1689_v54 = vadd.f32 %v1684_v59, %v1448_v19 }
 0x31d   : > { %v1882_v5 = vpop.f32.mrb[8].mxu0 }
 0x31e   : > { %v1889_v43 = vadd.f32 %v1882_v5, %v1688_v10  ;;  %v3022_v44 = vpop.f32.mrb[9].mxu0 }
 0x31f   : > { %v1885_v42 = vpop.f32.mrb[10].mxu0 }
 0x320   : > { %v1890_v3 = vadd.f32 %v1885_v42, %v1689_v54  ;;  %v3023_v61 = vpop.f32.mrb[11].mxu0 }
 0x324   : > { %v2083_v15 = vpop.f32.mrb[8].mxu1 }
 0x325   : > { %v2090_v46 = vadd.f32 %v2083_v15, %v1889_v43  ;;  %v3028_v49 = vpop.f32.mrb[9].mxu1  ;;  %v2276_v12 = vpop.f32.mrb[12].mxu0 }
 0x326   : > { %v2086_v24 = vpop.f32.mrb[10].mxu1  ;;  %v3034_v16 = vpop.f32.mrb[13].mxu0 }
 0x327   : > { %v2091_v30 = vadd.f32 %v2086_v24, %v1890_v3  ;;  %v2283_v27 = vadd.f32 %v2276_v12, %v2090_v46  ;;  %v2279_v36 = vpop.f32.mrb[14].mxu0  ;;  %v3029_v31 = vpop.f32.mrb[11].mxu1 }
 0x328   : > { %v3035_v57 = vpop.f32.mrb[15].mxu0 }
 0x329   : > { %v2284_v22 = vadd.f32 %v2279_v36, %v2091_v30 }
 0x32c   : > { %v2477_v41 = vpop.f32.mrb[12].mxu1 }
 0x32d   : > { %v2484_v53 = vadd.f32 %v2477_v41, %v2283_v27  ;;  %v3040_v55 = vpop.f32.mrb[13].mxu1 }
 0x32e   : > { %v2480_v11 = vpop.f32.mrb[14].mxu1 }
 0x32f   : > { %v2485_v38 = vadd.f32 %v2480_v11, %v2284_v22  ;;  %v3041_v32 = vpop.f32.mrb[15].mxu1 }
 0x331   : > { %v2678_v28 = vpop.f32.mrb[16].mxu0 }
 0x332   : > { %v2685_v39 = vadd.f32 %v2678_v28, %v2484_v53  ;;  %v3046_v40 = vpop.f32.mrb[17].mxu0 }
 0x333   : > { %v2681_v34 = vpop.f32.mrb[18].mxu0 }
 0x334   : > { %v2686_v56 = vadd.f32 %v2681_v34, %v2485_v38  ;;  %v3047_v6 = vpop.f32.mrb[19].mxu0  ;;  %v2699_v33 = vadd.f32 %v2692_v8, %v2685_v39  ;;  %2717 = sbr.rel (!%p3354_p10) target bundleno = 835 (0x343), region = 130 }
 0x336   : > { %v2700_v26 = vadd.f32 %v2697_v47, %v2686_v56 }
 0x338   : > { %v2971_v7 = vpack.c.bf16 %v2700_v26, %v2699_v33 }
 0x33a   : > { %2972 = vst [vmem:[%s454_s9] sm:$0xff] %v2971_v7  }
 0x341   : > { %v2737_v60 = vld [vmem:[%s454_s9] sm:$0xf]  ;;  %v2739_v21 = vld [vmem:[%s454_s9 + $0x4] sm:$0xf] }
 0x342   : > { %2738 = vst [vmem:[%s2721_s8] sm:$0xf] %v2737_v60  ;;  %2740 = vst [vmem:[%s2721_s8 + $0x8] sm:$0xf] %v2739_v21 }
 0x343 PF: > { %s16_s29 = sadd.s32 1, %s3219_s29   ;;  %s4526_s20 = sld [smem:[#allocation6_spill]] }
 0x344   : > { %p13_p2 = scmp.ge.s32.totalorder %s16_s29, 6   ;;  %s4527_s21 = smov %s3191_s22 }
 0x345   : > { %s4528_s22 = smov %s3362_s12  ;;  %s4529_s23 = smov %s3199_s24 }
 0x346   : > { %s4530_s24 = smov %s3359_s7  ;;  %s4531_s25 = smov %s3211_s27 }
 0x347   : > { %s4532_s26 = smov %s3215_s28  ;;  %s4533_s27 = smov %s3322_s10 }
 0x348   :  { %15 = sbr.rel (!%p13_p2) target bundleno = 7 (0x7), region = 224 }
 0x349   : > { %s4534_s28 = smov %s4526_s20 }

// kernel: _lambda_.9
= control target key start
LH: loop header
LB: loop body
LE: loop exit
PB: predicated region body
PF: predicated region fallthrough
CT: control target
= control target key end

     0   :  { %s2445_s30 = smov 0   ;;  %s3204_s0 = inlined_call_operand.vmem [shape: bf16[2,16,256], index: 0, kind: input, shape index: {}]   ;;  %s3205_s1 = inlined_call_operand.vmem [shape: f32[4,16], index: 1, kind: input, shape index: {}]   ;;  %s3206_s2 = inlined_call_operand.vmem [shape: f32[16,4], index: 2, kind: input, shape index: {}]   ;;  %s3207_s3 = inlined_call_operand.vmem [shape: f32[16,1], index: 3, kind: input, shape index: {}]   ;;  %s3208_s4 = inlined_call_operand.vmem [shape: f32[16,1], index: 4, kind: input, shape index: {}]   ;;  %s3209_s5 = inlined_call_operand.vmem [shape: bf16[48,16], index: 5, kind: input, shape index: {}]   ;;  %s3210_s6 = inlined_call_operand.vmem [shape: f32[48,1], index: 6, kind: input, shape index: {}]   ;;  %s3211_s7 = inlined_call_operand.vmem [shape: bf16[16,16], index: 7, kind: input, shape index: {}]   ;;  %s3212_s8 = inlined_call_operand.vmem [shape: f32[16,1], index: 8, kind: input, shape index: {}]   ;;  %s3213_s9 = inlined_call_operand.vmem [shape: f32[2,16,256], index: 9, kind: output, shape index: {}]  }
   0x1 LB: > { %s2058_s10 = sadd.s32 4294967295, %s2389_s30   ;;  %p2062_p0 = scmp.ge.s32.totalorder %s2389_s30, 1  ;;  %s2389_s30 = sphi %s2445_s30, %s19_s30  }
   0x2   : > { %p287_p1 = scmp.lt.s32.totalorder %s2389_s30, 3 }
   0x4   : > { %p288_p2 = pnand %p2062_p0, %p287_p1 }
   0x6   : > { %291 = sbr.rel (%p288_p2) target bundleno = 3008 (0xbc0), region = 56 }
   0xd   : > { %p323_p3 = scmp.lt.s32.totalorder %s2058_s10, 1  ;;  %v2391_v8 = vmov 0.0|0.0   ;;  %vm2392_vm0 = vmmov 0   ;;  %v2393_v9 = vmov 0.0   ;;  %v346_v13 = vld [vmem:[%s3205_s1] sm:$0xf] }
   0xe   : > { %2157 = vmatprep.subr.bf16.mxu0 %v2391_v8  ;;  %2137 = vmatprep.mubr.msk.f32.mxu0 %vm2392_vm0, %v2393_v9  ;;  %vm347_vm1 = vcmask 130048   ;;  %v422_v14 = vld [vmem:[%s3206_s2] sm:$0xff]  ;;  %vm424_vm2 = vcmask 31744   ;;  %vm431_vm3 = vcmask 1043456   ;;  %v423_v18 = vld [vmem:[%s3206_s2 + $0x8] sm:$0xff]  ;;  %v2394_v19 = vmov 0  }
   0xf   : > { %s3333_s10 = smov (!%p323_p3, %s2058_s10), 1  ;;  %2183 = vset.pattern.permute.xlu1 %v2394_v19  ;;  %2184 = vset.pattern.permute.xlu0 %v2394_v19  ;;  %v703_v37 = vld [vmem:[%s3208_s4] sm:$0xff]  ;;  %v686_v43 = vld [vmem:[%s3207_s3 + $0x8] sm:$0xff]  ;;  %v729_v51 = vld [vmem:[%s3210_s6 + $0x10] sm:$0xff] }
  0x10   : > { %s2101_s11 = sshll.u32 %s3333_s10, 4  ;;  %819 = vmatprep.mubr.bf16.mxu1 %v2394_v19  ;;  %v685_v44 = vld [vmem:[%s3207_s3] sm:$0xff]  ;;  %v704_v50 = vld [vmem:[%s3208_s4 + $0x8] sm:$0xff]  ;;  %v730_v53 = vld [vmem:[%s3210_s6 + $0x18] sm:$0xff]  ;;  %s2102_s15 = sshll.u32 %s3333_s10, 5 }
  0x11   : > { %s327_s14 = scalar_lea.vmem %s3204_s0, %s2101_s11  ;;  %v727_v49 = vld [vmem:[%s3210_s6] sm:$0xff]  ;;  %v728_v52 = vld [vmem:[%s3210_s6 + $0x8] sm:$0xff]  ;;  %s332_s18 = scalar_lea.vmem %s3213_s9, %s2102_s15 }
  0x12   : > { %v334_v0 = vld [vmem:[%s327_s14] sm:$0xff]  ;;  %v335_v1 = vld [vmem:[%s327_s14 + $0x8] sm:$0xff] }
  0x13   : > { %v2459_v2 = vunpack.c.l.bf16 %v334_v0  ;;  %v2461_v3 = vunpack.c.h.bf16 %v334_v0  ;;  %v2463_v4 = vunpack.c.l.bf16 %v335_v1  ;;  %v2465_v5 = vunpack.c.h.bf16 %v335_v1 }
  0x15   : > { %3252 = vst [vmem:[#allocation2_spill] sm:$0xff] %v2459_v2  ;;  %3253 = vst [vmem:[#allocation3_spill] sm:$0xff] %v2461_v3  ;;  %v340_v6 = vadd.f32 %v2461_v3, %v2459_v2  ;;  %v343_v7 = vadd.f32 %v2465_v5, %v2463_v4 }
  0x16   : > { %3254 = vst [vmem:[#allocation4_spill] sm:$0xff] %v2463_v4  ;;  %3255 = vst [vmem:[#allocation5_spill] sm:$0xff] %v2465_v5 }
  0x17   : > { %341 = vadd.xlane.f32.xlu0 %v340_v6 }
  0x1b   : > { %344 = vadd.xlane.f32.xlu0 %v343_v7 }
  0xa4   : > { %v342_v10 = vpop.xlane.xlu0 %341 }
  0xa8   : > { %v345_v11 = vpop.xlane.xlu0 %344 }
  0xa9   : > { %v2158_v12 = vpack.c.bf16 %v345_v11, %v342_v10 }
  0xab   : > { %2159 = vmatpush3.bf16.msra.mxu0 %v2158_v12 }
  0xae   : > { %2138 = vmatmul.mubr.msk.f32.vlgmr.msra.gmra.mrb[0].mxu0 %vm347_vm1, %v346_v13 }
  0xaf   : > { %2142 = vmatprep.mubr.msk.f32.mxu0 %vm424_vm2, %v422_v14 }
 0x181   : > { %v417_v15 = vpop.f32.mrb[0].mxu0 }
 0x182   : > { %v421_v16 = vmul.f32 0.0009765625, %v417_v15  ;;  %v2139_v17 = vpop.f32.mrb[1].mxu0 }
 0x184   : > { %2140 = vmatprep.subr.msk.mxu0 %vm431_vm3, %v421_v16 }
 0x185   : > { %2141 = vmatpush3.msk.msra.mxu0 %vm431_vm3, %v421_v16 }
 0x186   : > { %2143 = vmatmul.mubr.msk.f32.vlgmr.msra.gmra.mrb[2].mxu0 %vm424_vm2, %v423_v18  ;;  %2160 = vmatprep.subr.bf16.mxu0 %v2391_v8  ;;  %v2185_v8 = vld [vmem:[%s3209_s5] sm:$0xff]  }
 0x187   : > { %2149 = vmatprep.mubr.msk.f32.mxu0 %vm2392_vm0, %v2393_v9  ;;  %v2186_v9 = vld [vmem:[%s3209_s5 + $0x8] sm:$0xff]  }
 0x259   : > { %v2144_v20 = vpop.f32.mrb[2].mxu0 }
 0x25a   : > { %v501_v21 = vpop.f32.mrb[3].mxu0 }
 0x25b   : > { %512 = vperm.xlu1 %2183, %v501_v21  }
 0x25f   : > { %517 = vperm.xlu1 %2183, %v2144_v20  }
 0x2da   : > { %v513_v22 = vpop.permute.xlu1 %512 }
 0x2db   : > { %v520_v23 = vsub.f32 %v2459_v2, %v513_v22  ;;  %v521_v24 = vsub.f32 %v2461_v3, %v513_v22 }
 0x2dd   : > { %v524_v25 = vmul.f32 %v520_v23, %v520_v23  ;;  %v525_v26 = vmul.f32 %v521_v24, %v521_v24 }
 0x2de   : > { %v518_v27 = vpop.permute.xlu1 %517 }
 0x2df   : > { %v522_v28 = vsub.f32 %v2463_v4, %v518_v27  ;;  %v523_v29 = vsub.f32 %v2465_v5, %v518_v27  ;;  %v528_v30 = vadd.f32 %v525_v26, %v524_v25 }
 0x2e1   : > { %529 = vadd.xlane.f32.xlu0 %v528_v30  ;;  %v526_v31 = vmul.f32 %v522_v28, %v522_v28  ;;  %v527_v32 = vmul.f32 %v523_v29, %v523_v29 }
 0x2e3   : > { %v531_v33 = vadd.f32 %v527_v32, %v526_v31 }
 0x2e5   : > { %532 = vadd.xlane.f32.xlu1 %v531_v33 }
 0x2f7   : > { %707 = vperm.xlu0 %2184, %v703_v37  }
 0x36e   : > { %v530_v34 = vpop.xlane.xlu0 %529 }
 0x372   : > { %v533_v35 = vpop.xlane.xlu1 %532 }
 0x373   : > { %v2161_v36 = vpack.c.bf16 %v533_v35, %v530_v34 }
 0x375   : > { %2162 = vmatpush3.bf16.msra.mxu0 %v2161_v36 }
 0x376   : > { %v708_v54 = vpop.permute.xlu0 %707 }
 0x378   : > { %2150 = vmatmul.mubr.msk.f32.vlgmr.msra.gmra.mrb[4].mxu0 %vm347_vm1, %v346_v13 }
 0x379   : > { %2154 = vmatprep.mubr.msk.f32.mxu0 %vm424_vm2, %v422_v14 }
 0x44b   : > { %v600_v38 = vpop.f32.mrb[4].mxu0 }
 0x44c   : > { %v604_v39 = vmul.f32 0.0009765625, %v600_v38  ;;  %v2151_v40 = vpop.f32.mrb[5].mxu0 }
 0x44e   : > { %v605_v41 = vadd.f32 1e-05, %v604_v39 }
 0x450   : > { %2189 = vrsqrt.f32 %v605_v41 }
 0x45a   : > { %v2190_v42 = vpop.eup %2189 }
 0x45b   : > { %2152 = vmatprep.subr.msk.mxu0 %vm431_vm3, %v2190_v42 }
 0x45c   : > { %2153 = vmatpush3.msk.msra.mxu0 %vm431_vm3, %v2190_v42 }
 0x45d   : > { %2155 = vmatmul.mubr.msk.f32.vlgmr.msra.gmra.mrb[6].mxu0 %vm424_vm2, %v423_v18 }
 0x45e   : > { %966 = vmatprep.mubr.bf16.mxu0 %v2394_v19 }
 0x530   : > { %v2156_v45 = vpop.f32.mrb[6].mxu0 }
 0x531   : > { %v688_v46 = vmul.f32 %v2156_v45, %v686_v43  ;;  %v676_v47 = vpop.f32.mrb[7].mxu0 }
 0x532   : > { %v687_v48 = vmul.f32 %v685_v44, %v676_v47 }
 0x533   : > { %696 = vperm.xlu1 %2183, %v688_v46  }
 0x534   : > { %691 = vperm.xlu0 %2184, %v687_v48  }
 0x537   : > { %735 = vperm.xlu1 %2183, %v727_v49  }
 0x538   : > { %712 = vperm.xlu0 %2184, %v704_v50  }
 0x53b   : > { %745 = vperm.xlu1 %2183, %v729_v51   ;;  %v2187_v51 = vld [vmem:[%s3209_s5 + $0x10] sm:$0xff]  }
 0x53c   : > { %740 = vperm.xlu0 %2184, %v728_v52  }
 0x540   : > { %750 = vperm.xlu0 %2184, %v730_v53  }
 0x5b2   : > { %v697_v55 = vpop.permute.xlu1 %696 }
 0x5b3   : > { %v692_v56 = vpop.permute.xlu0 %691  ;;  %v701_v59 = vmul.f32 %v697_v55, %v522_v28  ;;  %v702_v60 = vmul.f32 %v697_v55, %v523_v29 }
 0x5b4   : > { %v699_v57 = vmul.f32 %v692_v56, %v520_v23  ;;  %v700_v58 = vmul.f32 %v692_v56, %v521_v24 }
 0x5b6   : > { %v716_v0 = vadd.f32 %v708_v54, %v700_v58  ;;  %v715_v1 = vadd.f32 %v708_v54, %v699_v57  ;;  %v736_v11 = vpop.permute.xlu1 %735 }
 0x5b7   : > { %v713_v61 = vpop.permute.xlu0 %712 }
 0x5b8   : > { %v717_v62 = vadd.f32 %v713_v61, %v701_v59  ;;  %v718_v63 = vadd.f32 %v713_v61, %v702_v60 }
 0x5ba   : > { %v726_v6 = vpack.c.bf16 %v718_v63, %v716_v0  ;;  %v725_v7 = vpack.c.bf16 %v717_v62, %v715_v1  ;;  %v746_v24 = vpop.permute.xlu1 %745 }
 0x5bb   : > { %v741_v13 = vpop.permute.xlu0 %740 }
 0x5bc   : > { %787 = vmatprep.subr.bf16.mxu1 %v726_v6 }
 0x5bd   : > { %788 = vmatpush1.bf16.msra.mxu1 %v725_v7 }
 0x5bf   : > { %v751_v26 = vpop.permute.xlu0 %750 }
 0x5c0   : > { %2078 = vmatmul.mubr.msk.bf16.vlgmr.msra.gmra.mrb[0].mxu1 %vm347_vm1, %v2185_v8 }
 0x5c1   : > { %829 = vmatprep.mubr.bf16.mxu1 %v2394_v19 }
 0x5c8   : > { %2079 = vmatmul.mubr.msk.bf16.gmra.mrb[4].mxu1 %vm347_vm1, %v2186_v9 }
 0x5c9   : > { %839 = vmatprep.mubr.bf16.mxu1 %v2394_v19 }
 0x5d0   : > { %2080 = vmatmul.mubr.msk.bf16.gmra.mrb[8].mxu1 %vm347_vm1, %v2187_v51 }
 0x693   : > { %v821_v10 = vpop.f32.mrb[0].mxu1 }
 0x694   : > { %v823_v12 = vpop.f32.mrb[1].mxu1  ;;  %v822_v15 = vadd.f32 %v821_v10, %v736_v11 }
 0x695   : > { %v825_v14 = vpop.f32.mrb[2].mxu1  ;;  %v824_v18 = vadd.f32 %v823_v12, %v736_v11 }
 0x696   : > { %v826_v16 = vadd.f32 %v825_v14, %v741_v13  ;;  %v827_v17 = vpop.f32.mrb[3].mxu1 }
 0x697   : > { %v828_v20 = vadd.f32 %v827_v17, %v741_v13 }
 0x698   : > { %v850_v21 = vpack.c.bf16 %v826_v16, %v822_v15 }
 0x699   : > { %v851_v22 = vpack.c.bf16 %v828_v20, %v824_v18 }
 0x69a   : > { %854 = vxpose.xlu1.c.b16.start.end [1/1] (short) %v850_v21, 128 }
 0x69b   : > { %v831_v23 = vpop.f32.mrb[4].mxu1  ;;  %870 = vxpose.xlu0.c.b16.start.end [1/1] (short) %v851_v22, 128 }
 0x69c   : > { %v833_v25 = vpop.f32.mrb[5].mxu1  ;;  %v832_v28 = vadd.f32 %v831_v23, %v746_v24 }
 0x69d   : > { %v835_v27 = vpop.f32.mrb[6].mxu1  ;;  %v834_v31 = vadd.f32 %v833_v25, %v746_v24 }
 0x69e   : > { %v836_v29 = vadd.f32 %v835_v27, %v751_v26  ;;  %v837_v30 = vpop.f32.mrb[7].mxu1 }
 0x69f   : > { %v838_v32 = vadd.f32 %v837_v30, %v751_v26 }
 0x6a0   : > { %v852_v33 = vpack.c.bf16 %v836_v29, %v832_v28 }
 0x6a1   : > { %v853_v34 = vpack.c.bf16 %v838_v32, %v834_v31 }
 0x6a3   : > { %934 = vmatprep.subr.bf16.mxu0 %v853_v34 }
 0x6a4   : > { %935 = vmatpush1.bf16.msra.mxu0 %v852_v33 }
 0x700   : > { %v862_v35 = vpop.trf.xlu1 }
 0x701   : > { %2081 = vmatmul.mubr.msk.bf16.vlgmr.msra.gmra.mrb[8].mxu0 %vm347_vm1, %v862_v35  ;;  %v878_v43 = vpop.trf.xlu0 }
 0x702   : > { %976 = vmatprep.mubr.bf16.mxu0 %v2394_v19 }
 0x704   : > { %v863_v36 = vpop.trf.xlu1 }
 0x705   : > { %v879_v44 = vpop.trf.xlu0 }
 0x708   : > { %v864_v37 = vpop.trf.xlu1 }
 0x709   : > { %2082 = vmatmul.mubr.msk.bf16.gmra.mrb[12].mxu0 %vm347_vm1, %v863_v36  ;;  %v880_v45 = vpop.trf.xlu0 }
 0x70a   : > { %986 = vmatprep.mubr.bf16.mxu0 %v2394_v19 }
 0x70c   : > { %v865_v38 = vpop.trf.xlu1 }
 0x70d   : > { %v881_v46 = vpop.trf.xlu0 }
 0x710   : > { %v866_v39 = vpop.trf.xlu1 }
 0x711   : > { %2083 = vmatmul.mubr.msk.bf16.gmra.mrb[16].mxu0 %vm347_vm1, %v864_v37  ;;  %v882_v47 = vpop.trf.xlu0 }
 0x712   : > { %996 = vmatprep.mubr.bf16.mxu0 %v2394_v19 }
 0x714   : > { %v867_v40 = vpop.trf.xlu1 }
 0x715   : > { %v883_v48 = vpop.trf.xlu0 }
 0x718   : > { %v868_v41 = vpop.trf.xlu1 }
 0x719   : > { %2084 = vmatmul.mubr.msk.bf16.gmra.mrb[20].mxu0 %vm347_vm1, %v865_v38  ;;  %v884_v49 = vpop.trf.xlu0 }
 0x71a   : > { %1006 = vmatprep.mubr.bf16.mxu0 %v2394_v19 }
 0x71c   : > { %v869_v42 = vpop.trf.xlu1 }
 0x71d   : > { %v885_v50 = vpop.trf.xlu0 }
 0x721   : > { %2085 = vmatmul.mubr.msk.bf16.gmra.mrb[24].mxu0 %vm347_vm1, %v866_v39 }
 0x722   : > { %1016 = vmatprep.mubr.bf16.mxu0 %v2394_v19 }
 0x729   : > { %2086 = vmatmul.mubr.msk.bf16.gmra.mrb[28].mxu0 %vm347_vm1, %v867_v40 }
 0x72a   : > { %1026 = vmatprep.mubr.bf16.mxu0 %v2394_v19 }
 0x731   : > { %2087 = vmatmul.mubr.msk.bf16.gmra.mrb[32].mxu0 %vm347_vm1, %v868_v41 }
 0x732   : > { %1036 = vmatprep.mubr.bf16.mxu0 %v2394_v19 }
 0x739   : > { %2088 = vmatmul.mubr.msk.bf16.gmra.mrb[36].mxu0 %vm347_vm1, %v869_v42 }
 0x73a   : > { %1046 = vmatprep.mubr.bf16.mxu0 %v2394_v19 }
 0x741   : > { %2089 = vmatmul.mubr.msk.bf16.gmra.mrb[40].mxu0 %vm347_vm1, %v878_v43 }
 0x742   : > { %1056 = vmatprep.mubr.bf16.mxu0 %v2394_v19 }
 0x749   : > { %2090 = vmatmul.mubr.msk.bf16.gmra.mrb[44].mxu0 %vm347_vm1, %v879_v44 }
 0x74a   : > { %1066 = vmatprep.mubr.bf16.mxu0 %v2394_v19 }
 0x751   : > { %2091 = vmatmul.mubr.msk.bf16.gmra.mrb[48].mxu0 %vm347_vm1, %v880_v45 }
 0x752   : > { %1076 = vmatprep.mubr.bf16.mxu0 %v2394_v19 }
 0x759   : > { %2092 = vmatmul.mubr.msk.bf16.gmra.mrb[52].mxu0 %vm347_vm1, %v881_v46 }
 0x75a   : > { %1086 = vmatprep.mubr.bf16.mxu0 %v2394_v19 }
 0x761   : > { %2093 = vmatmul.mubr.msk.bf16.gmra.mrb[56].mxu0 %vm347_vm1, %v882_v47 }
 0x762   : > { %1096 = vmatprep.mubr.bf16.mxu0 %v2394_v19 }
 0x769   : > { %2094 = vmatmul.mubr.msk.bf16.gmra.mrb[60].mxu0 %vm347_vm1, %v883_v48 }
 0x76a   : > { %1106 = vmatprep.mubr.bf16.mxu0 %v2394_v19 }
 0x771   : > { %2095 = vmatmul.mubr.msk.bf16.gmra.mrb[64].mxu0 %vm347_vm1, %v884_v49 }
 0x772   : > { %1116 = vmatprep.mubr.bf16.mxu0 %v2394_v19 }
 0x779   : > { %2096 = vmatmul.mubr.msk.bf16.gmra.mrb[68].mxu0 %vm347_vm1, %v885_v50 }
 0x7d4   : > { %v968_v52 = vpop.f32.mrb[8].mxu0 }
 0x7d5   : > { %v2569_v53 = vmul.f32 0.25, %v968_v52  ;;  %v970_v54 = vpop.f32.mrb[9].mxu0 }
 0x7d6   : > { %v2571_v55 = vmul.f32 0.25, %v970_v54  ;;  %v972_v56 = vpop.f32.mrb[10].mxu0 }
 0x7d7   : > { %v2573_v57 = vmul.f32 0.25, %v972_v56  ;;  %v974_v58 = vpop.f32.mrb[11].mxu0 }
 0x7d8   : > { %v2575_v19 = vmul.f32 0.25, %v974_v58  ;;  %v1191_v59 = vmax.f32 %v2569_v53, %v2571_v55 }
 0x7da   : > { %1192 = vmax.xlane.f32.xlu0 %v1191_v59  ;;  %v1194_v60 = vmax.f32 %v2573_v57, %v2575_v19 }
 0x7dc   : > { %1195 = vmax.xlane.f32.xlu1 %v1194_v60  ;;  %v978_v61 = vpop.f32.mrb[12].mxu0 }
 0x7dd   : > { %v2581_v62 = vmul.f32 0.25, %v978_v61  ;;  %v980_v63 = vpop.f32.mrb[13].mxu0 }
 0x7de   : > { %v2583_v0 = vmul.f32 0.25, %v980_v63  ;;  %v982_v1 = vpop.f32.mrb[14].mxu0 }
 0x7df   : > { %v2585_v6 = vmul.f32 0.25, %v982_v1  ;;  %v984_v7 = vpop.f32.mrb[15].mxu0 }
 0x7e0   : > { %v2587_v8 = vmul.f32 0.25, %v984_v7  ;;  %v1197_v9 = vmax.f32 %v2581_v62, %v2583_v0 }
 0x7e2   : > { %1198 = vmax.xlane.f32.xlu0 %v1197_v9  ;;  %v1200_v10 = vmax.f32 %v2585_v6, %v2587_v8 }
 0x7e4   : > { %1201 = vmax.xlane.f32.xlu1 %v1200_v10  ;;  %v988_v11 = vpop.f32.mrb[16].mxu0 }
 0x7e5   : > { %v2593_v12 = vmul.f32 0.25, %v988_v11  ;;  %v990_v13 = vpop.f32.mrb[17].mxu0 }
 0x7e6   : > { %v2595_v14 = vmul.f32 0.25, %v990_v13  ;;  %v992_v15 = vpop.f32.mrb[18].mxu0 }
 0x7e7   : > { %v2597_v16 = vmul.f32 0.25, %v992_v15  ;;  %v994_v17 = vpop.f32.mrb[19].mxu0 }
 0x7e8   : > { %v2599_v18 = vmul.f32 0.25, %v994_v17  ;;  %v1203_v20 = vmax.f32 %v2593_v12, %v2595_v14 }
 0x7ea   : > { %1204 = vmax.xlane.f32.xlu0 %v1203_v20  ;;  %v1206_v21 = vmax.f32 %v2597_v16, %v2599_v18 }
 0x7ec   : > { %1207 = vmax.xlane.f32.xlu1 %v1206_v21  ;;  %v998_v22 = vpop.f32.mrb[20].mxu0 }
 0x7ed   : > { %v2605_v23 = vmul.f32 0.25, %v998_v22  ;;  %v1000_v24 = vpop.f32.mrb[21].mxu0 }
 0x7ee   : > { %v2607_v25 = vmul.f32 0.25, %v1000_v24  ;;  %v1002_v26 = vpop.f32.mrb[22].mxu0 }
 0x7ef   : > { %v2609_v27 = vmul.f32 0.25, %v1002_v26  ;;  %v1004_v28 = vpop.f32.mrb[23].mxu0 }
 0x7f0   : > { %v2611_v29 = vmul.f32 0.25, %v1004_v28  ;;  %v1209_v30 = vmax.f32 %v2605_v23, %v2607_v25 }
 0x7f2   : > { %1210 = vmax.xlane.f32.xlu0 %v1209_v30  ;;  %v1212_v31 = vmax.f32 %v2609_v27, %v2611_v29 }
 0x7f4   : > { %1213 = vmax.xlane.f32.xlu1 %v1212_v31  ;;  %v1008_v32 = vpop.f32.mrb[24].mxu0 }
 0x7f5   : > { %v2617_v33 = vmul.f32 0.25, %v1008_v32  ;;  %v1010_v34 = vpop.f32.mrb[25].mxu0 }
 0x7f6   : > { %v2619_v35 = vmul.f32 0.25, %v1010_v34  ;;  %v1012_v36 = vpop.f32.mrb[26].mxu0 }
 0x7f7   : > { %v2621_v37 = vmul.f32 0.25, %v1012_v36  ;;  %v1014_v38 = vpop.f32.mrb[27].mxu0 }
 0x7f8   : > { %v2623_v39 = vmul.f32 0.25, %v1014_v38  ;;  %v1215_v40 = vmax.f32 %v2617_v33, %v2619_v35 }
 0x7fa   : > { %1216 = vmax.xlane.f32.xlu0 %v1215_v40  ;;  %v1218_v41 = vmax.f32 %v2621_v37, %v2623_v39 }
 0x7fc   : > { %1219 = vmax.xlane.f32.xlu1 %v1218_v41  ;;  %v1018_v42 = vpop.f32.mrb[28].mxu0 }
 0x7fd   : > { %v2629_v43 = vmul.f32 0.25, %v1018_v42  ;;  %v1020_v44 = vpop.f32.mrb[29].mxu0 }
 0x7fe   : > { %v2631_v45 = vmul.f32 0.25, %v1020_v44  ;;  %v1022_v46 = vpop.f32.mrb[30].mxu0 }
 0x7ff   : > { %v2633_v47 = vmul.f32 0.25, %v1022_v46  ;;  %v1024_v48 = vpop.f32.mrb[31].mxu0 }
 0x800   : > { %v2635_v49 = vmul.f32 0.25, %v1024_v48  ;;  %v1221_v50 = vmax.f32 %v2629_v43, %v2631_v45 }
 0x802   : > { %1222 = vmax.xlane.f32.xlu0 %v1221_v50  ;;  %v1224_v51 = vmax.f32 %v2633_v47, %v2635_v49 }
 0x804   : > { %1225 = vmax.xlane.f32.xlu1 %v1224_v51  ;;  %v1028_v52 = vpop.f32.mrb[32].mxu0 }
 0x805   : > { %v2641_v54 = vmul.f32 0.25, %v1028_v52  ;;  %v1030_v56 = vpop.f32.mrb[33].mxu0 }
 0x806   : > { %v2643_v58 = vmul.f32 0.25, %v1030_v56  ;;  %v1032_v59 = vpop.f32.mrb[34].mxu0 }
 0x807   : > { %v2645_v60 = vmul.f32 0.25, %v1032_v59  ;;  %v1034_v61 = vpop.f32.mrb[35].mxu0 }
 0x808   : > { %v2647_v63 = vmul.f32 0.25, %v1034_v61  ;;  %v1227_v1 = vmax.f32 %v2641_v54, %v2643_v58 }
 0x80a   : > { %1228 = vmax.xlane.f32.xlu0 %v1227_v1  ;;  %v1230_v7 = vmax.f32 %v2645_v60, %v2647_v63 }
 0x80c   : > { %1231 = vmax.xlane.f32.xlu1 %v1230_v7  ;;  %v1038_v9 = vpop.f32.mrb[36].mxu0 }
 0x80d   : > { %v2653_v10 = vmul.f32 0.25, %v1038_v9  ;;  %v1040_v11 = vpop.f32.mrb[37].mxu0 }
 0x80e   : > { %v2655_v13 = vmul.f32 0.25, %v1040_v11  ;;  %v1042_v15 = vpop.f32.mrb[38].mxu0 }
 0x80f   : > { %v2657_v17 = vmul.f32 0.25, %v1042_v15  ;;  %v1044_v20 = vpop.f32.mrb[39].mxu0 }
 0x810   : > { %v2659_v21 = vmul.f32 0.25, %v1044_v20  ;;  %v1233_v22 = vmax.f32 %v2653_v10, %v2655_v13 }
 0x812   : > { %1234 = vmax.xlane.f32.xlu0 %v1233_v22  ;;  %v1236_v24 = vmax.f32 %v2657_v17, %v2659_v21 }
 0x814   : > { %1237 = vmax.xlane.f32.xlu1 %v1236_v24  ;;  %v1048_v26 = vpop.f32.mrb[40].mxu0 }
 0x815   : > { %v2665_v28 = vmul.f32 0.25, %v1048_v26  ;;  %v1050_v30 = vpop.f32.mrb[41].mxu0 }
 0x816   : > { %v2667_v31 = vmul.f32 0.25, %v1050_v30  ;;  %v1052_v32 = vpop.f32.mrb[42].mxu0 }
 0x817   : > { %v2669_v34 = vmul.f32 0.25, %v1052_v32  ;;  %v1054_v36 = vpop.f32.mrb[43].mxu0 }
 0x818   : > { %v2671_v38 = vmul.f32 0.25, %v1054_v36  ;;  %v1239_v40 = vmax.f32 %v2665_v28, %v2667_v31 }
 0x81a   : > { %1240 = vmax.xlane.f32.xlu0 %v1239_v40  ;;  %v1242_v41 = vmax.f32 %v2669_v34, %v2671_v38 }
 0x81c   : > { %1243 = vmax.xlane.f32.xlu1 %v1242_v41  ;;  %v1058_v42 = vpop.f32.mrb[44].mxu0 }
 0x81d   : > { %v2677_v44 = vmul.f32 0.25, %v1058_v42  ;;  %v1060_v46 = vpop.f32.mrb[45].mxu0 }
 0x81e   : > { %v2679_v48 = vmul.f32 0.25, %v1060_v46  ;;  %v1062_v50 = vpop.f32.mrb[46].mxu0 }
 0x81f   : > { %v2681_v51 = vmul.f32 0.25, %v1062_v50  ;;  %v1064_v52 = vpop.f32.mrb[47].mxu0 }
 0x820   : > { %v2683_v56 = vmul.f32 0.25, %v1064_v52  ;;  %v1245_v59 = vmax.f32 %v2677_v44, %v2679_v48 }
 0x822   : > { %1246 = vmax.xlane.f32.xlu0 %v1245_v59  ;;  %v1248_v61 = vmax.f32 %v2681_v51, %v2683_v56 }
 0x824   : > { %1249 = vmax.xlane.f32.xlu1 %v1248_v61  ;;  %v1068_v1 = vpop.f32.mrb[48].mxu0 }
 0x825   : > { %v2689_v7 = vmul.f32 0.25, %v1068_v1  ;;  %v1070_v9 = vpop.f32.mrb[49].mxu0 }
 0x826   : > { %v2691_v11 = vmul.f32 0.25, %v1070_v9  ;;  %v1072_v15 = vpop.f32.mrb[50].mxu0 }
 0x827   : > { %3256 = vst [vmem:[#allocation6_spill] sm:$0xff] %v2689_v7  ;;  %v2693_v20 = vmul.f32 0.25, %v1072_v15  ;;  %v1074_v22 = vpop.f32.mrb[51].mxu0 }
 0x828   : > { %3257 = vst [vmem:[#allocation7_spill] sm:$0xff] %v2691_v11  ;;  %v2695_v24 = vmul.f32 0.25, %v1074_v22  ;;  %v1251_v26 = vmax.f32 %v2689_v7, %v2691_v11 }
 0x829   : > { %3258 = vst [vmem:[#allocation8_spill] sm:$0xff] %v2693_v20 }
 0x82a   : > { %3259 = vst [vmem:[#allocation9_spill] sm:$0xff] %v2695_v24  ;;  %1252 = vmax.xlane.f32.xlu0 %v1251_v26  ;;  %v1254_v30 = vmax.f32 %v2693_v20, %v2695_v24 }
 0x82c   : > { %1255 = vmax.xlane.f32.xlu1 %v1254_v30  ;;  %v1078_v32 = vpop.f32.mrb[52].mxu0 }
 0x82d   : > { %v2701_v36 = vmul.f32 0.25, %v1078_v32  ;;  %v1080_v40 = vpop.f32.mrb[53].mxu0 }
 0x82e   : > { %v2703_v41 = vmul.f32 0.25, %v1080_v40  ;;  %v1082_v42 = vpop.f32.mrb[54].mxu0 }
 0x82f   : > { %3260 = vst [vmem:[#allocation10_spill] sm:$0xff] %v2701_v36  ;;  %v2705_v46 = vmul.f32 0.25, %v1082_v42  ;;  %v1084_v50 = vpop.f32.mrb[55].mxu0 }
 0x830   : > { %3261 = vst [vmem:[#allocation11_spill] sm:$0xff] %v2703_v41  ;;  %v2707_v52 = vmul.f32 0.25, %v1084_v50  ;;  %v1257_v59 = vmax.f32 %v2701_v36, %v2703_v41 }
 0x831   : > { %3262 = vst [vmem:[#allocation12_spill] sm:$0xff] %v2705_v46 }
 0x832   : > { %3263 = vst [vmem:[#allocation13_spill] sm:$0xff] %v2707_v52  ;;  %1258 = vmax.xlane.f32.xlu0 %v1257_v59  ;;  %v1260_v61 = vmax.f32 %v2705_v46, %v2707_v52 }
 0x834   : > { %1261 = vmax.xlane.f32.xlu1 %v1260_v61  ;;  %v1088_v1 = vpop.f32.mrb[56].mxu0 }
 0x835   : > { %v2713_v9 = vmul.f32 0.25, %v1088_v1  ;;  %v1090_v15 = vpop.f32.mrb[57].mxu0 }
 0x836   : > { %v2715_v22 = vmul.f32 0.25, %v1090_v15  ;;  %v1092_v26 = vpop.f32.mrb[58].mxu0 }
 0x837   : > { %3264 = vst [vmem:[#allocation14_spill] sm:$0xff] %v2713_v9  ;;  %v2717_v30 = vmul.f32 0.25, %v1092_v26  ;;  %v1094_v32 = vpop.f32.mrb[59].mxu0 }
 0x838   : > { %3265 = vst [vmem:[#allocation15_spill] sm:$0xff] %v2715_v22  ;;  %v2719_v40 = vmul.f32 0.25, %v1094_v32  ;;  %v1263_v42 = vmax.f32 %v2713_v9, %v2715_v22 }
 0x839   : > { %3266 = vst [vmem:[#allocation16_spill] sm:$0xff] %v2717_v30 }
 0x83a   : > { %3267 = vst [vmem:[#allocation17_spill] sm:$0xff] %v2719_v40  ;;  %1264 = vmax.xlane.f32.xlu0 %v1263_v42  ;;  %v1266_v50 = vmax.f32 %v2717_v30, %v2719_v40 }
 0x83c   : > { %1267 = vmax.xlane.f32.xlu1 %v1266_v50  ;;  %v2725_v59 = vpop.f32.mrb[60].mxu0 }
 0x83d   : > { %v2727_v61 = vpop.f32.mrb[61].mxu0 }
 0x83e   : > { %v2729_v1 = vpop.f32.mrb[62].mxu0 }
 0x83f   : > { %v2731_v15 = vpop.f32.mrb[63].mxu0 }
 0x844   : > { %v2733_v26 = vpop.f32.mrb[64].mxu0 }
 0x845   : > { %v2735_v32 = vpop.f32.mrb[65].mxu0 }
 0x846   : > { %v2737_v5 = vpop.f32.mrb[66].mxu0 }
 0x847   : > { %v2739_v4 = vpop.f32.mrb[67].mxu0 }
 0x84c   : > { %v2741_v42 = vpop.f32.mrb[68].mxu0 }
 0x84d   : > { %v2743_v3 = vpop.f32.mrb[69].mxu0 }
 0x84e   : > { %v2745_v50 = vpop.f32.mrb[70].mxu0 }
 0x84f   : > { %v2747_v2 = vpop.f32.mrb[71].mxu0 }
 0x867   : > { %v1193_v40 = vpop.xlane.xlu0 %1192 }
 0x868   : > { %v1287_v30 = vsub.f32 %v2569_v53, %v1193_v40  ;;  %v1288_v22 = vsub.f32 %v2571_v55, %v1193_v40 }
 0x869   : > { %v1196_v9 = vpop.xlane.xlu1 %1195 }
 0x86a   : > { %v1351_v52 = vmul.f32 1.442695, %v1287_v30  ;;  %v1353_v46 = vmul.f32 1.442695, %v1288_v22  ;;  %v1289_v41 = vsub.f32 %v2573_v57, %v1196_v9  ;;  %v1290_v36 = vsub.f32 %v2575_v19, %v1196_v9  ;;  %v732_v19 = vld [vmem:[%s3210_s6 + $0x28] sm:$0xff] }
 0x86c   : > { %2191 = vpow2.f32 %v1351_v52  ;;  %v1355_v24 = vmul.f32 1.442695, %v1289_v41  ;;  %v1357_v20 = vmul.f32 1.442695, %v1290_v36  ;;  %v731_v36 = vld [vmem:[%s3210_s6 + $0x20] sm:$0xff] }
 0x86d   : > { %2193 = vpow2.f32 %v1353_v46 }
 0x86e   : > { %2195 = vpow2.f32 %v1355_v24 }
 0x86f   : > { %2197 = vpow2.f32 %v1357_v20  ;;  %v2768_v20 = vpop.f32.mrb[8].mxu1  ;;  %v1199_v52 = vpop.xlane.xlu0 %1198 }
 0x870   : > { %3272 = vst [vmem:[#allocation22_spill] sm:$0xff] %v2768_v20  ;;  %v2770_v24 = vpop.f32.mrb[9].mxu1  ;;  %v1291_v9 = vsub.f32 %v2581_v62, %v1199_v52  ;;  %v1292_v40 = vsub.f32 %v2583_v0, %v1199_v52 }
 0x871   : > { %3273 = vst [vmem:[#allocation23_spill] sm:$0xff] %v2770_v24  ;;  %v2775_v41 = vpop.f32.mrb[10].mxu1  ;;  %v1202_v30 = vpop.xlane.xlu1 %1201 }
 0x872   : > { %v2777_v46 = vpop.f32.mrb[11].mxu1 }
 0x876   : > { %v2753_v11 = vpop.eup %2191 }
 0x877   : > { %3268 = vst [vmem:[#allocation18_spill] sm:$0xff] %v2753_v11  ;;  %v2755_v7 = vpop.eup %2193 }
 0x878   : > { %3269 = vst [vmem:[#allocation19_spill] sm:$0xff] %v2755_v7  ;;  %v2757_v53 = vpop.eup %2195  ;;  %v1479_v55 = vadd.f32 %v2755_v7, %v2753_v11  ;;  %v1294_v11 = vsub.f32 %v2587_v8, %v1202_v30  ;;  %v1205_v7 = vpop.xlane.xlu0 %1204 }
 0x879   : > { %3270 = vst [vmem:[#allocation20_spill] sm:$0xff] %v2757_v53  ;;  %v2761_v22 = vpop.eup %2197  ;;  %v1208_v20 = vpop.xlane.xlu1 %1207 }
 0x87a   : > { %3271 = vst [vmem:[#allocation21_spill] sm:$0xff] %v2761_v22  ;;  %1480 = vadd.xlane.f32.xlu0 %v1479_v55  ;;  %v1482_v57 = vadd.f32 %v2761_v22, %v2757_v53  ;;  %v1293_v55 = vsub.f32 %v2585_v6, %v1202_v30  ;;  %v1361_v22 = vmul.f32 1.442695, %v1292_v40  ;;  %v1365_v24 = vmul.f32 1.442695, %v1294_v11 }
 0x87b   : > { %v1297_v62 = vsub.f32 %v2597_v16, %v1208_v20  ;;  %v1298_v6 = vsub.f32 %v2599_v18, %v1208_v20  ;;  %v2795_v18 = vmul.f32 0.25, %v2729_v1  ;;  %v2808_v1 = vmul.f32 0.25, %v2725_v59 }
 0x87c   : > { %1483 = vadd.xlane.f32.xlu1 %v1482_v57  ;;  %v1359_v57 = vmul.f32 1.442695, %v1291_v9  ;;  %v1363_v53 = vmul.f32 1.442695, %v1293_v55 }
 0x87d   : > { %v1371_v9 = vmul.f32 1.442695, %v1297_v62  ;;  %v1373_v30 = vmul.f32 1.442695, %v1298_v6  ;;  %v2815_v6 = vmul.f32 0.25, %v2727_v61 }
 0x87e   : > { %2199 = vpow2.f32 %v1359_v57 }
 0x87f   : > { %2201 = vpow2.f32 %v1361_v22  ;;  %v1211_v8 = vpop.xlane.xlu0 %1210 }
 0x880   : > { %2203 = vpow2.f32 %v1363_v53  ;;  %v1299_v11 = vsub.f32 %v2605_v23, %v1211_v8  ;;  %v2799_v23 = vmul.f32 0.25, %v2731_v15 }
 0x881   : > { %2205 = vpow2.f32 %v1365_v24  ;;  %v1214_v40 = vpop.xlane.xlu1 %1213 }
 0x882   : > { %v1301_v16 = vsub.f32 %v2609_v27, %v1214_v40  ;;  %v1302_v53 = vsub.f32 %v2611_v29, %v1214_v40  ;;  %v1272_v15 = vmax.f32 %v2795_v18, %v2799_v23  ;;  %v2830_v40 = vmul.f32 0.25, %v2735_v32 }
 0x884   : > { %v1379_v27 = vmul.f32 1.442695, %v1301_v16 }
 0x887   : > { %v1217_v24 = vpop.xlane.xlu0 %1216 }
 0x888   : > { %v2789_v22 = vpop.eup %2199  ;;  %v1303_v29 = vsub.f32 %v2617_v33, %v1217_v24  ;;  %v1304_v62 = vsub.f32 %v2619_v35, %v1217_v24  ;;  %v2826_v35 = vmul.f32 0.25, %v2733_v26  ;;  %v2838_v26 = vmul.f32 0.25, %v2737_v5 }
 0x889   : > { %v2846_v24 = vmul.f32 0.25, %v2739_v4 }
 0x88a   : > { %v1383_v61 = vmul.f32 1.442695, %v1303_v29 }
 0x88d   : > { %760 = vperm.xlu1 %2183, %v732_v19   ;;  %v1295_v19 = vsub.f32 %v2593_v12, %v1205_v7  ;;  %v1300_v12 = vsub.f32 %v2607_v25, %v1211_v8 }
 0x88f   : > { %v1367_v0 = vmul.f32 1.442695, %v1295_v19  ;;  %v1377_v25 = vmul.f32 1.442695, %v1300_v12  ;;  %v1220_v19 = vpop.xlane.xlu1 %1219 }
 0x890   : > { %755 = vperm.xlu0 %2184, %v731_v36   ;;  %v1296_v36 = vsub.f32 %v2595_v14, %v1205_v7  ;;  %v2791_v14 = vpop.eup %2201  ;;  %v1375_v7 = vmul.f32 1.442695, %v1299_v11  ;;  %v1305_v8 = vsub.f32 %v2621_v37, %v1220_v19  ;;  %v1306_v33 = vsub.f32 %v2623_v39, %v1220_v19 }
 0x891   : > { %2207 = vpow2.f32 %v1367_v0  ;;  %v2801_v20 = vpop.eup %2203  ;;  %v1485_v57 = vadd.f32 %v2791_v14, %v2789_v22  ;;  %v1223_v0 = vpop.xlane.xlu0 %1222  ;;  %v1385_v37 = vmul.f32 1.442695, %v1304_v62  ;;  %v1269_v39 = vmax.f32 %v2808_v1, %v2815_v6 }
 0x892   : > { %v1369_v52 = vmul.f32 1.442695, %v1296_v36  ;;  %v2803_v55 = vpop.eup %2205  ;;  %v1381_v36 = vmul.f32 1.442695, %v1302_v53  ;;  %v1307_v11 = vsub.f32 %v2629_v43, %v1223_v0  ;;  %v1308_v16 = vsub.f32 %v2631_v45, %v1223_v0 }
 0x894   : > { %2209 = vpow2.f32 %v1369_v52  ;;  %v1488_v52 = vadd.f32 %v2803_v55, %v2801_v20  ;;  %v1391_v19 = vmul.f32 1.442695, %v1307_v11 }
 0x895   : > { %2211 = vpow2.f32 %v1371_v9 }
 0x896   : > { %2213 = vpow2.f32 %v1373_v30  ;;  %v1226_v30 = vpop.xlane.xlu1 %1225 }
 0x897   : > { %2215 = vpow2.f32 %v1375_v7  ;;  %v1229_v7 = vpop.xlane.xlu0 %1228  ;;  %v1309_v43 = vsub.f32 %v2633_v47, %v1226_v30  ;;  %v1310_v45 = vsub.f32 %v2635_v49, %v1226_v30  ;;  %v1393_v47 = vmul.f32 1.442695, %v1308_v16 }
 0x898   : > { %2217 = vpow2.f32 %v1377_v25  ;;  %v1387_v25 = vmul.f32 1.442695, %v1305_v8  ;;  %v1311_v5 = vsub.f32 %v2641_v54, %v1229_v7  ;;  %v1312_v29 = vsub.f32 %v2643_v58, %v1229_v7 }
 0x899   : > { %2219 = vpow2.f32 %v1379_v27  ;;  %v1395_v49 = vmul.f32 1.442695, %v1309_v43  ;;  %v1278_v54 = vmax.f32 %v2838_v26, %v2846_v24  ;;  %v1397_v8 = vmul.f32 1.442695, %v1310_v45 }
 0x89a   : > { %2221 = vpow2.f32 %v1381_v36  ;;  %v1232_v27 = vpop.xlane.xlu1 %1231  ;;  %v1275_v36 = vmax.f32 %v2826_v35, %v2830_v40  ;;  %v2864_v30 = vmul.f32 0.25, %v2741_v42  ;;  %v1401_v16 = vmul.f32 1.442695, %v1312_v29 }
 0x89b   : > { %v2819_v59 = vpop.eup %2207  ;;  %2223 = vpow2.f32 %v1383_v61  ;;  %v1313_v0 = vsub.f32 %v2645_v60, %v1232_v27  ;;  %v1399_v61 = vmul.f32 1.442695, %v1311_v5  ;;  %v2868_v60 = vmul.f32 0.25, %v2743_v3 }
 0x89c   : > { %2225 = vpow2.f32 %v1385_v37 }
 0x89d   : > { %2227 = vpow2.f32 %v1387_v25  ;;  %v1403_v25 = vmul.f32 1.442695, %v1313_v0 }
 0x89e   : > { %v2822_v9 = vpop.eup %2209 }
 0x89f   : > { %v2832_v12 = vpop.eup %2211  ;;  %v1491_v32 = vadd.f32 %v2822_v9, %v2819_v59 }
 0x8a0   : > { %v2840_v53 = vpop.eup %2213 }
 0x8a1   : > { %v1494_v4 = vadd.f32 %v2840_v53, %v2832_v12  ;;  %v2855_v62 = vpop.eup %2215  ;;  %v1238_v58 = vpop.xlane.xlu1 %1237 }
 0x8af   : > { %1486 = vadd.xlane.f32.xlu0 %v1485_v57  ;;  %v1389_v57 = vmul.f32 1.442695, %v1306_v33  ;;  %v1314_v33 = vsub.f32 %v2647_v63, %v1232_v27 }
 0x8b1   : > { %1489 = vadd.xlane.f32.xlu1 %v1488_v52  ;;  %v2860_v52 = vpop.eup %2217  ;;  %2229 = vpow2.f32 %v1389_v57  ;;  %v1405_v43 = vmul.f32 1.442695, %v1314_v33  ;;  %v1244_v57 = vpop.xlane.xlu1 %1243 }
 0x8b2   : > { %2231 = vpow2.f32 %v1391_v19  ;;  %v2870_v37 = vpop.eup %2219  ;;  %v1497_v3 = vadd.f32 %v2860_v52, %v2855_v62 }
 0x8b3   : > { %1273 = vmax.xlane.f32.xlu0 %v1272_v15  ;;  %v1235_v15 = vpop.xlane.xlu0 %1234  ;;  %2233 = vpow2.f32 %v1393_v47  ;;  %v2876_v42 = vpop.eup %2221  ;;  %v1321_v47 = vsub.f32 %v2669_v34, %v1244_v57 }
 0x8b4   : > { %v1315_v11 = vsub.f32 %v2653_v10, %v1235_v15  ;;  %v1316_v7 = vsub.f32 %v2655_v13, %v1235_v15  ;;  %2235 = vpow2.f32 %v1395_v49  ;;  %v1317_v10 = vsub.f32 %v2657_v17, %v1238_v58 }
 0x8b5   : > { %1270 = vmax.xlane.f32.xlu1 %v1269_v39  ;;  %v2874_v39 = vmul.f32 0.25, %v2745_v50  ;;  %2237 = vpow2.f32 %v1397_v8  ;;  %v2883_v13 = vmul.f32 0.25, %v2747_v2  ;;  %v1281_v17 = vmax.f32 %v2864_v30, %v2868_v60 }
 0x8b6   : > { %2239 = vpow2.f32 %v1399_v61  ;;  %v1407_v50 = vmul.f32 1.442695, %v1315_v11  ;;  %v1409_v27 = vmul.f32 1.442695, %v1316_v7  ;;  %v1411_v2 = vmul.f32 1.442695, %v1317_v10 }
 0x8b7   : > { %1492 = vadd.xlane.f32.xlu0 %v1491_v32  ;;  %v1241_v63 = vpop.xlane.xlu0 %1240  ;;  %v1318_v32 = vsub.f32 %v2659_v21, %v1238_v58  ;;  %2241 = vpow2.f32 %v1401_v16  ;;  %v1500_v21 = vadd.f32 %v2876_v42, %v2870_v37  ;;  %v1322_v15 = vsub.f32 %v2671_v38, %v1244_v57  ;;  %v3275_v57 = vld [vmem:[#allocation7_spill] sm:$0xff] }
 0x8b8   : > { %v1319_v45 = vsub.f32 %v2665_v28, %v1241_v63  ;;  %v1320_v19 = vsub.f32 %v2667_v31, %v1241_v63  ;;  %2243 = vpow2.f32 %v1403_v25  ;;  %v1284_v58 = vmax.f32 %v2874_v39, %v2883_v13 }
 0x8b9   : > { %1495 = vadd.xlane.f32.xlu1 %v1494_v4  ;;  %2245 = vpow2.f32 %v1405_v43  ;;  %v1413_v28 = vmul.f32 1.442695, %v1318_v32  ;;  %v1250_v4 = vpop.xlane.xlu1 %1249  ;;  %v1419_v61 = vmul.f32 1.442695, %v1321_v47  ;;  %v1421_v7 = vmul.f32 1.442695, %v1322_v15 }
 0x8ba   : > { %2247 = vpow2.f32 %v1407_v50  ;;  %v1415_v31 = vmul.f32 1.442695, %v1319_v45  ;;  %v1417_v8 = vmul.f32 1.442695, %v1320_v19  ;;  %v1325_v11 = vsub.f32 %v2681_v51, %v1250_v4  ;;  %v3276_v19 = vld [vmem:[#allocation8_spill] sm:$0xff] }
 0x8bb   : > { %1276 = vmax.xlane.f32.xlu0 %v1275_v36  ;;  %v1247_v5 = vpop.xlane.xlu0 %1246  ;;  %v2891_v36 = vpop.eup %2223  ;;  %2249 = vpow2.f32 %v1409_v27  ;;  %v1326_v63 = vsub.f32 %v2683_v56, %v1250_v4 }
 0x8bc   : > { %v2894_v29 = vpop.eup %2225  ;;  %v1323_v0 = vsub.f32 %v2677_v44, %v1247_v5  ;;  %v1324_v34 = vsub.f32 %v2679_v48, %v1247_v5  ;;  %2251 = vpow2.f32 %v1411_v2  ;;  %v1427_v27 = vmul.f32 1.442695, %v1325_v11 }
 0x8bd   : > { %1279 = vmax.xlane.f32.xlu1 %v1278_v54  ;;  %v2897_v49 = vpop.eup %2227  ;;  %v1503_v44 = vadd.f32 %v2894_v29, %v2891_v36  ;;  %2253 = vpow2.f32 %v1413_v28  ;;  %v1256_v48 = vpop.xlane.xlu1 %1255  ;;  %v1429_v47 = vmul.f32 1.442695, %v1326_v63  ;;  %v3277_v28 = vld [vmem:[#allocation9_spill] sm:$0xff] }
 0x8be   : > { %v2900_v54 = vpop.eup %2229  ;;  %2255 = vpow2.f32 %v1415_v31  ;;  %v1423_v10 = vmul.f32 1.442695, %v1323_v0  ;;  %v1425_v51 = vmul.f32 1.442695, %v1324_v34  ;;  %v1329_v5 = vsub.f32 %v3276_v19, %v1256_v48 }
 0x8bf   : > { %1498 = vadd.xlane.f32.xlu0 %v1497_v3  ;;  %v1253_v33 = vpop.xlane.xlu0 %1252  ;;  %v2905_v38 = vpop.eup %2231  ;;  %v3274_v3 = vld [vmem:[#allocation6_spill] sm:$0xff]  ;;  %2257 = vpow2.f32 %v1417_v8  ;;  %v1330_v15 = vsub.f32 %v3277_v28, %v1256_v48 }
 0x8c0   : > { %v2910_v16 = vpop.eup %2233  ;;  %v1327_v43 = vsub.f32 %v3274_v3, %v1253_v33  ;;  %v1328_v50 = vsub.f32 %v3275_v57, %v1253_v33  ;;  %2259 = vpow2.f32 %v1419_v61  ;;  %v3278_v8 = vld [vmem:[#allocation10_spill] sm:$0xff]  ;;  %v3279_v61 = vld [vmem:[#allocation11_spill] sm:$0xff]  ;;  %v1435_v48 = vmul.f32 1.442695, %v1329_v5  ;;  %v3281_v3 = vld [vmem:[#allocation12_spill] sm:$0xff] }
 0x8c1   : > { %1501 = vadd.xlane.f32.xlu1 %v1500_v21  ;;  %v2913_v25 = vpop.eup %2235  ;;  %v1509_v21 = vadd.f32 %v2910_v16, %v2905_v38  ;;  %2261 = vpow2.f32 %v1421_v7  ;;  %v1262_v4 = vpop.xlane.xlu1 %1261 }
 0x8c2   : > { %v2916_v32 = vpop.eup %2237  ;;  %2263 = vpow2.f32 %v1423_v10  ;;  %v1431_v0 = vmul.f32 1.442695, %v1327_v43  ;;  %v1333_v10 = vsub.f32 %v3281_v3, %v1262_v4 }
 0x8c3   : > { %1282 = vmax.xlane.f32.xlu0 %v1281_v17  ;;  %v1259_v45 = vpop.xlane.xlu0 %1258  ;;  %v1506_v17 = vadd.f32 %v2900_v54, %v2897_v49  ;;  %v2921_v56 = vpop.eup %2239  ;;  %2265 = vpow2.f32 %v1425_v51  ;;  %v1512_v7 = vadd.f32 %v2916_v32, %v2913_v25  ;;  %v1437_v51 = vmul.f32 1.442695, %v1330_v15 }
 0x8c4   : > { %v2926_v2 = vpop.eup %2241  ;;  %v1331_v34 = vsub.f32 %v3278_v8, %v1259_v45  ;;  %v1332_v11 = vsub.f32 %v3279_v61, %v1259_v45  ;;  %2267 = vpow2.f32 %v1427_v27  ;;  %v3284_v61 = vld [vmem:[#allocation15_spill] sm:$0xff] }
 0x8c5   : > { %1285 = vmax.xlane.f32.xlu1 %v1284_v58  ;;  %v2929_v31 = vpop.eup %2243  ;;  %v1433_v58 = vmul.f32 1.442695, %v1328_v50  ;;  %v1515_v43 = vadd.f32 %v2926_v2, %v2921_v56  ;;  %2269 = vpow2.f32 %v1429_v47  ;;  %v3282_v50 = vld [vmem:[#allocation13_spill] sm:$0xff] }
 0x8c6   : > { %v2932_v33 = vpop.eup %2245  ;;  %2271 = vpow2.f32 %v1431_v0  ;;  %v1439_v19 = vmul.f32 1.442695, %v1331_v34  ;;  %v1441_v8 = vmul.f32 1.442695, %v1332_v11 }
 0x8c7   : > { %1504 = vadd.xlane.f32.xlu0 %v1503_v44  ;;  %v1265_v44 = vpop.xlane.xlu0 %1264  ;;  %v2937_v63 = vpop.eup %2247  ;;  %2273 = vpow2.f32 %v1433_v58  ;;  %v1518_v47 = vadd.f32 %v2932_v33, %v2929_v31 }
 0x8c8   : > { %3280 = vst [vmem:[#allocation6_spill] sm:$0xff] %v2937_v63  ;;  %v2942_v57 = vpop.eup %2249  ;;  %v1336_v3 = vsub.f32 %v3284_v61, %v1265_v44  ;;  %2275 = vpow2.f32 %v1435_v48 }
 0x8c9   : > { %1507 = vadd.xlane.f32.xlu1 %v1506_v17  ;;  %v1334_v17 = vsub.f32 %v3282_v50, %v1262_v4  ;;  %v2945_v45 = vpop.eup %2251  ;;  %v1268_v27 = vpop.xlane.xlu1 %1267  ;;  %v1443_v4 = vmul.f32 1.442695, %v1333_v10  ;;  %v1521_v0 = vadd.f32 %v2942_v57, %v2937_v63  ;;  %2277 = vpow2.f32 %v1437_v51 }
 0x8ca   : > { %v2948_v5 = vpop.eup %2253  ;;  %2279 = vpow2.f32 %v1439_v19  ;;  %v1449_v48 = vmul.f32 1.442695, %v1336_v3 }
 0x8cb   : > { %1510 = vadd.xlane.f32.xlu0 %v1509_v21  ;;  %v3283_v21 = vld [vmem:[#allocation14_spill] sm:$0xff]  ;;  %v2953_v15 = vpop.eup %2255  ;;  %2281 = vpow2.f32 %v1441_v8  ;;  %v1524_v10 = vadd.f32 %v2948_v5, %v2945_v45 }
 0x8cc   : > { %v1335_v28 = vsub.f32 %v3283_v21, %v1265_v44  ;;  %3285 = vst [vmem:[#allocation7_spill] sm:$0xff] %v2953_v15  ;;  %v2957_v34 = vpop.eup %2257  ;;  %v3287_v44 = vld [vmem:[#allocation17_spill] sm:$0xff]  ;;  %2283 = vpow2.f32 %v1443_v4 }
 0x8cd   : > { %1513 = vadd.xlane.f32.xlu1 %v1512_v7  ;;  %v1445_v7 = vmul.f32 1.442695, %v1334_v17  ;;  %v2960_v58 = vpop.eup %2259  ;;  %v1338_v21 = vsub.f32 %v3287_v44, %v1268_v27  ;;  %v1527_v51 = vadd.f32 %v2957_v34, %v2953_v15  ;;  %v3309_v15 = vld [vmem:[#allocation18_spill] sm:$0xff] }
 0x8ce   : > { %v1447_v11 = vmul.f32 1.442695, %v1335_v28  ;;  %v2963_v61 = vpop.eup %2261 }
 0x8cf   : > { %1516 = vadd.xlane.f32.xlu0 %v1515_v43  ;;  %v3286_v43 = vld [vmem:[#allocation16_spill] sm:$0xff]  ;;  %v2967_v63 = vpop.eup %2263  ;;  %2285 = vpow2.f32 %v1445_v7  ;;  %v1530_v3 = vadd.f32 %v2963_v61, %v2960_v58 }
 0x8d0   : > { %v1337_v50 = vsub.f32 %v3286_v43, %v1268_v27  ;;  %3288 = vst [vmem:[#allocation8_spill] sm:$0xff] %v2967_v63  ;;  %v2971_v17 = vpop.eup %2265  ;;  %2287 = vpow2.f32 %v1447_v11  ;;  %v1453_v27 = vmul.f32 1.442695, %v1338_v21 }
 0x8d1   : > { %1519 = vadd.xlane.f32.xlu1 %v1518_v47  ;;  %3289 = vst [vmem:[#allocation9_spill] sm:$0xff] %v2971_v17  ;;  %v2973_v28 = vpop.eup %2267  ;;  %2289 = vpow2.f32 %v1449_v48  ;;  %v1533_v4 = vadd.f32 %v2971_v17, %v2967_v63 }
 0x8d2   : > { %v1451_v19 = vmul.f32 1.442695, %v1337_v50  ;;  %3290 = vst [vmem:[#allocation10_spill] sm:$0xff] %v2973_v28  ;;  %v2975_v8 = vpop.eup %2269 }
 0x8d3   : > { %1522 = vadd.xlane.f32.xlu0 %v1521_v0  ;;  %3291 = vst [vmem:[#allocation11_spill] sm:$0xff] %v2975_v8  ;;  %v2979_v47 = vpop.eup %2271  ;;  %v1536_v50 = vadd.f32 %v2975_v8, %v2973_v28  ;;  %v3308_v28 = vld [vmem:[#allocation21_spill] sm:$0xff] }
 0x8d4   : > { %3292 = vst [vmem:[#allocation12_spill] sm:$0xff] %v2979_v47  ;;  %v2983_v0 = vpop.eup %2273  ;;  %2291 = vpow2.f32 %v1451_v19 }
 0x8d5   : > { %1525 = vadd.xlane.f32.xlu1 %v1524_v10  ;;  %3293 = vst [vmem:[#allocation13_spill] sm:$0xff] %v2983_v0  ;;  %v2985_v7 = vpop.eup %2275  ;;  %2293 = vpow2.f32 %v1453_v27  ;;  %v1539_v44 = vadd.f32 %v2983_v0, %v2979_v47 }
 0x8d6   : > { %3294 = vst [vmem:[#allocation14_spill] sm:$0xff] %v2985_v7  ;;  %v2987_v43 = vpop.eup %2277 }
 0x8d7   : > { %1528 = vadd.xlane.f32.xlu0 %v1527_v51  ;;  %3295 = vst [vmem:[#allocation15_spill] sm:$0xff] %v2987_v43  ;;  %v2991_v11 = vpop.eup %2279  ;;  %v1542_v51 = vadd.f32 %v2987_v43, %v2985_v7  ;;  %v3305_v43 = vld [vmem:[#allocation23_spill] sm:$0xff] }
 0x8d8   : > { %3296 = vst [vmem:[#allocation16_spill] sm:$0xff] %v2991_v11  ;;  %v2995_v21 = vpop.eup %2281 }
 0x8d9   : > { %1531 = vadd.xlane.f32.xlu1 %v1530_v3  ;;  %3297 = vst [vmem:[#allocation17_spill] sm:$0xff] %v2995_v21  ;;  %v2997_v48 = vpop.eup %2283  ;;  %v1545_v27 = vadd.f32 %v2995_v21, %v2991_v11 }
 0x8da   : > { %3298 = vst [vmem:[#allocation24_spill] sm:$0xff] %v2997_v48  ;;  %v2999_v10 = vpop.eup %2285 }
 0x8db   : > { %1534 = vadd.xlane.f32.xlu0 %v1533_v4  ;;  %3299 = vst [vmem:[#allocation25_spill] sm:$0xff] %v2999_v10  ;;  %v3003_v19 = vpop.eup %2287 }
 0x8dc   : > { %3300 = vst [vmem:[#allocation26_spill] sm:$0xff] %v3003_v19  ;;  %v3007_v3 = vpop.eup %2289 }
 0x8dd   : > { %1537 = vadd.xlane.f32.xlu1 %v1536_v50  ;;  %3301 = vst [vmem:[#allocation27_spill] sm:$0xff] %v3007_v3  ;;  %v1548_v50 = vadd.f32 %v2999_v10, %v2997_v48  ;;  %v1551_v47 = vadd.f32 %v3007_v3, %v3003_v19  ;;  %v3304_v10 = vld [vmem:[#allocation22_spill] sm:$0xff] }
 0x8de   : > { %v3009_v4 = vpop.eup %2291 }
 0x8df   : > { %1540 = vadd.xlane.f32.xlu0 %v1539_v44  ;;  %3302 = vst [vmem:[#allocation28_spill] sm:$0xff] %v3009_v4  ;;  %v3013_v44 = vpop.eup %2293 }
 0x8e0   : > { %3303 = vst [vmem:[#allocation29_spill] sm:$0xff] %v3013_v44  ;;  %v1554_v7 = vadd.f32 %v3013_v44, %v3009_v4  ;;  %v3307_v44 = vld [vmem:[#allocation19_spill] sm:$0xff] }
 0x8e1   : > { %1543 = vadd.xlane.f32.xlu1 %v1542_v51 }
 0x8e3   : > { %1546 = vadd.xlane.f32.xlu0 %v1545_v27 }
 0x8e5   : > { %1549 = vadd.xlane.f32.xlu1 %v1548_v50 }
 0x8e7   : > { %1552 = vadd.xlane.f32.xlu0 %v1551_v47 }
 0x8e9   : > { %1555 = vadd.xlane.f32.xlu1 %v1554_v7  ;;  %v3306_v7 = vld [vmem:[#allocation20_spill] sm:$0xff] }
 0x907   : > { %v1481_v11 = vpop.xlane.xlu0 %1480 }
 0x908   : > { %2295 = vrcp.f32 %v1481_v11 }
 0x909   : > { %v1484_v51 = vpop.xlane.xlu1 %1483 }
 0x90a   : > { %2297 = vrcp.f32 %v1484_v51 }
 0x90d   : > { %v761_v27 = vpop.permute.xlu1 %760 }
 0x90e   : > { %v846_v0 = vadd.f32 %v2775_v41, %v761_v27  ;;  %v848_v48 = vadd.f32 %v2777_v46, %v761_v27 }
 0x90f   : > { %v756_v21 = vpop.permute.xlu0 %755 }
 0x910   : > { %v842_v63 = vadd.f32 %v3304_v10, %v756_v21  ;;  %v844_v19 = vadd.f32 %v3305_v43, %v756_v21 }
 0x912   : > { %v1703_v50 = vpack.c.bf16 %v846_v0, %v842_v63  ;;  %v1704_v47 = vpack.c.bf16 %v848_v48, %v844_v19  ;;  %v2296_v3 = vpop.eup %2295 }
 0x913   : > { %v1608_v51 = vmul.f32 %v2296_v3, %v3307_v44  ;;  %v1607_v41 = vmul.f32 %v2296_v3, %v3309_v15 }
 0x914   : > { %1705 = vmatprep.subr.bf16.mxu1 %v1704_v47  ;;  %v2298_v4 = vpop.eup %2297 }
 0x915   : > { %1706 = vmatpush1.bf16.xpose.msra.mxu1 %v1703_v50  ;;  %v1609_v11 = vmul.f32 %v2298_v4, %v3306_v7  ;;  %v1610_v17 = vmul.f32 %v2298_v4, %v3308_v28 }
 0x917   : > { %v1672_v8 = vpack.c.bf16 %v1610_v17, %v1608_v51  ;;  %v1671_v46 = vpack.c.bf16 %v1609_v11, %v1607_v41 }
 0x919   : > { %1737 = vmatprep.mubr.bf16.mxu1 %v1672_v8 }
 0x91c   : > { %1738 = vmatmul.mubr.bf16.vlgmr.msra.gmra.mrb[12].mxu1 %v1671_v46 }
 0x93c   : > { %v1487_v10 = vpop.xlane.xlu0 %1486 }
 0x93d   : > { %2299 = vrcp.f32 %v1487_v10 }
 0x93e   : > { %v1490_v63 = vpop.xlane.xlu1 %1489 }
 0x93f   : > { %2301 = vrcp.f32 %v1490_v63 }
 0x940   : > { %v1274_v0 = vpop.xlane.xlu0 %1273 }
 0x941   : > { %v1341_v43 = vsub.f32 %v2795_v18, %v1274_v0  ;;  %v1342_v21 = vsub.f32 %v2799_v23, %v1274_v0 }
 0x942   : > { %v1271_v44 = vpop.xlane.xlu1 %1270 }
 0x943   : > { %v1459_v48 = vmul.f32 1.442695, %v1341_v43  ;;  %v1461_v19 = vmul.f32 1.442695, %v1342_v21  ;;  %v1339_v28 = vsub.f32 %v2808_v1, %v1271_v44  ;;  %v1340_v15 = vsub.f32 %v2815_v6, %v1271_v44 }
 0x944   : > { %v1493_v17 = vpop.xlane.xlu0 %1492 }
 0x945   : > { %2303 = vpow2.f32 %v1459_v48  ;;  %v1455_v8 = vmul.f32 1.442695, %v1339_v28  ;;  %v1457_v3 = vmul.f32 1.442695, %v1340_v15 }
 0x946   : > { %2305 = vpow2.f32 %v1461_v19  ;;  %v1496_v27 = vpop.xlane.xlu1 %1495 }
 0x947   : > { %v2300_v4 = vpop.eup %2299  ;;  %2307 = vrcp.f32 %v1493_v17 }
 0x948   : > { %2309 = vpow2.f32 %v1455_v8  ;;  %v1277_v50 = vpop.xlane.xlu0 %1276  ;;  %v1612_v1 = vmul.f32 %v2300_v4, %v2791_v14  ;;  %v1611_v6 = vmul.f32 %v2300_v4, %v2789_v22 }
 0x949   : > { %2311 = vpow2.f32 %v1457_v3  ;;  %v1343_v18 = vsub.f32 %v2826_v35, %v1277_v50  ;;  %v1344_v23 = vsub.f32 %v2830_v40, %v1277_v50  ;;  %v2302_v47 = vpop.eup %2301 }
 0x94a   : > { %2313 = vrcp.f32 %v1496_v27  ;;  %v1280_v51 = vpop.xlane.xlu1 %1279  ;;  %v1614_v41 = vmul.f32 %v2302_v47, %v2803_v55  ;;  %v1613_v46 = vmul.f32 %v2302_v47, %v2801_v20 }
 0x94b   : > { %v1463_v7 = vmul.f32 1.442695, %v1343_v18  ;;  %v1465_v11 = vmul.f32 1.442695, %v1344_v23  ;;  %v1345_v10 = vsub.f32 %v2838_v26, %v1280_v51  ;;  %v1346_v63 = vsub.f32 %v2846_v24, %v1280_v51 }
 0x94c   : > { %v1499_v35 = vpop.xlane.xlu0 %1498  ;;  %v1674_v40 = vpack.c.bf16 %v1614_v41, %v1612_v1  ;;  %v1673_v0 = vpack.c.bf16 %v1613_v46, %v1611_v6 }
 0x94d   : > { %2315 = vpow2.f32 %v1463_v7  ;;  %v1467_v43 = vmul.f32 1.442695, %v1345_v10  ;;  %v1469_v14 = vmul.f32 1.442695, %v1346_v63 }
 0x94e   : > { %2317 = vpow2.f32 %v1465_v11  ;;  %v1502_v22 = vpop.xlane.xlu1 %1501  ;;  %1745 = vmatprep.mubr.bf16.mxu1 %v1674_v40 }
 0x94f   : > { %v3039_v21 = vpop.eup %2303  ;;  %2319 = vrcp.f32 %v1499_v35  ;;  %1746 = vmatmul.mubr.bf16.gmra.mrb[16].mxu1 %v1673_v0 }
 0x950   : > { %v3041_v48 = vpop.eup %2305  ;;  %2321 = vpow2.f32 %v1467_v43  ;;  %v1283_v20 = vpop.xlane.xlu0 %1282 }
 0x951   : > { %v2308_v55 = vpop.eup %2307  ;;  %2323 = vpow2.f32 %v1469_v14  ;;  %v1347_v26 = vsub.f32 %v2864_v30, %v1283_v20  ;;  %v1348_v24 = vsub.f32 %v2868_v60, %v1283_v20  ;;  %v1560_v19 = vadd.f32 %v3041_v48, %v3039_v21 }
 0x952   : > { %v3047_v44 = vpop.eup %2309  ;;  %2325 = vrcp.f32 %v1502_v22  ;;  %v1286_v8 = vpop.xlane.xlu1 %1285  ;;  %v1616_v50 = vmul.f32 %v2308_v55, %v2822_v9  ;;  %v1615_v23 = vmul.f32 %v2308_v55, %v2819_v59 }
 0x953   : > { %v3049_v28 = vpop.eup %2311  ;;  %v1471_v15 = vmul.f32 1.442695, %v1347_v26  ;;  %v1473_v17 = vmul.f32 1.442695, %v1348_v24  ;;  %1561 = vadd.xlane.f32.xlu1 %v1560_v19  ;;  %v1349_v4 = vsub.f32 %v2874_v39, %v1286_v8  ;;  %v1350_v27 = vsub.f32 %v2883_v13, %v1286_v8 }
 0x954   : > { %v2314_v3 = vpop.eup %2313  ;;  %v1557_v30 = vadd.f32 %v3049_v28, %v3047_v44  ;;  %v1505_v60 = vpop.xlane.xlu0 %1504 }
 0x955   : > { %2327 = vpow2.f32 %v1471_v15  ;;  %v1618_v18 = vmul.f32 %v2314_v3, %v2840_v53  ;;  %v1617_v47 = vmul.f32 %v2314_v3, %v2832_v12  ;;  %v1475_v1 = vmul.f32 1.442695, %v1349_v4 }
 0x956   : > { %2329 = vpow2.f32 %v1473_v17  ;;  %v1477_v6 = vmul.f32 1.442695, %v1350_v27  ;;  %1558 = vadd.xlane.f32.xlu0 %v1557_v30  ;;  %v1508_v13 = vpop.xlane.xlu1 %1507 }
 0x957   : > { %v3059_v39 = vpop.eup %2315  ;;  %2331 = vrcp.f32 %v1505_v60  ;;  %v1676_v7 = vpack.c.bf16 %v1618_v18, %v1616_v50  ;;  %v1675_v11 = vpack.c.bf16 %v1617_v47, %v1615_v23 }
 0x958   : > { %v3061_v51 = vpop.eup %2317  ;;  %2333 = vpow2.f32 %v1475_v1  ;;  %v1511_v9 = vpop.xlane.xlu0 %1510 }
 0x959   : > { %v2320_v41 = vpop.eup %2319  ;;  %2335 = vpow2.f32 %v1477_v6  ;;  %1753 = vmatprep.mubr.bf16.mxu1 %v1676_v7  ;;  %v1563_v59 = vadd.f32 %v3061_v51, %v3059_v39 }
 0x95a   : > { %v3065_v12 = vpop.eup %2321  ;;  %2337 = vrcp.f32 %v1508_v13  ;;  %1754 = vmatmul.mubr.bf16.gmra.mrb[20].mxu1 %v1675_v11  ;;  %v1514_v46 = vpop.xlane.xlu1 %1513  ;;  %v1620_v35 = vmul.f32 %v2320_v41, %v2860_v52  ;;  %v1619_v0 = vmul.f32 %v2320_v41, %v2855_v62 }
 0x95b   : > { %v3067_v53 = vpop.eup %2323  ;;  %2339 = vrcp.f32 %v1511_v9  ;;  %1564 = vadd.xlane.f32.xlu0 %v1563_v59 }
 0x95c   : > { %v2326_v10 = vpop.eup %2325  ;;  %2341 = vrcp.f32 %v1514_v46  ;;  %v1566_v63 = vadd.f32 %v3067_v53, %v3065_v12  ;;  %v1517_v22 = vpop.xlane.xlu0 %1516 }
 0x95d   : > { %v1622_v40 = vmul.f32 %v2326_v10, %v2876_v42  ;;  %v1621_v43 = vmul.f32 %v2326_v10, %v2870_v37 }
 0x95e   : > { %1567 = vadd.xlane.f32.xlu1 %v1566_v63  ;;  %v1520_v20 = vpop.xlane.xlu1 %1519 }
 0x95f   : > { %v3075_v14 = vpop.eup %2327  ;;  %v1678_v55 = vpack.c.bf16 %v1622_v40, %v1620_v35  ;;  %v1677_v26 = vpack.c.bf16 %v1621_v43, %v1619_v0  ;;  %2343 = vrcp.f32 %v1520_v20  ;;  %v3310_v20 = vld [vmem:[#allocation6_spill] sm:$0xff] }
 0x960   : > { %v3077_v24 = vpop.eup %2329  ;;  %2345 = vrcp.f32 %v1517_v22  ;;  %v1523_v50 = vpop.xlane.xlu0 %1522 }
 0x961   : > { %v2332_v19 = vpop.eup %2331  ;;  %1761 = vmatprep.mubr.bf16.mxu1 %v1678_v55  ;;  %v1569_v52 = vadd.f32 %v3077_v24, %v3075_v14 }
 0x962   : > { %v3081_v42 = vpop.eup %2333  ;;  %1762 = vmatmul.mubr.bf16.gmra.mrb[24].mxu1 %v1677_v26  ;;  %v1526_v8 = vpop.xlane.xlu1 %1525  ;;  %v1624_v3 = vmul.f32 %v2332_v19, %v2894_v29  ;;  %v1623_v27 = vmul.f32 %v2332_v19, %v2891_v36 }
 0x963   : > { %v3083_v62 = vpop.eup %2335  ;;  %1570 = vadd.xlane.f32.xlu0 %v1569_v52  ;;  %2347 = vrcp.f32 %v1526_v8 }
 0x964   : > { %v2338_v37 = vpop.eup %2337  ;;  %v1572_v15 = vadd.f32 %v3083_v62, %v3081_v42  ;;  %2349 = vrcp.f32 %v1523_v50  ;;  %v1529_v11 = vpop.xlane.xlu0 %1528 }
 0x965   : > { %v2340_v17 = vpop.eup %2339  ;;  %v1626_v4 = vmul.f32 %v2338_v37, %v2900_v54  ;;  %v1625_v30 = vmul.f32 %v2338_v37, %v2897_v49 }
 0x966   : > { %v2342_v60 = vpop.eup %2341  ;;  %1573 = vadd.xlane.f32.xlu1 %v1572_v15  ;;  %v1628_v47 = vmul.f32 %v2340_v17, %v2910_v16  ;;  %v1532_v49 = vpop.xlane.xlu1 %1531  ;;  %v1627_v7 = vmul.f32 %v2340_v17, %v2905_v38 }
 0x967   : > { %v1680_v18 = vpack.c.bf16 %v1626_v4, %v1624_v3  ;;  %v1679_v23 = vpack.c.bf16 %v1625_v30, %v1623_v27  ;;  %v1630_v1 = vmul.f32 %v2342_v60, %v2916_v32  ;;  %v1629_v36 = vmul.f32 %v2342_v60, %v2913_v25  ;;  %v1885_v25 = vld [vmem:[%s3212_s8 + $0x8] sm:$0xff]  ;;  %v3313_v30 = vld [vmem:[#allocation9_spill] sm:$0xff] }
 0x968   : > { %2351 = vrcp.f32 %v1532_v49  ;;  %v1535_v63 = vpop.xlane.xlu0 %1534  ;;  %v3312_v4 = vld [vmem:[#allocation7_spill] sm:$0xff] }
 0x969   : > { %1769 = vmatprep.mubr.bf16.mxu1 %v1680_v18  ;;  %v1682_v6 = vpack.c.bf16 %v1630_v1, %v1628_v47  ;;  %v2344_v13 = vpop.eup %2343  ;;  %v1681_v32 = vpack.c.bf16 %v1629_v36, %v1627_v7  ;;  %2353 = vrcp.f32 %v1529_v11  ;;  %v3314_v47 = vld [vmem:[#allocation10_spill] sm:$0xff] }
 0x96a   : > { %1770 = vmatmul.mubr.bf16.gmra.mrb[28].mxu1 %v1679_v23  ;;  %v2346_v29 = vpop.eup %2345  ;;  %v1634_v54 = vmul.f32 %v2344_v13, %v2932_v33  ;;  %v1633_v46 = vmul.f32 %v2344_v13, %v2929_v31  ;;  %v1538_v33 = vpop.xlane.xlu1 %1537 }
 0x96b   : > { %1777 = vmatprep.mubr.bf16.mxu1 %v1682_v6  ;;  %v1632_v16 = vmul.f32 %v2346_v29, %v2926_v2  ;;  %v1631_v10 = vmul.f32 %v2346_v29, %v2921_v56  ;;  %v1884_v2 = vld [vmem:[%s3212_s8] sm:$0xff]  ;;  %2355 = vrcp.f32 %v1538_v33  ;;  %v3316_v29 = vld [vmem:[#allocation8_spill] sm:$0xff] }
 0x96c   : > { %2357 = vrcp.f32 %v1535_v63  ;;  %v1541_v26 = vpop.xlane.xlu0 %1540  ;;  %v3320_v33 = vld [vmem:[#allocation12_spill] sm:$0xff] }
 0x96d   : > { %v1684_v9 = vpack.c.bf16 %v1634_v54, %v1632_v16  ;;  %v2348_v41 = vpop.eup %2347  ;;  %v1683_v40 = vpack.c.bf16 %v1633_v46, %v1631_v10  ;;  %v3317_v54 = vld [vmem:[#allocation13_spill] sm:$0xff] }
 0x96e   : > { %v2350_v59 = vpop.eup %2349  ;;  %v1638_v38 = vmul.f32 %v2348_v41, %v2948_v5  ;;  %v1637_v5 = vmul.f32 %v2348_v41, %v2945_v45  ;;  %v1544_v56 = vpop.xlane.xlu1 %1543  ;;  %v3311_v45 = vld [vmem:[#allocation11_spill] sm:$0xff]  ;;  %v3318_v41 = vld [vmem:[#allocation14_spill] sm:$0xff]  ;;  %v3321_v10 = vld [vmem:[#allocation17_spill] sm:$0xff] }
 0x96f   : > { %v1636_v35 = vmul.f32 %v2350_v59, %v2942_v57  ;;  %v1635_v55 = vmul.f32 %v2350_v59, %v3310_v20  ;;  %2359 = vrcp.f32 %v1544_v56 }
 0x970   : > { %2361 = vrcp.f32 %v1541_v26  ;;  %v1547_v27 = vpop.xlane.xlu0 %1546 }
 0x971   : > { %v1686_v0 = vpack.c.bf16 %v1638_v38, %v1636_v35  ;;  %v1685_v57 = vpack.c.bf16 %v1637_v5, %v1635_v55  ;;  %v3323_v5 = vld [vmem:[#allocation29_spill] sm:$0xff]  ;;  %v3325_v55 = vld [vmem:[#allocation27_spill] sm:$0xff] }
 0x972   : > { %1778 = vmatmul.mubr.bf16.gmra.mrb[32].mxu1 %v1681_v32  ;;  %v2352_v43 = vpop.eup %2351  ;;  %v1550_v8 = vpop.xlane.xlu1 %1549 }
 0x973   : > { %1785 = vmatprep.mubr.bf16.mxu1 %v1684_v9  ;;  %v2354_v31 = vpop.eup %2353  ;;  %v1642_v22 = vmul.f32 %v2352_v43, %v2963_v61  ;;  %v1641_v17 = vmul.f32 %v2352_v43, %v2960_v58  ;;  %2363 = vrcp.f32 %v1550_v8  ;;  %v3315_v58 = vld [vmem:[#allocation15_spill] sm:$0xff]  ;;  %v3322_v43 = vld [vmem:[#allocation24_spill] sm:$0xff] }
 0x974   : > { %v1640_v19 = vmul.f32 %v2354_v31, %v2957_v34  ;;  %v1639_v61 = vmul.f32 %v2354_v31, %v3312_v4  ;;  %2365 = vrcp.f32 %v1547_v27  ;;  %v1553_v49 = vpop.xlane.xlu0 %1552 }
 0x975   : > { %v2356_v37 = vpop.eup %2355 }
 0x976   : > { %v1688_v52 = vpack.c.bf16 %v1642_v22, %v1640_v19  ;;  %v2358_v15 = vpop.eup %2357  ;;  %v1646_v3 = vmul.f32 %v2356_v37, %v3311_v45  ;;  %v1687_v34 = vpack.c.bf16 %v1641_v17, %v1639_v61  ;;  %v1645_v1 = vmul.f32 %v2356_v37, %v3314_v47  ;;  %v1556_v6 = vpop.xlane.xlu1 %1555  ;;  %v3324_v22 = vld [vmem:[#allocation16_spill] sm:$0xff] }
 0x977   : > { %1893 = vperm.xlu1 %2183, %v1885_v25   ;;  %v1644_v60 = vmul.f32 %v2358_v15, %v3313_v30  ;;  %v1643_v36 = vmul.f32 %v2358_v15, %v3316_v29  ;;  %2367 = vrcp.f32 %v1556_v6  ;;  %v3319_v25 = vld [vmem:[#allocation25_spill] sm:$0xff]  ;;  %v3327_v15 = vld [vmem:[#allocation26_spill] sm:$0xff] }
 0x978   : > { %2369 = vrcp.f32 %v1553_v49 }
 0x979   : > { %1888 = vperm.xlu0 %2184, %v1884_v2   ;;  %v1690_v50 = vpack.c.bf16 %v1646_v3, %v1644_v60  ;;  %v2360_v18 = vpop.eup %2359  ;;  %v1689_v11 = vpack.c.bf16 %v1645_v1, %v1643_v36 }
 0x97a   : > { %1786 = vmatmul.mubr.bf16.gmra.mrb[36].mxu1 %v1683_v40  ;;  %v2362_v23 = vpop.eup %2361  ;;  %v1650_v13 = vmul.f32 %v2360_v18, %v3315_v58  ;;  %v1649_v59 = vmul.f32 %v2360_v18, %v3318_v41 }
 0x97b   : > { %1793 = vmatprep.mubr.bf16.mxu1 %v1686_v0  ;;  %v1648_v7 = vmul.f32 %v2362_v23, %v3317_v54  ;;  %v1647_v38 = vmul.f32 %v2362_v23, %v3320_v33 }
 0x97d   : > { %v1692_v16 = vpack.c.bf16 %v1650_v13, %v1648_v7  ;;  %v2364_v32 = vpop.eup %2363  ;;  %v1691_v63 = vpack.c.bf16 %v1649_v59, %v1647_v38 }
 0x97e   : > { %v2366_v9 = vpop.eup %2365  ;;  %v1654_v46 = vmul.f32 %v2364_v32, %v3319_v25  ;;  %v1653_v31 = vmul.f32 %v2364_v32, %v3322_v43 }
 0x97f   : > { %v1652_v2 = vmul.f32 %v2366_v9, %v3321_v10  ;;  %v1651_v20 = vmul.f32 %v2366_v9, %v3324_v22 }
 0x981   : > { %v1694_v35 = vpack.c.bf16 %v1654_v46, %v1652_v2  ;;  %v2368_v40 = vpop.eup %2367  ;;  %v1693_v19 = vpack.c.bf16 %v1653_v31, %v1651_v20 }
 0x982   : > { %1794 = vmatmul.mubr.bf16.gmra.mrb[40].mxu1 %v1685_v57  ;;  %v2370_v0 = vpop.eup %2369  ;;  %v1658_v56 = vmul.f32 %v2368_v40, %v3323_v5 }
 0x983   : > { %1801 = vmatprep.mubr.bf16.mxu1 %v1688_v52  ;;  %v1656_v26 = vmul.f32 %v2370_v0, %v3325_v55  ;;  %v3326_v52 = vld [vmem:[#allocation28_spill] sm:$0xff]  ;;  %v1655_v17 = vmul.f32 %v2370_v0, %v3327_v15 }
 0x984   : > { %v1657_v37 = vmul.f32 %v2368_v40, %v3326_v52 }
 0x985   : > { %v1696_v57 = vpack.c.bf16 %v1658_v56, %v1656_v26 }
 0x986   : > { %v1695_v8 = vpack.c.bf16 %v1657_v37, %v1655_v17 }
 0x98a   : > { %1802 = vmatmul.mubr.bf16.gmra.mrb[44].mxu1 %v1687_v34 }
 0x98b   : > { %1809 = vmatprep.mubr.bf16.mxu1 %v1690_v50 }
 0x992   : > { %1810 = vmatmul.mubr.bf16.gmra.mrb[48].mxu1 %v1689_v11 }
 0x993   : > { %1817 = vmatprep.mubr.bf16.mxu1 %v1692_v16 }
 0x99a   : > { %1818 = vmatmul.mubr.bf16.gmra.mrb[52].mxu1 %v1691_v63 }
 0x99b   : > { %1825 = vmatprep.mubr.bf16.mxu1 %v1694_v35 }
 0x9a2   : > { %1826 = vmatmul.mubr.bf16.gmra.mrb[56].mxu1 %v1693_v19 }
 0x9a3   : > { %1833 = vmatprep.mubr.bf16.mxu1 %v1696_v57 }
 0x9aa   : > { %1834 = vmatmul.mubr.bf16.gmra.mrb[60].mxu1 %v1695_v8 }
 0x9e0   : > { %v1562_v45 = vpop.xlane.xlu1 %1561 }
 0x9e1   : > { %2371 = vrcp.f32 %v1562_v45 }
 0x9e3   : > { %v1559_v3 = vpop.xlane.xlu0 %1558 }
 0x9e4   : > { %2373 = vrcp.f32 %v1559_v3 }
 0x9e8   : > { %v1565_v4 = vpop.xlane.xlu0 %1564 }
 0x9e9   : > { %2375 = vrcp.f32 %v1565_v4 }
 0x9eb   : > { %v1568_v61 = vpop.xlane.xlu1 %1567  ;;  %v2372_v27 = vpop.eup %2371 }
 0x9ec   : > { %2377 = vrcp.f32 %v1568_v61  ;;  %v1662_v50 = vmul.f32 %v2372_v27, %v3041_v48  ;;  %v1661_v23 = vmul.f32 %v2372_v27, %v3039_v21 }
 0x9ee   : > { %v2374_v30 = vpop.eup %2373 }
 0x9ef   : > { %v3129_v60 = vpop.f32.mrb[12].mxu1  ;;  %v1660_v34 = vmul.f32 %v2374_v30, %v3049_v28  ;;  %v1659_v18 = vmul.f32 %v2374_v30, %v3047_v44 }
 0x9f0   : > { %v1571_v47 = vpop.xlane.xlu0 %1570  ;;  %v1741_v1 = vpop.f32.mrb[13].mxu1 }
 0x9f1   : > { %v3135_v6 = vpop.f32.mrb[14].mxu1  ;;  %v1698_v58 = vpack.c.bf16 %v1662_v50, %v1660_v34  ;;  %v1697_v13 = vpack.c.bf16 %v1661_v23, %v1659_v18  ;;  %2379 = vrcp.f32 %v1571_v47  ;;  %v3165_v50 = vld [vmem:[%s3211_s7] sm:$0xff]  }
 0x9f2   : > { %v1868_v29 = vpack.c.bf16 %v3135_v6, %v3129_v60  ;;  %v1744_v36 = vpop.f32.mrb[15].mxu1  ;;  %2131 = vmatprep.mubr.msk.bf16.mxu0 %vm347_vm1, %v3165_v50 }
 0x9f3   : > { %v1574_v49 = vpop.xlane.xlu1 %1573  ;;  %1841 = vmatprep.mubr.bf16.mxu1 %v1698_v58  ;;  %v2376_v28 = vpop.eup %2375 }
 0x9f4   : > { %2381 = vrcp.f32 %v1574_v49  ;;  %1842 = vmatmul.mubr.bf16.gmra.mrb[64].mxu1 %v1697_v13  ;;  %v1664_v44 = vmul.f32 %v2376_v28, %v3061_v51  ;;  %v1663_v54 = vmul.f32 %v2376_v28, %v3059_v39  ;;  %v1905_v58 = vsel %vm347_vm1, %v1868_v29, 0 }
 0x9f6   : > { %v2378_v48 = vpop.eup %2377 }
 0x9f7   : > { %v1666_v21 = vmul.f32 %v2378_v48, %v3067_v53  ;;  %v1665_v7 = vmul.f32 %v2378_v48, %v3065_v12 }
 0x9f9   : > { %v1700_v11 = vpack.c.bf16 %v1666_v21, %v1664_v44  ;;  %v1699_v16 = vpack.c.bf16 %v1665_v7, %v1663_v54 }
 0x9fb   : > { %1849 = vmatprep.mubr.bf16.mxu1 %v1700_v11  ;;  %v2380_v32 = vpop.eup %2379 }
 0x9fc   : > { %1850 = vmatmul.mubr.bf16.gmra.mrb[68].mxu1 %v1699_v16  ;;  %v1668_v41 = vmul.f32 %v2380_v32, %v3077_v24  ;;  %v1667_v25 = vmul.f32 %v2380_v32, %v3075_v14 }
 0x9fe   : > { %v2382_v9 = vpop.eup %2381 }
 0x9ff   : > { %v1670_v59 = vmul.f32 %v2382_v9, %v3083_v62  ;;  %v1669_v51 = vmul.f32 %v2382_v9, %v3081_v42 }
 0xa01   : > { %v1702_v46 = vpack.c.bf16 %v1670_v59, %v1668_v41  ;;  %v1701_v53 = vpack.c.bf16 %v1669_v51, %v1667_v25 }
 0xa03   : > { %1857 = vmatprep.mubr.bf16.mxu1 %v1702_v46 }
 0xa04   : > { %1858 = vmatmul.mubr.bf16.gmra.mrb[72].mxu1 %v1701_v53 }
 0xa22   : > { %v1747_v39 = vpop.f32.mrb[16].mxu1 }
 0xa23   : > { %v1749_v12 = vpop.f32.mrb[17].mxu1 }
 0xa24   : > { %v1750_v33 = vpop.f32.mrb[18].mxu1 }
 0xa25   : > { %v1869_v38 = vpack.c.bf16 %v1750_v33, %v1747_v39  ;;  %v1752_v10 = vpop.f32.mrb[19].mxu1 }
 0xa27   : > { %v1908_v44 = vsel %vm347_vm1, %v1869_v38, 0 }
 0xa2d   : > { %v1755_v2 = vpop.f32.mrb[20].mxu1 }
 0xa2e   : > { %v1757_v63 = vpop.f32.mrb[21].mxu1 }
 0xa2f   : > { %v1758_v35 = vpop.f32.mrb[22].mxu1 }
 0xa30   : > { %v1870_v40 = vpack.c.bf16 %v1758_v35, %v1755_v2  ;;  %v1760_v24 = vpop.f32.mrb[23].mxu1 }
 0xa32   : > { %v1911_v6 = vsel %vm347_vm1, %v1870_v40, 0 }
 0xa35   : > { %v1763_v0 = vpop.f32.mrb[24].mxu1 }
 0xa36   : > { %v1765_v62 = vpop.f32.mrb[25].mxu1 }
 0xa37   : > { %v1766_v43 = vpop.f32.mrb[26].mxu1 }
 0xa38   : > { %v1871_v14 = vpack.c.bf16 %v1766_v43, %v1763_v0  ;;  %v1768_v31 = vpop.f32.mrb[27].mxu1 }
 0xa3a   : > { %v1914_v59 = vsel %vm347_vm1, %v1871_v14, 0 }
 0xa3d   : > { %v1771_v42 = vpop.f32.mrb[28].mxu1 }
 0xa3e   : > { %v1773_v5 = vpop.f32.mrb[29].mxu1 }
 0xa3f   : > { %v1774_v56 = vpop.f32.mrb[30].mxu1 }
 0xa40   : > { %v1872_v22 = vpack.c.bf16 %v1774_v56, %v1771_v42  ;;  %v1776_v20 = vpop.f32.mrb[31].mxu1 }
 0xa42   : > { %v1917_v12 = vsel %vm347_vm1, %v1872_v22, 0 }
 0xa45   : > { %v3147_v55 = vpop.f32.mrb[32].mxu1 }
 0xa46   : > { %v1781_v26 = vpop.f32.mrb[33].mxu1 }
 0xa47   : > { %v1782_v19 = vpop.f32.mrb[34].mxu1 }
 0xa48   : > { %v1873_v57 = vpack.c.bf16 %v1782_v19, %v3147_v55  ;;  %v1784_v52 = vpop.f32.mrb[35].mxu1  ;;  %v1889_v55 = vpop.permute.xlu0 %1888 }
 0xa49   : > { %v1894_v52 = vpop.permute.xlu1 %1893 }
 0xa4a   : > { %v1920_v35 = vsel %vm347_vm1, %v1873_v57, 0 }
 0xa4d   : > { %v3150_v37 = vpop.f32.mrb[36].mxu1 }
 0xa4e   : > { %v1789_v15 = vpop.f32.mrb[37].mxu1 }
 0xa4f   : > { %v3152_v17 = vpop.f32.mrb[38].mxu1 }
 0xa50   : > { %v1874_v8 = vpack.c.bf16 %v3152_v17, %v3150_v37  ;;  %v1792_v45 = vpop.f32.mrb[39].mxu1  ;;  %v3328_v17 = vld [vmem:[#allocation2_spill] sm:$0xff] }
 0xa52   : > { %v1923_v14 = vsel %vm347_vm1, %v1874_v8, 0 }
 0xa55   : > { %v3156_v3 = vpop.f32.mrb[40].mxu1 }
 0xa56   : > { %v1797_v4 = vpop.f32.mrb[41].mxu1 }
 0xa57   : > { %v3158_v61 = vpop.f32.mrb[42].mxu1  ;;  %v3329_v4 = vld [vmem:[#allocation3_spill] sm:$0xff] }
 0xa58   : > { %v1875_v27 = vpack.c.bf16 %v3158_v61, %v3156_v3  ;;  %v1800_v30 = vpop.f32.mrb[43].mxu1 }
 0xa59   : > { %v3330_v30 = vld [vmem:[#allocation4_spill] sm:$0xff] }
 0xa5a   : > { %v1926_v20 = vsel %vm347_vm1, %v1875_v27, 0 }
 0xa5d   : > { %v1803_v34 = vpop.f32.mrb[44].mxu1 }
 0xa5e   : > { %v1805_v18 = vpop.f32.mrb[45].mxu1 }
 0xa5f   : > { %v1806_v23 = vpop.f32.mrb[46].mxu1 }
 0xa60   : > { %v1876_v47 = vpack.c.bf16 %v1806_v23, %v1803_v34  ;;  %v1808_v1 = vpop.f32.mrb[47].mxu1 }
 0xa62   : > { %2163 = vmatprep.subr.msk.bf16.mxu0 %vm347_vm1, %v1876_v47 }
 0xa63   : > { %2116 = vmatpush3.bf16.xpose.msra.mxu0 %v1905_v58 }
 0xa65   : > { %v1811_v13 = vpop.f32.mrb[48].mxu1 }
 0xa66   : > { %v1813_v36 = vpop.f32.mrb[49].mxu1 }
 0xa67   : > { %v1814_v49 = vpop.f32.mrb[50].mxu1 }
 0xa68   : > { %v1877_v28 = vpack.c.bf16 %v1814_v49, %v1811_v13  ;;  %v1816_v48 = vpop.f32.mrb[51].mxu1 }
 0xa6a   : > { %2164 = vmatprep.subr.msk.bf16.mxu0 %vm347_vm1, %v1877_v28 }
 0xa6b   : > { %2118 = vmatpush3.bf16.xpose.msra.mxu0 %v1908_v44 }
 0xa6d   : > { %v1819_v21 = vpop.f32.mrb[52].mxu1 }
 0xa6e   : > { %v1821_v54 = vpop.f32.mrb[53].mxu1 }
 0xa6f   : > { %v1822_v7 = vpop.f32.mrb[54].mxu1 }
 0xa70   : > { %v1878_v11 = vpack.c.bf16 %v1822_v7, %v1819_v21  ;;  %v1824_v60 = vpop.f32.mrb[55].mxu1 }
 0xa72   : > { %2165 = vmatprep.subr.msk.bf16.mxu0 %vm347_vm1, %v1878_v11 }
 0xa73   : > { %2120 = vmatpush3.bf16.xpose.msra.mxu0 %v1911_v6 }
 0xa75   : > { %v1827_v29 = vpop.f32.mrb[56].mxu1 }
 0xa76   : > { %v1829_v16 = vpop.f32.mrb[57].mxu1 }
 0xa77   : > { %v1830_v32 = vpop.f32.mrb[58].mxu1 }
 0xa78   : > { %v1879_v9 = vpack.c.bf16 %v1830_v32, %v1827_v29  ;;  %v1832_v41 = vpop.f32.mrb[59].mxu1 }
 0xa7a   : > { %2166 = vmatprep.subr.msk.bf16.mxu0 %vm347_vm1, %v1879_v9 }
 0xa7b   : > { %2122 = vmatpush3.bf16.xpose.msra.mxu0 %v1914_v59 }
 0xa7d   : > { %v1835_v25 = vpop.f32.mrb[60].mxu1 }
 0xa7e   : > { %v1837_v51 = vpop.f32.mrb[61].mxu1 }
 0xa7f   : > { %v1838_v46 = vpop.f32.mrb[62].mxu1 }
 0xa80   : > { %v1880_v53 = vpack.c.bf16 %v1838_v46, %v1835_v25  ;;  %v1840_v39 = vpop.f32.mrb[63].mxu1 }
 0xa82   : > { %2167 = vmatprep.subr.msk.bf16.mxu0 %vm347_vm1, %v1880_v53 }
 0xa83   : > { %2124 = vmatpush3.bf16.xpose.msra.mxu0 %v1917_v12 }
 0xac7   : > { %v1843_v33 = vpop.f32.mrb[64].mxu1 }
 0xac8   : > { %v1845_v38 = vpop.f32.mrb[65].mxu1 }
 0xac9   : > { %v1846_v10 = vpop.f32.mrb[66].mxu1 }
 0xaca   : > { %v1881_v2 = vpack.c.bf16 %v1846_v10, %v1843_v33  ;;  %v1848_v63 = vpop.f32.mrb[67].mxu1 }
 0xacc   : > { %2168 = vmatprep.subr.msk.bf16.mxu0 %vm347_vm1, %v1881_v2 }
 0xacd   : > { %2126 = vmatpush3.bf16.xpose.msra.mxu0 %v1920_v35 }
 0xacf   : > { %v1851_v40 = vpop.f32.mrb[68].mxu1 }
 0xad0   : > { %v1853_v24 = vpop.f32.mrb[69].mxu1 }
 0xad1   : > { %v1854_v0 = vpop.f32.mrb[70].mxu1 }
 0xad2   : > { %v1882_v62 = vpack.c.bf16 %v1854_v0, %v1851_v40  ;;  %v1856_v43 = vpop.f32.mrb[71].mxu1 }
 0xad4   : > { %2169 = vmatprep.subr.msk.bf16.mxu0 %vm347_vm1, %v1882_v62 }
 0xad5   : > { %2128 = vmatpush3.bf16.xpose.msra.mxu0 %v1923_v14 }
 0xad7   : > { %v1859_v31 = vpop.f32.mrb[72].mxu1 }
 0xad8   : > { %v1861_v42 = vpop.f32.mrb[73].mxu1 }
 0xad9   : > { %v1862_v5 = vpop.f32.mrb[74].mxu1 }
 0xada   : > { %v1883_v56 = vpack.c.bf16 %v1862_v5, %v1859_v31  ;;  %v1864_v22 = vpop.f32.mrb[75].mxu1 }
 0xadc   : > { %2170 = vmatprep.subr.msk.bf16.mxu0 %vm347_vm1, %v1883_v56 }
 0xadd   : > { %2130 = vmatpush3.bf16.xpose.msra.mxu0 %v1926_v20 }
 0xae4   : > { %2132 = vmatmul.mubr.msk.bf16.vlgmr.msra.gmra.mrb[72].mxu0 %vm347_vm1, %v3165_v50  ;;  %v3331_v50 = vld [vmem:[#allocation5_spill] sm:$0xff] }
 0xbb7   : > { %v1986_v26 = vpop.f32.mrb[72].mxu0 }
 0xbb8   : > { %v1987_v19 = vadd.f32 %v1986_v26, %v1889_v55  ;;  %v1988_v57 = vpop.f32.mrb[73].mxu0 }
 0xbb9   : > { %v1989_v37 = vadd.f32 %v1988_v57, %v1889_v55  ;;  %v1990_v15 = vpop.f32.mrb[74].mxu0 }
 0xbba   : > { %v1995_v8 = vadd.f32 %v1987_v19, %v3328_v17  ;;  %v1991_v45 = vadd.f32 %v1990_v15, %v1894_v52  ;;  %v1992_v3 = vpop.f32.mrb[75].mxu0 }
 0xbbb   : > { %v1996_v61 = vadd.f32 %v1989_v37, %v3329_v4  ;;  %v1993_v27 = vadd.f32 %v1992_v3, %v1894_v52 }
 0xbbc   : > { %1999 = vst [vmem:[%s332_s18] sm:$0xff] %v1995_v8  ;;  %v1997_v34 = vadd.f32 %v1991_v45, %v3330_v30 }
 0xbbd   : > { %2000 = vst [vmem:[%s332_s18 + $0x8] sm:$0xff] %v1996_v61  ;;  %v1998_v18 = vadd.f32 %v1993_v27, %v3331_v50 }
 0xbbe   : > { %2001 = vst [vmem:[%s332_s18 + $0x10] sm:$0xff] %v1997_v34 }
 0xbbf   : > { %2002 = vst [vmem:[%s332_s18 + $0x18] sm:$0xff] %v1998_v18 }
 0xbc0 PF: > { %s19_s30 = sadd.s32 1, %s2389_s30  }
 0xbc1   : > { %p16_p4 = scmp.ge.s32.totalorder %s19_s30, 4  }
 0xbc3   :  { %18 = sbr.rel (!%p16_p4) target bundleno = 1 (0x1), region = 86 }

// kernel: _lambda_.8
= control target key start
LH: loop header
LB: loop body
LE: loop exit
PB: predicated region body
PF: predicated region fallthrough
CT: control target
= control target key end

     0   :  { %s6679_s0 = inlined_call_operand.vmem [shape: bf16[2,16,24,18], index: 0, kind: input, shape index: {}, may-alias: {0,1}]   ;;  %s6680_s1 = inlined_call_operand.vmem [shape: bf16[2,16,24,18], index: 1, kind: input, shape index: {}, may-alias: {0,1}]   ;;  %s6681_s2 = inlined_call_operand.vmem [shape: bf16[9,16,16], index: 2, kind: input, shape index: {}]   ;;  %s6682_s3 = inlined_call_operand.vmem [shape: f32[16,1], index: 3, kind: input, shape index: {}]   ;;  %s6683_s4 = inlined_call_operand.vmem [shape: f32[2,16,1], index: 4, kind: input, shape index: {}]   ;;  %s6684_s5 = inlined_call_operand.vmem [shape: f32[2,16,1], index: 5, kind: input, shape index: {}]   ;;  %s6685_s6 = inlined_call_operand.vmem [shape: bf16[2,8,256], index: 6, kind: input, shape index: {}]   ;;  %s6686_s7 = inlined_call_operand.vmem [shape: bf16[16,8], index: 7, kind: input, shape index: {}]   ;;  %s6687_s8 = inlined_call_operand.vmem [shape: bf16[2,16,256], index: 8, kind: output, shape index: {}]  }
   0x1   :  { %6743 = sst [smem:[#allocation47_spill]] %s6687_s8 }
   0x2   :  { %s4799_s27 = smov 0   ;;  %s4801_s28 = smov 0  }
   0x3   :  { %s4803_s29 = smov 0   ;;  %s4805_s30 = smov 0  }
   0x4   :  { %s4807_s9 = smov 0   ;;  %s4809_s10 = smov 0  }
   0x5   :  { %s4811_s11 = smov 0   ;;  %s4813_s12 = smov 0  }
   0x6   :  { %s4815_s13 = smov 0  }
   0x7 LB: > { %s4313_s14 = sadd.s32 4294967295, %s4737_s13   ;;  %s27_s15 = sadd.s32 1, %s4729_s11  ;;  %s4737_s13 = sphi %s4815_s13, %s18_s13   ;;  %s4733_s12 = sphi %s4813_s12, %s6856_s12   ;;  %s4729_s11 = sphi %s4811_s11, %s6855_s11   ;;  %s4725_s10 = sphi %s4809_s10, %s6854_s10   ;;  %s4721_s9 = sphi %s4807_s9, %s6853_s9   ;;  %s4717_s30 = sphi %s4805_s30, %s6852_s30   ;;  %s4713_s29 = sphi %s4803_s29, %s6851_s29   ;;  %s4709_s28 = sphi %s4801_s28, %s6850_s28   ;;  %s4705_s27 = sphi %s4799_s27, %s6849_s27  }
   0x8   : > { %p28_p0 = scmp.ge.s32.totalorder %s27_s15, 2  ;;  %s30_s16 = sadd.s32 1, %s4733_s12 }
   0x9   : > { %s39_s17 = sadd.s32 1, %s4717_s30  ;;  %p46_p1 = scmp.ne.s32.totalorder %s4717_s30, %s4713_s29 }
   0xa   : > { %s4850_s18 = scalar_select %p28_p0, 0, %s27_s15  }
   0xb   : > { %s6858_s16 = smov (!%p28_p0, %s30_s16), %s4733_s12  ;;  %p47_p2 = scmp.eq.s32.totalorder %s4737_s13, 0 }
   0xc   : > { %6744 = sst [smem:[#allocation6_spill]] %s4850_s18  ;;  %s35_s19 = ssub.s32 %s4729_s11, %s4850_s18 }
   0xd   : > { %p32_p3 = scmp.ge.s32.totalorder %s6858_s16, 2  ;;  %s63_s20 = sadd.s32 1, %s4850_s18 }
   0xe   : > { %p4862_p4 = por %p47_p2, %p46_p1  ;;  %s65_s22 = ssub.s32 %s27_s15, %s63_s20 }
   0xf   : > { %s6860_s16 = smov (%p32_p3, %s6858_s16), 0  ;;  %s69_s23 = sadd.s32 1, %s4709_s28 }
  0x10   : > { %6746 = sst [smem:[#allocation7_spill]] %s6860_s16  ;;  %p76_p5 = scmp.ne.s32.totalorder %s4709_s28, %s4705_s27 }
  0x11   : > { %s34_s24 = ssub.s32 %s4733_s12, %s6860_s16  ;;  %p251_p6 = scmp.eq.s32.totalorder %s4313_s14, 3 }
  0x12   : > { %s36_s25 = sor.u32 %s35_s19, %s34_s24  ;;  %s66_s26 = sor.u32 %s65_s22, %s34_s24 }
  0x13   : > { %p37_p7 = scmp.eq.s32.totalorder %s36_s25, 0  ;;  %p67_p8 = scmp.eq.s32.totalorder %s66_s26, 0 }
  0x14   : > { %p4875_p9 = por %p76_p5, %p47_p2  ;;  %p4882_p10 = por %p251_p6, %p46_p1 }
  0x15   : > { %s4887_s15 = scalar_select %p37_p7, %s4717_s30, %s39_s17  }
  0x16   : > { %s4890_s20 = scalar_select %p67_p8, %s4709_s28, %s69_s23  }
  0x17   : > { %p4316_p11 = scmp.ge.s32.totalorder %s4737_s13, 4 }
  0x19   : > { %282 = sbr.rel (%p4316_p11) target bundleno = 66 (0x42), region = 28 }
  0x20   : > { %285 = sbr.rel (!%p4862_p4) target bundleno = 49 (0x31), region = 32  ;;  %s287_s14 = sand.u32 (%p4862_p4), 1, %s4717_s30  }
  0x21   : > { %s4563_s19 = smul.u32 (%p4862_p4), 48, %s4733_s12  ;;  %s4317_s22 = sshll.u32 (%p4862_p4), %s287_s14, 6 }
  0x22   : > { %s289_s21 = scalar_lea.vmem (%p4862_p4), [#allocation3], %s4317_s22 }
  0x23   : > { %s291_s24 = sadd.s32 (%p4862_p4), %s4729_s11, %s4563_s19 }
  0x24   : > { %s4318_s25 = sshll.u32 (%p4862_p4), %s291_s24, 2 }
  0x25   : > { %s4901_s17 = scalar_lea.vmem (%p4862_p4), %s6679_s0, %s4318_s25 }
  0x26   : > { %v309_v0 = vld [vmem:[%s4901_s17] sm:$0xf] (%p4862_p4)  ;;  %v311_v1 = vld [vmem:[%s4901_s17 + $0xc] sm:$0xf] (%p4862_p4)  ;;  %v313_v2 = vld [vmem:[%s4901_s17 + $0x18] sm:$0xf] (%p4862_p4) }
  0x27   : > { %310 = vst [vmem:[%s289_s21] sm:$0xf] %v309_v0  ;;  %312 = vst [vmem:[%s289_s21 + $0x4] sm:$0xf] %v311_v1  ;;  %v315_v3 = vld [vmem:[%s4901_s17 + $0x24] sm:$0xf] }
  0x28   : > { %314 = vst [vmem:[%s289_s21 + $0x8] sm:$0xf] %v313_v2  ;;  %v317_v4 = vld [vmem:[%s4901_s17 + $0x30] sm:$0xf]  ;;  %v319_v5 = vld [vmem:[%s4901_s17 + $0x3c] sm:$0xf] }
  0x29   : > { %316 = vst [vmem:[%s289_s21 + $0xc] sm:$0xf] %v315_v3  ;;  %318 = vst [vmem:[%s289_s21 + $0x10] sm:$0xf] %v317_v4  ;;  %v321_v6 = vld [vmem:[%s4901_s17 + $0x48] sm:$0xf] }
  0x2a   : > { %320 = vst [vmem:[%s289_s21 + $0x14] sm:$0xf] %v319_v5  ;;  %v323_v7 = vld [vmem:[%s4901_s17 + $0x54] sm:$0xf]  ;;  %v325_v8 = vld [vmem:[%s4901_s17 + $0x60] sm:$0xf] }
  0x2b   : > { %322 = vst [vmem:[%s289_s21 + $0x18] sm:$0xf] %v321_v6  ;;  %324 = vst [vmem:[%s289_s21 + $0x1c] sm:$0xf] %v323_v7  ;;  %v327_v9 = vld [vmem:[%s4901_s17 + $0x6c] sm:$0xf] }
  0x2c   : > { %326 = vst [vmem:[%s289_s21 + $0x20] sm:$0xf] %v325_v8  ;;  %v329_v10 = vld [vmem:[%s4901_s17 + $0x78] sm:$0xf]  ;;  %v331_v11 = vld [vmem:[%s4901_s17 + $0x84] sm:$0xf] }
  0x2d   : > { %328 = vst [vmem:[%s289_s21 + $0x24] sm:$0xf] %v327_v9  ;;  %330 = vst [vmem:[%s289_s21 + $0x28] sm:$0xf] %v329_v10  ;;  %v333_v12 = vld [vmem:[%s4901_s17 + $0x90] sm:$0xf] }
  0x2e   : > { %332 = vst [vmem:[%s289_s21 + $0x2c] sm:$0xf] %v331_v11  ;;  %v335_v13 = vld [vmem:[%s4901_s17 + $0x9c] sm:$0xf]  ;;  %v337_v14 = vld [vmem:[%s4901_s17 + $0xa8] sm:$0xf] }
  0x2f   : > { %334 = vst [vmem:[%s289_s21 + $0x30] sm:$0xf] %v333_v12  ;;  %336 = vst [vmem:[%s289_s21 + $0x34] sm:$0xf] %v335_v13  ;;  %v339_v15 = vld [vmem:[%s4901_s17 + $0xb4] sm:$0xf] }
  0x30   : > { %338 = vst [vmem:[%s289_s21 + $0x38] sm:$0xf] %v337_v14  ;;  %340 = vst [vmem:[%s289_s21 + $0x3c] sm:$0xf] %v339_v15 }
  0x31 PF: > { %395 = sbr.rel (!%p4875_p9) target bundleno = 66 (0x42), region = 73  ;;  %s397_s16 = sand.u32 (%p4875_p9), 1, %s4709_s28  }
  0x32   : > { %s4198_s23 = smul.u32 (%p4875_p9), 48, %s4733_s12  ;;  %s4319_s14 = sshll.u32 (%p4875_p9), %s397_s16, 6 }
  0x33   : > { %s399_s18 = scalar_lea.vmem (%p4875_p9), [#allocation4], %s4319_s14 }
  0x34   : > { %s4199_s19 = sadd.s32 (%p4875_p9), %s4729_s11, %s4198_s23 }
  0x35   : > { %s4320_s22 = sshll.u32 (%p4875_p9), %s4199_s19, 2 }
  0x36   : > { %s4927_s26 = scalar_lea.vmem (%p4875_p9), %s6680_s1, %s4320_s22 }
  0x37   : > { %v4321_v16 = vld [vmem:[%s4927_s26 + $0x4] sm:$0xf] (%p4875_p9)  ;;  %v4322_v17 = vld [vmem:[%s4927_s26 + $0x10] sm:$0xf] (%p4875_p9)  ;;  %v4323_v18 = vld [vmem:[%s4927_s26 + $0x1c] sm:$0xf] (%p4875_p9) }
  0x38   : > { %421 = vst [vmem:[%s399_s18] sm:$0xf] %v4321_v16  ;;  %423 = vst [vmem:[%s399_s18 + $0x4] sm:$0xf] %v4322_v17  ;;  %v4324_v19 = vld [vmem:[%s4927_s26 + $0x28] sm:$0xf] }
  0x39   : > { %425 = vst [vmem:[%s399_s18 + $0x8] sm:$0xf] %v4323_v18  ;;  %v4325_v20 = vld [vmem:[%s4927_s26 + $0x34] sm:$0xf]  ;;  %v4326_v21 = vld [vmem:[%s4927_s26 + $0x40] sm:$0xf] }
  0x3a   : > { %427 = vst [vmem:[%s399_s18 + $0xc] sm:$0xf] %v4324_v19  ;;  %429 = vst [vmem:[%s399_s18 + $0x10] sm:$0xf] %v4325_v20  ;;  %v4327_v22 = vld [vmem:[%s4927_s26 + $0x4c] sm:$0xf] }
  0x3b   : > { %431 = vst [vmem:[%s399_s18 + $0x14] sm:$0xf] %v4326_v21  ;;  %v4328_v23 = vld [vmem:[%s4927_s26 + $0x58] sm:$0xf]  ;;  %v4329_v24 = vld [vmem:[%s4927_s26 + $0x64] sm:$0xf] }
  0x3c   : > { %433 = vst [vmem:[%s399_s18 + $0x18] sm:$0xf] %v4327_v22  ;;  %435 = vst [vmem:[%s399_s18 + $0x1c] sm:$0xf] %v4328_v23  ;;  %v4330_v25 = vld [vmem:[%s4927_s26 + $0x70] sm:$0xf] }
  0x3d   : > { %437 = vst [vmem:[%s399_s18 + $0x20] sm:$0xf] %v4329_v24  ;;  %v4331_v26 = vld [vmem:[%s4927_s26 + $0x7c] sm:$0xf]  ;;  %v4332_v27 = vld [vmem:[%s4927_s26 + $0x88] sm:$0xf] }
  0x3e   : > { %439 = vst [vmem:[%s399_s18 + $0x24] sm:$0xf] %v4330_v25  ;;  %441 = vst [vmem:[%s399_s18 + $0x28] sm:$0xf] %v4331_v26  ;;  %v4333_v28 = vld [vmem:[%s4927_s26 + $0x94] sm:$0xf] }
  0x3f   : > { %443 = vst [vmem:[%s399_s18 + $0x2c] sm:$0xf] %v4332_v27  ;;  %v4334_v29 = vld [vmem:[%s4927_s26 + $0xa0] sm:$0xf]  ;;  %v4335_v30 = vld [vmem:[%s4927_s26 + $0xac] sm:$0xf] }
  0x40   : > { %445 = vst [vmem:[%s399_s18 + $0x30] sm:$0xf] %v4333_v28  ;;  %447 = vst [vmem:[%s399_s18 + $0x34] sm:$0xf] %v4334_v29  ;;  %v4336_v31 = vld [vmem:[%s4927_s26 + $0xb8] sm:$0xf] }
  0x41   : > { %449 = vst [vmem:[%s399_s18 + $0x38] sm:$0xf] %v4335_v30  ;;  %451 = vst [vmem:[%s399_s18 + $0x3c] sm:$0xf] %v4336_v31 }
  0x42 PF: > { %p4337_p12 = scmp.ge.s32.totalorder %s4737_s13, 1  ;;  %p532_p13 = scmp.lt.s32.totalorder %s4737_s13, 5 }
  0x44   : > { %p533_p0 = pnand %p4337_p12, %p532_p13 }
  0x46   : > { %536 = sbr.rel (%p533_p0) target bundleno = 952 (0x3b8), region = 126 }
  0x4d   : > { %p601_p1 = scmp.lt.s32.totalorder %s4725_s10, 1  ;;  %v718_v32 = vlaneseq  ;;  %v4739_v33 = vmov 0   ;;  %v4740_v34 = vmov 1966171168   ;;  %s539_s17 = sand.u32 1, %s4713_s29   ;;  %vm652_vm0 = vcmask 146432  }
  0x4e   : > { %4651 = vset.pattern.permute.xlu0 %v4739_v33  ;;  %v745_v35 = vunpack.c.l.s4 %v4740_v34  ;;  %4652 = vset.pattern.permute.xlu1 %v4739_v33  ;;  %s4338_s16 = sshll.u32 %s539_s17, 6  ;;  %s546_s25 = sand.u32 1, %s4705_s27   ;;  %vm701_vm1 = vcmask 140288   ;;  %vm4753_vm14 = vmmov 0   ;;  %vm1553_vm15 = vcmask 130048  }
  0x4f   : > { %s4950_s21 = scalar_select %p601_p1, %s4725_s10, 1  ;;  %v4953_v36 = vshrl.u32 %v718_v32, 7 }
  0x50   : > { %v746_v37 = vunpack.c.0.s8 %v745_v35  ;;  %s4966_s24 = scalar_lea.vmem [#allocation3], %s4338_s16  ;;  %s4339_s26 = sshll.u32 %s546_s25, 6 }
  0x51   : > { %s4399_s23 = sshll.u32 %s4950_s21, 4  ;;  %v4969_v39 = vld [vmem:[%s4966_s24] sm:$0xff]   ;;  %v4972_v40 = vld [vmem:[%s4966_s24 + $0x8] sm:$0xff]   ;;  %v4978_v46 = vsub.s32 0, %v4953_v36  ;;  %s5010_s14 = scalar_lea.vmem [#allocation4], %s4339_s26  ;;  %v4441_v28 = vld [vmem:[%s4966_s24 + $0x10] sm:$0xff]  }
  0x52   : > { %s605_s22 = scalar_lea.vmem %s6683_s4, %s4399_s23  ;;  %v4964_v38 = vsub.s32 %v746_v37, %v4953_v36  ;;  %v4405_v43 = vunpack.c.l.bf16 %v4969_v39  ;;  %v4409_v44 = vunpack.c.l.bf16 %v4972_v40  ;;  %s5006_s16 = scalar_lea.vmem %s6684_s5, %s4399_s23  ;;  %v669_v4 = vld [vmem:[%s5010_s14] sm:$0x1]  ;;  %v671_v8 = vld [vmem:[%s5010_s14 + $0x8] sm:$0x1]  ;;  %v678_v19 = vld [vmem:[%s5010_s14 + $0x24] sm:$0x1]  ;;  %v4406_v33 = vunpack.c.h.bf16 %v4969_v39 }
  0x53   : > { %v739_v41 = vld [vmem:[%s605_s22] sm:$0xff]  ;;  %v740_v42 = vld [vmem:[%s605_s22 + $0x8] sm:$0xff]  ;;  %v685_v13 = vunpack.c.l.bf16 %v669_v4  ;;  %v687_v17 = vunpack.c.l.bf16 %v671_v8  ;;  %v673_v29 = vld [vmem:[%s5010_s14 + $0x10] sm:$0x1]  ;;  %v694_v31 = vunpack.c.l.bf16 %v678_v19  ;;  %v4410_v39 = vunpack.c.h.bf16 %v4972_v40  ;;  %s4347_s23 = sshll.u32 %s4721_s9, 3  ;;  %s4743_s19 = smov 127  }
  0x54   : > { %v750_v45 = vrot.slane %v739_v41, %v4964_v38  ;;  %v743_v47 = vcombine.high %v739_v41, %v739_v41  ;;  %v799_v48 = vrot.slane %v740_v42, %v4964_v38  ;;  %653 = vst.msk [vmem:[#allocation2] sm:$0xff] %vm652_vm0, %v4405_v43  ;;  %655 = vst.msk [vmem:[#allocation2 + $0x20] sm:$0xff] %vm652_vm0, %v4409_v44  ;;  %v5015_v7 = vld [vmem:[%s5006_s16] sm:$0xff]  ;;  %v672_v27 = vld [vmem:[%s5010_s14 + $0xc] sm:$0x1]  ;;  %s4744_s22 = smov 126  }
  0x55   : > { %v792_v1 = vcombine.high %v740_v42, %v740_v42  ;;  %v4443_v9 = vld [vmem:[%s4966_s24 + $0x20] sm:$0xff]   ;;  %v5026_v16 = vrot.slane %v5015_v7, %v4964_v38  ;;  %702 = vst.msk [vmem:[#allocation2 + $0x8] sm:$0x3] %vm701_vm1, %v685_v13  ;;  %704 = vst.msk [vmem:[#allocation2 + $0x28] sm:$0x3] %vm701_vm1, %v687_v17  ;;  %v845_v37 = vcombine.high %v5015_v7, %v5015_v7  ;;  %v4442_v43 = vld [vmem:[%s4966_s24 + $0x18] sm:$0xff]  }
  0x56   : > { %v766_v49 = vrot.slane %v750_v45, %v4964_v38  ;;  %v758_v50 = vcombine.high %v750_v45, %v750_v45  ;;  %v4985_v51 = vrot.slane %v799_v48, %v4964_v38  ;;  %v807_v52 = vcombine.high %v799_v48, %v799_v48  ;;  %v677_v14 = vld [vmem:[%s5010_s14 + $0x20] sm:$0x1]  ;;  %v670_v22 = vld [vmem:[%s5010_s14 + $0x4] sm:$0x1]  ;;  %v674_v42 = vld [vmem:[%s5010_s14 + $0x14] sm:$0x1] }
  0x57   : > { %v757_v56 = vrot.slane %v743_v47, %v4964_v38  ;;  %v806_v10 = vrot.slane %v792_v1, %v4964_v38  ;;  %v4421_v18 = vunpack.c.l.bf16 %v4443_v9  ;;  %v693_v25 = vunpack.c.l.bf16 %v677_v14  ;;  %v675_v44 = vld [vmem:[%s5010_s14 + $0x18] sm:$0x1]  ;;  %711 = vst.msk [vmem:[#allocation2 + $0x98] sm:$0x3] %vm701_vm1, %v694_v31  ;;  %v680_v40 = vld [vmem:[%s5010_s14 + $0x2c] sm:$0x1] }
  0x58   : > { %v978_v53 = vrot.slane %v766_v49, %v4978_v46  ;;  %v788_v54 = vcombine.high %v766_v49, %v766_v49  ;;  %v4990_v55 = vrot.slane %v807_v52, %v4964_v38  ;;  %v780_v57 = vrot.slane %v758_v50, %v4964_v38  ;;  %654 = vst.msk [vmem:[#allocation2 + $0x10] sm:$0xff] %vm652_vm0, %v4406_v33  ;;  %v676_v49 = vld [vmem:[%s5010_s14 + $0x1c] sm:$0x1]  ;;  %v4444_v50 = vld [vmem:[%s4966_s24 + $0x28] sm:$0xff]   ;;  %s4746_s25 = smov 32   ;;  %s4747_s26 = smov 48  }
  0x59   : > { %v1010_v59 = vrot.slane %v4985_v51, %v4978_v46  ;;  %v759_v62 = vcombine.high %v757_v56, %v757_v56  ;;  %v773_v0 = vrot.slane %v757_v56, %v4964_v38  ;;  %v837_v15 = vcombine.high %v4985_v51, %v4985_v51  ;;  %661 = vst.msk [vmem:[#allocation2 + $0x80] sm:$0xff] %vm652_vm0, %v4421_v18  ;;  %v679_v51 = vld [vmem:[%s5010_s14 + $0x28] sm:$0x1]  ;;  %v4445_v56 = vld [vmem:[%s4966_s24 + $0x30] sm:$0xff]   ;;  %s4748_s27 = smov 64   ;;  %s4749_s18 = smov 96  }
  0x5a   : > { %1040 = vperm.xlu0 %4651, %v978_v53   ;;  %v986_v58 = vrot.slane %v788_v54, %v4978_v46  ;;  %v1014_v60 = vrot.slane %v4990_v55, %v4978_v46  ;;  %v790_v61 = vcombine.high %v780_v57, %v780_v57  ;;  %v982_v63 = vrot.slane %v780_v57, %v4978_v46  ;;  %v681_v57 = vld [vmem:[%s5010_s14 + $0x30] sm:$0x1]  ;;  %p613_p2 = scmp.lt.s32.totalorder %s4721_s9, 1  ;;  %s6846_s29 = sld [smem:[#allocation47_spill]] (%p4882_p10) }
  0x5b   : > { %v787_v3 = vrot.slane %v759_v62, %v4964_v38  ;;  %v994_v5 = vrot.slane %v773_v0, %v4978_v46  ;;  %v789_v6 = vcombine.high %v773_v0, %v773_v0  ;;  %v839_v21 = vcombine.high %v4990_v55, %v4990_v55  ;;  %710 = vst.msk [vmem:[#allocation2 + $0x88] sm:$0x3] %vm701_vm1, %v693_v25  ;;  %v682_v62 = vld [vmem:[%s5010_s14 + $0x34] sm:$0x1]  ;;  %v683_v0 = vld [vmem:[%s5010_s14 + $0x38] sm:$0x1] }
  0x5c   : > { %1048 = vperm.xlu1 %4652, %v986_v58   ;;  %v990_v2 = vrot.slane %v790_v61, %v4978_v46  ;;  %v5035_v23 = vrot.slane %v806_v10, %v4964_v38  ;;  %v808_v24 = vcombine.high %v806_v10, %v806_v10  ;;  %v4422_v26 = vunpack.c.h.bf16 %v4443_v9  ;;  %656 = vst.msk [vmem:[#allocation2 + $0x30] sm:$0xff] %vm652_vm0, %v4410_v39 }
  0x5d   : > { %v998_v11 = vrot.slane %v787_v3, %v4978_v46  ;;  %v791_v12 = vcombine.high %v787_v3, %v787_v3  ;;  %v1002_v20 = vrot.slane %v789_v6, %v4978_v46  ;;  %v1018_v34 = vrot.slane %v837_v15, %v4978_v46 }
  0x5e   : > { %1072 = vperm.xlu0 %4651, %v1010_v59   ;;  %v860_v35 = vcombine.high %v5026_v16, %v5026_v16  ;;  %662 = vst.msk [vmem:[#allocation2 + $0x90] sm:$0xff] %vm652_vm0, %v4422_v26  ;;  %v686_v41 = vunpack.c.l.bf16 %v670_v22  ;;  %v688_v45 = vunpack.c.l.bf16 %v672_v27  ;;  %v4413_v47 = vunpack.c.l.bf16 %v4441_v28 }
  0x5f   : > { %v1006_v30 = vrot.slane %v791_v12, %v4978_v46  ;;  %v689_v48 = vunpack.c.l.bf16 %v673_v29  ;;  %v1022_v52 = vrot.slane %v839_v21, %v4978_v46  ;;  %v1026_v53 = vrot.slane %v5035_v23, %v4978_v46 }
  0x60   : > { %1076 = vperm.xlu1 %4652, %v1014_v60   ;;  %v836_v54 = vrot.slane %v808_v24, %v4964_v38  ;;  %703 = vst.msk [vmem:[#allocation2 + $0x18] sm:$0x3] %vm701_vm1, %v686_v41  ;;  %v4414_v55 = vunpack.c.h.bf16 %v4441_v28  ;;  %705 = vst.msk [vmem:[#allocation2 + $0x38] sm:$0x3] %vm701_vm1, %v688_v45  ;;  %v690_v58 = vunpack.c.l.bf16 %v674_v42  ;;  %v4417_v59 = vunpack.c.l.bf16 %v4442_v43 }
  0x61   : > { %657 = vst.msk [vmem:[#allocation2 + $0x40] sm:$0xff] %vm652_vm0, %v4413_v47  ;;  %v691_v60 = vunpack.c.l.bf16 %v675_v44  ;;  %v4418_v61 = vunpack.c.h.bf16 %v4442_v43  ;;  %v838_v1 = vcombine.high %v5035_v23, %v5035_v23  ;;  %v4425_v3 = vunpack.c.l.bf16 %v4444_v50 }
  0x62   : > { %1044 = vperm.xlu0 %4651, %v982_v63   ;;  %706 = vst.msk [vmem:[#allocation2 + $0x48] sm:$0x3] %vm701_vm1, %v689_v48  ;;  %v4446_v63 = vld [vmem:[%s4966_s24 + $0x38] sm:$0xff]   ;;  %v695_v4 = vunpack.c.l.bf16 %v679_v51  ;;  %707 = vst.msk [vmem:[#allocation2 + $0x58] sm:$0x3] %vm701_vm1, %v690_v58  ;;  %v4426_v6 = vunpack.c.h.bf16 %v4444_v50  ;;  %v696_v8 = vunpack.c.l.bf16 %v680_v40  ;;  %v4429_v9 = vunpack.c.l.bf16 %v4445_v56  ;;  %s4745_s24 = smov 16  }
  0x63   : > { %658 = vst.msk [vmem:[#allocation2 + $0x50] sm:$0xff] %vm652_vm0, %v4414_v55  ;;  %659 = vst.msk [vmem:[#allocation2 + $0x60] sm:$0xff] %vm652_vm0, %v4417_v59  ;;  %v697_v10 = vunpack.c.l.bf16 %v681_v57  ;;  %v698_v12 = vunpack.c.l.bf16 %v682_v62  ;;  %v4433_v13 = vunpack.c.l.bf16 %v4446_v63  ;;  %v699_v14 = vunpack.c.l.bf16 %v683_v0 }
  0x64   : > { %1052 = vperm.xlu1 %4652, %v990_v2   ;;  %v692_v2 = vunpack.c.l.bf16 %v676_v49  ;;  %708 = vst.msk [vmem:[#allocation2 + $0x68] sm:$0x3] %vm701_vm1, %v691_v60  ;;  %712 = vst.msk [vmem:[#allocation2 + $0xa8] sm:$0x3] %vm701_vm1, %v695_v4  ;;  %v1030_v15 = vrot.slane %v836_v54, %v4978_v46  ;;  %v840_v17 = vcombine.high %v836_v54, %v836_v54  ;;  %v4434_v18 = vunpack.c.h.bf16 %v4446_v63 }
  0x65   : > { %660 = vst.msk [vmem:[#allocation2 + $0x70] sm:$0xff] %vm652_vm0, %v4418_v61  ;;  %663 = vst.msk [vmem:[#allocation2 + $0xa0] sm:$0xff] %vm652_vm0, %v4425_v3  ;;  %v868_v21 = vrot.slane %v5026_v16, %v4964_v38  ;;  %v882_v22 = vrot.slane %v860_v35, %v4964_v38  ;;  %v859_v24 = vrot.slane %v845_v37, %v4964_v38  ;;  %v720_v27 = vadd.s32 8, %v4953_v36  ;;  %v842_v35 = vld [vmem:[%s5006_s16 + $0x8] sm:$0xff]  ;;  %s4751_s16 = smov 80  }
  0x66   : > { %1056 = vperm.xlu0 %4651, %v994_v5   ;;  %v684_v5 = vld [vmem:[%s5010_s14 + $0x3c] sm:$0x1]  ;;  %709 = vst.msk [vmem:[#allocation2 + $0x78] sm:$0x3] %vm701_vm1, %v692_v2  ;;  %713 = vst.msk [vmem:[#allocation2 + $0xb8] sm:$0x3] %vm701_vm1, %v696_v8  ;;  %v1038_v23 = vrot.slane %v840_v17, %v4978_v46  ;;  %v722_v29 = vstv %s4347_s23  ;;  %v901_v43 = vrot.slane %v842_v35, %v4964_v38 }
  0x67   : > { %664 = vst.msk [vmem:[#allocation2 + $0xb0] sm:$0xff] %vm652_vm0, %v4426_v6  ;;  %665 = vst.msk [vmem:[#allocation2 + $0xc0] sm:$0xff] %vm652_vm0, %v4429_v9  ;;  %v700_v19 = vunpack.c.l.bf16 %v684_v5  ;;  %v890_v25 = vcombine.high %v868_v21, %v868_v21  ;;  %v1138_v26 = vrot.slane %v868_v21, %v4978_v46  ;;  %v1142_v28 = vrot.slane %v882_v22, %v4978_v46  ;;  %s4752_s14 = smov 112  }
  0x68   : > { %1060 = vperm.xlu1 %4652, %v998_v11   ;;  %v4430_v11 = vunpack.c.h.bf16 %v4445_v56  ;;  %714 = vst.msk [vmem:[#allocation2 + $0xc8] sm:$0x3] %vm701_vm1, %v697_v10  ;;  %715 = vst.msk [vmem:[#allocation2 + $0xd8] sm:$0x3] %vm701_vm1, %v698_v12  ;;  %v892_v16 = vcombine.high %v882_v22, %v882_v22  ;;  %v723_v31 = vadd.s32 %v722_v29, %v4953_v36  ;;  %v726_v7 = vand.u32 127, %v718_v32 }
  0x69   : > { %667 = vst.msk [vmem:[#allocation2 + $0xe0] sm:$0xff] %vm652_vm0, %v4433_v13  ;;  %668 = vst.msk [vmem:[#allocation2 + $0xf0] sm:$0xff] %vm652_vm0, %v4434_v18  ;;  %v724_v33 = vadd.s32 %v722_v29, %v720_v27  ;;  %v875_v37 = vrot.slane %v859_v24, %v4964_v38  ;;  %v909_v48 = vcombine.high %v901_v43, %v901_v43  ;;  %v4741_v18 = vmov 1983009808   ;;  %v948_v27 = vld [vmem:[#allocation2 + $0x28] sm:$0x3] }
  0x6a   : > { %1064 = vperm.xlu0 %4651, %v1002_v20   ;;  %666 = vst.msk [vmem:[#allocation2 + $0xd0] sm:$0xff] %vm652_vm0, %v4430_v11  ;;  %v1034_v20 = vrot.slane %v838_v1, %v4978_v46  ;;  %vm727_vm2 = vcmp.ge.s32.totalorder %v723_v31, 1  ;;  %vm729_vm4 = vcmp.le.s32.totalorder %v723_v31, 16  ;;  %vm733_vm7 = vcmp.ge.s32.totalorder %v726_v7, 1  ;;  %v962_v31 = vld [vmem:[#allocation2 + $0x98] sm:$0x3] }
  0x6b   : > { %716 = vst.msk [vmem:[#allocation2 + $0xe8] sm:$0x3] %vm701_vm1, %v699_v14  ;;  %717 = vst.msk [vmem:[#allocation2 + $0xf8] sm:$0x3] %vm701_vm1, %v700_v19  ;;  %vm728_vm3 = vcmp.ge.s32.totalorder %v724_v33, 1  ;;  %vm730_vm5 = vcmp.le.s32.totalorder %v724_v33, 16  ;;  %v1150_v41 = vrot.slane %v892_v16, %v4978_v46  ;;  %v1154_v32 = vrot.slane %v875_v37, %v4978_v46 }
  0x6c   : > { %1068 = vperm.xlu1 %4652, %v1006_v30   ;;  %v861_v30 = vcombine.high %v859_v24, %v859_v24  ;;  %vm731_vm6 = vmand %vm727_vm2, %vm729_vm4  ;;  %vm736_vm9 = vcmp.le.s32.totalorder %v726_v7, 16  ;;  %v891_v44 = vcombine.high %v875_v37, %v875_v37  ;;  %v894_v49 = vcombine.high %v842_v35, %v842_v35  ;;  %v943_v24 = vld [vmem:[#allocation2] sm:$0xff]  ;;  %v960_v16 = vld [vmem:[#allocation2 + $0x88] sm:$0x3] }
  0x6d   : > { %vm732_vm8 = vmand %vm728_vm3, %vm730_vm5  ;;  %v931_v54 = vrot.slane %v909_v48, %v4964_v38  ;;  %v1381_v19 = vunpack.c.l.s4 %v4741_v18  ;;  %v4742_v21 = vmov 1934713408   ;;  %v945_v33 = vld [vmem:[#allocation2 + $0x10] sm:$0xff]  ;;  %v950_v37 = vld [vmem:[#allocation2 + $0x38] sm:$0x3]  ;;  %vm1557_vm0 = vcmask 261120  }
  0x6e   : > { %1080 = vperm.xlu0 %4651, %v1018_v34   ;;  %v1146_v34 = vrot.slane %v890_v25, %v4978_v46  ;;  %v889_v42 = vrot.slane %v861_v30, %v4964_v38  ;;  %vm734_vm10 = vmand %vm731_vm6, %vm733_vm7  ;;  %v1162_v51 = vrot.slane %v891_v44, %v4978_v46  ;;  %v908_v55 = vrot.slane %v894_v49, %v4964_v38  ;;  %v944_v25 = vld [vmem:[#allocation2 + $0x8] sm:$0x3]  ;;  %v961_v30 = vld [vmem:[#allocation2 + $0x90] sm:$0xff] }
  0x6f   : > { %vm735_vm11 = vmand %vm732_vm8, %vm733_vm7  ;;  %v1174_v57 = vrot.slane %v931_v54, %v4978_v46  ;;  %v941_v58 = vcombine.high %v931_v54, %v931_v54  ;;  %v949_v35 = vld [vmem:[#allocation2 + $0x30] sm:$0xff]  ;;  %v954_v54 = vld [vmem:[#allocation2 + $0x58] sm:$0x3]  ;;  %vm1560_vm1 = vcmask 392192   ;;  %vm1563_vm2 = vcmask 523264  }
  0x70   : > { %1084 = vperm.xlu1 %4652, %v1022_v52   ;;  %vm5122_vm12 = vmand %vm734_vm10, %vm736_vm9  ;;  %v1158_v45 = vrot.slane %v889_v42, %v4978_v46  ;;  %v893_v47 = vcombine.high %v889_v42, %v889_v42  ;;  %v917_v52 = vrot.slane %v901_v43, %v4964_v38  ;;  %v910_v59 = vcombine.high %v908_v55, %v908_v55  ;;  %v953_v48 = vld [vmem:[#allocation2 + $0x50] sm:$0xff]  ;;  %v967_v18 = vld [vmem:[#allocation2 + $0xc0] sm:$0xff] }
  0x71   : > { %vm5127_vm13 = vmand %vm735_vm11, %vm736_vm9  ;;  %v924_v61 = vrot.slane %v908_v55, %v4964_v38  ;;  %v1182_v62 = vrot.slane %v941_v58, %v4978_v46  ;;  %v955_v55 = vld [vmem:[#allocation2 + $0x60] sm:$0xff]  ;;  %vm1566_vm3 = vcmask 654336   ;;  %vm1569_vm4 = vcmask 785408  }
  0x72   : > { %1088 = vperm.xlu0 %4651, %v1026_v53   ;;  %v1166_v53 = vrot.slane %v893_v47, %v4978_v46  ;;  %v1170_v40 = vrot.slane %v917_v52, %v4978_v46  ;;  %v939_v56 = vcombine.high %v917_v52, %v917_v52  ;;  %v938_v63 = vrot.slane %v910_v59, %v4964_v38  ;;  %v952_v47 = vld [vmem:[#allocation2 + $0x48] sm:$0x3] }
  0x73   : > { %v1186_v0 = vrot.slane %v924_v61, %v4978_v46  ;;  %v940_v1 = vcombine.high %v924_v61, %v924_v61  ;;  %v957_v61 = vld [vmem:[#allocation2 + $0x70] sm:$0xff]  ;;  %vm1572_vm5 = vcmask 916480   ;;  %vm4067_vm6 = vcmask 1043456  }
  0x74   : > { %1092 = vperm.xlu1 %4652, %v1030_v15   ;;  %v1178_v60 = vrot.slane %v939_v56, %v4978_v46  ;;  %v1190_v2 = vrot.slane %v938_v63, %v4978_v46  ;;  %v942_v3 = vcombine.high %v938_v63, %v938_v63  ;;  %v963_v63 = vld [vmem:[#allocation2 + $0xa0] sm:$0xff]  ;;  %vm4063_vm7 = vcmask 64512  }
  0x75   : > { %v1194_v4 = vrot.slane %v940_v1, %v4978_v46 }
  0x76   : > { %1096 = vperm.xlu0 %4651, %v1034_v20   ;;  %v1198_v5 = vrot.slane %v942_v3, %v4978_v46  ;;  %v5150_v46 = vunpack.c.l.s4 %v4742_v21 }
  0x78   : > { %1100 = vperm.xlu1 %4652, %v1038_v23   ;;  %v1382_v23 = vunpack.c.0.s8 %v1381_v19  ;;  %v1415_v7 = vunpack.c.0.s8 %v5150_v46 }
  0x7a   : > { %1200 = vperm.xlu0 %4651, %v1138_v26   ;;  %v947_v26 = vld [vmem:[#allocation2 + $0x20] sm:$0xff]  ;;  %v5160_v42 = vsub.s32 %v1382_v23, %v4953_v36 }
  0x7c   : > { %1204 = vperm.xlu1 %4652, %v1142_v28   ;;  %v959_v28 = vld [vmem:[#allocation2 + $0x80] sm:$0xff] }
  0x7e   : > { %1208 = vperm.xlu0 %4651, %v1146_v34   ;;  %v946_v34 = vld [vmem:[#allocation2 + $0x18] sm:$0x3] }
  0x80   : > { %1212 = vperm.xlu1 %4652, %v1150_v41  }
  0x82   : > { %1216 = vperm.xlu0 %4651, %v1154_v32  }
  0x84   : > { %1220 = vperm.xlu1 %4652, %v1158_v45   ;;  %v951_v45 = vld [vmem:[#allocation2 + $0x40] sm:$0xff] }
  0x86   : > { %1224 = vperm.xlu0 %4651, %v1162_v51  }
  0x88   : > { %1228 = vperm.xlu1 %4652, %v1166_v53  }
  0x8a   : > { %1232 = vperm.xlu0 %4651, %v1170_v40   ;;  %v956_v40 = vld [vmem:[#allocation2 + $0x68] sm:$0x3] }
  0x8c   : > { %1236 = vperm.xlu1 %4652, %v1174_v57  }
  0x8e   : > { %1240 = vperm.xlu0 %4651, %v1178_v60  }
  0x90   : > { %1244 = vperm.xlu1 %4652, %v1182_v62   ;;  %v958_v62 = vld [vmem:[#allocation2 + $0x78] sm:$0x3] }
  0x92   : > { %1248 = vperm.xlu0 %4651, %v1186_v0  }
  0x94   : > { %1252 = vperm.xlu1 %4652, %v1190_v2  }
  0x96   : > { %1256 = vperm.xlu0 %4651, %v1194_v4   ;;  %v964_v4 = vld [vmem:[#allocation2 + $0xa8] sm:$0x3] }
  0x98   : > { %1260 = vperm.xlu1 %4652, %v1198_v5  }
  0xd9   : > { %v1041_v6 = vpop.permute.xlu0 %1040 }
  0xda   : > { %v1103_v43 = vmul.f32 %v1041_v6, %v943_v24  ;;  %v1104_v32 = vmul.f32 %v1041_v6, %v944_v25  ;;  %v968_v25 = vld [vmem:[#allocation2 + $0xc8] sm:$0x3] }
  0xdb   : > { %v1049_v8 = vpop.permute.xlu1 %1048 }
  0xdc   : > { %v1107_v44 = vmul.f32 %v1049_v8, %v947_v26  ;;  %v1108_v49 = vmul.f32 %v1049_v8, %v948_v27 }
  0xdd   : > { %v1073_v9 = vpop.permute.xlu0 %1072 }
  0xde   : > { %v5162_v51 = vmul.f32 %v1073_v9, %v959_v28  ;;  %v5164_v52 = vmul.f32 %v1073_v9, %v960_v16  ;;  %v965_v9 = vld [vmem:[#allocation2 + $0xb0] sm:$0xff] }
  0xdf   : > { %v1077_v38 = vpop.permute.xlu1 %1076 }
  0xe0   : > { %v5166_v53 = vmul.f32 %v1077_v38, %v961_v30  ;;  %v5170_v57 = vmul.f32 %v1077_v38, %v962_v31  ;;  %v966_v38 = vld [vmem:[#allocation2 + $0xb8] sm:$0x3] }
  0xe1   : > { %v1045_v10 = vpop.permute.xlu0 %1044 }
  0xe2   : > { %v1105_v58 = vmul.f32 %v1045_v10, %v945_v33  ;;  %v1106_v59 = vmul.f32 %v1045_v10, %v946_v34  ;;  %v969_v33 = vld [vmem:[#allocation2 + $0xd0] sm:$0xff] }
  0xe3   : > { %v1053_v11 = vpop.permute.xlu1 %1052 }
  0xe4   : > { %v1109_v60 = vmul.f32 %v1053_v11, %v949_v35  ;;  %v1110_v0 = vmul.f32 %v1053_v11, %v950_v37 }
  0xe5   : > { %v1057_v12 = vpop.permute.xlu0 %1056 }
  0xe6   : > { %v1111_v1 = vmul.f32 %v1057_v12, %v951_v45  ;;  %v1112_v2 = vmul.f32 %v1057_v12, %v952_v47 }
  0xe7   : > { %v1061_v13 = vpop.permute.xlu1 %1060 }
  0xe8   : > { %v5172_v3 = vmul.f32 %v1061_v13, %v953_v48  ;;  %v5174_v6 = vmul.f32 %v1061_v13, %v954_v54  ;;  %v970_v48 = vld [vmem:[#allocation2 + $0xd8] sm:$0x3]  ;;  %v971_v54 = vld [vmem:[#allocation2 + $0xe0] sm:$0xff] }
  0xe9   : > { %v1065_v14 = vpop.permute.xlu0 %1064 }
  0xea   : > { %v5176_v8 = vmul.f32 %v1065_v14, %v955_v55  ;;  %v1116_v21 = vmul.f32 %v1065_v14, %v956_v40 }
  0xeb   : > { %v1069_v15 = vpop.permute.xlu1 %1068 }
  0xec   : > { %v5178_v23 = vmul.f32 %v1069_v15, %v957_v61  ;;  %v5180_v24 = vmul.f32 %v1069_v15, %v958_v62 }
  0xed   : > { %v5146_v17 = vpop.permute.xlu0 %1080 }
  0xee   : > { %v5183_v11 = vmul.f32 %v5146_v17, %v963_v63  ;;  %v5186_v16 = vmul.f32 %v5146_v17, %v964_v4 }
  0xef   : > { %v5148_v20 = vpop.permute.xlu1 %1084 }
  0xf0   : > { %v5189_v30 = vmul.f32 %v5148_v20, %v965_v9  ;;  %v5192_v14 = vmul.f32 %v5148_v20, %v966_v38 }
  0xf1   : > { %v5152_v22 = vpop.permute.xlu0 %1088 }
  0xf2   : > { %v5195_v15 = vmul.f32 %v5152_v22, %v967_v18 }
  0xf3   : > { %v5154_v29 = vpop.permute.xlu1 %1092 }
  0xf4   : > { %v5211_v61 = vmul.f32 %v5154_v29, %v969_v33  ;;  %v5218_v38 = vmul.f32 %v5154_v29, %v970_v48 }
  0xf5   : > { %v5157_v41 = vpop.permute.xlu0 %1096 }
  0xf7   : > { %v5168_v56 = vpop.permute.xlu1 %1100 }
  0xf9   : > { %v1201_v5 = vpop.permute.xlu0 %1200 }
  0xfa   : > { %v1263_v19 = vadd.f32 %v1201_v5, %v1103_v43  ;;  %v1264_v10 = vadd.f32 %v1201_v5, %v1104_v32  ;;  %v5202_v43 = vmul.f32 %v5152_v22, %v968_v25 }
  0xfb   : > { %v1205_v12 = vpop.permute.xlu1 %1204 }
  0xfc   : > { %v1295_v26 = vmax.f32 %v1263_v19, 0.0  ;;  %v1296_v13 = vmax.f32 %v1264_v10, 0.0  ;;  %v1265_v27 = vadd.f32 %v1205_v12, %v1105_v58  ;;  %v1266_v28 = vadd.f32 %v1205_v12, %v1106_v59 }
  0xfd   : > { %v1209_v31 = vpop.permute.xlu0 %1208 }
  0xfe   : > { %v1331_v34 = vsel %vm5122_vm12, %v1295_v26, 0.0  ;;  %v1332_v35 = vsel %vm5127_vm13, %v1296_v13, 0.0  ;;  %v1297_v37 = vmax.f32 %v1265_v27, 0.0  ;;  %v1298_v17 = vmax.f32 %v1266_v28, 0.0 }
  0xff   : > { %v5204_v32 = vpack.c.bf16 %v1332_v35, %v1331_v34  ;;  %v1267_v20 = vadd.f32 %v1209_v31, %v1107_v44  ;;  %v1268_v45 = vadd.f32 %v1209_v31, %v1108_v49  ;;  %v1213_v47 = vpop.permute.xlu1 %1212 }
 0x100   : > { %v1333_v55 = vsel %vm5122_vm12, %v1297_v37, 0.0  ;;  %v1334_v40 = vsel %vm5127_vm13, %v1298_v17, 0.0  ;;  %v1269_v58 = vadd.f32 %v1213_v47, %v1109_v60  ;;  %v1270_v59 = vadd.f32 %v1213_v47, %v1110_v0  ;;  %v972_v60 = vld [vmem:[#allocation2 + $0xe8] sm:$0x3] }
 0x101   : > { %v5213_v22 = vpack.c.bf16 %v1334_v40, %v1333_v55  ;;  %v1299_v62 = vmax.f32 %v1267_v20, 0.0  ;;  %v1300_v63 = vmax.f32 %v1268_v45, 0.0  ;;  %v1217_v44 = vpop.permute.xlu0 %1216  ;;  %1594 = vrot.lane.b32.xlu0 %v5204_v32, %s4743_s19  ;;  %v5221_v0 = vmul.f32 %v5157_v41, %v971_v54 }
 0x102   : > { %v1301_v49 = vmax.f32 %v1269_v58, 0.0  ;;  %v1302_v4 = vmax.f32 %v1270_v59, 0.0  ;;  %v1271_v5 = vadd.f32 %v1217_v44, %v1111_v1  ;;  %v1272_v9 = vadd.f32 %v1217_v44, %v1112_v2 }
 0x103   : > { %v1335_v18 = vsel %vm5122_vm12, %v1299_v62, 0.0  ;;  %v1336_v19 = vsel %vm5127_vm13, %v1300_v63, 0.0  ;;  %v1221_v10 = vpop.permute.xlu1 %1220  ;;  %1596 = vrot.lane.b32.xlu1 %v5213_v22, %s4743_s19  ;;  %v5240_v31 = vmul.f32 %v5157_v41, %v972_v60  ;;  %v5375_v46 = vrot.slane %v5213_v22, 1 }
 0x104   : > { %v5229_v12 = vpack.c.bf16 %v1336_v19, %v1335_v18  ;;  %v1337_v29 = vsel %vm5122_vm12, %v1301_v49, 0.0  ;;  %v1338_v1 = vsel %vm5127_vm13, %v1302_v4, 0.0  ;;  %v1303_v2 = vmax.f32 %v1271_v5, 0.0 }
 0x105   : > { %v5235_v25 = vpack.c.bf16 %v1338_v1, %v1337_v29  ;;  %v1304_v26 = vmax.f32 %v1272_v9, 0.0  ;;  %v1273_v13 = vadd.f32 %v1221_v10, %v5172_v3  ;;  %v1274_v27 = vadd.f32 %v1221_v10, %v5174_v6  ;;  %v1225_v28 = vpop.permute.xlu0 %1224  ;;  %6754 = vst [vmem:[#allocation9_spill] sm:$0xff] %v5375_v46 }
 0x106   : > { %v1339_v33 = vsel %vm5122_vm12, %v1303_v2, 0.0  ;;  %v1275_v35 = vadd.f32 %v1225_v28, %v5176_v8  ;;  %v1276_v37 = vadd.f32 %v1225_v28, %v1116_v21 }
 0x107   : > { %v1340_v17 = vsel %vm5127_vm13, %v1304_v26, 0.0  ;;  %v4348_v20 = vpack.c.bf16 %v1339_v33, %v1331_v34  ;;  %v1305_v45 = vmax.f32 %v1273_v13, 0.0  ;;  %v1306_v47 = vmax.f32 %v1274_v27, 0.0  ;;  %v1229_v48 = vpop.permute.xlu1 %1228  ;;  %v973_v13 = vld [vmem:[#allocation2 + $0xf0] sm:$0xff] }
 0x108   : > { %v5247_v3 = vpack.c.bf16 %v1340_v17, %v1339_v33  ;;  %v1307_v6 = vmax.f32 %v1275_v35, 0.0  ;;  %v1308_v54 = vmax.f32 %v1276_v37, 0.0  ;;  %v1277_v41 = vadd.f32 %v1229_v48, %v5178_v23 }
 0x109   : > { %v5251_v40 = vrot.slane %v4348_v20, %v5160_v42  ;;  %v1341_v8 = vsel %vm5122_vm12, %v1305_v45, 0.0  ;;  %v1342_v21 = vsel %vm5127_vm13, %v1306_v47, 0.0  ;;  %v1278_v34 = vadd.f32 %v1229_v48, %v5180_v24  ;;  %v1233_v58 = vpop.permute.xlu0 %1232  ;;  %v974_v47 = vld [vmem:[#allocation2 + $0xf8] sm:$0x3] }
 0x10a   : > { %v5258_v59 = vpack.c.bf16 %v1342_v21, %v1341_v8  ;;  %v4352_v62 = vpack.c.bf16 %v1341_v8, %v1333_v55  ;;  %v1343_v63 = vsel %vm5122_vm12, %v1307_v6, 0.0  ;;  %v1344_v23 = vsel %vm5127_vm13, %v1308_v54, 0.0 }
 0x10b   : > { %v5264_v44 = vpack.c.bf16 %v1344_v23, %v1343_v63  ;;  %v4349_v49 = vpack.c.bf16 %v1343_v63, %v1335_v18  ;;  %v1309_v4 = vmax.f32 %v1277_v41, 0.0  ;;  %v1310_v5 = vmax.f32 %v1278_v34, 0.0  ;;  %v1237_v9 = vpop.permute.xlu1 %1236 }
 0x10c   : > { %v5267_v60 = vrot.slane %v4352_v62, %v5160_v42  ;;  %v1279_v24 = vadd.f32 %v1233_v58, %v5162_v51  ;;  %v1280_v19 = vadd.f32 %v1233_v58, %v5164_v52  ;;  %v1281_v55 = vadd.f32 %v1237_v9, %v5166_v53 }
 0x10d   : > { %v5273_v10 = vrot.slane %v4349_v49, %v5160_v42  ;;  %v1345_v1 = vsel %vm5122_vm12, %v1309_v4, 0.0  ;;  %v1346_v18 = vsel %vm5127_vm13, %v1310_v5, 0.0  ;;  %v1282_v2 = vadd.f32 %v1237_v9, %v5170_v57  ;;  %v1241_v26 = vpop.permute.xlu0 %1240 }
 0x10e   : > { %v5280_v27 = vpack.c.bf16 %v1346_v18, %v1345_v1  ;;  %v4353_v51 = vpack.c.bf16 %v1345_v1, %v1337_v29  ;;  %v1311_v28 = vmax.f32 %v1279_v24, 0.0  ;;  %v1312_v52 = vmax.f32 %v1280_v19, 0.0 }
 0x10f   : > { %v1411_v53 = vcombine.low %v5251_v40, %v5273_v10  ;;  %v1313_v35 = vmax.f32 %v1281_v55, 0.0  ;;  %v1314_v37 = vmax.f32 %v1282_v2, 0.0  ;;  %v1245_v17 = vpop.permute.xlu1 %1244  ;;  %v1283_v45 = vadd.f32 %v1241_v26, %v5183_v11 }
 0x110   : > { %v5287_v20 = vrot.slane %v4353_v51, %v5160_v42  ;;  %v5291_v57 = vsel %vm5122_vm12, %v1311_v28, 0.0  ;;  %v1348_v29 = vsel %vm5127_vm13, %v1312_v52, 0.0  ;;  %v1133_v48 = vmul.f32 %v5168_v56, %v973_v13 }
 0x111   : > { %v5298_v6 = vpack.c.bf16 %v1348_v29, %v5291_v57  ;;  %v5302_v54 = vsel %vm5122_vm12, %v1313_v35, 0.0  ;;  %v1350_v41 = vsel %vm5127_vm13, %v1314_v37, 0.0  ;;  %v1249_v8 = vpop.permute.xlu0 %1248  ;;  %v1284_v58 = vadd.f32 %v1241_v26, %v5186_v16 }
 0x112   : > { %v1479_v21 = vcombine.low %v5267_v60, %v5287_v20  ;;  %v5311_v34 = vpack.c.bf16 %v1350_v41, %v5302_v54  ;;  %v1315_v62 = vmax.f32 %v1283_v45, 0.0  ;;  %v1285_v63 = vadd.f32 %v1245_v17, %v5189_v30 }
 0x113   : > { %v1286_v23 = vadd.f32 %v1245_v17, %v5192_v14  ;;  %v1287_v49 = vadd.f32 %v1249_v8, %v5195_v15  ;;  %1610 = vrot.lane.b32.xlu0 %v5298_v6, %s4743_s19  ;;  %v1253_v4 = vpop.permute.xlu1 %1252  ;;  %v1134_v5 = vmul.f32 %v5168_v56, %v974_v47  ;;  %v1316_v9 = vmax.f32 %v1284_v58, 0.0 }
 0x114   : > { %v1288_v24 = vadd.f32 %v1249_v8, %v5202_v43  ;;  %v1289_v19 = vadd.f32 %v1253_v4, %v5211_v61  ;;  %1612 = vrot.lane.b32.xlu1 %v5311_v34, %s4743_s19  ;;  %v1351_v16 = vsel %vm5122_vm12, %v1315_v62, 0.0  ;;  %v1317_v30 = vmax.f32 %v1285_v63, 0.0 }
 0x115   : > { %v1318_v14 = vmax.f32 %v1286_v23, 0.0  ;;  %v1319_v15 = vmax.f32 %v1287_v49, 0.0  ;;  %v1352_v55 = vsel %vm5127_vm13, %v1316_v9, 0.0  ;;  %v1290_v56 = vadd.f32 %v1253_v4, %v5218_v38  ;;  %v1257_v2 = vpop.permute.xlu0 %1256 }
 0x116   : > { %v1320_v1 = vmax.f32 %v1288_v24, 0.0  ;;  %v1321_v18 = vmax.f32 %v1289_v19, 0.0  ;;  %v5329_v43 = vpack.c.bf16 %v1352_v55, %v1351_v16  ;;  %v1353_v61 = vsel %vm5122_vm12, %v1317_v30, 0.0 }
 0x117   : > { %v1354_v26 = vsel %vm5127_vm13, %v1318_v14, 0.0  ;;  %v1355_v13 = vsel %vm5122_vm12, %v1319_v15, 0.0  ;;  %1933 = vrot.lane.b32.xlu0 %v5204_v32, %s4744_s22  ;;  %v1261_v51 = vpop.permute.xlu1 %1260  ;;  %v1322_v35 = vmax.f32 %v1290_v56, 0.0  ;;  %v1291_v29 = vadd.f32 %v1257_v2, %v5221_v0 }
 0x118   : > { %v5339_v28 = vpack.c.bf16 %v1354_v26, %v1353_v61  ;;  %v1356_v38 = vsel %vm5127_vm13, %v1320_v1, 0.0  ;;  %v4350_v52 = vpack.c.bf16 %v1355_v13, %v5291_v57  ;;  %1935 = vrot.lane.b32.xlu1 %v5213_v22, %s4744_s22  ;;  %v1357_v17 = vsel %vm5122_vm12, %v1321_v18, 0.0 }
 0x119   : > { %v5346_v37 = vpack.c.bf16 %v1356_v38, %v1355_v13  ;;  %v1292_v45 = vadd.f32 %v1257_v2, %v5240_v31  ;;  %v1358_v47 = vsel %vm5127_vm13, %v1322_v35, 0.0  ;;  %v4354_v41 = vpack.c.bf16 %v1357_v17, %v5302_v54 }
 0x11a   : > { %v1293_v8 = vadd.f32 %v1261_v51, %v1133_v48  ;;  %v5355_v57 = vpack.c.bf16 %v1358_v47, %v1357_v17  ;;  %v1323_v58 = vmax.f32 %v1291_v29, 0.0  ;;  %v1294_v63 = vadd.f32 %v1261_v51, %v1134_v5 }
 0x11b   : > { %v1324_v62 = vmax.f32 %v1292_v45, 0.0  ;;  %1949 = vrot.lane.b32.xlu0 %v5298_v6, %s4744_s22  ;;  %v5362_v0 = vsub.s32 %v1415_v7, %v4953_v36  ;;  %v5367_v54 = vrot.slane %v5204_v32, 1  ;;  %v2228_v48 = vshll.u32 %v5204_v32, 16 }
 0x11c   : > { %v1325_v31 = vmax.f32 %v1293_v8, 0.0  ;;  %1951 = vrot.lane.b32.xlu1 %v5311_v34, %s4744_s22  ;;  %v1359_v23 = vsel %vm5122_vm12, %v1323_v58, 0.0  ;;  %v1326_v4 = vmax.f32 %v1294_v63, 0.0  ;;  %v2235_v9 = vshll.u32 %v5213_v22, 16 }
 0x11d   : > { %6753 = vst [vmem:[#allocation8_spill] sm:$0xff] %v5367_v54  ;;  %v1360_v49 = vsel %vm5127_vm13, %v1324_v62, 0.0  ;;  %v4351_v7 = vpack.c.bf16 %v1359_v23, %v1351_v16  ;;  %v5383_v24 = vrot.slane %v4350_v52, %v5160_v42  ;;  %v2226_v14 = vshrl.u32 %v5204_v32, 16 }
 0x11e   : > { %v5377_v36 = vpack.c.bf16 %v1360_v49, %v1359_v23  ;;  %v1361_v5 = vsel %vm5122_vm12, %v1325_v31, 0.0  ;;  %v1362_v19 = vsel %vm5127_vm13, %v1326_v4, 0.0  ;;  %v2230_v39 = vrot.slane %v2228_v48, 1 }
 0x11f   : > { %v4355_v30 = vpack.c.bf16 %v1361_v5, %v1353_v61  ;;  %1598 = vrot.lane.b32.xlu0 %v5229_v12, %s4743_s19  ;;  %v5391_v15 = vrot.slane %v4351_v7, %v5160_v42  ;;  %v5393_v16 = vpack.c.bf16 %v1362_v19, %v1361_v5  ;;  %v2284_v55 = vshll.u32 %v5298_v6, 16 }
 0x120   : > { %1600 = vrot.lane.b32.xlu1 %v5235_v25, %s4743_s19  ;;  %v5402_v50 = vrot.slane %v1411_v53, %v5362_v0  ;;  %v5405_v1 = vrot.slane %v4354_v41, %v5160_v42  ;;  %v2291_v56 = vshll.u32 %v5311_v34, 16  ;;  %v2237_v61 = vrot.slane %v2235_v9, 1 }
 0x121   : > { %v5408_v32 = vrot.slane %v4355_v30, %v5160_v42  ;;  %v1427_v18 = vcombine.low %v5383_v24, %v5391_v15  ;;  %v2242_v26 = vshll.u32 %v5229_v12, 16  ;;  %v2286_v51 = vrot.slane %v2284_v55, 1 }
 0x122   : > { %v2293_v38 = vrot.slane %v2291_v56, 1  ;;  %v5426_v52 = vrot.slane %v1479_v21, %v5362_v0  ;;  %v5430_v35 = vor.u32 %v2230_v39, %v2226_v14  ;;  %v2233_v17 = vshrl.u32 %v5213_v22, 16 }
 0x123   : > { %v1495_v53 = vcombine.low %v5405_v1, %v5408_v32  ;;  %1602 = vrot.lane.b32.xlu0 %v5247_v3, %s4743_s19  ;;  %v2249_v29 = vshll.u32 %v5235_v25, 16  ;;  %v2282_v45 = vshrl.u32 %v5298_v6, 16  ;;  %v2289_v47 = vshrl.u32 %v5311_v34, 16 }
 0x124   : > { %1604 = vrot.lane.b32.xlu1 %v5258_v59, %s4743_s19  ;;  %v2244_v41 = vrot.slane %v2242_v26, 1  ;;  %v2256_v8 = vshll.u32 %v5247_v3, 16  ;;  %v5437_v58 = vor.u32 %v2237_v61, %v2233_v17  ;;  %v2240_v21 = vshrl.u32 %v5229_v12, 16 }
 0x125   : > { %v2247_v62 = vshrl.u32 %v5235_v25, 16  ;;  %v2263_v63 = vshll.u32 %v5258_v59, 16  ;;  %v5444_v22 = vor.u32 %v2286_v51, %v2282_v45  ;;  %v5446_v31 = vor.u32 %v2293_v38, %v2289_v47 }
 0x126   : > { %v2258_v48 = vrot.slane %v2256_v8, 1  ;;  %v2298_v23 = vshll.u32 %v5329_v43, 16  ;;  %v2251_v49 = vrot.slane %v2249_v29, 1  ;;  %v2254_v4 = vshrl.u32 %v5247_v3, 16 }
 0x127   : > { %1614 = vrot.lane.b32.xlu0 %v5329_v43, %s4743_s19  ;;  %v2265_v7 = vrot.slane %v2263_v63, 1  ;;  %v2305_v5 = vshll.u32 %v5339_v28, 16  ;;  %v5453_v9 = vor.u32 %v2244_v41, %v2240_v21  ;;  %v2261_v19 = vshrl.u32 %v5258_v59, 16 }
 0x128   : > { %1616 = vrot.lane.b32.xlu1 %v5339_v28, %s4743_s19  ;;  %v2296_v30 = vshrl.u32 %v5329_v43, 16  ;;  %v2312_v14 = vshll.u32 %v5346_v37, 16  ;;  %v5458_v39 = vor.u32 %v2258_v48, %v2254_v4  ;;  %v2300_v55 = vrot.slane %v2298_v23, 1 }
 0x129   : > { %v2303_v56 = vshrl.u32 %v5339_v28, 16  ;;  %v2319_v61 = vshll.u32 %v5355_v57, 16  ;;  %v5464_v26 = vor.u32 %v2265_v7, %v2261_v19  ;;  %v2310_v51 = vshrl.u32 %v5346_v37, 16 }
 0x12a   : > { %v2314_v38 = vrot.slane %v2312_v14, 1  ;;  %v2270_v17 = vshll.u32 %v5264_v44, 16  ;;  %v5470_v29 = vor.u32 %v2251_v49, %v2247_v62  ;;  %v2307_v45 = vrot.slane %v2305_v5, 1 }
 0x12b   : > { %1618 = vrot.lane.b32.xlu0 %v5346_v37, %s4743_s19  ;;  %v2317_v47 = vshrl.u32 %v5355_v57, 16  ;;  %v2321_v41 = vrot.slane %v2319_v61, 1  ;;  %v2268_v21 = vshrl.u32 %v5264_v44, 16  ;;  %v2277_v48 = vshll.u32 %v5280_v27, 16 }
 0x12c   : > { %1620 = vrot.lane.b32.xlu1 %v5355_v57, %s4743_s19  ;;  %v5473_v8 = vor.u32 %v2314_v38, %v2310_v51  ;;  %v2272_v63 = vrot.slane %v2270_v17, 1  ;;  %v2353_v23 = vcombine.low %v5430_v35, %v5458_v39  ;;  %v5479_v4 = vor.u32 %v2300_v55, %v2296_v30 }
 0x12d   : > { %v5481_v7 = vor.u32 %v2321_v41, %v2317_v47  ;;  %v2326_v62 = vshll.u32 %v5377_v36, 16  ;;  %v2421_v49 = vcombine.low %v5437_v58, %v5464_v26  ;;  %v2275_v19 = vshrl.u32 %v5280_v27, 16 }
 0x12e   : > { %v5488_v5 = vor.u32 %v2272_v63, %v2268_v21  ;;  %v2279_v14 = vrot.slane %v2277_v48, 1  ;;  %v5493_v30 = vor.u32 %v2307_v45, %v2303_v56  ;;  %v2324_v55 = vshrl.u32 %v5377_v36, 16 }
 0x12f   : > { %1937 = vrot.lane.b32.xlu0 %v5229_v12, %s4744_s22  ;;  %v2328_v61 = vrot.slane %v2326_v62, 1  ;;  %v2333_v51 = vshll.u32 %v5393_v16, 16  ;;  %v2369_v38 = vcombine.low %v5444_v22, %v5473_v8  ;;  %v2437_v17 = vcombine.low %v5446_v31, %v5481_v7 }
 0x130   : > { %1939 = vrot.lane.b32.xlu1 %v5235_v25, %s4744_s22  ;;  %v5501_v47 = vor.u32 %v2279_v14, %v2275_v19  ;;  %v2331_v41 = vshrl.u32 %v5393_v16, 16  ;;  %v5507_v56 = vrot.slane %v5229_v12, 1  ;;  %v5510_v45 = vrot.slane %v5247_v3, 1 }
 0x131   : > { %v5504_v21 = vor.u32 %v2328_v61, %v2324_v55  ;;  %v2335_v63 = vrot.slane %v2333_v51, 1  ;;  %v2361_v48 = vcombine.low %v5453_v9, %v5488_v5  ;;  %v5519_v19 = vrot.slane %v5258_v59, 1 }
 0x132   : > { %6755 = vst [vmem:[#allocation10_spill] sm:$0xff] %v5507_v56  ;;  %6756 = vst [vmem:[#allocation11_spill] sm:$0xff] %v5510_v45  ;;  %v2429_v62 = vcombine.low %v5470_v29, %v5501_v47  ;;  %v5522_v14 = vrot.slane %v5264_v44, 1  ;;  %v5533_v61 = vrot.slane %v5280_v27, 1  ;;  %v1435_v51 = vrot.slane %v1427_v18, %v5362_v0 }
 0x133   : > { %1941 = vrot.lane.b32.xlu0 %v5247_v3, %s4744_s22  ;;  %6757 = vst [vmem:[#allocation12_spill] sm:$0xff] %v5519_v19  ;;  %v2377_v12 = vcombine.low %v5479_v4, %v5504_v21  ;;  %v5528_v55 = vor.u32 %v2335_v63, %v2331_v41  ;;  %v3213_v3 = vcombine.low %v5367_v54, %v5510_v45  ;;  %v5544_v13 = vrot.slane %v5235_v25, 1 }
 0x134   : > { %6758 = vst [vmem:[#allocation13_spill] sm:$0xff] %v5522_v14  ;;  %1943 = vrot.lane.b32.xlu1 %v5258_v59, %s4744_s22  ;;  %6759 = vst [vmem:[#allocation14_spill] sm:$0xff] %v5533_v61  ;;  %v1503_v59 = vrot.slane %v1495_v53, %v5362_v0  ;;  %v3281_v41 = vcombine.low %v5375_v46, %v5519_v19  ;;  %v5549_v63 = vrot.slane %v2353_v23, %v5160_v42 }
 0x135   : > { %6760 = vst [vmem:[#allocation15_spill] sm:$0xff] %v5544_v13  ;;  %v5552_v11 = vrot.slane %v2421_v49, %v5160_v42  ;;  %v2445_v18 = vcombine.low %v5493_v30, %v5528_v55  ;;  %v3221_v2 = vcombine.low %v5507_v56, %v5522_v14  ;;  %v5561_v25 = vrot.slane %v2369_v38, %v5160_v42 }
 0x136   : > { %6761 = vst [vmem:[#allocation16_spill] sm:$0xff] %v5549_v63  ;;  %v5564_v53 = vrot.slane %v2437_v17, %v5160_v42  ;;  %v5567_v23 = vrot.slane %v2361_v48, %v5160_v42  ;;  %v3289_v49 = vcombine.low %v5544_v13, %v5533_v61  ;;  %v5574_v33 = vrot.slane %v2429_v62, %v5160_v42 }
 0x137   : > { %6762 = vst [vmem:[#allocation17_spill] sm:$0xff] %v5552_v11  ;;  %1953 = vrot.lane.b32.xlu0 %v5329_v43, %s4744_s22  ;;  %6763 = vst [vmem:[#allocation18_spill] sm:$0xff] %v5561_v25  ;;  %v5577_v14 = vrot.slane %v2377_v12, %v5160_v42  ;;  %v3220_v38 = vrot.slane %v3213_v3, %v5160_v42  ;;  %v3228_v17 = vrot.slane %v3221_v2, %v5160_v42 }
 0x138   : > { %6764 = vst [vmem:[#allocation19_spill] sm:$0xff] %v5564_v53  ;;  %6765 = vst [vmem:[#allocation20_spill] sm:$0xff] %v5567_v23  ;;  %1955 = vrot.lane.b32.xlu1 %v5339_v28, %s4744_s22  ;;  %v5582_v19 = vrot.slane %v2445_v18, %v5160_v42  ;;  %v3288_v48 = vrot.slane %v3281_v41, %v5160_v42  ;;  %v3296_v61 = vrot.slane %v3289_v49, %v5160_v42 }
 0x139   : > { %6766 = vst [vmem:[#allocation21_spill] sm:$0xff] %v5574_v33  ;;  %6767 = vst [vmem:[#allocation22_spill] sm:$0xff] %v5577_v14  ;;  %v5587_v45 = vrot.slane %v5298_v6, 1  ;;  %v3245_v13 = vcombine.low %v3220_v38, %v3228_v17  ;;  %v3246_v62 = vcombine.high %v3220_v38, %v3228_v17  ;;  %v5590_v56 = vrot.slane %v5311_v34, 1 }
 0x13a   : > { %6768 = vst [vmem:[#allocation23_spill] sm:$0xff] %v5582_v19  ;;  %v5593_v12 = vrot.slane %v5329_v43, 1  ;;  %v3313_v2 = vcombine.low %v3288_v48, %v3296_v61  ;;  %v3314_v3 = vcombine.high %v3288_v48, %v3296_v61  ;;  %v5598_v41 = vrot.slane %v5339_v28, 1 }
 0x13b   : > { %6769 = vst [vmem:[#allocation24_spill] sm:$0xff] %v5587_v45  ;;  %6770 = vst [vmem:[#allocation25_spill] sm:$0xff] %v5590_v56  ;;  %1957 = vrot.lane.b32.xlu0 %v5346_v37, %s4744_s22  ;;  %v5601_v18 = vrot.slane %v5346_v37, 1  ;;  %v5606_v6 = vrot.slane %v5355_v57, 1  ;;  %v5609_v34 = vrot.slane %v5377_v36, 1  ;;  %v5612_v43 = vrot.slane %v5393_v16, 1 }
 0x13c   : > { %6771 = vst [vmem:[#allocation26_spill] sm:$0xff] %v5593_v12  ;;  %6772 = vst [vmem:[#allocation27_spill] sm:$0xff] %v5598_v41  ;;  %1959 = vrot.lane.b32.xlu1 %v5355_v57, %s4744_s22  ;;  %v5615_v61 = vcombine.low %v5402_v50, %v1435_v51  ;;  %v5620_v37 = vcombine.low %v5426_v52, %v1503_v59  ;;  %v5623_v49 = vcombine.high %v5402_v50, %v1435_v51 }
 0x13d   : > { %6773 = vst [vmem:[#allocation28_spill] sm:$0xff] %v5601_v18  ;;  %6774 = vst [vmem:[#allocation29_spill] sm:$0xff] %v5606_v6  ;;  %v3229_v28 = vcombine.low %v5587_v45, %v5601_v18  ;;  %v5626_v57 = vcombine.high %v5426_v52, %v1503_v59  ;;  %v3297_v38 = vcombine.low %v5590_v56, %v5606_v6 }
 0x13e   : > { %6775 = vst [vmem:[#allocation30_spill] sm:$0xff] %v5609_v34  ;;  %6776 = vst [vmem:[#allocation31_spill] sm:$0xff] %v5612_v43  ;;  %v3237_v17 = vcombine.low %v5593_v12, %v5609_v34  ;;  %v3305_v48 = vcombine.low %v5598_v41, %v5612_v43  ;;  %v1518_v18 = vshrl.u32 %v5615_v61, 16  ;;  %v1519_v51 = vshrl.u32 %v5620_v37, 16 }
 0x13f   : > { %6777 = vst [vmem:[#allocation32_spill] sm:$0xff] %v5615_v61  ;;  %6778 = vst [vmem:[#allocation33_spill] sm:$0xff] %v5620_v37  ;;  %3457 = vrot.lane.b32.xlu0 %v5367_v54, %s4743_s19  ;;  %v3236_v50 = vrot.slane %v3229_v28, %v5160_v42  ;;  %v1524_v59 = vshrl.u32 %v5623_v49, 16  ;;  %v3304_v34 = vrot.slane %v3297_v38, %v5160_v42  ;;  %v1525_v54 = vshrl.u32 %v5626_v57, 16 }
 0x140   : > { %6779 = vst [vmem:[#allocation34_spill] sm:$0xff] %v5623_v49  ;;  %3459 = vrot.lane.b32.xlu1 %v5375_v46, %s4743_s19  ;;  %v3244_v43 = vrot.slane %v3237_v17, %v5160_v42  ;;  %v3312_v6 = vrot.slane %v3305_v48, %v5160_v42  ;;  %v5648_v41 = vpack.i.b16 %v1519_v51, %v1518_v18 }
 0x141   : > { %v3253_v28 = vrot.slane %v3245_v13, %v5362_v0  ;;  %v3321_v12 = vrot.slane %v3313_v2, %v5362_v0  ;;  %v6780_v52 = vcombine.high %v5251_v40, %v5273_v10  ;;  %v5658_v17 = vpack.i.b16 %v1525_v54, %v1524_v59 }
 0x142   : > { %v3261_v46 = vcombine.low %v3236_v50, %v3244_v43  ;;  %v3262_v56 = vcombine.high %v3236_v50, %v3244_v43  ;;  %v3329_v38 = vcombine.low %v3304_v34, %v3312_v6  ;;  %v3330_v45 = vcombine.high %v3304_v34, %v3312_v6 }
 0x143   : > { %v1426_v49 = vrot.slane %v6780_v52, %v5362_v0  ;;  %1606 = vrot.lane.b32.xlu0 %v5264_v44, %s4743_s19  ;;  %v6781_v13 = vcombine.high %v5383_v24, %v5391_v15  ;;  %v6782_v2 = vcombine.high %v5267_v60, %v5287_v20  ;;  %v6783_v10 = vcombine.high %v5405_v1, %v5408_v32  ;;  %v6805_v61 = vld [vmem:[#allocation27_spill] sm:$0xff] }
 0x144   : > { %1608 = vrot.lane.b32.xlu1 %v5280_v27, %s4743_s19  ;;  %v3269_v54 = vrot.slane %v3261_v46, %v5362_v0  ;;  %v3337_v34 = vrot.slane %v3329_v38, %v5362_v0  ;;  %v3260_v24 = vrot.slane %v3246_v62, %v5362_v0  ;;  %v3276_v15 = vrot.slane %v3262_v56, %v5362_v0 }
 0x145   : > { %v1442_v18 = vrot.slane %v6781_v13, %v5362_v0  ;;  %v1494_v40 = vrot.slane %v6782_v2, %v5362_v0  ;;  %v1510_v6 = vrot.slane %v6783_v10, %v5362_v0  ;;  %v3328_v46 = vrot.slane %v3314_v3, %v5362_v0 }
 0x146   : > { %v5686_v1 = vcombine.low %v3253_v28, %v3269_v54  ;;  %v5688_v32 = vcombine.low %v3321_v12, %v3337_v34  ;;  %v5690_v50 = vcombine.high %v3260_v24, %v3276_v15  ;;  %v5710_v2 = vcombine.high %v3253_v28, %v3269_v54 }
 0x147   : > { %v5678_v43 = vcombine.low %v1426_v49, %v1442_v18  ;;  %v5680_v60 = vcombine.low %v1494_v40, %v1510_v6  ;;  %v5682_v20 = vcombine.high %v1426_v49, %v1442_v18  ;;  %v5684_v48 = vcombine.high %v1494_v40, %v1510_v6  ;;  %1622 = vrot.lane.b32.xlu0 %v5377_v36, %s4743_s19 }
 0x148   : > { %6784 = vst [vmem:[#allocation35_spill] sm:$0xff] %v5686_v1  ;;  %6785 = vst [vmem:[#allocation36_spill] sm:$0xff] %v5688_v32  ;;  %1624 = vrot.lane.b32.xlu1 %v5393_v16, %s4743_s19  ;;  %v3352_v52 = vshrl.u32 %v5686_v1, 16  ;;  %v3353_v3 = vshrl.u32 %v5688_v32, 16  ;;  %v3344_v18 = vrot.slane %v3330_v45, %v5362_v0  ;;  %v5712_v40 = vcombine.high %v3321_v12, %v3337_v34  ;;  %v6804_v32 = vld [vmem:[#allocation26_spill] sm:$0xff] }
 0x149   : > { %v1530_v62 = vshrl.u32 %v5678_v43, 16  ;;  %v1531_v49 = vshrl.u32 %v5680_v60, 16  ;;  %v1536_v59 = vshrl.u32 %v5682_v20, 16  ;;  %v1537_v38 = vshrl.u32 %v5684_v48, 16 }
 0x14a   : > { %v2469_v10 = vcombine.low %v5564_v53, %v5582_v19  ;;  %v5716_v6 = vpack.i.b16 %v3353_v3, %v3352_v52  ;;  %v5720_v56 = vcombine.low %v3260_v24, %v3276_v15  ;;  %v3358_v12 = vshrl.u32 %v5710_v2, 16  ;;  %v6809_v53 = vld [vmem:[#allocation31_spill] sm:$0xff] }
 0x14b   : > { %v5707_v13 = vpack.i.b16 %v1531_v49, %v1530_v62  ;;  %v5718_v51 = vpack.i.b16 %v1537_v38, %v1536_v59  ;;  %1945 = vrot.lane.b32.xlu0 %v5264_v44, %s4744_s22  ;;  %v5724_v62 = vcombine.high %v3328_v46, %v3344_v18  ;;  %v3359_v28 = vshrl.u32 %v5712_v40, 16 }
 0x14c   : > { %6786 = vst [vmem:[#allocation37_spill] sm:$0xff] %v5720_v56  ;;  %1947 = vrot.lane.b32.xlu1 %v5280_v27, %s4744_s22  ;;  %v2385_v54 = vcombine.low %v5549_v63, %v5567_v23  ;;  %v2453_v34 = vcombine.low %v5552_v11, %v5574_v33  ;;  %v2401_v44 = vcombine.low %v5561_v25, %v5577_v14  ;;  %v3370_v52 = vshrl.u32 %v5690_v50, 16  ;;  %v6810_v25 = vld [vmem:[#allocation8_spill] sm:$0xff]  ;;  %v6811_v14 = vld [vmem:[#allocation9_spill] sm:$0xff] }
 0x14d   : > { %v5738_v24 = vcombine.low %v3328_v46, %v3344_v18  ;;  %v5742_v49 = vpack.i.b16 %v3359_v28, %v3358_v12  ;;  %v3371_v27 = vshrl.u32 %v5724_v62, 16  ;;  %v3364_v59 = vshrl.u32 %v5720_v56, 16 }
 0x14e   : > { %v5751_v45 = vrot.slane %v2469_v10, %v5362_v0  ;;  %v5762_v12 = vrot.slane %v2401_v44, %v5362_v0  ;;  %v5765_v28 = vrot.slane %v2453_v34, %v5362_v0  ;;  %v5768_v3 = vrot.slane %v2385_v54, %v5362_v0  ;;  %v6796_v44 = vld [vmem:[#allocation10_spill] sm:$0xff]  ;;  %v6802_v54 = vld [vmem:[#allocation24_spill] sm:$0xff] }
 0x14f   : > { %6787 = vst [vmem:[#allocation38_spill] sm:$0xff] %v5738_v24  ;;  %v3365_v38 = vshrl.u32 %v5738_v24, 16  ;;  %1961 = vrot.lane.b32.xlu0 %v5377_v36, %s4744_s22  ;;  %v5755_v46 = vpack.i.b16 %v3371_v27, %v3370_v52  ;;  %v6797_v52 = vld [vmem:[#allocation15_spill] sm:$0xff]  ;;  %v6801_v34 = vld [vmem:[#allocation14_spill] sm:$0xff]  ;;  %v6803_v36 = vld [vmem:[#allocation25_spill] sm:$0xff] }
 0x150   : > { %6788 = vst [vmem:[#allocation39_spill] sm:$0xff] %v5751_v45  ;;  %1963 = vrot.lane.b32.xlu1 %v5393_v16, %s4744_s22  ;;  %6791 = vst [vmem:[#allocation42_spill] sm:$0xff] %v5762_v12  ;;  %v5772_v10 = vcombine.low %v5765_v28, %v5751_v45  ;;  %v5782_v16 = vcombine.low %v5768_v3, %v5762_v12  ;;  %v6798_v27 = vld [vmem:[#allocation11_spill] sm:$0xff]  ;;  %v6808_v12 = vld [vmem:[#allocation30_spill] sm:$0xff] }
 0x151   : > { %6789 = vst [vmem:[#allocation40_spill] sm:$0xff] %v5755_v46  ;;  %v5759_v18 = vpack.i.b16 %v3365_v38, %v3364_v59  ;;  %6792 = vst [vmem:[#allocation43_spill] sm:$0xff] %v5765_v28  ;;  %v6799_v59 = vld [vmem:[#allocation12_spill] sm:$0xff]  ;;  %v6800_v38 = vld [vmem:[#allocation13_spill] sm:$0xff] }
 0x152   : > { %6793 = vst [vmem:[#allocation44_spill] sm:$0xff] %v5768_v3  ;;  %6794 = vst [vmem:[#allocation45_spill] sm:$0xff] %v5772_v10  ;;  %v6807_v28 = vld [vmem:[#allocation29_spill] sm:$0xff] }
 0x153   : > { %6790 = vst [vmem:[#allocation41_spill] sm:$0xff] %v5759_v18  ;;  %2889 = vrot.lane.b32.xlu0 %v5430_v35, %s4744_s22  ;;  %6795 = vst [vmem:[#allocation46_spill] sm:$0xff] %v5782_v16  ;;  %v6806_v16 = vld [vmem:[#allocation28_spill] sm:$0xff] }
 0x154   : > { %2891 = vrot.lane.b32.xlu1 %v5437_v58, %s4744_s22 }
 0x157   : > { %2905 = vrot.lane.b32.xlu0 %v5444_v22, %s4744_s22 }
 0x158   : > { %2907 = vrot.lane.b32.xlu1 %v5446_v31, %s4744_s22 }
 0x15b   : > { %2893 = vrot.lane.b32.xlu0 %v5453_v9, %s4744_s22 }
 0x15c   : > { %2895 = vrot.lane.b32.xlu1 %v5470_v29, %s4744_s22 }
 0x15f   : > { %2897 = vrot.lane.b32.xlu0 %v5458_v39, %s4744_s22 }
 0x160   : > { %2899 = vrot.lane.b32.xlu1 %v5464_v26, %s4744_s22 }
 0x163   : > { %2909 = vrot.lane.b32.xlu0 %v5479_v4, %s4744_s22 }
 0x164   : > { %2911 = vrot.lane.b32.xlu1 %v5493_v30, %s4744_s22 }
 0x167   : > { %2913 = vrot.lane.b32.xlu0 %v5473_v8, %s4744_s22 }
 0x168   : > { %2915 = vrot.lane.b32.xlu1 %v5481_v7, %s4744_s22 }
 0x16b   : > { %2901 = vrot.lane.b32.xlu0 %v5488_v5, %s4744_s22 }
 0x16c   : > { %2903 = vrot.lane.b32.xlu1 %v5501_v47, %s4744_s22 }
 0x16f   : > { %2917 = vrot.lane.b32.xlu0 %v5504_v21, %s4744_s22 }
 0x170   : > { %2919 = vrot.lane.b32.xlu1 %v5528_v55, %s4744_s22 }
 0x173   : > { %3461 = vrot.lane.b32.xlu0 %v6796_v44, %s4743_s19  ;;  %v5832_v15 = vpop.permute.xlu0 %1594 }
 0x174   : > { %3463 = vrot.lane.b32.xlu1 %v6797_v52, %s4743_s19 }
 0x175   : > { %v5834_v1 = vpop.permute.xlu1 %1596 }
 0x177   : > { %3465 = vrot.lane.b32.xlu0 %v6798_v27, %s4743_s19 }
 0x178   : > { %3467 = vrot.lane.b32.xlu1 %v6799_v59, %s4743_s19 }
 0x17b   : > { %3469 = vrot.lane.b32.xlu0 %v6800_v38, %s4743_s19 }
 0x17c   : > { %3471 = vrot.lane.b32.xlu1 %v6801_v34, %s4743_s19 }
 0x17f   : > { %3473 = vrot.lane.b32.xlu0 %v6802_v54, %s4743_s19 }
 0x180   : > { %3475 = vrot.lane.b32.xlu1 %v6803_v36, %s4743_s19 }
 0x183   : > { %3477 = vrot.lane.b32.xlu0 %v6804_v32, %s4743_s19 }
 0x184   : > { %3479 = vrot.lane.b32.xlu1 %v6805_v61, %s4743_s19 }
 0x185   : > { %v5840_v37 = vpop.permute.xlu0 %1610 }
 0x186   : > { %v5842_v10 = vpop.permute.xlu1 %1612 }
 0x187   : > { %3481 = vrot.lane.b32.xlu0 %v6806_v16, %s4743_s19 }
 0x188   : > { %3483 = vrot.lane.b32.xlu1 %v6807_v28, %s4743_s19 }
 0x189   : > { %v5848_v45 = vpop.permute.xlu0 %1933 }
 0x18a   : > { %v5850_v3 = vpop.permute.xlu1 %1935 }
 0x18b   : > { %3485 = vrot.lane.b32.xlu0 %v6808_v12, %s4743_s19 }
 0x18c   : > { %3487 = vrot.lane.b32.xlu1 %v6809_v53, %s4743_s19 }
 0x18d   : > { %v5856_v19 = vpop.permute.xlu0 %1949 }
 0x18e   : > { %v5858_v46 = vpop.permute.xlu1 %1951 }
 0x18f   : > { %3749 = vrot.lane.b32.xlu0 %v6810_v25, %s4744_s22 }
 0x190   : > { %3751 = vrot.lane.b32.xlu1 %v6811_v14, %s4744_s22 }
 0x191   : > { %v5864_v11 = vpop.permute.xlu0 %1598 }
 0x192   : > { %v5866_v33 = vpop.permute.xlu1 %1600 }
 0x193   : > { %3753 = vrot.lane.b32.xlu0 %v6796_v44, %s4744_s22 }
 0x194   : > { %3755 = vrot.lane.b32.xlu1 %v6797_v52, %s4744_s22 }
 0x195   : > { %v5872_v63 = vpop.permute.xlu0 %1602 }
 0x196   : > { %v5874_v23 = vpop.permute.xlu1 %1604 }
 0x197   : > { %3757 = vrot.lane.b32.xlu0 %v6798_v27, %s4744_s22 }
 0x198   : > { %3759 = vrot.lane.b32.xlu1 %v6799_v59, %s4744_s22 }
 0x199   : > { %v5880_v14 = vpop.permute.xlu0 %1614 }
 0x19a   : > { %v1617_v25 = vpop.permute.xlu1 %1616 }
 0x19b   : > { %3761 = vrot.lane.b32.xlu0 %v6800_v38, %s4744_s22 }
 0x19c   : > { %3763 = vrot.lane.b32.xlu1 %v6801_v34, %s4744_s22 }
 0x19d   : > { %v5886_v44 = vpop.permute.xlu0 %1618 }
 0x19e   : > { %v1621_v52 = vpop.permute.xlu1 %1620 }
 0x19f   : > { %3765 = vrot.lane.b32.xlu0 %v6802_v54, %s4744_s22 }
 0x1a0   : > { %3767 = vrot.lane.b32.xlu1 %v6803_v36, %s4744_s22 }
 0x1a1   : > { %v5892_v27 = vpop.permute.xlu0 %1937 }
 0x1a2   : > { %v1940_v59 = vpop.permute.xlu1 %1939 }
 0x1a3   : > { %3769 = vrot.lane.b32.xlu0 %v6804_v32, %s4744_s22 }
 0x1a4   : > { %3771 = vrot.lane.b32.xlu1 %v6805_v61, %s4744_s22 }
 0x1a5   : > { %v5898_v38 = vpop.permute.xlu0 %1941 }
 0x1a6   : > { %v1944_v34 = vpop.permute.xlu1 %1943 }
 0x1a7   : > { %3773 = vrot.lane.b32.xlu0 %v6806_v16, %s4744_s22 }
 0x1a8   : > { %3775 = vrot.lane.b32.xlu1 %v6807_v28, %s4744_s22 }
 0x1a9   : > { %v1954_v54 = vpop.permute.xlu0 %1953 }
 0x1aa   : > { %v1956_v36 = vpop.permute.xlu1 %1955 }
 0x1ab   : > { %3777 = vrot.lane.b32.xlu0 %v6808_v12, %s4744_s22 }
 0x1ac   : > { %3779 = vrot.lane.b32.xlu1 %v6809_v53, %s4744_s22 }
 0x1ad   : > { %v1958_v32 = vpop.permute.xlu0 %1957 }
 0x1ae   : > { %v1960_v18 = vpop.permute.xlu1 %1959 }
 0x1af   : > { %2597 = vrot.lane.b32.xlu0 %v5430_v35, %s4743_s19 }
 0x1b0   : > { %2599 = vrot.lane.b32.xlu1 %v5437_v58, %s4743_s19 }
 0x1b1   : > { %v5912_v61 = vpop.permute.xlu0 %3457 }
 0x1b2   : > { %v5914_v16 = vpop.permute.xlu1 %3459 }
 0x1b3   : > { %2601 = vrot.lane.b32.xlu0 %v5453_v9, %s4743_s19 }
 0x1b4   : > { %2603 = vrot.lane.b32.xlu1 %v5470_v29, %s4743_s19  ;;  %v1726_v29 = vcombine.low %v5842_v10, %v1621_v52 }
 0x1b5   : > { %v1607_v12 = vpop.permute.xlu0 %1606 }
 0x1b6   : > { %v1609_v53 = vpop.permute.xlu1 %1608 }
 0x1b7   : > { %2605 = vrot.lane.b32.xlu0 %v5458_v39, %s4743_s19  ;;  %v2065_v39 = vcombine.low %v5858_v46, %v1960_v18  ;;  %v2049_v46 = vcombine.low %v5850_v3, %v1944_v34 }
 0x1b8   : > { %2607 = vrot.lane.b32.xlu1 %v5464_v26, %s4743_s19  ;;  %v1718_v26 = vcombine.low %v5866_v33, %v1609_v53  ;;  %v1650_v33 = vcombine.low %v5864_v11, %v1607_v12 }
 0x1b9   : > { %v1623_v35 = vpop.permute.xlu0 %1622  ;;  %v5953_v3 = vrot.slane %v2065_v39, %v5160_v42  ;;  %v5973_v52 = vrot.slane %v2049_v46, %v5160_v42 }
 0x1ba   : > { %v1625_v58 = vpop.permute.xlu1 %1624  ;;  %v1725_v11 = vrot.slane %v1718_v26, %v5160_v42 }
 0x1bb   : > { %2609 = vrot.lane.b32.xlu0 %v5488_v5, %s4743_s19  ;;  %v1734_v56 = vcombine.low %v1617_v25, %v1625_v58  ;;  %v1642_v5 = vcombine.low %v5832_v15, %v5872_v63  ;;  %v1666_v25 = vcombine.low %v5880_v14, %v1623_v35 }
 0x1bc   : > { %2611 = vrot.lane.b32.xlu1 %v5501_v47, %s4743_s19  ;;  %v1710_v47 = vcombine.low %v5834_v1, %v5874_v23  ;;  %v1733_v1 = vrot.slane %v1726_v29, %v5160_v42 }
 0x1bd   : > { %v1946_v9 = vpop.permute.xlu0 %1945  ;;  %v1741_v63 = vrot.slane %v1734_v56, %v5160_v42 }
 0x1be   : > { %v1948_v28 = vpop.permute.xlu1 %1947  ;;  %v1989_v15 = vcombine.low %v5892_v27, %v1946_v9  ;;  %v1717_v14 = vrot.slane %v1710_v47, %v5160_v42 }
 0x1bf   : > { %2613 = vrot.lane.b32.xlu0 %v5444_v22, %s4743_s19  ;;  %v2057_v58 = vcombine.low %v1940_v59, %v1948_v28  ;;  %v1658_v22 = vcombine.low %v5840_v37, %v5886_v44  ;;  %v1981_v37 = vcombine.low %v5848_v45, %v5898_v38  ;;  %v1758_v38 = vcombine.low %v1733_v1, %v1741_v63 }
 0x1c0   : > { %2615 = vrot.lane.b32.xlu1 %v5446_v31, %s4743_s19  ;;  %v1997_v31 = vcombine.low %v5856_v19, %v1958_v32  ;;  %v1673_v19 = vrot.slane %v1666_v25, %v5160_v42  ;;  %v5982_v34 = vrot.slane %v1989_v15, %v5160_v42  ;;  %v1742_v12 = vcombine.low %v1717_v14, %v1725_v11 }
 0x1c1   : > { %v1962_v24 = vpop.permute.xlu0 %1961  ;;  %v5960_v56 = vrot.slane %v2057_v58, %v5160_v42  ;;  %v1665_v44 = vrot.slane %v1658_v22, %v5160_v42  ;;  %v5990_v32 = vrot.slane %v1981_v37, %v5160_v42  ;;  %v1759_v35 = vcombine.high %v1733_v1, %v1741_v63 }
 0x1c2   : > { %v2005_v18 = vcombine.low %v1954_v54, %v1962_v24  ;;  %v1964_v10 = vpop.permute.xlu1 %1963  ;;  %v5979_v59 = vrot.slane %v1997_v31, %v5160_v42  ;;  %v1743_v39 = vcombine.high %v1717_v14, %v1725_v11  ;;  %v1766_v47 = vrot.slane %v1758_v38, %v5362_v0  ;;  %v6812_v11 = vld [vmem:[#allocation34_spill] sm:$0xff] }
 0x1c3   : > { %v2073_v23 = vcombine.low %v1956_v36, %v1964_v10  ;;  %2617 = vrot.lane.b32.xlu0 %v5479_v4, %s4743_s19  ;;  %v1649_v36 = vrot.slane %v1642_v5, %v5160_v42  ;;  %v1690_v53 = vcombine.low %v1665_v44, %v1673_v19  ;;  %v2081_v9 = vcombine.low %v5973_v52, %v5960_v56 }
 0x1c4   : > { %2619 = vrot.lane.b32.xlu1 %v5493_v30, %s4743_s19  ;;  %v5963_v4 = vrot.slane %v2005_v18, %v5160_v42  ;;  %v1657_v30 = vrot.slane %v1650_v33, %v5160_v42  ;;  %v1691_v5 = vcombine.high %v1665_v44, %v1673_v19  ;;  %v1750_v22 = vrot.slane %v1742_v12, %v5362_v0 }
 0x1c5   : > { %v5966_v24 = vrot.slane %v2073_v23, %v5160_v42  ;;  %v5968_v45 = vpop.permute.xlu0 %2889  ;;  %v1698_v46 = vrot.slane %v1690_v53, %v5362_v0  ;;  %v1773_v33 = vrot.slane %v1759_v35, %v5362_v0  ;;  %v6016_v18 = vrot.slane %v2081_v9, %v5362_v0 }
 0x1c6   : > { %v5976_v27 = vpop.permute.xlu1 %2891  ;;  %v2029_v28 = vcombine.low %v5979_v59, %v5963_v4  ;;  %v1675_v58 = vcombine.high %v1649_v36, %v1657_v30  ;;  %v1705_v23 = vrot.slane %v1691_v5, %v5362_v0  ;;  %v6024_v1 = vcombine.low %v1750_v22, %v1766_v47 }
 0x1c7   : > { %v2097_v54 = vcombine.low %v5953_v3, %v5966_v24  ;;  %2621 = vrot.lane.b32.xlu0 %v5473_v8, %s4743_s19  ;;  %v1674_v8 = vcombine.low %v1649_v36, %v1657_v30  ;;  %v6813_v19 = vpack.i.b16 %v5626_v57, %v6812_v11  ;;  %v1775_v12 = vcombine.high %v1750_v22, %v1766_v47 }
 0x1c8   : > { %2623 = vrot.lane.b32.xlu1 %v5481_v7, %s4743_s19  ;;  %v2013_v7 = vcombine.low %v5990_v32, %v5982_v34  ;;  %v6019_v10 = vrot.slane %v2029_v28, %v5362_v0  ;;  %v1689_v14 = vrot.slane %v1675_v58, %v5362_v0  ;;  %v1782_v58 = vshrl.u32 %v6024_v1, 16 }
 0x1c9   : > { %v5998_v29 = vpop.permute.xlu0 %2905  ;;  %v6006_v25 = vrot.slane %v2097_v54, %v5362_v0  ;;  %v1682_v63 = vrot.slane %v1674_v8, %v5362_v0 }
 0x1ca   : > { %v6000_v26 = vpop.permute.xlu1 %2907 }
 0x1cb   : > { %2625 = vrot.lane.b32.xlu0 %v5504_v21, %s4743_s19  ;;  %v1757_v21 = vrot.slane %v1743_v39, %v5362_v0  ;;  %v6031_v37 = vcombine.low %v6016_v18, %v6006_v25  ;;  %v6040_v44 = vcombine.low %v1682_v63, %v1698_v46  ;;  %v1707_v35 = vcombine.high %v1682_v63, %v1698_v46 }
 0x1cc   : > { %2627 = vrot.lane.b32.xlu1 %v5528_v55, %s4743_s19  ;;  %v6027_v55 = vrot.slane %v2013_v7, %v5362_v0  ;;  %v1788_v63 = vshrl.u32 %v1775_v12, 16 }
 0x1cd   : > { %v2894_v31 = vpop.permute.xlu0 %2893  ;;  %v1776_v54 = vcombine.low %v1757_v21, %v1773_v33  ;;  %v1777_v8 = vcombine.high %v1757_v21, %v1773_v33  ;;  %v1786_v5 = vpack.i.b16 %v1775_v12, %v1707_v35 }
 0x1ce   : > { %v2896_v15 = vpop.permute.xlu1 %2895  ;;  %v6044_v30 = vcombine.low %v6027_v55, %v6019_v10 }
 0x1cf   : > { %1539 = vrot.lane.b32.xlu0 %v5648_v41, %s4745_s24  ;;  %v1708_v41 = vcombine.low %v1689_v14, %v1705_v23 }
 0x1d0   : > { %1541 = vrot.lane.b32.xlu1 %v6813_v19, %s4746_s25 }
 0x1d1   : > { %v2898_v38 = vpop.permute.xlu0 %2897  ;;  %v1792_v28 = vpack.i.b16 %v1776_v54, %v1708_v41 }
 0x1d2   : > { %v2900_v36 = vpop.permute.xlu1 %2899  ;;  %v2937_v21 = vcombine.low %v5968_v45, %v2898_v38 }
 0x1d3   : > { %1543 = vrot.lane.b32.xlu0 %v5658_v17, %s4747_s26  ;;  %v1709_v17 = vcombine.high %v1689_v14, %v1705_v23  ;;  %v4750_v23 = vmov 0.0   ;;  %v3005_v14 = vcombine.low %v5976_v27, %v2900_v36 }
 0x1d4   : > { %3373 = vrot.lane.b32.xlu1 %v5716_v6, %s4745_s24  ;;  %v1781_v6 = vshrl.u32 %v6040_v44, 16  ;;  %4467 = vmatprep.subr.bf16.mxu1 %v4750_v23 }
 0x1d5   : > { %v2910_v9 = vpop.permute.xlu0 %2909  ;;  %v1798_v7 = vpack.i.b16 %v1777_v8, %v1709_v17  ;;  %4497 = vmatprep.subr.bf16.mxu0 %v4750_v23  ;;  %v3012_v36 = vrot.slane %v3005_v14, %v5160_v42  ;;  %4469 = vmatprep.mubr.msk.bf16.mxu1 %vm4753_vm14, %v4750_v23 }
 0x1d6   : > { %v2912_v39 = vpop.permute.xlu1 %2911  ;;  %v1783_v33 = vpack.i.b16 %v1782_v58, %v1781_v6  ;;  %v1793_v6 = vshrl.u32 %v1708_v41, 16  ;;  %4499 = vmatprep.mubr.msk.bf16.mxu0 %vm4753_vm14, %v4750_v23 }
 0x1d7   : > { %1808 = vrot.lane.b32.xlu0 %v1792_v28, %s4748_s27 }
 0x1d8   : > { %1804 = vrot.lane.b32.xlu1 %v1786_v5, %s4746_s25  ;;  %v1787_v5 = vshrl.u32 %v1707_v35, 16 }
 0x1d9   : > { %v2914_v47 = vpop.permute.xlu0 %2913 }
 0x1da   : > { %v2916_v22 = vpop.permute.xlu1 %2915  ;;  %v2953_v53 = vcombine.low %v5998_v29, %v2914_v47  ;;  %v1789_v58 = vpack.i.b16 %v1788_v63, %v1787_v5 }
 0x1db   : > { %1812 = vrot.lane.b32.xlu0 %v1798_v7, %s4749_s18  ;;  %v1794_v7 = vshrl.u32 %v1776_v54, 16  ;;  %v3021_v45 = vcombine.low %v6000_v26, %v2916_v22  ;;  %v1800_v54 = vshrl.u32 %v1777_v8, 16 }
 0x1dc   : > { %v2960_v47 = vrot.slane %v2953_v53, %v5160_v42 }
 0x1dd   : > { %v2902_v46 = vpop.permute.xlu0 %2901  ;;  %v1795_v29 = vpack.i.b16 %v1794_v7, %v1793_v6  ;;  %v3028_v41 = vrot.slane %v3021_v45, %v5160_v42 }
 0x1de   : > { %v2945_v11 = vcombine.low %v2894_v31, %v2902_v46  ;;  %v2904_v19 = vpop.permute.xlu1 %2903  ;;  %v2944_v46 = vrot.slane %v2937_v21, %v5160_v42 }
 0x1df   : > { %v3013_v28 = vcombine.low %v2896_v15, %v2904_v19  ;;  %1802 = vrot.lane.b32.xlu0 %v1783_v33, %s4745_s24  ;;  %v1799_v15 = vshrl.u32 %v1709_v17, 16 }
 0x1e0   : > { %v2952_v12 = vrot.slane %v2945_v11, %v5160_v42 }
 0x1e1   : > { %v3020_v31 = vrot.slane %v3013_v28, %v5160_v42  ;;  %v2918_v38 = vpop.permute.xlu0 %2917  ;;  %v1801_v53 = vpack.i.b16 %v1800_v54, %v1799_v15 }
 0x1e2   : > { %v2961_v57 = vcombine.low %v2910_v9, %v2918_v38  ;;  %v2920_v27 = vpop.permute.xlu1 %2919  ;;  %v2969_v26 = vcombine.low %v2944_v46, %v2952_v12  ;;  %v2970_v22 = vcombine.high %v2944_v46, %v2952_v12 }
 0x1e3   : > { %v3029_v35 = vcombine.low %v2912_v39, %v2920_v27  ;;  %1806 = vrot.lane.b32.xlu0 %v1789_v58, %s4747_s26  ;;  %v3037_v63 = vcombine.low %v3012_v36, %v3020_v31  ;;  %v3038_v21 = vcombine.high %v3012_v36, %v3020_v31 }
 0x1e4   : > { %v2968_v33 = vrot.slane %v2961_v57, %v5160_v42  ;;  %v2977_v57 = vrot.slane %v2969_v26, %v5362_v0  ;;  %v2984_v28 = vrot.slane %v2970_v22, %v5362_v0 }
 0x1e5   : > { %v3036_v9 = vrot.slane %v3029_v35, %v5160_v42  ;;  %v6075_v17 = vpop.permute.xlu0 %3461  ;;  %v3045_v12 = vrot.slane %v3037_v63, %v5362_v0  ;;  %v3052_v45 = vrot.slane %v3038_v21, %v5362_v0 }
 0x1e6   : > { %v2985_v11 = vcombine.low %v2960_v47, %v2968_v33  ;;  %v2986_v39 = vcombine.high %v2960_v47, %v2968_v33  ;;  %v6077_v19 = vpop.permute.xlu1 %3463 }
 0x1e7   : > { %v3053_v14 = vcombine.low %v3028_v41, %v3036_v9  ;;  %v3054_v8 = vcombine.high %v3028_v41, %v3036_v9  ;;  %1810 = vrot.lane.b32.xlu0 %v1795_v29, %s4751_s16 }
 0x1e8   : > { %v2993_v5 = vrot.slane %v2985_v11, %v5362_v0  ;;  %v3000_v7 = vrot.slane %v2986_v39, %v5362_v0 }
 0x1e9   : > { %v3061_v31 = vrot.slane %v3053_v14, %v5362_v0  ;;  %v3068_v38 = vrot.slane %v3054_v8, %v5362_v0  ;;  %v6088_v58 = vpop.permute.xlu0 %3465  ;;  %v6814_v14 = vpack.i.b16 %v5680_v60, %v5678_v43 }
 0x1ea   : > { %v3468_v6 = vpop.permute.xlu1 %3467  ;;  %v6091_v46 = vcombine.high %v2984_v28, %v3000_v7  ;;  %v3002_v15 = vcombine.high %v2977_v57, %v2993_v5  ;;  %v6099_v33 = vcombine.low %v2977_v57, %v2993_v5  ;;  %v3003_v41 = vcombine.low %v2984_v28, %v3000_v7 }
 0x1eb   : > { %1814 = vrot.lane.b32.xlu0 %v1801_v53, %s4752_s14  ;;  %v6093_v27 = vcombine.high %v3052_v45, %v3068_v38  ;;  %v3070_v36 = vcombine.high %v3045_v12, %v3061_v31  ;;  %v6095_v35 = vcombine.low %v3045_v12, %v3061_v31  ;;  %v3071_v26 = vcombine.low %v3052_v45, %v3068_v38 }
 0x1ec   : > { %v3076_v8 = vshrl.u32 %v6099_v33, 16  ;;  %v3082_v43 = vshrl.u32 %v3002_v15, 16  ;;  %v3573_v38 = vcombine.low %v5914_v16, %v3468_v6  ;;  %v2098_v6 = vcombine.high %v5953_v3, %v5966_v24 }
 0x1ed   : > { %v3470_v29 = vpop.permute.xlu0 %3469  ;;  %v3093_v54 = vpack.i.b16 %v6093_v27, %v6091_v46  ;;  %v3081_v47 = vpack.i.b16 %v3070_v36, %v3002_v15  ;;  %v3087_v21 = vpack.i.b16 %v3071_v26, %v3003_v41  ;;  %v3077_v9 = vshrl.u32 %v6095_v35, 16 }
 0x1ee   : > { %v3472_v22 = vpop.permute.xlu1 %3471  ;;  %v3075_v11 = vpack.i.b16 %v6095_v35, %v6099_v33  ;;  %v3083_v28 = vshrl.u32 %v3070_v36, 16  ;;  %v3089_v45 = vshrl.u32 %v3071_v26, 16  ;;  %v6815_v36 = vpack.i.b16 %v5684_v48, %v5682_v20 }
 0x1ef   : > { %3107 = vrot.lane.b32.xlu0 %v3093_v54, %s4749_s18  ;;  %3099 = vrot.lane.b32.xlu1 %v3081_v47, %s4746_s25  ;;  %v3078_v57 = vpack.i.b16 %v3077_v9, %v3076_v8  ;;  %v3581_v60 = vcombine.low %v6077_v19, %v3472_v22  ;;  %v3513_v54 = vcombine.low %v6075_v17, %v3470_v29  ;;  %v3095_v17 = vshrl.u32 %v6093_v27, 16 }
 0x1f0   : > { %v3084_v12 = vpack.i.b16 %v3083_v28, %v3082_v43  ;;  %v3505_v15 = vcombine.low %v5912_v61, %v6088_v58  ;;  %v6137_v20 = vcombine.high %v6016_v18, %v6006_v25  ;;  %v6140_v61 = vrot.slane %v3573_v38, %v5160_v42 }
 0x1f1   : > { %v3474_v63 = vpop.permute.xlu0 %3473  ;;  %v6130_v47 = vrot.slane %v3581_v60, %v5160_v42  ;;  %v6143_v58 = vrot.slane %v3513_v54, %v5160_v42  ;;  %v3094_v3 = vshrl.u32 %v6091_v46, 16  ;;  %v2121_v27 = vshrl.u32 %v6031_v37, 16 }
 0x1f2   : > { %v3476_v39 = vpop.permute.xlu1 %3475  ;;  %v6150_v24 = vrot.slane %v3505_v15, %v5160_v42  ;;  %v6817_v38 = vpack.i.b16 %v5712_v40, %v5710_v2 }
 0x1f3   : > { %1545 = vrot.lane.b32.xlu0 %v6814_v14, %s4748_s27  ;;  %3103 = vrot.lane.b32.xlu1 %v3087_v21, %s4748_s27  ;;  %v3096_v46 = vpack.i.b16 %v3095_v17, %v3094_v3  ;;  %v2030_v14 = vcombine.high %v5979_v59, %v5963_v4  ;;  %v2120_v4 = vshrl.u32 %v6044_v30, 16  ;;  %v2112_v59 = vrot.slane %v2098_v6, %v5362_v0 }
 0x1f4   : > { %v3537_v28 = vcombine.low %v6150_v24, %v6143_v58 }
 0x1f5   : > { %v3478_v53 = vpop.permute.xlu0 %3477  ;;  %v2122_v60 = vpack.i.b16 %v2121_v27, %v2120_v4 }
 0x1f6   : > { %v3480_v5 = vpop.permute.xlu1 %3479 }
 0x1f7   : > { %1547 = vrot.lane.b32.xlu0 %v5707_v13, %s4751_s16  ;;  %3097 = vrot.lane.b32.xlu1 %v3078_v57, %s4745_s24  ;;  %v3088_v13 = vshrl.u32 %v3003_v41, 16  ;;  %v6175_v57 = vcombine.high %v6027_v55, %v6019_v10  ;;  %v2127_v10 = vshrl.u32 %v6137_v20, 16 }
 0x1f9   : > { %v3482_v7 = vpop.permute.xlu0 %3481  ;;  %v3090_v16 = vpack.i.b16 %v3089_v45, %v3088_v13 }
 0x1fa   : > { %v3484_v31 = vpop.permute.xlu1 %3483  ;;  %v3521_v19 = vcombine.low %v3474_v63, %v3482_v7  ;;  %v3605_v63 = vcombine.low %v6140_v61, %v6130_v47 }
 0x1fb   : > { %1549 = vrot.lane.b32.xlu0 %v6815_v36, %s4749_s18  ;;  %3101 = vrot.lane.b32.xlu1 %v3084_v12, %s4747_s26  ;;  %v3589_v26 = vcombine.low %v3476_v39, %v3484_v31  ;;  %v2082_v39 = vcombine.high %v5973_v52, %v5960_v56  ;;  %v6816_v56 = vpack.i.b16 %v5724_v62, %v5690_v50  ;;  %v2126_v31 = vshrl.u32 %v6175_v57, 16 }
 0x1fc   : > { %v6153_v25 = vrot.slane %v3521_v19, %v5160_v42  ;;  %v2014_v52 = vcombine.high %v5990_v32, %v5982_v34  ;;  %v6190_v55 = vrot.slane %v3605_v63, %v5362_v0  ;;  %v2044_v34 = vrot.slane %v2030_v14, %v5362_v0 }
 0x1fd   : > { %v3486_v22 = vpop.permute.xlu0 %3485  ;;  %v2096_v7 = vrot.slane %v2082_v39, %v5362_v0  ;;  %v6205_v32 = vrot.slane %v3537_v28, %v5362_v0  ;;  %v2128_v15 = vpack.i.b16 %v2127_v10, %v2126_v31  ;;  %v6823_v10 = vld [vmem:[#allocation16_spill] sm:$0xff]  ;;  %v6827_v31 = vld [vmem:[#allocation18_spill] sm:$0xff] }
 0x1fe   : > { %v3529_v48 = vcombine.low %v3478_v53, %v3486_v22  ;;  %v3488_v29 = vpop.permute.xlu1 %3487  ;;  %v2028_v54 = vrot.slane %v2014_v52, %v5362_v0 }
 0x1ff   : > { %v3597_v41 = vcombine.low %v3480_v5, %v3488_v29  ;;  %1551 = vrot.lane.b32.xlu0 %v5718_v51, %s4752_s14  ;;  %3105 = vrot.lane.b32.xlu1 %v3090_v16, %s4751_s16  ;;  %v3596_v51 = vrot.slane %v3589_v26, %v5160_v42  ;;  %v2115_v19 = vcombine.low %v2096_v7, %v2112_v59  ;;  %v6818_v29 = vld [vmem:[#allocation38_spill] sm:$0xff] }
 0x200   : > { %v6156_v18 = vrot.slane %v3529_v48, %v5160_v42  ;;  %v2047_v22 = vcombine.low %v2028_v54, %v2044_v34  ;;  %v2116_v39 = vcombine.high %v2096_v7, %v2112_v59  ;;  %v2048_v28 = vcombine.high %v2028_v54, %v2044_v34  ;;  %v6826_v34 = vld [vmem:[#allocation22_spill] sm:$0xff]  ;;  %v6828_v54 = vld [vmem:[#allocation40_spill] sm:$0xff] }
 0x201   : > { %v3604_v21 = vrot.slane %v3597_v41, %v5160_v42  ;;  %v6163_v9 = vpop.permute.xlu0 %3749  ;;  %v2133_v17 = vshrl.u32 %v2115_v19, 16  ;;  %v6819_v41 = vld [vmem:[#allocation37_spill] sm:$0xff] }
 0x202   : > { %v3553_v8 = vcombine.low %v6153_v25, %v6156_v18  ;;  %v6171_v53 = vpop.permute.xlu1 %3751  ;;  %v2131_v40 = vpack.i.b16 %v2115_v19, %v2047_v22  ;;  %v2132_v48 = vshrl.u32 %v2047_v22, 16  ;;  %v6820_v3 = vpack.i.b16 %v6818_v29, %v6819_v41  ;;  %v6830_v29 = vld [vmem:[#allocation19_spill] sm:$0xff] }
 0x203   : > { %v3621_v5 = vcombine.low %v3596_v51, %v3604_v21  ;;  %3383 = vrot.lane.b32.xlu0 %v6816_v56, %s4749_s18  ;;  %3109 = vrot.lane.b32.xlu1 %v3096_v46, %s4752_s14  ;;  %v3622_v27 = vcombine.high %v3596_v51, %v3604_v21  ;;  %v3538_v51 = vcombine.high %v6150_v24, %v6143_v58  ;;  %v2139_v52 = vshrl.u32 %v2116_v39, 16  ;;  %v6824_v58 = vld [vmem:[#allocation21_spill] sm:$0xff] }
 0x204   : > { %v6193_v43 = vrot.slane %v3553_v8, %v5362_v0  ;;  %v2134_v46 = vpack.i.b16 %v2133_v17, %v2132_v48  ;;  %v3554_v8 = vcombine.high %v6153_v25, %v6156_v18  ;;  %v2137_v4 = vpack.i.b16 %v2116_v39, %v2048_v28  ;;  %v6822_v18 = vld [vmem:[#allocation20_spill] sm:$0xff]  ;;  %v6825_v24 = vld [vmem:[#allocation17_spill] sm:$0xff]  ;;  %v6829_v48 = vld [vmem:[#allocation23_spill] sm:$0xff] }
 0x205   : > { %v6196_v50 = vrot.slane %v3621_v5, %v5362_v0  ;;  %v6198_v62 = vpop.permute.xlu0 %3753  ;;  %v6821_v5 = vld [vmem:[#allocation41_spill] sm:$0xff]  ;;  %v6250_v21 = vrot.slane %v3622_v27, %v5362_v0  ;;  %v2138_v25 = vshrl.u32 %v2048_v28, 16  ;;  %v2454_v7 = vcombine.high %v6825_v24, %v6824_v58  ;;  %v6831_v39 = vld [vmem:[#allocation42_spill] sm:$0xff] }
 0x206   : > { %v6201_v12 = vpop.permute.xlu1 %3755  ;;  %v6220_v36 = vcombine.low %v6205_v32, %v6193_v43  ;;  %v2470_v41 = vcombine.high %v6830_v29, %v6829_v48  ;;  %v2125_v27 = vpack.i.b16 %v6137_v20, %v6175_v57  ;;  %v6834_v20 = vld [vmem:[#allocation43_spill] sm:$0xff] }
 0x207   : > { %v6209_v45 = vcombine.low %v6190_v55, %v6196_v50  ;;  %2141 = vrot.lane.b32.xlu0 %v2122_v60, %s4745_s24  ;;  %3375 = vrot.lane.b32.xlu1 %v6817_v38, %s4746_s25  ;;  %v2386_v60 = vcombine.high %v6823_v10, %v6822_v18  ;;  %v2402_v38 = vcombine.high %v6827_v31, %v6826_v34 }
 0x208   : > { %v2140_v17 = vpack.i.b16 %v2139_v52, %v2138_v25  ;;  %v6835_v52 = vld [vmem:[#allocation46_spill] sm:$0xff]  ;;  %v3638_v58 = vcombine.high %v6190_v55, %v6196_v50  ;;  %v3570_v50 = vcombine.high %v6205_v32, %v6193_v43  ;;  %v2468_v32 = vrot.slane %v2454_v7, %v5362_v0 }
 0x209   : > { %v6222_v13 = vpop.permute.xlu0 %3757  ;;  %v3643_v16 = vpack.i.b16 %v6209_v45, %v6220_v36 }
 0x20a   : > { %v6224_v26 = vpop.permute.xlu1 %3759  ;;  %v3651_v43 = vshrl.u32 %v3638_v58, 16 }
 0x20b   : > { %2145 = vrot.lane.b32.xlu0 %v2128_v15, %s4747_s26  ;;  %3377 = vrot.lane.b32.xlu1 %v5742_v49, %s4747_s26  ;;  %v3606_v49 = vcombine.high %v6140_v61, %v6130_v47  ;;  %v6256_v61 = vrot.slane %v3554_v8, %v5362_v0  ;;  %v6268_v15 = vrot.slane %v3538_v51, %v5362_v0 }
 0x20c   : > { %v3865_v28 = vcombine.low %v6171_v53, %v6224_v26  ;;  %v2492_v53 = vshrl.u32 %v6835_v52, 16  ;;  %v6836_v26 = vld [vmem:[#allocation45_spill] sm:$0xff] }
 0x20d   : > { %v6231_v2 = vpop.permute.xlu0 %3761  ;;  %v6253_v47 = vrot.slane %v3606_v49, %v5362_v0  ;;  %v6832_v49 = vld [vmem:[#allocation44_spill] sm:$0xff]  ;;  %v2493_v25 = vshrl.u32 %v6836_v26, 16 }
 0x20e   : > { %v3764_v6 = vpop.permute.xlu1 %3763  ;;  %v6282_v8 = vcombine.high %v6832_v49, %v6831_v39 }
 0x20f   : > { %2147 = vrot.lane.b32.xlu0 %v2131_v40, %s4748_s27  ;;  %3379 = vrot.lane.b32.xlu1 %v6820_v3, %s4748_s27  ;;  %v6272_v19 = vcombine.high %v6253_v47, %v6250_v21  ;;  %v3873_v22 = vcombine.low %v6201_v12, %v3764_v6  ;;  %v3805_v12 = vcombine.low %v6198_v62, %v6231_v2 }
 0x210   : > { %v6291_v6 = vcombine.high %v6268_v15, %v6256_v61  ;;  %v3797_v62 = vcombine.low %v6163_v9, %v6222_v13 }
 0x211   : > { %v3766_v63 = vpop.permute.xlu0 %3765  ;;  %v6304_v2 = vrot.slane %v3873_v22, %v5160_v42  ;;  %v6316_v9 = vrot.slane %v3805_v12, %v5160_v42  ;;  %v2416_v12 = vrot.slane %v2402_v38, %v5362_v0  ;;  %v3639_v38 = vcombine.low %v6253_v47, %v6250_v21 }
 0x212   : > { %v6238_v14 = vpop.permute.xlu1 %3767 }
 0x213   : > { %2149 = vrot.lane.b32.xlu0 %v2134_v46, %s4751_s16  ;;  %3381 = vrot.lane.b32.xlu1 %v6821_v5, %s4751_s16  ;;  %v3645_v46 = vshrl.u32 %v6209_v45, 16  ;;  %v6833_v5 = vld [vmem:[#allocation39_spill] sm:$0xff]  ;;  %v4662_v45 = vld [vmem:[%s6681_s2 + $0x38] sm:$0xff]  }
 0x214   : > { %v6295_v57 = vcombine.high %v6834_v20, %v6833_v5  ;;  %v3650_v5 = vshrl.u32 %v3570_v50, 16  ;;  %v2400_v20 = vrot.slane %v2386_v60, %v5362_v0 }
 0x215   : > { %v3770_v56 = vpop.permute.xlu0 %3769 }
 0x216   : > { %v3772_v59 = vpop.permute.xlu1 %3771 }
 0x217   : > { %2151 = vrot.lane.b32.xlu0 %v2137_v4, %s4749_s18  ;;  %3385 = vrot.lane.b32.xlu1 %v6828_v54, %s4752_s14  ;;  %v3644_v4 = vshrl.u32 %v6220_v36, 16  ;;  %v2484_v54 = vrot.slane %v2470_v41, %v5362_v0 }
 0x219   : > { %v3774_v40 = vpop.permute.xlu0 %3773  ;;  %v3646_v31 = vpack.i.b16 %v3645_v46, %v3644_v4  ;;  %v3649_v46 = vpack.i.b16 %v3638_v58, %v3570_v50  ;;  %v2419_v58 = vcombine.low %v2400_v20, %v2416_v12  ;;  %v3657_v50 = vshrl.u32 %v3639_v38, 16 }
 0x21a   : > { %v3776_v3 = vpop.permute.xlu1 %3775  ;;  %v3813_v51 = vcombine.low %v3766_v63, %v3774_v40  ;;  %v3661_v63 = vpack.i.b16 %v6272_v19, %v6291_v6  ;;  %v6313_v40 = vrot.slane %v3865_v28, %v5160_v42  ;;  %v2498_v28 = vshrl.u32 %v6282_v8, 16 }
 0x21b   : > { %2153 = vrot.lane.b32.xlu0 %v2140_v17, %s4752_s14  ;;  %2143 = vrot.lane.b32.xlu1 %v2125_v27, %s4746_s25  ;;  %v3881_v18 = vcombine.low %v6238_v14, %v3776_v3  ;;  %v2499_v14 = vshrl.u32 %v6295_v57, 16  ;;  %v6330_v17 = vrot.slane %v3797_v62, %v5160_v42 }
 0x21c   : > { %v6321_v22 = vrot.slane %v3813_v51, %v5160_v42  ;;  %v2487_v51 = vcombine.low %v2468_v32, %v2484_v54 }
 0x21d   : > { %v3778_v10 = vpop.permute.xlu0 %3777  ;;  %v3888_v48 = vrot.slane %v3881_v18, %v5160_v42  ;;  %v3829_v39 = vcombine.low %v6330_v17, %v6316_v9  ;;  %v2500_v62 = vpack.i.b16 %v2499_v14, %v2498_v28  ;;  %v3663_v28 = vshrl.u32 %v6272_v19, 16 }
 0x21e   : > { %v3821_v24 = vcombine.low %v3770_v56, %v3778_v10  ;;  %v3780_v34 = vpop.permute.xlu1 %3779  ;;  %v2494_v56 = vpack.i.b16 %v2493_v25, %v2492_v53  ;;  %v3652_v10 = vpack.i.b16 %v3651_v43, %v3650_v5  ;;  %v2488_v43 = vcombine.high %v2468_v32, %v2484_v54 }
 0x21f   : > { %v3889_v13 = vcombine.low %v3772_v59, %v3780_v34  ;;  %3675 = vrot.lane.b32.xlu0 %v3661_v63, %s4749_s18  ;;  %3665 = vrot.lane.b32.xlu1 %v3646_v31, %s4745_s24  ;;  %v3897_v59 = vcombine.low %v6313_v40, %v6304_v2  ;;  %v6366_v60 = vrot.slane %v3829_v39, %v5362_v0  ;;  %v2505_v31 = vshrl.u32 %v2487_v51, 16 }
 0x220   : > { %v6324_v55 = vrot.slane %v3821_v24, %v5160_v42  ;;  %v3571_v24 = vcombine.low %v6268_v15, %v6256_v61  ;;  %v2503_v34 = vpack.i.b16 %v2487_v51, %v2419_v58  ;;  %v3898_v5 = vcombine.high %v6313_v40, %v6304_v2 }
 0x221   : > { %v3896_v29 = vrot.slane %v3889_v13, %v5160_v42  ;;  %v6336_v41 = vpop.permute.xlu0 %2597  ;;  %v6351_v4 = vrot.slane %v3897_v59, %v5362_v0  ;;  %v3830_v54 = vcombine.high %v6330_v17, %v6316_v9 }
 0x222   : > { %v3845_v3 = vcombine.low %v6321_v22, %v6324_v55  ;;  %v6340_v27 = vpop.permute.xlu1 %2599  ;;  %v3655_v14 = vpack.i.b16 %v3639_v38, %v3571_v24  ;;  %v3656_v61 = vshrl.u32 %v3571_v24, 16  ;;  %v3846_v51 = vcombine.high %v6321_v22, %v6324_v55 }
 0x223   : > { %v3913_v49 = vcombine.low %v3888_v48, %v3896_v29  ;;  %2513 = vrot.lane.b32.xlu0 %v2494_v56, %s4745_s24  ;;  %3667 = vrot.lane.b32.xlu1 %v3649_v46, %s4746_s25  ;;  %v2504_v56 = vshrl.u32 %v2419_v58, 16  ;;  %v3914_v15 = vcombine.high %v3888_v48, %v3896_v29  ;;  %v3662_v48 = vshrl.u32 %v6291_v6, 16 }
 0x224   : > { %v6354_v7 = vrot.slane %v3845_v3, %v5362_v0  ;;  %v2511_v38 = vshrl.u32 %v2488_v43, 16  ;;  %v3912_v40 = vrot.slane %v3898_v5, %v5362_v0  ;;  %v3860_v22 = vrot.slane %v3846_v51, %v5362_v0 }
 0x225   : > { %v6357_v53 = vrot.slane %v3913_v49, %v5362_v0  ;;  %v6359_v25 = vpop.permute.xlu0 %2601  ;;  %v2506_v46 = vpack.i.b16 %v2505_v31, %v2504_v56  ;;  %v3658_v49 = vpack.i.b16 %v3657_v50, %v3656_v61  ;;  %v3928_v29 = vrot.slane %v3914_v15, %v5362_v0 }
 0x226   : > { %v6363_v18 = vpop.permute.xlu1 %2603  ;;  %v6378_v21 = vcombine.low %v6366_v60, %v6354_v7  ;;  %v3664_v2 = vpack.i.b16 %v3663_v28, %v3662_v48  ;;  %v3844_v6 = vrot.slane %v3830_v54, %v5362_v0  ;;  %v2497_v58 = vpack.i.b16 %v6295_v57, %v6282_v8 }
 0x227   : > { %v6370_v63 = vcombine.low %v6351_v4, %v6357_v53  ;;  %2517 = vrot.lane.b32.xlu0 %v2500_v62, %s4747_s26  ;;  %3669 = vrot.lane.b32.xlu1 %v3652_v10, %s4747_s26  ;;  %v2420_v62 = vcombine.high %v2400_v20, %v2416_v12  ;;  %v6404_v12 = vcombine.high %v3912_v40, %v3928_v29 }
 0x228   : > { %v3930_v8 = vcombine.high %v6351_v4, %v6357_v53 }
 0x229   : > { %v6380_v47 = vpop.permute.xlu0 %2605  ;;  %v3935_v59 = vpack.i.b16 %v6370_v63, %v6378_v21  ;;  %v2509_v19 = vpack.i.b16 %v2488_v43, %v2420_v62  ;;  %v2510_v55 = vshrl.u32 %v2420_v62, 16  ;;  %v3937_v24 = vshrl.u32 %v6370_v63, 16 }
 0x22a   : > { %v6382_v13 = vpop.permute.xlu1 %2607  ;;  %v2645_v57 = vcombine.low %v6336_v41, %v6380_v47 }
 0x22b   : > { %2519 = vrot.lane.b32.xlu0 %v2503_v34, %s4748_s27  ;;  %3671 = vrot.lane.b32.xlu1 %v3655_v14, %s4748_s27  ;;  %v2512_v17 = vpack.i.b16 %v2511_v38, %v2510_v55  ;;  %v6409_v34 = vcombine.high %v3844_v6, %v3860_v22  ;;  %v3936_v14 = vshrl.u32 %v6378_v21, 16  ;;  %v3931_v38 = vcombine.low %v3912_v40, %v3928_v29 }
 0x22c   : > { %v2652_v41 = vrot.slane %v2645_v57, %v5160_v42 }
 0x22d   : > { %v2610_v3 = vpop.permute.xlu0 %2609  ;;  %v3953_v61 = vpack.i.b16 %v6404_v12, %v6409_v34 }
 0x22e   : > { %v2612_v39 = vpop.permute.xlu1 %2611  ;;  %v2653_v31 = vcombine.low %v6359_v25, %v2610_v3  ;;  %v2713_v25 = vcombine.low %v6340_v27, %v6382_v13  ;;  %v3943_v27 = vshrl.u32 %v3930_v8, 16 }
 0x22f   : > { %2521 = vrot.lane.b32.xlu0 %v2506_v46, %s4751_s16  ;;  %3673 = vrot.lane.b32.xlu1 %v3658_v49, %s4751_s16  ;;  %v2721_v50 = vcombine.low %v6363_v18, %v2612_v39  ;;  %v3938_v46 = vpack.i.b16 %v3937_v24, %v3936_v14  ;;  %v3862_v18 = vcombine.high %v6366_v60, %v6354_v7 }
 0x230   : > { %v2660_v3 = vrot.slane %v2653_v31, %v5160_v42  ;;  %v2720_v13 = vrot.slane %v2713_v25, %v5160_v42 }
 0x231   : > { %v2614_v32 = vpop.permute.xlu0 %2613  ;;  %v2728_v4 = vrot.slane %v2721_v50, %v5160_v42  ;;  %v3941_v28 = vpack.i.b16 %v3930_v8, %v3862_v18  ;;  %v3942_v62 = vshrl.u32 %v3862_v18, 16 }
 0x232   : > { %v2616_v10 = vpop.permute.xlu1 %2615  ;;  %v2677_v51 = vcombine.low %v2652_v41, %v2660_v3  ;;  %v2678_v29 = vcombine.high %v2652_v41, %v2660_v3  ;;  %v3955_v41 = vshrl.u32 %v6404_v12, 16 }
 0x233   : > { %2523 = vrot.lane.b32.xlu0 %v2509_v19, %s4749_s18  ;;  %3677 = vrot.lane.b32.xlu1 %v3664_v2, %s4752_s14  ;;  %v2745_v48 = vcombine.low %v2720_v13, %v2728_v4  ;;  %v3944_v2 = vpack.i.b16 %v3943_v27, %v3942_v62 }
 0x235   : > { %v2618_v9 = vpop.permute.xlu0 %2617  ;;  %v2753_v31 = vrot.slane %v2745_v48, %v5362_v0 }
 0x236   : > { %v2620_v20 = vpop.permute.xlu1 %2619 }
 0x237   : > { %2525 = vrot.lane.b32.xlu0 %v2512_v17, %s4752_s14  ;;  %2515 = vrot.lane.b32.xlu1 %v2497_v58, %s4746_s25  ;;  %v3863_v17 = vcombine.low %v3844_v6, %v3860_v22  ;;  %v2746_v58 = vcombine.high %v2720_v13, %v2728_v4  ;;  %v3954_v13 = vshrl.u32 %v6409_v34, 16  ;;  %v6837_v34 = vpack.i.b16 %v6024_v1, %v6040_v44 }
 0x239   : > { %v2622_v56 = vpop.permute.xlu0 %2621  ;;  %v2760_v57 = vrot.slane %v2746_v58, %v5362_v0 }
 0x23a   : > { %v2624_v15 = vpop.permute.xlu1 %2623  ;;  %v2661_v43 = vcombine.low %v2614_v32, %v2622_v56  ;;  %v3947_v56 = vpack.i.b16 %v3931_v38, %v3863_v17 }
 0x23b   : > { %3967 = vrot.lane.b32.xlu0 %v3953_v61, %s4749_s18  ;;  %3957 = vrot.lane.b32.xlu1 %v3938_v46, %s4745_s24  ;;  %v2729_v53 = vcombine.low %v2616_v10, %v2624_v15  ;;  %v3949_v61 = vshrl.u32 %v3931_v38, 16  ;;  %v3948_v46 = vshrl.u32 %v3863_v17, 16 }
 0x23c   : > { %v2668_v7 = vrot.slane %v2661_v43, %v5160_v42 }
 0x23d   : > { %v2626_v39 = vpop.permute.xlu0 %2625  ;;  %v2736_v54 = vrot.slane %v2729_v53, %v5160_v42  ;;  %v2692_v53 = vrot.slane %v2678_v29, %v5362_v0 }
 0x23e   : > { %v2669_v47 = vcombine.low %v2618_v9, %v2626_v39  ;;  %v2628_v49 = vpop.permute.xlu1 %2627  ;;  %v3950_v39 = vpack.i.b16 %v3949_v61, %v3948_v46  ;;  %v4042_v61 = vld [vmem:[%s6682_s3 + $0x8] sm:$0xff] }
 0x23f   : > { %v2737_v5 = vcombine.low %v2620_v20, %v2628_v49  ;;  %3959 = vrot.lane.b32.xlu1 %v3941_v28, %s4746_s25  ;;  %v2685_v20 = vrot.slane %v2677_v51, %v5362_v0 }
 0x240   : > { %v2676_v60 = vrot.slane %v2669_v47, %v5160_v42 }
 0x241   : > { %v2744_v32 = vrot.slane %v2737_v5, %v5160_v42  ;;  %v6437_v19 = vpop.permute.xlu0 %1539 }
 0x242   : > { %v2693_v10 = vcombine.low %v2668_v7, %v2676_v60  ;;  %v2694_v14 = vcombine.high %v2668_v7, %v2676_v60  ;;  %v6452_v15 = vpop.permute.xlu1 %1541 }
 0x243   : > { %v2761_v55 = vcombine.low %v2736_v54, %v2744_v32  ;;  %v2762_v9 = vcombine.high %v2736_v54, %v2744_v32  ;;  %3961 = vrot.lane.b32.xlu1 %v3944_v2, %s4747_s26 }
 0x244   : > { %v2701_v24 = vrot.slane %v2693_v10, %v5362_v0  ;;  %v2708_v25 = vrot.slane %v2694_v14, %v5362_v0 }
 0x245   : > { %v2769_v42 = vrot.slane %v2761_v55, %v5362_v0  ;;  %v6444_v50 = vpop.permute.xlu0 %1543  ;;  %v2776_v22 = vrot.slane %v2762_v9, %v5362_v0  ;;  %v3956_v0 = vpack.i.b16 %v3955_v41, %v3954_v13 }
 0x246   : > { %v6446_v40 = vcombine.low %v2685_v20, %v2701_v24  ;;  %v2710_v18 = vcombine.high %v2685_v20, %v2701_v24  ;;  %v2711_v5 = vcombine.low %v2692_v53, %v2708_v25  ;;  %v6465_v60 = vpop.permute.xlu1 %3373  ;;  %v2712_v54 = vcombine.high %v2692_v53, %v2708_v25  ;;  %v4657_v25 = vld [vmem:[%s6681_s2 + $0x8] sm:$0xff]   ;;  %v6838_v53 = vld [vmem:[#allocation33_spill] sm:$0xff] }
 0x247   : > { %v6449_v6 = vcombine.low %v2753_v31, %v2769_v42  ;;  %v2778_v8 = vcombine.high %v2753_v31, %v2769_v42  ;;  %3963 = vrot.lane.b32.xlu1 %v3947_v56, %s4748_s27  ;;  %v2779_v47 = vcombine.low %v2760_v57, %v2776_v22  ;;  %v2780_v62 = vcombine.high %v2760_v57, %v2776_v22  ;;  %v4041_v57 = vld [vmem:[%s6682_s3] sm:$0xff] }
 0x248   : > { %v2784_v43 = vshrl.u32 %v6446_v40, 16  ;;  %v2790_v7 = vshrl.u32 %v2710_v18, 16  ;;  %v2796_v38 = vshrl.u32 %v2711_v5, 16  ;;  %v2802_v24 = vshrl.u32 %v2712_v54, 16 }
 0x249   : > { %v1809_v3 = vpop.permute.xlu0 %1808  ;;  %v2785_v4 = vshrl.u32 %v6449_v6, 16  ;;  %v2791_v28 = vshrl.u32 %v2778_v8, 16  ;;  %v2783_v27 = vpack.i.b16 %v6449_v6, %v6446_v40  ;;  %v2797_v48 = vshrl.u32 %v2779_v47, 16 }
 0x24a   : > { %v2789_v2 = vpack.i.b16 %v2778_v8, %v2710_v18  ;;  %v2803_v9 = vshrl.u32 %v2780_v62, 16  ;;  %v1805_v17 = vpop.permute.xlu1 %1804  ;;  %v2795_v14 = vpack.i.b16 %v2779_v47, %v2711_v5  ;;  %v2801_v56 = vpack.i.b16 %v2780_v62, %v2712_v54 }
 0x24b   : > { %v2786_v49 = vpack.i.b16 %v2785_v4, %v2784_v43  ;;  %3965 = vrot.lane.b32.xlu1 %v3950_v39, %s4751_s16  ;;  %v2792_v12 = vpack.i.b16 %v2791_v28, %v2790_v7  ;;  %v2798_v55 = vpack.i.b16 %v2797_v48, %v2796_v38  ;;  %v6839_v39 = vld [vmem:[#allocation32_spill] sm:$0xff] }
 0x24c   : > { %v2804_v1 = vpack.i.b16 %v2803_v9, %v2802_v24  ;;  %v6840_v41 = vpack.i.b16 %v6838_v53, %v6839_v39 }
 0x24d   : > { %v1813_v51 = vpop.permute.xlu0 %1812  ;;  %2805 = vrot.lane.b32.xlu0 %v2786_v49, %s4745_s24 }
 0x24e   : > { %v1556_v47 = vsel %vm1553_vm15, %v6840_v41, %v6437_v19 }
 0x24f   : > { %3969 = vrot.lane.b32.xlu1 %v3956_v0, %s4752_s14  ;;  %v1559_v5 = vsel %vm1557_vm0, %v1556_v47, %v6452_v15 }
 0x250   : > { %v1562_v62 = vsel %vm1560_vm1, %v1559_v5, %v6444_v50  ;;  %v4659_v50 = vld [vmem:[%s6681_s2] sm:$0xff]  }
 0x251   : > { %v1803_v32 = vpop.permute.xlu0 %1802  ;;  %2809 = vrot.lane.b32.xlu0 %v2792_v12, %s4747_s26 }
 0x252   : > { %v1818_v10 = vsel %vm1553_vm15, %v6837_v34, %v1803_v32 }
 0x253   : > { %2807 = vrot.lane.b32.xlu1 %v2789_v2, %s4746_s25  ;;  %v1820_v20 = vsel %vm1557_vm0, %v1818_v10, %v1805_v17 }
 0x255   : > { %v1807_v58 = vpop.permute.xlu0 %1806  ;;  %2813 = vrot.lane.b32.xlu0 %v2798_v55, %s4751_s16  ;;  %v4658_v55 = vld [vmem:[%s6681_s2 + $0x28] sm:$0xff]   ;;  %s614_s16 = scalar_select %p613_p2, %s4721_s9, 1 }
 0x256   : > { %v1822_v31 = vsel %vm1560_vm1, %v1820_v20, %v1807_v58 }
 0x257   : > { %2811 = vrot.lane.b32.xlu1 %v2795_v14, %s4748_s27  ;;  %v1824_v44 = vsel %vm1563_vm2, %v1822_v31, %v1809_v3  ;;  %v6841_v14 = vld [vmem:[#allocation36_spill] sm:$0xff] }
 0x259   : > { %v1811_v42 = vpop.permute.xlu0 %1810  ;;  %2817 = vrot.lane.b32.xlu0 %v2804_v1, %s4752_s14  ;;  %v6842_v1 = vld [vmem:[#allocation35_spill] sm:$0xff]  ;;  %s4345_s14 = sshll.u32 %s4950_s21, 1  ;;  %s4395_s21 = sshll.u32 (%p4882_p10), %s4725_s10, 2 }
 0x25a   : > { %v1826_v29 = vsel %vm1566_vm3, %v1824_v44, %v1811_v42  ;;  %v6843_v44 = vpack.i.b16 %v6841_v14, %v6842_v1  ;;  %v4664_v14 = vld [vmem:[%s6681_s2 + $0x18] sm:$0xff]   ;;  %s616_s23 = sadd.s32 %s4345_s14, %s614_s16  ;;  %s4132_s22 = sadd.s32 (%p4882_p10), %s4721_s9, %s4395_s21 }
 0x25b   : > { %2815 = vrot.lane.b32.xlu1 %v2801_v56, %s4749_s18  ;;  %v1828_v8 = vsel %vm1569_vm4, %v1826_v29, %v1813_v51  ;;  %s4346_s19 = sshll.u32 %s616_s23, 2  ;;  %s4340_s23 = sshll.u32 %s539_s17, 3 }
 0x25c   : > { %v3389_v42 = vsel %vm1553_vm15, %v6843_v44, %v6465_v60  ;;  %v4660_v60 = vld [vmem:[%s6681_s2 + $0x30] sm:$0xff]   ;;  %s618_s24 = scalar_lea.vmem %s6685_s6, %s4346_s19  ;;  %s599_s19 = scalar_lea.vmem [#allocation5], %s4340_s23 }
 0x25d   : > { %v1815_v22 = vpop.permute.xlu0 %1814  ;;  %4050 = vperm.xlu0 %4651, %v4042_v61   ;;  %v4055_v21 = vld [vmem:[%s618_s24] sm:$0xf]  ;;  %s4396_s24 = sshll.u32 (%p4882_p10), %s4132_s22, 2 }
 0x25e   : > { %v1830_v46 = vsel %vm1572_vm5, %v1828_v8, %v1815_v22  ;;  %s4134_s17 = scalar_lea.vmem (%p4882_p10), %s6846_s29, %s4396_s24 }
 0x25f   : > { %4468 = vmatpush3.bf16.msra.mxu1 %v1830_v46  ;;  %4045 = vperm.xlu1 %4652, %v4041_v57  }
 0x260   : > { %4473 = vmatprep.subr.bf16.mxu1 %v4750_v23 }
 0x261   : > { %v3100_v18 = vpop.permute.xlu1 %3099  ;;  %v3108_v3 = vpop.permute.xlu0 %3107 }
 0x262   : > { %4470 = vmatmul.mubr.msk.bf16.vlgmr.msra.gmra.mrb[0].mxu1 %vm1553_vm15, %v4657_v25 }
 0x263   : > { %4475 = vmatprep.mubr.msk.bf16.mxu1 %vm4753_vm14, %v4750_v23 }
 0x265   : > { %v3104_v43 = vpop.permute.xlu1 %3103  ;;  %v1546_v4 = vpop.permute.xlu0 %1545 }
 0x266   : > { %v1565_v19 = vsel %vm1563_vm2, %v1562_v62, %v1546_v4  ;;  %v6844_v4 = vpack.i.b16 %v6031_v37, %v6044_v30 }
 0x269   : > { %v3098_v49 = vpop.permute.xlu1 %3097  ;;  %v1548_v28 = vpop.permute.xlu0 %1547 }
 0x26a   : > { %v3113_v13 = vsel %vm1553_vm15, %v3075_v11, %v3098_v49  ;;  %v1568_v48 = vsel %vm1566_vm3, %v1565_v19, %v1548_v28 }
 0x26b   : > { %v3115_v7 = vsel %vm1557_vm0, %v3113_v13, %v3100_v18 }
 0x26d   : > { %v3102_v51 = vpop.permute.xlu1 %3101  ;;  %v1550_v0 = vpop.permute.xlu0 %1549 }
 0x26e   : > { %v3117_v12 = vsel %vm1560_vm1, %v3115_v7, %v3102_v51  ;;  %v1571_v35 = vsel %vm1569_vm4, %v1568_v48, %v1550_v0  ;;  %v4661_v51 = vld [vmem:[%s6681_s2 + $0x10] sm:$0xff]  }
 0x26f   : > { %v3119_v11 = vsel %vm1563_vm2, %v3117_v12, %v3104_v43 }
 0x271   : > { %v3106_v33 = vpop.permute.xlu1 %3105  ;;  %v1552_v54 = vpop.permute.xlu0 %1551 }
 0x272   : > { %v3121_v15 = vsel %vm1566_vm3, %v3119_v11, %v3106_v33  ;;  %v1574_v32 = vsel %vm1572_vm5, %v1571_v35, %v1552_v54 }
 0x273   : > { %4474 = vmatpush3.bf16.msra.mxu1 %v1574_v32  ;;  %v3123_v10 = vsel %vm1569_vm4, %v3121_v15, %v3108_v3 }
 0x274   : > { %4479 = vmatprep.subr.bf16.mxu1 %v4750_v23 }
 0x275   : > { %v3110_v38 = vpop.permute.xlu1 %3109  ;;  %v3384_v34 = vpop.permute.xlu0 %3383 }
 0x276   : > { %v3125_v2 = vsel %vm1572_vm5, %v3123_v10, %v3110_v38  ;;  %4476 = vmatmul.mubr.msk.bf16.vlgmr.msra.gmra.mrb[0].mxu1 %vm1553_vm15, %v4659_v50 }
 0x277   : > { %4498 = vmatpush3.bf16.msra.mxu0 %v3125_v2  ;;  %4481 = vmatprep.mubr.msk.bf16.mxu1 %vm4753_vm14, %v4750_v23 }
 0x278   : > { %4503 = vmatprep.subr.bf16.mxu0 %v4750_v23 }
 0x279   : > { %v2142_v9 = vpop.permute.xlu0 %2141  ;;  %v3376_v17 = vpop.permute.xlu1 %3375 }
 0x27a   : > { %4500 = vmatmul.mubr.msk.bf16.vlgmr.msra.gmra.mrb[0].mxu0 %vm1553_vm15, %v4658_v55  ;;  %v3391_v29 = vsel %vm1557_vm0, %v3389_v42, %v3376_v17  ;;  %v2157_v53 = vsel %vm1553_vm15, %v6844_v4, %v2142_v9 }
 0x27b   : > { %4505 = vmatprep.mubr.msk.bf16.mxu0 %vm4753_vm14, %v4750_v23 }
 0x27d   : > { %v2146_v20 = vpop.permute.xlu0 %2145  ;;  %v3378_v58 = vpop.permute.xlu1 %3377 }
 0x27e   : > { %v3393_v56 = vsel %vm1560_vm1, %v3391_v29, %v3378_v58 }
 0x281   : > { %v2148_v24 = vpop.permute.xlu0 %2147  ;;  %v3380_v31 = vpop.permute.xlu1 %3379 }
 0x282   : > { %v3395_v22 = vsel %vm1563_vm2, %v3393_v56, %v3380_v31 }
 0x285   : > { %v2150_v61 = vpop.permute.xlu0 %2149  ;;  %v3382_v8 = vpop.permute.xlu1 %3381 }
 0x286   : > { %v3397_v57 = vsel %vm1566_vm3, %v3395_v22, %v3382_v8 }
 0x287   : > { %v3399_v18 = vsel %vm1569_vm4, %v3397_v57, %v3384_v34 }
 0x289   : > { %v2152_v46 = vpop.permute.xlu0 %2151  ;;  %v3386_v25 = vpop.permute.xlu1 %3385 }
 0x28a   : > { %v3401_v3 = vsel %vm1572_vm5, %v3399_v18, %v3386_v25 }
 0x28b   : > { %4504 = vmatpush3.bf16.msra.mxu0 %v3401_v3 }
 0x28c   : > { %4509 = vmatprep.subr.bf16.mxu0 %v4750_v23 }
 0x28d   : > { %v2154_v43 = vpop.permute.xlu0 %2153  ;;  %v2144_v39 = vpop.permute.xlu1 %2143 }
 0x28e   : > { %v2159_v41 = vsel %vm1557_vm0, %v2157_v53, %v2144_v39  ;;  %4506 = vmatmul.mubr.msk.bf16.vlgmr.msra.gmra.mrb[0].mxu0 %vm1553_vm15, %v4660_v60  ;;  %v4663_v60 = vld [vmem:[%s6681_s2 + $0x40] sm:$0xff]  }
 0x28f   : > { %v2161_v47 = vsel %vm1560_vm1, %v2159_v41, %v2146_v20  ;;  %4511 = vmatprep.mubr.msk.bf16.mxu0 %vm4753_vm14, %v4750_v23 }
 0x290   : > { %v2163_v49 = vsel %vm1563_vm2, %v2161_v47, %v2148_v24 }
 0x291   : > { %v3676_v28 = vpop.permute.xlu0 %3675  ;;  %v2165_v13 = vsel %vm1566_vm3, %v2163_v49, %v2150_v61  ;;  %v3666_v5 = vpop.permute.xlu1 %3665 }
 0x292   : > { %v2167_v37 = vsel %vm1569_vm4, %v2165_v13, %v2152_v46  ;;  %v3681_v35 = vsel %vm1553_vm15, %v3643_v16, %v3666_v5  ;;  %v6845_v16 = vpack.i.b16 %v6836_v26, %v6835_v52  ;;  %v4665_v5 = vld [vmem:[%s6686_s7] sm:$0xff]  }
 0x293   : > { %v2169_v30 = vsel %vm1572_vm5, %v2167_v37, %v2154_v43  ;;  %v4069_v43 = vsel %vm4067_vm6, %v4055_v21, 0 }
 0x294   : > { %4480 = vmatpush3.bf16.msra.mxu1 %v2169_v30 }
 0x295   : > { %v2514_v7 = vpop.permute.xlu0 %2513  ;;  %v3668_v0 = vpop.permute.xlu1 %3667  ;;  %4485 = vmatprep.subr.bf16.mxu1 %v4750_v23 }
 0x296   : > { %v3683_v33 = vsel %vm1557_vm0, %v3681_v35, %v3668_v0  ;;  %v2529_v2 = vsel %vm1553_vm15, %v6845_v16, %v2514_v7 }
 0x297   : > { %4482 = vmatmul.mubr.msk.bf16.vlgmr.msra.gmra.mrb[0].mxu1 %vm1553_vm15, %v4661_v51 }
 0x298   : > { %4487 = vmatprep.mubr.msk.bf16.mxu1 %vm4753_vm14, %v4750_v23 }
 0x299   : > { %v2518_v62 = vpop.permute.xlu0 %2517  ;;  %v3670_v12 = vpop.permute.xlu1 %3669 }
 0x29a   : > { %v3685_v11 = vsel %vm1560_vm1, %v3683_v33, %v3670_v12 }
 0x29d   : > { %v2520_v19 = vpop.permute.xlu0 %2519  ;;  %v3672_v48 = vpop.permute.xlu1 %3671 }
 0x29e   : > { %v3687_v54 = vsel %vm1563_vm2, %v3685_v11, %v3672_v48 }
 0x2a1   : > { %v3674_v15 = vpop.permute.xlu1 %3673  ;;  %v2522_v50 = vpop.permute.xlu0 %2521 }
 0x2a2   : > { %v3689_v32 = vsel %vm1566_vm3, %v3687_v54, %v3674_v15 }
 0x2a3   : > { %v3691_v34 = vsel %vm1569_vm4, %v3689_v32, %v3676_v28 }
 0x2a5   : > { %v3678_v38 = vpop.permute.xlu1 %3677  ;;  %v2524_v36 = vpop.permute.xlu0 %2523 }
 0x2a6   : > { %v3693_v10 = vsel %vm1572_vm5, %v3691_v34, %v3678_v38 }
 0x2a7   : > { %4510 = vmatpush3.bf16.msra.mxu0 %v3693_v10 }
 0x2a8   : > { %4515 = vmatprep.subr.bf16.mxu0 %v4750_v23 }
 0x2a9   : > { %v2516_v55 = vpop.permute.xlu1 %2515  ;;  %v2526_v52 = vpop.permute.xlu0 %2525 }
 0x2aa   : > { %v2531_v9 = vsel %vm1557_vm0, %v2529_v2, %v2516_v55  ;;  %4512 = vmatmul.mubr.msk.bf16.vlgmr.msra.gmra.mrb[0].mxu0 %vm1553_vm15, %v4662_v45 }
 0x2ab   : > { %v2533_v17 = vsel %vm1560_vm1, %v2531_v9, %v2518_v62  ;;  %4517 = vmatprep.mubr.msk.bf16.mxu0 %vm4753_vm14, %v4750_v23 }
 0x2ac   : > { %v2535_v20 = vsel %vm1563_vm2, %v2533_v17, %v2520_v19 }
 0x2ad   : > { %v2537_v58 = vsel %vm1566_vm3, %v2535_v20, %v2522_v50  ;;  %v3958_v24 = vpop.permute.xlu1 %3957  ;;  %v3968_v56 = vpop.permute.xlu0 %3967 }
 0x2ae   : > { %v2539_v26 = vsel %vm1569_vm4, %v2537_v58, %v2524_v36  ;;  %v3973_v29 = vsel %vm1553_vm15, %v3935_v59, %v3958_v24 }
 0x2af   : > { %v2541_v31 = vsel %vm1572_vm5, %v2539_v26, %v2526_v52 }
 0x2b0   : > { %4486 = vmatpush3.bf16.msra.mxu1 %v2541_v31 }
 0x2b1   : > { %v3960_v1 = vpop.permute.xlu1 %3959  ;;  %4491 = vmatprep.subr.bf16.mxu1 %v4750_v23 }
 0x2b2   : > { %v3975_v61 = vsel %vm1557_vm0, %v3973_v29, %v3960_v1 }
 0x2b3   : > { %4488 = vmatmul.mubr.msk.bf16.vlgmr.msra.gmra.mrb[0].mxu1 %vm1553_vm15, %v4664_v14 }
 0x2b4   : > { %4493 = vmatprep.mubr.msk.bf16.mxu1 %vm4753_vm14, %v4750_v23 }
 0x2b5   : > { %v3962_v44 = vpop.permute.xlu1 %3961 }
 0x2b6   : > { %v3977_v22 = vsel %vm1560_vm1, %v3975_v61, %v3962_v44 }
 0x2b9   : > { %v3964_v42 = vpop.permute.xlu1 %3963 }
 0x2ba   : > { %v3979_v8 = vsel %vm1563_vm2, %v3977_v22, %v3964_v42 }
 0x2bd   : > { %v3966_v57 = vpop.permute.xlu1 %3965 }
 0x2be   : > { %v3981_v46 = vsel %vm1566_vm3, %v3979_v8, %v3966_v57 }
 0x2bf   : > { %v2806_v25 = vpop.permute.xlu0 %2805  ;;  %v3983_v63 = vsel %vm1569_vm4, %v3981_v46, %v3968_v56 }
 0x2c0   : > { %v2821_v4 = vsel %vm1553_vm15, %v2783_v27, %v2806_v25 }
 0x2c1   : > { %v3970_v18 = vpop.permute.xlu1 %3969 }
 0x2c2   : > { %v3985_v59 = vsel %vm1572_vm5, %v3983_v63, %v3970_v18 }
 0x2c3   : > { %v2810_v3 = vpop.permute.xlu0 %2809  ;;  %4516 = vmatpush3.bf16.msra.mxu0 %v3985_v59 }
 0x2c4   : > { %4521 = vmatprep.subr.bf16.mxu0 %v4750_v23 }
 0x2c5   : > { %v2808_v53 = vpop.permute.xlu1 %2807 }
 0x2c6   : > { %v2823_v39 = vsel %vm1557_vm0, %v2821_v4, %v2808_v53  ;;  %4518 = vmatmul.mubr.msk.bf16.vlgmr.msra.gmra.mrb[0].mxu0 %vm1553_vm15, %v4663_v60 }
 0x2c7   : > { %4522 = vmatpush3.bf16.msra.mxu0 %v4069_v43  ;;  %4523 = vmatprep.mubr.msk.bf16.mxu0 %vm4753_vm14, %v4750_v23  ;;  %v2814_v41 = vpop.permute.xlu0 %2813  ;;  %v2825_v49 = vsel %vm1560_vm1, %v2823_v39, %v2810_v3  ;;  %v4666_v23 = vld [vmem:[%s6681_s2 + $0x20] sm:$0xff]  }
 0x2c9   : > { %v2812_v47 = vpop.permute.xlu1 %2811 }
 0x2ca   : > { %v2827_v28 = vsel %vm1563_vm2, %v2825_v49, %v2812_v47 }
 0x2cb   : > { %v2829_v40 = vsel %vm1566_vm3, %v2827_v28, %v2814_v41  ;;  %v2818_v6 = vpop.permute.xlu0 %2817 }
 0x2cd   : > { %v2816_v13 = vpop.permute.xlu1 %2815 }
 0x2ce   : > { %v2831_v27 = vsel %vm1569_vm4, %v2829_v40, %v2816_v13 }
 0x2cf   : > { %v2833_v37 = vsel %vm1572_vm5, %v2831_v27, %v2818_v6 }
 0x2d0   : > { %4492 = vmatpush3.bf16.msra.mxu1 %v2833_v37 }
 0x2d2   : > { %4524 = vmatmul.mubr.msk.bf16.vlgmr.msra.gmra.mrb[0].mxu0 %vm4063_vm7, %v4665_v5 }
 0x2d3   : > { %4494 = vmatmul.mubr.msk.bf16.vlgmr.msra.gmra.mrb[0].mxu1 %vm1553_vm15, %v4666_v23 }
 0x2dc   : > { %v4051_v30 = vpop.permute.xlu0 %4050 }
 0x2de   : > { %v4046_v51 = vpop.permute.xlu1 %4045 }
 0x3a5   : > { %v4105_v7 = vpop.f32.mrb[0].mxu0 }
 0x3a6   : > { %v2880_v0 = vpop.f32.mrb[0].mxu1  ;;  %v4525_v62 = vpop.f32.mrb[1].mxu0 }
 0x3a7   : > { %v4527_v12 = vadd.f32 %v4046_v51, %v2880_v0  ;;  %v4495_v19 = vpop.f32.mrb[1].mxu1  ;;  %v4108_v48 = vpop.f32.mrb[2].mxu0 }
 0x3a8   : > { %v2883_v35 = vpop.f32.mrb[2].mxu1  ;;  %v4526_v33 = vpop.f32.mrb[3].mxu0 }
 0x3a9   : > { %v4528_v11 = vadd.f32 %v4527_v12, %v4105_v7  ;;  %v4529_v54 = vadd.f32 %v4051_v30, %v2883_v35  ;;  %v4496_v15 = vpop.f32.mrb[3].mxu1  ;;  %4130 = sbr.rel (!%p4882_p10) target bundleno = 952 (0x3b8), region = 138 }
 0x3ab   : > { %v4530_v32 = vadd.f32 %v4529_v54, %v4108_v48 }
 0x3ad   : > { %v4438_v50 = vpack.c.bf16 %v4530_v32, %v4528_v11 }
 0x3af   : > { %4439 = vst [vmem:[%s599_s19] sm:$0xff] %v4438_v50  }
 0x3b6   : > { %v4150_v38 = vld [vmem:[%s599_s19] sm:$0xf]  ;;  %v4152_v34 = vld [vmem:[%s599_s19 + $0x4] sm:$0xf] }
 0x3b7   : > { %4151 = vst [vmem:[%s4134_s17] sm:$0xf] %v4150_v38  ;;  %4153 = vst [vmem:[%s4134_s17 + $0x8] sm:$0xf] %v4152_v34 }
 0x3b8 PF: > { %s18_s13 = sadd.s32 1, %s4737_s13   ;;  %s6847_s8 = sld [smem:[#allocation6_spill]] }
 0x3b9   : > { %p15_p3 = scmp.ge.s32.totalorder %s18_s13, 6   ;;  %s6848_s18 = sld [smem:[#allocation7_spill]] }
 0x3ba   : > { %s6849_s27 = smov %s4709_s28  ;;  %s6850_s28 = smov %s4890_s20 }
 0x3bb   : > { %s6851_s29 = smov %s4717_s30  ;;  %s6852_s30 = smov %s4887_s15 }
 0x3bc   : > { %s6853_s9 = smov %s4729_s11  ;;  %s6854_s10 = smov %s4733_s12 }
 0x3bd   :  { %17 = sbr.rel (!%p15_p3) target bundleno = 7 (0x7), region = 235 }
 0x3be   : > { %s6855_s11 = smov %s6847_s8 }
 0x3bf   : > { %s6856_s12 = smov %s6848_s18 }

</bundles_post_ra>
